<compile_context>
chip_gen: v7x
topology: tpu7x:2x2x1
jax: 0.10.0
libtpu: 0.0.40
codegen_flags: <defaults>
</compile_context>

<pallas_src>
import functools
import math

import jax
import jax.numpy as jnp
from jax.experimental import pallas as pl
from jax.experimental.pallas import tpu as pltpu


# Fixed flattening order of the packed shared-layer weights (+ final norm).
PACKED_PARAM_ORDER = (
    "sa_wqkv", "sa_bqkv", "sa_wo", "sa_bo", "ln1_g", "ln1_b",
    "ca_wq", "ca_bq", "ca_wkv", "ca_bkv", "ca_wo", "ca_bo", "ln2_g", "ln2_b",
    "ff_w1", "ff_b1", "ff_w2", "ff_b2", "ln3_g", "ln3_b",
    "fin_g", "fin_b",
)


def _mm(a, w):
    """x @ W with MXU operands in the weight dtype and f32 accumulation."""
    return jnp.dot(a.astype(w.dtype), w, preferred_element_type=jnp.float32)


def _recip(x, approx):
    return pl.reciprocal(x, approx=True) if approx else 1.0 / x


def _layer_norm(x, gamma, beta, eps=1e-5):
    # One-pass variance: mean(x*x) - mu*mu (drops a broadcasted subtract and
    # lets the two cross-lane reductions issue back-to-back on the XLU).
    mu = jnp.mean(x, axis=-1, keepdims=True)
    var = jnp.mean(x * x, axis=-1, keepdims=True) - mu * mu
    return (x - mu) * jax.lax.rsqrt(var + eps) * gamma + beta


def _attend(q, k, v, wo, bo, mask, *, bt, tq, tk, nhead, head_dim,
            approx_recip):
    """Multi-head attention core.

    q: [bt*tq, D] already scaled + cast to the MXU dtype.
    k, v: [bt*tk, D] cast to the MXU dtype.
    Heads are lane-concatenated and hit the FULL Wo in one K=D matmul.
    """
    mxu_dtype = wo.dtype
    outs = []
    for b in range(bt):                       # static unroll over batch block
        qb = q[b * tq:(b + 1) * tq]
        kb = k[b * tk:(b + 1) * tk]
        vb = v[b * tk:(b + 1) * tk]
        heads = []
        for h in range(nhead):                # static unroll over heads
            lo = h * head_dim
            qh = qb[:, lo:lo + head_dim]
            kh = kb[:, lo:lo + head_dim]
            vh = vb[:, lo:lo + head_dim]
            # scores [tq, tk]: contract head_dim (NT matmul, no transpose op)
            sc = jax.lax.dot_general(qh, kh, (((1,), (1,)), ((), ())),
                                     preferred_element_type=jnp.float32)
            if mask is not None:              # static skip when no mask given
                sc = sc + mask
            sc = sc - jnp.max(sc, axis=-1, keepdims=True)   # f32 softmax
            e = jnp.exp(sc)
            a = e * _recip(jnp.sum(e, axis=-1, keepdims=True), approx_recip)
            heads.append(jnp.dot(a.astype(mxu_dtype), vh,
                                 preferred_element_type=jnp.float32))
        o = heads[0] if nhead == 1 else jnp.concatenate(heads, axis=-1)
        outs.append(o)
    o_all = outs[0] if bt == 1 else jnp.concatenate(outs, axis=0)
    return _mm(o_all, wo) + bo                # single full-Wo matmul + bias


def _decoder_block(x, mem, p, tmask, mmask, *, num_layers, nhead, head_dim,
                   bt, t_len, s_len, approx_recip):
    """Weight-shared decoder stack on a block of `bt` batch elements folded
    into the matmul M dimension (x: [bt*t_len, D], mem: [bt*s_len, D]).
    Used by BOTH the Pallas kernel and the pure-JAX references."""
    d = x.shape[-1]
    mxu_dtype = p["sa_wqkv"].dtype
    scale = 1.0 / math.sqrt(head_dim)

    # Cross-attention K/V are loop-invariant: project + bias + cast ONCE.
    kv_mem = _mm(mem, p["ca_wkv"]) + p["ca_bkv"]            # [bt*s_len, 2D]
    k_mem = kv_mem[:, :d].astype(mxu_dtype)
    v_mem = kv_mem[:, d:].astype(mxu_dtype)

    for _ in range(num_layers):      # static unroll; SAME params == sharing
        # ---- self-attention: fused QKV projection, one MXU pass (N=3D) ----
        qkv = _mm(x, p["sa_wqkv"]) + p["sa_bqkv"]           # [bt*t_len, 3D]
        q = (qkv[:, :d] * scale).astype(mxu_dtype)   # scale folded into cast
        k = qkv[:, d:2 * d].astype(mxu_dtype)
        v = qkv[:, 2 * d:].astype(mxu_dtype)
        sa = _attend(q, k, v, p["sa_wo"], p["sa_bo"], tmask,
                     bt=bt, tq=t_len, tk=t_len, nhead=nhead,
                     head_dim=head_dim, approx_recip=approx_recip)
        x = _layer_norm(x + sa, p["ln1_g"], p["ln1_b"])

        # ---- cross-attention (K/V hoisted above) ----
        qc = ((_mm(x, p["ca_wq"]) + p["ca_bq"]) * scale).astype(mxu_dtype)
        ca = _attend(qc, k_mem, v_mem, p["ca_wo"], p["ca_bo"], mmask,
                     bt=bt, tq=t_len, tk=s_len, nhead=nhead,
                     head_dim=head_dim, approx_recip=approx_recip)
        x = _layer_norm(x + ca, p["ln2_g"], p["ln2_b"])

        # ---- feed-forward ----
        h = jnp.maximum(_mm(x, p["ff_w1"]) + p["ff_b1"], 0.0)   # ReLU (f32)
        ff = _mm(h, p["ff_w2"]) + p["ff_b2"]
        x = _layer_norm(x + ff, p["ln3_g"], p["ln3_b"])

    # final (optional) norm of WeightSharingDecoder
    return _layer_norm(x, p["fin_g"], p["fin_b"])


def _decoder_kernel(num_layers, nhead, head_dim, bt, t_len, s_len,
                    has_tmask, has_mmask, *refs):
    """refs = (tgt, memory, [tgt_mask], [memory_mask], *packed weights, out)."""
    tgt_ref, mem_ref = refs[0], refs[1]
    i = 2
    tmask = None
    mmask = None
    if has_tmask:
        tmask = refs[i][...]
        i += 1
    if has_mmask:
        mmask = refs[i][...]
        i += 1
    out_ref = refs[-1]
    w_refs = refs[i:-1]

    # Weights: constant block index across the batch grid -> DMA'd HBM->VMEM
    # once and reused by every grid step and every shared-layer iteration.
    p = {name: r[...] for name, r in zip(PACKED_PARAM_ORDER, w_refs)}

    d = tgt_ref.shape[-1]
    # Fold the batch block into the matmul M dimension.
    x = tgt_ref[...].reshape(bt * t_len, d).astype(jnp.float32)
    mem = mem_ref[...].reshape(bt * s_len, d).astype(jnp.float32)

    y = _decoder_block(x, mem, p, tmask, mmask,
                       num_layers=num_layers, nhead=nhead, head_dim=head_dim,
                       bt=bt, t_len=t_len, s_len=s_len, approx_recip=True)
    out_ref[...] = y.reshape(bt, t_len, d).astype(out_ref.dtype)  # lane-dense


def _pick_batch_block(batch, t_len):
    """Fold batch into M for MXU fill, but keep >= 2 grid steps when batch >= 2
    so v7x's two TensorCores (dimension_semantics='parallel') both get work."""
    bt = max(1, min(batch, 256 // max(t_len, 1)))   # target ~256 M rows
    if batch >= 2:
        bt = min(bt, batch // 2)
    bt = max(bt, 1)
    while batch % bt:
        bt -= 1
    return bt


def weight_sharing_decoder_forward(tgt, memory, packed_params,
                                   tgt_mask=None, memory_mask=None, *,
                                   num_layers, nhead, batch_block=None):
    """tgt: [B,T,D] f32, memory: [B,S,D] f32, masks: additive f32 or None."""
    B, T, D = tgt.shape
    S = memory.shape[1]
    head_dim = D // nhead
    bt = _pick_batch_block(B, T) if batch_block is None else batch_block
    assert B % bt == 0

    inputs = [tgt, memory]
    in_specs = [pl.BlockSpec((bt, T, D), lambda b: (b, 0, 0)),   # tgt block
                pl.BlockSpec((bt, S, D), lambda b: (b, 0, 0))]   # memory block
    if tgt_mask is not None:
        inputs.append(tgt_mask.astype(jnp.float32))
        in_specs.append(pl.BlockSpec((T, T), lambda b: (0, 0)))  # shared
    if memory_mask is not None:
        inputs.append(memory_mask.astype(jnp.float32))
        in_specs.append(pl.BlockSpec((T, S), lambda b: (0, 0)))  # shared

    flat = [packed_params[name] for name in PACKED_PARAM_ORDER]
    for arr in flat:
        # Constant block index -> DMA'd once, VMEM-resident across the grid.
        # Default-arg capture avoids late binding of the loop variable.
        in_specs.append(pl.BlockSpec(arr.shape,
                                     lambda b, nd=arr.ndim: (0,) * nd))
    inputs.extend(flat)

    kernel = functools.partial(_decoder_kernel, num_layers, nhead, head_dim,
                               bt, T, S, tgt_mask is not None,
                               memory_mask is not None)

    return pl.pallas_call(
        kernel,
        out_shape=jax.ShapeDtypeStruct((B, T, D), jnp.float32),
        grid=(B // bt,),
        in_specs=in_specs,
        out_specs=pl.BlockSpec((bt, T, D), lambda b: (b, 0, 0)),
        compiler_params=pltpu.CompilerParams(
            dimension_semantics=("parallel",)),   # v7x: shard grid over 2 TCs
    )(*inputs)


def init_params(key, d_model, dim_ff):
    """PyTorch-style uniform(+/-1/sqrt(fan_in)) init, all f32 (weights stored
    in x@W orientation, i.e. transposed from PyTorch's W@x convention)."""
    def linear(k, fan_in, fan_out):
        kw, kb = jax.random.split(k)
        bound = 1.0 / math.sqrt(fan_in)
        w = jax.random.uniform(kw, (fan_in, fan_out), jnp.float32,
                               minval=-bound, maxval=bound)
        b = jax.random.uniform(kb, (1, fan_out), jnp.float32,
                               minval=-bound, maxval=bound)
        return w, b

    keys = jax.random.split(key, 10)
    p = {}
    for i, name in enumerate(["sa_wq", "sa_wk", "sa_wv", "sa_wo",
                              "ca_wq", "ca_wk", "ca_wv", "ca_wo"]):
        p[name], p[name.replace("w", "b")] = linear(keys[i], d_model, d_model)
    p["ff_w1"], p["ff_b1"] = linear(keys[8], d_model, dim_ff)
    p["ff_w2"], p["ff_b2"] = linear(keys[9], dim_ff, d_model)
    ones = jnp.ones((1, d_model), jnp.float32)
    zeros = jnp.zeros((1, d_model), jnp.float32)
    for ln in ["ln1", "ln2", "ln3", "fin"]:
        p[ln + "_g"] = ones
        p[ln + "_b"] = zeros
    return p


def pack_params(params, mxu_dtype=jnp.bfloat16):
    """Fuse QKV / KV projection weights (single wide MXU pass) and cast matmul
    weights to the MXU dtype; biases / LayerNorm params stay f32."""
    def w(*names):
        arr = (jnp.concatenate([params[n] for n in names], axis=1)
               if len(names) > 1 else params[names[0]])
        return arr.astype(mxu_dtype)

    def b(*names):
        arr = (jnp.concatenate([params[n] for n in names], axis=1)
               if len(names) > 1 else params[names[0]])
        return arr.astype(jnp.float32)

    return {
        "sa_wqkv": w("sa_wq", "sa_wk", "sa_wv"),
        "sa_bqkv": b("sa_bq", "sa_bk", "sa_bv"),
        "sa_wo": w("sa_wo"), "sa_bo": b("sa_bo"),
        "ln1_g": b("ln1_g"), "ln1_b": b("ln1_b"),
        "ca_wq": w("ca_wq"), "ca_bq": b("ca_bq"),
        "ca_wkv": w("ca_wk", "ca_wv"),
        "ca_bkv": b("ca_bk", "ca_bv"),
        "ca_wo": w("ca_wo"), "ca_bo": b("ca_bo"),
        "ln2_g": b("ln2_g"), "ln2_b": b("ln2_b"),
        "ff_w1": w("ff_w1"), "ff_b1": b("ff_b1"),
        "ff_w2": w("ff_w2"), "ff_b2": b("ff_b2"),
        "ln3_g": b("ln3_g"), "ln3_b": b("ln3_b"),
        "fin_g": b("fin_g"), "fin_b": b("fin_b"),
    }


def reference_forward(tgt, memory, packed_params, tgt_mask, memory_mask, *,
                      num_layers, nhead):
    """Pure-JAX reference (same stack function, exact divide, per batch elt)."""
    B, T, D = tgt.shape
    S = memory.shape[1]
    head_dim = D // nhead
    outs = []
    for b in range(B):
        outs.append(_decoder_block(
            tgt[b].astype(jnp.float32), memory[b].astype(jnp.float32),
            packed_params, tgt_mask, memory_mask,
            num_layers=num_layers, nhead=nhead, head_dim=head_dim,
            bt=1, t_len=T, s_len=S, approx_recip=False))
    return jnp.stack(outs)


if __name__ == "__main__":
    key = jax.random.PRNGKey(0)

    # Small but lane/sublane-friendly shapes: D and dim_ff multiples of 128,
    # seq lengths multiples of 8.
    B, T, S, D = 2, 32, 32, 128
    NHEAD, DIM_FF, NUM_LAYERS = 4, 256, 2

    key, k_tgt, k_mem, k_par = jax.random.split(key, 4)
    tgt = jax.random.normal(k_tgt, (B, T, D), jnp.float32)
    memory = jax.random.normal(k_mem, (B, S, D), jnp.float32)

    params_f32 = init_params(k_par, D, DIM_FF)             # "PyTorch" f32 params
    packed_bf16 = pack_params(params_f32, jnp.bfloat16)    # kernel weights
    packed_f32 = pack_params(params_f32, jnp.float32)      # fidelity reference

    # Causal additive tgt_mask; memory_mask=None (optional in the module) so
    # the kernel statically skips the cross-attention mask add and DMA.
    idx = jnp.arange(T)
    tgt_mask = jnp.where(idx[:, None] >= idx[None, :], 0.0, -1e9)
    tgt_mask = tgt_mask.astype(jnp.float32)
    memory_mask = None

    y = weight_sharing_decoder_forward(tgt, memory, packed_bf16,
                                       tgt_mask, memory_mask,
                                       num_layers=NUM_LAYERS, nhead=NHEAD)
    y = jax.block_until_ready(y)
    assert y.shape == (B, T, D)

    # (1) bit-level reference: identical bf16 math as the kernel (only the
    #     approx reciprocal / MXU accumulation order differ).
    y_ref = reference_forward(tgt, memory, packed_bf16, tgt_mask, memory_mask,
                              num_layers=NUM_LAYERS, nhead=NHEAD)
    max_diff = float(jnp.max(jnp.abs(y - y_ref)))
    assert jnp.allclose(y, y_ref, atol=1e-2, rtol=1e-2), \
        f"mismatch vs bf16 reference, max diff {max_diff}"

    # (2) fidelity reference: full-f32 math (PyTorch-like), looser tolerance —
    #     catches drift from the bf16-weight / bf16-MXU-operand design choice.
    y_f32 = reference_forward(tgt, memory, packed_f32, tgt_mask, memory_mask,
                              num_layers=NUM_LAYERS, nhead=NHEAD)
    max_diff_f32 = float(jnp.max(jnp.abs(y - y_f32)))
    assert max_diff_f32 < 0.3, \
        f"drift vs f32 reference too large: {max_diff_f32}"

    print("KERNEL_OK")
</pallas_src>

<mosaic_0001>
module attributes {stable_mosaic.version = 11 : i64} {
  func.func @_decoder_kernel(%arg0: i32, %arg1: memref<1x32x128xf32, #tpu.memory_space<vmem>>, %arg2: memref<1x32x128xf32, #tpu.memory_space<vmem>>, %arg3: memref<32x32xf32, #tpu.memory_space<vmem>>, %arg4: memref<128x384xbf16, #tpu.memory_space<vmem>>, %arg5: memref<1x384xf32, #tpu.memory_space<vmem>>, %arg6: memref<128x128xbf16, #tpu.memory_space<vmem>>, %arg7: memref<1x128xf32, #tpu.memory_space<vmem>>, %arg8: memref<1x128xf32, #tpu.memory_space<vmem>>, %arg9: memref<1x128xf32, #tpu.memory_space<vmem>>, %arg10: memref<128x128xbf16, #tpu.memory_space<vmem>>, %arg11: memref<1x128xf32, #tpu.memory_space<vmem>>, %arg12: memref<128x256xbf16, #tpu.memory_space<vmem>>, %arg13: memref<1x256xf32, #tpu.memory_space<vmem>>, %arg14: memref<128x128xbf16, #tpu.memory_space<vmem>>, %arg15: memref<1x128xf32, #tpu.memory_space<vmem>>, %arg16: memref<1x128xf32, #tpu.memory_space<vmem>>, %arg17: memref<1x128xf32, #tpu.memory_space<vmem>>, %arg18: memref<128x256xbf16, #tpu.memory_space<vmem>>, %arg19: memref<1x256xf32, #tpu.memory_space<vmem>>, %arg20: memref<256x128xbf16, #tpu.memory_space<vmem>>, %arg21: memref<1x128xf32, #tpu.memory_space<vmem>>, %arg22: memref<1x128xf32, #tpu.memory_space<vmem>>, %arg23: memref<1x128xf32, #tpu.memory_space<vmem>>, %arg24: memref<1x128xf32, #tpu.memory_space<vmem>>, %arg25: memref<1x128xf32, #tpu.memory_space<vmem>>, %arg26: memref<1x32x128xf32, #tpu.memory_space<vmem>>) attributes {dimension_semantics = [#tpu.dimension_semantics<parallel>], iteration_bounds = array<i64: 2>, scalar_prefetch = 0 : i64, scratch_operands = 0 : i64, tpu.core_type = #tpu.core_type<tc>, window_params = [{transform_indices = @transform_0, window_bounds = array<i64: 1, 32, 128>}, {transform_indices = @transform_1, window_bounds = array<i64: 1, 32, 128>}, {pipeline_mode = #tpu.pipeline_mode<synchronous>, transform_indices = @transform_2, window_bounds = array<i64: 32, 32>}, {pipeline_mode = #tpu.pipeline_mode<synchronous>, transform_indices = @transform_3, window_bounds = array<i64: 128, 384>}, {pipeline_mode = #tpu.pipeline_mode<synchronous>, transform_indices = @transform_4, window_bounds = array<i64: 1, 384>}, {pipeline_mode = #tpu.pipeline_mode<synchronous>, transform_indices = @transform_5, window_bounds = array<i64: 128, 128>}, {pipeline_mode = #tpu.pipeline_mode<synchronous>, transform_indices = @transform_6, window_bounds = array<i64: 1, 128>}, {pipeline_mode = #tpu.pipeline_mode<synchronous>, transform_indices = @transform_7, window_bounds = array<i64: 1, 128>}, {pipeline_mode = #tpu.pipeline_mode<synchronous>, transform_indices = @transform_8, window_bounds = array<i64: 1, 128>}, {pipeline_mode = #tpu.pipeline_mode<synchronous>, transform_indices = @transform_9, window_bounds = array<i64: 128, 128>}, {pipeline_mode = #tpu.pipeline_mode<synchronous>, transform_indices = @transform_10, window_bounds = array<i64: 1, 128>}, {pipeline_mode = #tpu.pipeline_mode<synchronous>, transform_indices = @transform_11, window_bounds = array<i64: 128, 256>}, {pipeline_mode = #tpu.pipeline_mode<synchronous>, transform_indices = @transform_12, window_bounds = array<i64: 1, 256>}, {pipeline_mode = #tpu.pipeline_mode<synchronous>, transform_indices = @transform_13, window_bounds = array<i64: 128, 128>}, {pipeline_mode = #tpu.pipeline_mode<synchronous>, transform_indices = @transform_14, window_bounds = array<i64: 1, 128>}, {pipeline_mode = #tpu.pipeline_mode<synchronous>, transform_indices = @transform_15, window_bounds = array<i64: 1, 128>}, {pipeline_mode = #tpu.pipeline_mode<synchronous>, transform_indices = @transform_16, window_bounds = array<i64: 1, 128>}, {pipeline_mode = #tpu.pipeline_mode<synchronous>, transform_indices = @transform_17, window_bounds = array<i64: 128, 256>}, {pipeline_mode = #tpu.pipeline_mode<synchronous>, transform_indices = @transform_18, window_bounds = array<i64: 1, 256>}, {pipeline_mode = #tpu.pipeline_mode<synchronous>, transform_indices = @transform_19, window_bounds = array<i64: 256, 128>}, {pipeline_mode = #tpu.pipeline_mode<synchronous>, transform_indices = @transform_20, window_bounds = array<i64: 1, 128>}, {pipeline_mode = #tpu.pipeline_mode<synchronous>, transform_indices = @transform_21, window_bounds = array<i64: 1, 128>}, {pipeline_mode = #tpu.pipeline_mode<synchronous>, transform_indices = @transform_22, window_bounds = array<i64: 1, 128>}, {pipeline_mode = #tpu.pipeline_mode<synchronous>, transform_indices = @transform_23, window_bounds = array<i64: 1, 128>}, {pipeline_mode = #tpu.pipeline_mode<synchronous>, transform_indices = @transform_24, window_bounds = array<i64: 1, 128>}, {transform_indices = @transform_25, window_bounds = array<i64: 1, 32, 128>}]} {
    %c0 = arith.constant 0 : index
    %c0_0 = arith.constant 0 : index
    %0 = vector.load %arg3[%c0, %c0_0] : memref<32x32xf32, #tpu.memory_space<vmem>>, vector<32x32xf32>
    %c0_1 = arith.constant 0 : index
    %c0_2 = arith.constant 0 : index
    %1 = vector.load %arg4[%c0_1, %c0_2] : memref<128x384xbf16, #tpu.memory_space<vmem>>, vector<128x384xbf16>
    %c0_3 = arith.constant 0 : index
    %c0_4 = arith.constant 0 : index
    %2 = vector.load %arg5[%c0_3, %c0_4] : memref<1x384xf32, #tpu.memory_space<vmem>>, vector<1x384xf32>
    %c0_5 = arith.constant 0 : index
    %c0_6 = arith.constant 0 : index
    %3 = vector.load %arg6[%c0_5, %c0_6] : memref<128x128xbf16, #tpu.memory_space<vmem>>, vector<128x128xbf16>
    %c0_7 = arith.constant 0 : index
    %c0_8 = arith.constant 0 : index
    %4 = vector.load %arg7[%c0_7, %c0_8] : memref<1x128xf32, #tpu.memory_space<vmem>>, vector<1x128xf32>
    %c0_9 = arith.constant 0 : index
    %c0_10 = arith.constant 0 : index
    %5 = vector.load %arg8[%c0_9, %c0_10] : memref<1x128xf32, #tpu.memory_space<vmem>>, vector<1x128xf32>
    %c0_11 = arith.constant 0 : index
    %c0_12 = arith.constant 0 : index
    %6 = vector.load %arg9[%c0_11, %c0_12] : memref<1x128xf32, #tpu.memory_space<vmem>>, vector<1x128xf32>
    %c0_13 = arith.constant 0 : index
    %c0_14 = arith.constant 0 : index
    %7 = vector.load %arg10[%c0_13, %c0_14] : memref<128x128xbf16, #tpu.memory_space<vmem>>, vector<128x128xbf16>
    %c0_15 = arith.constant 0 : index
    %c0_16 = arith.constant 0 : index
    %8 = vector.load %arg11[%c0_15, %c0_16] : memref<1x128xf32, #tpu.memory_space<vmem>>, vector<1x128xf32>
    %c0_17 = arith.constant 0 : index
    %c0_18 = arith.constant 0 : index
    %9 = vector.load %arg12[%c0_17, %c0_18] : memref<128x256xbf16, #tpu.memory_space<vmem>>, vector<128x256xbf16>
    %c0_19 = arith.constant 0 : index
    %c0_20 = arith.constant 0 : index
    %10 = vector.load %arg13[%c0_19, %c0_20] : memref<1x256xf32, #tpu.memory_space<vmem>>, vector<1x256xf32>
    %c0_21 = arith.constant 0 : index
    %c0_22 = arith.constant 0 : index
    %11 = vector.load %arg14[%c0_21, %c0_22] : memref<128x128xbf16, #tpu.memory_space<vmem>>, vector<128x128xbf16>
    %c0_23 = arith.constant 0 : index
    %c0_24 = arith.constant 0 : index
    %12 = vector.load %arg15[%c0_23, %c0_24] : memref<1x128xf32, #tpu.memory_space<vmem>>, vector<1x128xf32>
    %c0_25 = arith.constant 0 : index
    %c0_26 = arith.constant 0 : index
    %13 = vector.load %arg16[%c0_25, %c0_26] : memref<1x128xf32, #tpu.memory_space<vmem>>, vector<1x128xf32>
    %c0_27 = arith.constant 0 : index
    %c0_28 = arith.constant 0 : index
    %14 = vector.load %arg17[%c0_27, %c0_28] : memref<1x128xf32, #tpu.memory_space<vmem>>, vector<1x128xf32>
    %c0_29 = arith.constant 0 : index
    %c0_30 = arith.constant 0 : index
    %15 = vector.load %arg18[%c0_29, %c0_30] : memref<128x256xbf16, #tpu.memory_space<vmem>>, vector<128x256xbf16>
    %c0_31 = arith.constant 0 : index
    %c0_32 = arith.constant 0 : index
    %16 = vector.load %arg19[%c0_31, %c0_32] : memref<1x256xf32, #tpu.memory_space<vmem>>, vector<1x256xf32>
    %c0_33 = arith.constant 0 : index
    %c0_34 = arith.constant 0 : index
    %17 = vector.load %arg20[%c0_33, %c0_34] : memref<256x128xbf16, #tpu.memory_space<vmem>>, vector<256x128xbf16>
    %c0_35 = arith.constant 0 : index
    %c0_36 = arith.constant 0 : index
    %18 = vector.load %arg21[%c0_35, %c0_36] : memref<1x128xf32, #tpu.memory_space<vmem>>, vector<1x128xf32>
    %c0_37 = arith.constant 0 : index
    %c0_38 = arith.constant 0 : index
    %19 = vector.load %arg22[%c0_37, %c0_38] : memref<1x128xf32, #tpu.memory_space<vmem>>, vector<1x128xf32>
    %c0_39 = arith.constant 0 : index
    %c0_40 = arith.constant 0 : index
    %20 = vector.load %arg23[%c0_39, %c0_40] : memref<1x128xf32, #tpu.memory_space<vmem>>, vector<1x128xf32>
    %c0_41 = arith.constant 0 : index
    %c0_42 = arith.constant 0 : index
    %21 = vector.load %arg24[%c0_41, %c0_42] : memref<1x128xf32, #tpu.memory_space<vmem>>, vector<1x128xf32>
    %c0_43 = arith.constant 0 : index
    %c0_44 = arith.constant 0 : index
    %22 = vector.load %arg25[%c0_43, %c0_44] : memref<1x128xf32, #tpu.memory_space<vmem>>, vector<1x128xf32>
    %c0_45 = arith.constant 0 : index
    %c0_46 = arith.constant 0 : index
    %c0_47 = arith.constant 0 : index
    %23 = vector.load %arg1[%c0_45, %c0_46, %c0_47] : memref<1x32x128xf32, #tpu.memory_space<vmem>>, vector<1x32x128xf32>
    %24 = vector.shape_cast %23 : vector<1x32x128xf32> to vector<32x128xf32>
    %c0_48 = arith.constant 0 : index
    %c0_49 = arith.constant 0 : index
    %c0_50 = arith.constant 0 : index
    %25 = vector.load %arg2[%c0_48, %c0_49, %c0_50] : memref<1x32x128xf32, #tpu.memory_space<vmem>>, vector<1x32x128xf32>
    %26 = vector.shape_cast %25 : vector<1x32x128xf32> to vector<32x128xf32>
    %27 = arith.truncf %26 : vector<32x128xf32> to vector<32x128xbf16>
    %cst = arith.constant dense<0.000000e+00> : vector<32x256xf32>
    %28 = tpu.matmul %27, %9, %cst {dimension_numbers = #tpu.dot_dimension_numbers<[1], [0], [0], [1], [0, 0, 1, 1], [], []>} : vector<32x128xbf16>, vector<128x256xbf16>, vector<32x256xf32> -> vector<32x256xf32>
    %29 = vector.broadcast %10 : vector<1x256xf32> to vector<32x256xf32>
    %30 = arith.addf %28, %29 : vector<32x256xf32>
    %31 = vector.extract_strided_slice %30 {offsets = [0, 0], sizes = [32, 128], strides = [1, 1]} : vector<32x256xf32> to vector<32x128xf32>
    %32 = arith.truncf %31 : vector<32x128xf32> to vector<32x128xbf16>
    %33 = vector.extract_strided_slice %30 {offsets = [0, 128], sizes = [32, 128], strides = [1, 1]} : vector<32x256xf32> to vector<32x128xf32>
    %34 = arith.truncf %33 : vector<32x128xf32> to vector<32x128xbf16>
    %35 = arith.truncf %24 : vector<32x128xf32> to vector<32x128xbf16>
    %cst_51 = arith.constant dense<0.000000e+00> : vector<32x384xf32>
    %36 = tpu.matmul %35, %1, %cst_51 {dimension_numbers = #tpu.dot_dimension_numbers<[1], [0], [0], [1], [0, 0, 1, 1], [], []>} : vector<32x128xbf16>, vector<128x384xbf16>, vector<32x384xf32> -> vector<32x384xf32>
    %37 = vector.broadcast %2 : vector<1x384xf32> to vector<32x384xf32>
    %38 = arith.addf %36, %37 : vector<32x384xf32>
    %39 = vector.extract_strided_slice %38 {offsets = [0, 0], sizes = [32, 128], strides = [1, 1]} : vector<32x384xf32> to vector<32x128xf32>
    %cst_52 = arith.constant 0.176776692 : f32
    %40 = vector.broadcast %cst_52 : f32 to vector<32x128xf32>
    %41 = arith.mulf %39, %40 : vector<32x128xf32>
    %42 = arith.truncf %41 : vector<32x128xf32> to vector<32x128xbf16>
    %43 = vector.extract_strided_slice %38 {offsets = [0, 128], sizes = [32, 128], strides = [1, 1]} : vector<32x384xf32> to vector<32x128xf32>
    %44 = arith.truncf %43 : vector<32x128xf32> to vector<32x128xbf16>
    %45 = vector.extract_strided_slice %38 {offsets = [0, 256], sizes = [32, 128], strides = [1, 1]} : vector<32x384xf32> to vector<32x128xf32>
    %46 = arith.truncf %45 : vector<32x128xf32> to vector<32x128xbf16>
    %47 = vector.extract_strided_slice %42 {offsets = [0, 0], sizes = [32, 32], strides = [1, 1]} : vector<32x128xbf16> to vector<32x32xbf16>
    %48 = vector.extract_strided_slice %44 {offsets = [0, 0], sizes = [32, 32], strides = [1, 1]} : vector<32x128xbf16> to vector<32x32xbf16>
    %49 = vector.extract_strided_slice %46 {offsets = [0, 0], sizes = [32, 32], strides = [1, 1]} : vector<32x128xbf16> to vector<32x32xbf16>
    %cst_53 = arith.constant dense<0.000000e+00> : vector<32x32xf32>
    %50 = tpu.matmul %47, %48, %cst_53 {dimension_numbers = #tpu.dot_dimension_numbers<[1], [1], [0], [0], [0, 0, 1, 0], [], []>} : vector<32x32xbf16>, vector<32x32xbf16>, vector<32x32xf32> -> vector<32x32xf32>
    %51 = arith.addf %50, %0 : vector<32x32xf32>
    %cst_54 = arith.constant dense<0xFF800000> : vector<32xf32>
    %52 = vector.multi_reduction <maximumf>, %51, %cst_54 [1] : vector<32x32xf32> to vector<32xf32>
    %53 = vector.shape_cast %52 : vector<32xf32> to vector<32x1xf32>
    %54 = vector.broadcast %53 : vector<32x1xf32> to vector<32x32xf32>
    %55 = arith.subf %51, %54 : vector<32x32xf32>
    %56 = math.exp %55 : vector<32x32xf32>
    %cst_55 = arith.constant dense<0.000000e+00> : vector<32xf32>
    %57 = vector.multi_reduction <add>, %56, %cst_55 [1] : vector<32x32xf32> to vector<32xf32>
    %58 = vector.shape_cast %57 : vector<32xf32> to vector<32x1xf32>
    %59 = tpu.reciprocal %58 {approx = true} : vector<32x1xf32> -> vector<32x1xf32>
    %60 = vector.broadcast %59 : vector<32x1xf32> to vector<32x32xf32>
    %61 = arith.mulf %56, %60 : vector<32x32xf32>
    %62 = arith.truncf %61 : vector<32x32xf32> to vector<32x32xbf16>
    %cst_56 = arith.constant dense<0.000000e+00> : vector<32x32xf32>
    %63 = tpu.matmul %62, %49, %cst_56 {dimension_numbers = #tpu.dot_dimension_numbers<[1], [0], [0], [1], [0, 0, 1, 1], [], []>} : vector<32x32xbf16>, vector<32x32xbf16>, vector<32x32xf32> -> vector<32x32xf32>
    %64 = vector.extract_strided_slice %42 {offsets = [0, 32], sizes = [32, 32], strides = [1, 1]} : vector<32x128xbf16> to vector<32x32xbf16>
    %65 = vector.extract_strided_slice %44 {offsets = [0, 32], sizes = [32, 32], strides = [1, 1]} : vector<32x128xbf16> to vector<32x32xbf16>
    %66 = vector.extract_strided_slice %46 {offsets = [0, 32], sizes = [32, 32], strides = [1, 1]} : vector<32x128xbf16> to vector<32x32xbf16>
    %cst_57 = arith.constant dense<0.000000e+00> : vector<32x32xf32>
    %67 = tpu.matmul %64, %65, %cst_57 {dimension_numbers = #tpu.dot_dimension_numbers<[1], [1], [0], [0], [0, 0, 1, 0], [], []>} : vector<32x32xbf16>, vector<32x32xbf16>, vector<32x32xf32> -> vector<32x32xf32>
    %68 = arith.addf %67, %0 : vector<32x32xf32>
    %cst_58 = arith.constant dense<0xFF800000> : vector<32xf32>
    %69 = vector.multi_reduction <maximumf>, %68, %cst_58 [1] : vector<32x32xf32> to vector<32xf32>
    %70 = vector.shape_cast %69 : vector<32xf32> to vector<32x1xf32>
    %71 = vector.broadcast %70 : vector<32x1xf32> to vector<32x32xf32>
    %72 = arith.subf %68, %71 : vector<32x32xf32>
    %73 = math.exp %72 : vector<32x32xf32>
    %cst_59 = arith.constant dense<0.000000e+00> : vector<32xf32>
    %74 = vector.multi_reduction <add>, %73, %cst_59 [1] : vector<32x32xf32> to vector<32xf32>
    %75 = vector.shape_cast %74 : vector<32xf32> to vector<32x1xf32>
    %76 = tpu.reciprocal %75 {approx = true} : vector<32x1xf32> -> vector<32x1xf32>
    %77 = vector.broadcast %76 : vector<32x1xf32> to vector<32x32xf32>
    %78 = arith.mulf %73, %77 : vector<32x32xf32>
    %79 = arith.truncf %78 : vector<32x32xf32> to vector<32x32xbf16>
    %cst_60 = arith.constant dense<0.000000e+00> : vector<32x32xf32>
    %80 = tpu.matmul %79, %66, %cst_60 {dimension_numbers = #tpu.dot_dimension_numbers<[1], [0], [0], [1], [0, 0, 1, 1], [], []>} : vector<32x32xbf16>, vector<32x32xbf16>, vector<32x32xf32> -> vector<32x32xf32>
    %81 = vector.extract_strided_slice %42 {offsets = [0, 64], sizes = [32, 32], strides = [1, 1]} : vector<32x128xbf16> to vector<32x32xbf16>
    %82 = vector.extract_strided_slice %44 {offsets = [0, 64], sizes = [32, 32], strides = [1, 1]} : vector<32x128xbf16> to vector<32x32xbf16>
    %83 = vector.extract_strided_slice %46 {offsets = [0, 64], sizes = [32, 32], strides = [1, 1]} : vector<32x128xbf16> to vector<32x32xbf16>
    %cst_61 = arith.constant dense<0.000000e+00> : vector<32x32xf32>
    %84 = tpu.matmul %81, %82, %cst_61 {dimension_numbers = #tpu.dot_dimension_numbers<[1], [1], [0], [0], [0, 0, 1, 0], [], []>} : vector<32x32xbf16>, vector<32x32xbf16>, vector<32x32xf32> -> vector<32x32xf32>
    %85 = arith.addf %84, %0 : vector<32x32xf32>
    %cst_62 = arith.constant dense<0xFF800000> : vector<32xf32>
    %86 = vector.multi_reduction <maximumf>, %85, %cst_62 [1] : vector<32x32xf32> to vector<32xf32>
    %87 = vector.shape_cast %86 : vector<32xf32> to vector<32x1xf32>
    %88 = vector.broadcast %87 : vector<32x1xf32> to vector<32x32xf32>
    %89 = arith.subf %85, %88 : vector<32x32xf32>
    %90 = math.exp %89 : vector<32x32xf32>
    %cst_63 = arith.constant dense<0.000000e+00> : vector<32xf32>
    %91 = vector.multi_reduction <add>, %90, %cst_63 [1] : vector<32x32xf32> to vector<32xf32>
    %92 = vector.shape_cast %91 : vector<32xf32> to vector<32x1xf32>
    %93 = tpu.reciprocal %92 {approx = true} : vector<32x1xf32> -> vector<32x1xf32>
    %94 = vector.broadcast %93 : vector<32x1xf32> to vector<32x32xf32>
    %95 = arith.mulf %90, %94 : vector<32x32xf32>
    %96 = arith.truncf %95 : vector<32x32xf32> to vector<32x32xbf16>
    %cst_64 = arith.constant dense<0.000000e+00> : vector<32x32xf32>
    %97 = tpu.matmul %96, %83, %cst_64 {dimension_numbers = #tpu.dot_dimension_numbers<[1], [0], [0], [1], [0, 0, 1, 1], [], []>} : vector<32x32xbf16>, vector<32x32xbf16>, vector<32x32xf32> -> vector<32x32xf32>
    %98 = vector.extract_strided_slice %42 {offsets = [0, 96], sizes = [32, 32], strides = [1, 1]} : vector<32x128xbf16> to vector<32x32xbf16>
    %99 = vector.extract_strided_slice %44 {offsets = [0, 96], sizes = [32, 32], strides = [1, 1]} : vector<32x128xbf16> to vector<32x32xbf16>
    %100 = vector.extract_strided_slice %46 {offsets = [0, 96], sizes = [32, 32], strides = [1, 1]} : vector<32x128xbf16> to vector<32x32xbf16>
    %cst_65 = arith.constant dense<0.000000e+00> : vector<32x32xf32>
    %101 = tpu.matmul %98, %99, %cst_65 {dimension_numbers = #tpu.dot_dimension_numbers<[1], [1], [0], [0], [0, 0, 1, 0], [], []>} : vector<32x32xbf16>, vector<32x32xbf16>, vector<32x32xf32> -> vector<32x32xf32>
    %102 = arith.addf %101, %0 : vector<32x32xf32>
    %cst_66 = arith.constant dense<0xFF800000> : vector<32xf32>
    %103 = vector.multi_reduction <maximumf>, %102, %cst_66 [1] : vector<32x32xf32> to vector<32xf32>
    %104 = vector.shape_cast %103 : vector<32xf32> to vector<32x1xf32>
    %105 = vector.broadcast %104 : vector<32x1xf32> to vector<32x32xf32>
    %106 = arith.subf %102, %105 : vector<32x32xf32>
    %107 = math.exp %106 : vector<32x32xf32>
    %cst_67 = arith.constant dense<0.000000e+00> : vector<32xf32>
    %108 = vector.multi_reduction <add>, %107, %cst_67 [1] : vector<32x32xf32> to vector<32xf32>
    %109 = vector.shape_cast %108 : vector<32xf32> to vector<32x1xf32>
    %110 = tpu.reciprocal %109 {approx = true} : vector<32x1xf32> -> vector<32x1xf32>
    %111 = vector.broadcast %110 : vector<32x1xf32> to vector<32x32xf32>
    %112 = arith.mulf %107, %111 : vector<32x32xf32>
    %113 = arith.truncf %112 : vector<32x32xf32> to vector<32x32xbf16>
    %cst_68 = arith.constant dense<0.000000e+00> : vector<32x32xf32>
    %114 = tpu.matmul %113, %100, %cst_68 {dimension_numbers = #tpu.dot_dimension_numbers<[1], [0], [0], [1], [0, 0, 1, 1], [], []>} : vector<32x32xbf16>, vector<32x32xbf16>, vector<32x32xf32> -> vector<32x32xf32>
    %115 = tpu.concatenate %63, %80, %97, %114 in 1 : vector<32x32xf32>, vector<32x32xf32>, vector<32x32xf32>, vector<32x32xf32> -> vector<32x128xf32>
    %116 = arith.truncf %115 : vector<32x128xf32> to vector<32x128xbf16>
    %cst_69 = arith.constant dense<0.000000e+00> : vector<32x128xf32>
    %117 = tpu.matmul %116, %3, %cst_69 {dimension_numbers = #tpu.dot_dimension_numbers<[1], [0], [0], [1], [0, 0, 1, 1], [], []>} : vector<32x128xbf16>, vector<128x128xbf16>, vector<32x128xf32> -> vector<32x128xf32>
    %118 = vector.broadcast %4 : vector<1x128xf32> to vector<32x128xf32>
    %119 = arith.addf %117, %118 : vector<32x128xf32>
    %120 = arith.addf %24, %119 : vector<32x128xf32>
    %cst_70 = arith.constant dense<0.000000e+00> : vector<32xf32>
    %121 = vector.multi_reduction <add>, %120, %cst_70 [1] : vector<32x128xf32> to vector<32xf32>
    %122 = vector.shape_cast %121 : vector<32xf32> to vector<32x1xf32>
    %cst_71 = arith.constant 1.280000e+02 : f32
    %123 = vector.broadcast %cst_71 : f32 to vector<32x1xf32>
    %124 = arith.divf %122, %123 : vector<32x1xf32>
    %125 = arith.mulf %120, %120 : vector<32x128xf32>
    %cst_72 = arith.constant dense<0.000000e+00> : vector<32xf32>
    %126 = vector.multi_reduction <add>, %125, %cst_72 [1] : vector<32x128xf32> to vector<32xf32>
    %127 = vector.shape_cast %126 : vector<32xf32> to vector<32x1xf32>
    %cst_73 = arith.constant 1.280000e+02 : f32
    %128 = vector.broadcast %cst_73 : f32 to vector<32x1xf32>
    %129 = arith.divf %127, %128 : vector<32x1xf32>
    %130 = arith.mulf %124, %124 : vector<32x1xf32>
    %131 = arith.subf %129, %130 : vector<32x1xf32>
    %132 = vector.broadcast %124 : vector<32x1xf32> to vector<32x128xf32>
    %133 = arith.subf %120, %132 : vector<32x128xf32>
    %cst_74 = arith.constant 9.99999974E-6 : f32
    %134 = vector.broadcast %cst_74 : f32 to vector<32x1xf32>
    %135 = arith.addf %131, %134 : vector<32x1xf32>
    %136 = math.rsqrt %135 : vector<32x1xf32>
    %137 = vector.broadcast %136 : vector<32x1xf32> to vector<32x128xf32>
    %138 = arith.mulf %133, %137 : vector<32x128xf32>
    %139 = vector.broadcast %5 : vector<1x128xf32> to vector<32x128xf32>
    %140 = arith.mulf %138, %139 : vector<32x128xf32>
    %141 = vector.broadcast %6 : vector<1x128xf32> to vector<32x128xf32>
    %142 = arith.addf %140, %141 : vector<32x128xf32>
    %143 = arith.truncf %142 : vector<32x128xf32> to vector<32x128xbf16>
    %cst_75 = arith.constant dense<0.000000e+00> : vector<32x128xf32>
    %144 = tpu.matmul %143, %7, %cst_75 {dimension_numbers = #tpu.dot_dimension_numbers<[1], [0], [0], [1], [0, 0, 1, 1], [], []>} : vector<32x128xbf16>, vector<128x128xbf16>, vector<32x128xf32> -> vector<32x128xf32>
    %145 = vector.broadcast %8 : vector<1x128xf32> to vector<32x128xf32>
    %146 = arith.addf %144, %145 : vector<32x128xf32>
    %cst_76 = arith.constant 0.176776692 : f32
    %147 = vector.broadcast %cst_76 : f32 to vector<32x128xf32>
    %148 = arith.mulf %146, %147 : vector<32x128xf32>
    %149 = arith.truncf %148 : vector<32x128xf32> to vector<32x128xbf16>
    %150 = vector.extract_strided_slice %149 {offsets = [0, 0], sizes = [32, 32], strides = [1, 1]} : vector<32x128xbf16> to vector<32x32xbf16>
    %151 = vector.extract_strided_slice %32 {offsets = [0, 0], sizes = [32, 32], strides = [1, 1]} : vector<32x128xbf16> to vector<32x32xbf16>
    %152 = vector.extract_strided_slice %34 {offsets = [0, 0], sizes = [32, 32], strides = [1, 1]} : vector<32x128xbf16> to vector<32x32xbf16>
    %cst_77 = arith.constant dense<0.000000e+00> : vector<32x32xf32>
    %153 = tpu.matmul %150, %151, %cst_77 {dimension_numbers = #tpu.dot_dimension_numbers<[1], [1], [0], [0], [0, 0, 1, 0], [], []>} : vector<32x32xbf16>, vector<32x32xbf16>, vector<32x32xf32> -> vector<32x32xf32>
    %cst_78 = arith.constant dense<0xFF800000> : vector<32xf32>
    %154 = vector.multi_reduction <maximumf>, %153, %cst_78 [1] : vector<32x32xf32> to vector<32xf32>
    %155 = vector.shape_cast %154 : vector<32xf32> to vector<32x1xf32>
    %156 = vector.broadcast %155 : vector<32x1xf32> to vector<32x32xf32>
    %157 = arith.subf %153, %156 : vector<32x32xf32>
    %158 = math.exp %157 : vector<32x32xf32>
    %cst_79 = arith.constant dense<0.000000e+00> : vector<32xf32>
    %159 = vector.multi_reduction <add>, %158, %cst_79 [1] : vector<32x32xf32> to vector<32xf32>
    %160 = vector.shape_cast %159 : vector<32xf32> to vector<32x1xf32>
    %161 = tpu.reciprocal %160 {approx = true} : vector<32x1xf32> -> vector<32x1xf32>
    %162 = vector.broadcast %161 : vector<32x1xf32> to vector<32x32xf32>
    %163 = arith.mulf %158, %162 : vector<32x32xf32>
    %164 = arith.truncf %163 : vector<32x32xf32> to vector<32x32xbf16>
    %cst_80 = arith.constant dense<0.000000e+00> : vector<32x32xf32>
    %165 = tpu.matmul %164, %152, %cst_80 {dimension_numbers = #tpu.dot_dimension_numbers<[1], [0], [0], [1], [0, 0, 1, 1], [], []>} : vector<32x32xbf16>, vector<32x32xbf16>, vector<32x32xf32> -> vector<32x32xf32>
    %166 = vector.extract_strided_slice %149 {offsets = [0, 32], sizes = [32, 32], strides = [1, 1]} : vector<32x128xbf16> to vector<32x32xbf16>
    %167 = vector.extract_strided_slice %32 {offsets = [0, 32], sizes = [32, 32], strides = [1, 1]} : vector<32x128xbf16> to vector<32x32xbf16>
    %168 = vector.extract_strided_slice %34 {offsets = [0, 32], sizes = [32, 32], strides = [1, 1]} : vector<32x128xbf16> to vector<32x32xbf16>
    %cst_81 = arith.constant dense<0.000000e+00> : vector<32x32xf32>
    %169 = tpu.matmul %166, %167, %cst_81 {dimension_numbers = #tpu.dot_dimension_numbers<[1], [1], [0], [0], [0, 0, 1, 0], [], []>} : vector<32x32xbf16>, vector<32x32xbf16>, vector<32x32xf32> -> vector<32x32xf32>
    %cst_82 = arith.constant dense<0xFF800000> : vector<32xf32>
    %170 = vector.multi_reduction <maximumf>, %169, %cst_82 [1] : vector<32x32xf32> to vector<32xf32>
    %171 = vector.shape_cast %170 : vector<32xf32> to vector<32x1xf32>
    %172 = vector.broadcast %171 : vector<32x1xf32> to vector<32x32xf32>
    %173 = arith.subf %169, %172 : vector<32x32xf32>
    %174 = math.exp %173 : vector<32x32xf32>
    %cst_83 = arith.constant dense<0.000000e+00> : vector<32xf32>
    %175 = vector.multi_reduction <add>, %174, %cst_83 [1] : vector<32x32xf32> to vector<32xf32>
    %176 = vector.shape_cast %175 : vector<32xf32> to vector<32x1xf32>
    %177 = tpu.reciprocal %176 {approx = true} : vector<32x1xf32> -> vector<32x1xf32>
    %178 = vector.broadcast %177 : vector<32x1xf32> to vector<32x32xf32>
    %179 = arith.mulf %174, %178 : vector<32x32xf32>
    %180 = arith.truncf %179 : vector<32x32xf32> to vector<32x32xbf16>
    %cst_84 = arith.constant dense<0.000000e+00> : vector<32x32xf32>
    %181 = tpu.matmul %180, %168, %cst_84 {dimension_numbers = #tpu.dot_dimension_numbers<[1], [0], [0], [1], [0, 0, 1, 1], [], []>} : vector<32x32xbf16>, vector<32x32xbf16>, vector<32x32xf32> -> vector<32x32xf32>
    %182 = vector.extract_strided_slice %149 {offsets = [0, 64], sizes = [32, 32], strides = [1, 1]} : vector<32x128xbf16> to vector<32x32xbf16>
    %183 = vector.extract_strided_slice %32 {offsets = [0, 64], sizes = [32, 32], strides = [1, 1]} : vector<32x128xbf16> to vector<32x32xbf16>
    %184 = vector.extract_strided_slice %34 {offsets = [0, 64], sizes = [32, 32], strides = [1, 1]} : vector<32x128xbf16> to vector<32x32xbf16>
    %cst_85 = arith.constant dense<0.000000e+00> : vector<32x32xf32>
    %185 = tpu.matmul %182, %183, %cst_85 {dimension_numbers = #tpu.dot_dimension_numbers<[1], [1], [0], [0], [0, 0, 1, 0], [], []>} : vector<32x32xbf16>, vector<32x32xbf16>, vector<32x32xf32> -> vector<32x32xf32>
    %cst_86 = arith.constant dense<0xFF800000> : vector<32xf32>
    %186 = vector.multi_reduction <maximumf>, %185, %cst_86 [1] : vector<32x32xf32> to vector<32xf32>
    %187 = vector.shape_cast %186 : vector<32xf32> to vector<32x1xf32>
    %188 = vector.broadcast %187 : vector<32x1xf32> to vector<32x32xf32>
    %189 = arith.subf %185, %188 : vector<32x32xf32>
    %190 = math.exp %189 : vector<32x32xf32>
    %cst_87 = arith.constant dense<0.000000e+00> : vector<32xf32>
    %191 = vector.multi_reduction <add>, %190, %cst_87 [1] : vector<32x32xf32> to vector<32xf32>
    %192 = vector.shape_cast %191 : vector<32xf32> to vector<32x1xf32>
    %193 = tpu.reciprocal %192 {approx = true} : vector<32x1xf32> -> vector<32x1xf32>
    %194 = vector.broadcast %193 : vector<32x1xf32> to vector<32x32xf32>
    %195 = arith.mulf %190, %194 : vector<32x32xf32>
    %196 = arith.truncf %195 : vector<32x32xf32> to vector<32x32xbf16>
    %cst_88 = arith.constant dense<0.000000e+00> : vector<32x32xf32>
    %197 = tpu.matmul %196, %184, %cst_88 {dimension_numbers = #tpu.dot_dimension_numbers<[1], [0], [0], [1], [0, 0, 1, 1], [], []>} : vector<32x32xbf16>, vector<32x32xbf16>, vector<32x32xf32> -> vector<32x32xf32>
    %198 = vector.extract_strided_slice %149 {offsets = [0, 96], sizes = [32, 32], strides = [1, 1]} : vector<32x128xbf16> to vector<32x32xbf16>
    %199 = vector.extract_strided_slice %32 {offsets = [0, 96], sizes = [32, 32], strides = [1, 1]} : vector<32x128xbf16> to vector<32x32xbf16>
    %200 = vector.extract_strided_slice %34 {offsets = [0, 96], sizes = [32, 32], strides = [1, 1]} : vector<32x128xbf16> to vector<32x32xbf16>
    %cst_89 = arith.constant dense<0.000000e+00> : vector<32x32xf32>
    %201 = tpu.matmul %198, %199, %cst_89 {dimension_numbers = #tpu.dot_dimension_numbers<[1], [1], [0], [0], [0, 0, 1, 0], [], []>} : vector<32x32xbf16>, vector<32x32xbf16>, vector<32x32xf32> -> vector<32x32xf32>
    %cst_90 = arith.constant dense<0xFF800000> : vector<32xf32>
    %202 = vector.multi_reduction <maximumf>, %201, %cst_90 [1] : vector<32x32xf32> to vector<32xf32>
    %203 = vector.shape_cast %202 : vector<32xf32> to vector<32x1xf32>
    %204 = vector.broadcast %203 : vector<32x1xf32> to vector<32x32xf32>
    %205 = arith.subf %201, %204 : vector<32x32xf32>
    %206 = math.exp %205 : vector<32x32xf32>
    %cst_91 = arith.constant dense<0.000000e+00> : vector<32xf32>
    %207 = vector.multi_reduction <add>, %206, %cst_91 [1] : vector<32x32xf32> to vector<32xf32>
    %208 = vector.shape_cast %207 : vector<32xf32> to vector<32x1xf32>
    %209 = tpu.reciprocal %208 {approx = true} : vector<32x1xf32> -> vector<32x1xf32>
    %210 = vector.broadcast %209 : vector<32x1xf32> to vector<32x32xf32>
    %211 = arith.mulf %206, %210 : vector<32x32xf32>
    %212 = arith.truncf %211 : vector<32x32xf32> to vector<32x32xbf16>
    %cst_92 = arith.constant dense<0.000000e+00> : vector<32x32xf32>
    %213 = tpu.matmul %212, %200, %cst_92 {dimension_numbers = #tpu.dot_dimension_numbers<[1], [0], [0], [1], [0, 0, 1, 1], [], []>} : vector<32x32xbf16>, vector<32x32xbf16>, vector<32x32xf32> -> vector<32x32xf32>
    %214 = tpu.concatenate %165, %181, %197, %213 in 1 : vector<32x32xf32>, vector<32x32xf32>, vector<32x32xf32>, vector<32x32xf32> -> vector<32x128xf32>
    %215 = arith.truncf %214 : vector<32x128xf32> to vector<32x128xbf16>
    %cst_93 = arith.constant dense<0.000000e+00> : vector<32x128xf32>
    %216 = tpu.matmul %215, %11, %cst_93 {dimension_numbers = #tpu.dot_dimension_numbers<[1], [0], [0], [1], [0, 0, 1, 1], [], []>} : vector<32x128xbf16>, vector<128x128xbf16>, vector<32x128xf32> -> vector<32x128xf32>
    %217 = vector.broadcast %12 : vector<1x128xf32> to vector<32x128xf32>
    %218 = arith.addf %216, %217 : vector<32x128xf32>
    %219 = arith.addf %142, %218 : vector<32x128xf32>
    %cst_94 = arith.constant dense<0.000000e+00> : vector<32xf32>
    %220 = vector.multi_reduction <add>, %219, %cst_94 [1] : vector<32x128xf32> to vector<32xf32>
    %221 = vector.shape_cast %220 : vector<32xf32> to vector<32x1xf32>
    %cst_95 = arith.constant 1.280000e+02 : f32
    %222 = vector.broadcast %cst_95 : f32 to vector<32x1xf32>
    %223 = arith.divf %221, %222 : vector<32x1xf32>
    %224 = arith.mulf %219, %219 : vector<32x128xf32>
    %cst_96 = arith.constant dense<0.000000e+00> : vector<32xf32>
    %225 = vector.multi_reduction <add>, %224, %cst_96 [1] : vector<32x128xf32> to vector<32xf32>
    %226 = vector.shape_cast %225 : vector<32xf32> to vector<32x1xf32>
    %cst_97 = arith.constant 1.280000e+02 : f32
    %227 = vector.broadcast %cst_97 : f32 to vector<32x1xf32>
    %228 = arith.divf %226, %227 : vector<32x1xf32>
    %229 = arith.mulf %223, %223 : vector<32x1xf32>
    %230 = arith.subf %228, %229 : vector<32x1xf32>
    %231 = vector.broadcast %223 : vector<32x1xf32> to vector<32x128xf32>
    %232 = arith.subf %219, %231 : vector<32x128xf32>
    %cst_98 = arith.constant 9.99999974E-6 : f32
    %233 = vector.broadcast %cst_98 : f32 to vector<32x1xf32>
    %234 = arith.addf %230, %233 : vector<32x1xf32>
    %235 = math.rsqrt %234 : vector<32x1xf32>
    %236 = vector.broadcast %235 : vector<32x1xf32> to vector<32x128xf32>
    %237 = arith.mulf %232, %236 : vector<32x128xf32>
    %238 = vector.broadcast %13 : vector<1x128xf32> to vector<32x128xf32>
    %239 = arith.mulf %237, %238 : vector<32x128xf32>
    %240 = vector.broadcast %14 : vector<1x128xf32> to vector<32x128xf32>
    %241 = arith.addf %239, %240 : vector<32x128xf32>
    %242 = arith.truncf %241 : vector<32x128xf32> to vector<32x128xbf16>
    %cst_99 = arith.constant dense<0.000000e+00> : vector<32x256xf32>
    %243 = tpu.matmul %242, %15, %cst_99 {dimension_numbers = #tpu.dot_dimension_numbers<[1], [0], [0], [1], [0, 0, 1, 1], [], []>} : vector<32x128xbf16>, vector<128x256xbf16>, vector<32x256xf32> -> vector<32x256xf32>
    %244 = vector.broadcast %16 : vector<1x256xf32> to vector<32x256xf32>
    %245 = arith.addf %243, %244 : vector<32x256xf32>
    %cst_100 = arith.constant 0.000000e+00 : f32
    %246 = vector.broadcast %cst_100 : f32 to vector<32x256xf32>
    %247 = arith.maximumf %245, %246 : vector<32x256xf32>
    %248 = arith.truncf %247 : vector<32x256xf32> to vector<32x256xbf16>
    %cst_101 = arith.constant dense<0.000000e+00> : vector<32x128xf32>
    %249 = tpu.matmul %248, %17, %cst_101 {dimension_numbers = #tpu.dot_dimension_numbers<[1], [0], [0], [1], [0, 0, 1, 1], [], []>} : vector<32x256xbf16>, vector<256x128xbf16>, vector<32x128xf32> -> vector<32x128xf32>
    %250 = vector.broadcast %18 : vector<1x128xf32> to vector<32x128xf32>
    %251 = arith.addf %249, %250 : vector<32x128xf32>
    %252 = arith.addf %241, %251 : vector<32x128xf32>
    %cst_102 = arith.constant dense<0.000000e+00> : vector<32xf32>
    %253 = vector.multi_reduction <add>, %252, %cst_102 [1] : vector<32x128xf32> to vector<32xf32>
    %254 = vector.shape_cast %253 : vector<32xf32> to vector<32x1xf32>
    %cst_103 = arith.constant 1.280000e+02 : f32
    %255 = vector.broadcast %cst_103 : f32 to vector<32x1xf32>
    %256 = arith.divf %254, %255 : vector<32x1xf32>
    %257 = arith.mulf %252, %252 : vector<32x128xf32>
    %cst_104 = arith.constant dense<0.000000e+00> : vector<32xf32>
    %258 = vector.multi_reduction <add>, %257, %cst_104 [1] : vector<32x128xf32> to vector<32xf32>
    %259 = vector.shape_cast %258 : vector<32xf32> to vector<32x1xf32>
    %cst_105 = arith.constant 1.280000e+02 : f32
    %260 = vector.broadcast %cst_105 : f32 to vector<32x1xf32>
    %261 = arith.divf %259, %260 : vector<32x1xf32>
    %262 = arith.mulf %256, %256 : vector<32x1xf32>
    %263 = arith.subf %261, %262 : vector<32x1xf32>
    %264 = vector.broadcast %256 : vector<32x1xf32> to vector<32x128xf32>
    %265 = arith.subf %252, %264 : vector<32x128xf32>
    %cst_106 = arith.constant 9.99999974E-6 : f32
    %266 = vector.broadcast %cst_106 : f32 to vector<32x1xf32>
    %267 = arith.addf %263, %266 : vector<32x1xf32>
    %268 = math.rsqrt %267 : vector<32x1xf32>
    %269 = vector.broadcast %268 : vector<32x1xf32> to vector<32x128xf32>
    %270 = arith.mulf %265, %269 : vector<32x128xf32>
    %271 = vector.broadcast %19 : vector<1x128xf32> to vector<32x128xf32>
    %272 = arith.mulf %270, %271 : vector<32x128xf32>
    %273 = vector.broadcast %20 : vector<1x128xf32> to vector<32x128xf32>
    %274 = arith.addf %272, %273 : vector<32x128xf32>
    %275 = arith.truncf %274 : vector<32x128xf32> to vector<32x128xbf16>
    %cst_107 = arith.constant dense<0.000000e+00> : vector<32x384xf32>
    %276 = tpu.matmul %275, %1, %cst_107 {dimension_numbers = #tpu.dot_dimension_numbers<[1], [0], [0], [1], [0, 0, 1, 1], [], []>} : vector<32x128xbf16>, vector<128x384xbf16>, vector<32x384xf32> -> vector<32x384xf32>
    %277 = vector.broadcast %2 : vector<1x384xf32> to vector<32x384xf32>
    %278 = arith.addf %276, %277 : vector<32x384xf32>
    %279 = vector.extract_strided_slice %278 {offsets = [0, 0], sizes = [32, 128], strides = [1, 1]} : vector<32x384xf32> to vector<32x128xf32>
    %cst_108 = arith.constant 0.176776692 : f32
    %280 = vector.broadcast %cst_108 : f32 to vector<32x128xf32>
    %281 = arith.mulf %279, %280 : vector<32x128xf32>
    %282 = arith.truncf %281 : vector<32x128xf32> to vector<32x128xbf16>
    %283 = vector.extract_strided_slice %278 {offsets = [0, 128], sizes = [32, 128], strides = [1, 1]} : vector<32x384xf32> to vector<32x128xf32>
    %284 = arith.truncf %283 : vector<32x128xf32> to vector<32x128xbf16>
    %285 = vector.extract_strided_slice %278 {offsets = [0, 256], sizes = [32, 128], strides = [1, 1]} : vector<32x384xf32> to vector<32x128xf32>
    %286 = arith.truncf %285 : vector<32x128xf32> to vector<32x128xbf16>
    %287 = vector.extract_strided_slice %282 {offsets = [0, 0], sizes = [32, 32], strides = [1, 1]} : vector<32x128xbf16> to vector<32x32xbf16>
    %288 = vector.extract_strided_slice %284 {offsets = [0, 0], sizes = [32, 32], strides = [1, 1]} : vector<32x128xbf16> to vector<32x32xbf16>
    %289 = vector.extract_strided_slice %286 {offsets = [0, 0], sizes = [32, 32], strides = [1, 1]} : vector<32x128xbf16> to vector<32x32xbf16>
    %cst_109 = arith.constant dense<0.000000e+00> : vector<32x32xf32>
    %290 = tpu.matmul %287, %288, %cst_109 {dimension_numbers = #tpu.dot_dimension_numbers<[1], [1], [0], [0], [0, 0, 1, 0], [], []>} : vector<32x32xbf16>, vector<32x32xbf16>, vector<32x32xf32> -> vector<32x32xf32>
    %291 = arith.addf %290, %0 : vector<32x32xf32>
    %cst_110 = arith.constant dense<0xFF800000> : vector<32xf32>
    %292 = vector.multi_reduction <maximumf>, %291, %cst_110 [1] : vector<32x32xf32> to vector<32xf32>
    %293 = vector.shape_cast %292 : vector<32xf32> to vector<32x1xf32>
    %294 = vector.broadcast %293 : vector<32x1xf32> to vector<32x32xf32>
    %295 = arith.subf %291, %294 : vector<32x32xf32>
    %296 = math.exp %295 : vector<32x32xf32>
    %cst_111 = arith.constant dense<0.000000e+00> : vector<32xf32>
    %297 = vector.multi_reduction <add>, %296, %cst_111 [1] : vector<32x32xf32> to vector<32xf32>
    %298 = vector.shape_cast %297 : vector<32xf32> to vector<32x1xf32>
    %299 = tpu.reciprocal %298 {approx = true} : vector<32x1xf32> -> vector<32x1xf32>
    %300 = vector.broadcast %299 : vector<32x1xf32> to vector<32x32xf32>
    %301 = arith.mulf %296, %300 : vector<32x32xf32>
    %302 = arith.truncf %301 : vector<32x32xf32> to vector<32x32xbf16>
    %cst_112 = arith.constant dense<0.000000e+00> : vector<32x32xf32>
    %303 = tpu.matmul %302, %289, %cst_112 {dimension_numbers = #tpu.dot_dimension_numbers<[1], [0], [0], [1], [0, 0, 1, 1], [], []>} : vector<32x32xbf16>, vector<32x32xbf16>, vector<32x32xf32> -> vector<32x32xf32>
    %304 = vector.extract_strided_slice %282 {offsets = [0, 32], sizes = [32, 32], strides = [1, 1]} : vector<32x128xbf16> to vector<32x32xbf16>
    %305 = vector.extract_strided_slice %284 {offsets = [0, 32], sizes = [32, 32], strides = [1, 1]} : vector<32x128xbf16> to vector<32x32xbf16>
    %306 = vector.extract_strided_slice %286 {offsets = [0, 32], sizes = [32, 32], strides = [1, 1]} : vector<32x128xbf16> to vector<32x32xbf16>
    %cst_113 = arith.constant dense<0.000000e+00> : vector<32x32xf32>
    %307 = tpu.matmul %304, %305, %cst_113 {dimension_numbers = #tpu.dot_dimension_numbers<[1], [1], [0], [0], [0, 0, 1, 0], [], []>} : vector<32x32xbf16>, vector<32x32xbf16>, vector<32x32xf32> -> vector<32x32xf32>
    %308 = arith.addf %307, %0 : vector<32x32xf32>
    %cst_114 = arith.constant dense<0xFF800000> : vector<32xf32>
    %309 = vector.multi_reduction <maximumf>, %308, %cst_114 [1] : vector<32x32xf32> to vector<32xf32>
    %310 = vector.shape_cast %309 : vector<32xf32> to vector<32x1xf32>
    %311 = vector.broadcast %310 : vector<32x1xf32> to vector<32x32xf32>
    %312 = arith.subf %308, %311 : vector<32x32xf32>
    %313 = math.exp %312 : vector<32x32xf32>
    %cst_115 = arith.constant dense<0.000000e+00> : vector<32xf32>
    %314 = vector.multi_reduction <add>, %313, %cst_115 [1] : vector<32x32xf32> to vector<32xf32>
    %315 = vector.shape_cast %314 : vector<32xf32> to vector<32x1xf32>
    %316 = tpu.reciprocal %315 {approx = true} : vector<32x1xf32> -> vector<32x1xf32>
    %317 = vector.broadcast %316 : vector<32x1xf32> to vector<32x32xf32>
    %318 = arith.mulf %313, %317 : vector<32x32xf32>
    %319 = arith.truncf %318 : vector<32x32xf32> to vector<32x32xbf16>
    %cst_116 = arith.constant dense<0.000000e+00> : vector<32x32xf32>
    %320 = tpu.matmul %319, %306, %cst_116 {dimension_numbers = #tpu.dot_dimension_numbers<[1], [0], [0], [1], [0, 0, 1, 1], [], []>} : vector<32x32xbf16>, vector<32x32xbf16>, vector<32x32xf32> -> vector<32x32xf32>
    %321 = vector.extract_strided_slice %282 {offsets = [0, 64], sizes = [32, 32], strides = [1, 1]} : vector<32x128xbf16> to vector<32x32xbf16>
    %322 = vector.extract_strided_slice %284 {offsets = [0, 64], sizes = [32, 32], strides = [1, 1]} : vector<32x128xbf16> to vector<32x32xbf16>
    %323 = vector.extract_strided_slice %286 {offsets = [0, 64], sizes = [32, 32], strides = [1, 1]} : vector<32x128xbf16> to vector<32x32xbf16>
    %cst_117 = arith.constant dense<0.000000e+00> : vector<32x32xf32>
    %324 = tpu.matmul %321, %322, %cst_117 {dimension_numbers = #tpu.dot_dimension_numbers<[1], [1], [0], [0], [0, 0, 1, 0], [], []>} : vector<32x32xbf16>, vector<32x32xbf16>, vector<32x32xf32> -> vector<32x32xf32>
    %325 = arith.addf %324, %0 : vector<32x32xf32>
    %cst_118 = arith.constant dense<0xFF800000> : vector<32xf32>
    %326 = vector.multi_reduction <maximumf>, %325, %cst_118 [1] : vector<32x32xf32> to vector<32xf32>
    %327 = vector.shape_cast %326 : vector<32xf32> to vector<32x1xf32>
    %328 = vector.broadcast %327 : vector<32x1xf32> to vector<32x32xf32>
    %329 = arith.subf %325, %328 : vector<32x32xf32>
    %330 = math.exp %329 : vector<32x32xf32>
    %cst_119 = arith.constant dense<0.000000e+00> : vector<32xf32>
    %331 = vector.multi_reduction <add>, %330, %cst_119 [1] : vector<32x32xf32> to vector<32xf32>
    %332 = vector.shape_cast %331 : vector<32xf32> to vector<32x1xf32>
    %333 = tpu.reciprocal %332 {approx = true} : vector<32x1xf32> -> vector<32x1xf32>
    %334 = vector.broadcast %333 : vector<32x1xf32> to vector<32x32xf32>
    %335 = arith.mulf %330, %334 : vector<32x32xf32>
    %336 = arith.truncf %335 : vector<32x32xf32> to vector<32x32xbf16>
    %cst_120 = arith.constant dense<0.000000e+00> : vector<32x32xf32>
    %337 = tpu.matmul %336, %323, %cst_120 {dimension_numbers = #tpu.dot_dimension_numbers<[1], [0], [0], [1], [0, 0, 1, 1], [], []>} : vector<32x32xbf16>, vector<32x32xbf16>, vector<32x32xf32> -> vector<32x32xf32>
    %338 = vector.extract_strided_slice %282 {offsets = [0, 96], sizes = [32, 32], strides = [1, 1]} : vector<32x128xbf16> to vector<32x32xbf16>
    %339 = vector.extract_strided_slice %284 {offsets = [0, 96], sizes = [32, 32], strides = [1, 1]} : vector<32x128xbf16> to vector<32x32xbf16>
    %340 = vector.extract_strided_slice %286 {offsets = [0, 96], sizes = [32, 32], strides = [1, 1]} : vector<32x128xbf16> to vector<32x32xbf16>
    %cst_121 = arith.constant dense<0.000000e+00> : vector<32x32xf32>
    %341 = tpu.matmul %338, %339, %cst_121 {dimension_numbers = #tpu.dot_dimension_numbers<[1], [1], [0], [0], [0, 0, 1, 0], [], []>} : vector<32x32xbf16>, vector<32x32xbf16>, vector<32x32xf32> -> vector<32x32xf32>
    %342 = arith.addf %341, %0 : vector<32x32xf32>
    %cst_122 = arith.constant dense<0xFF800000> : vector<32xf32>
    %343 = vector.multi_reduction <maximumf>, %342, %cst_122 [1] : vector<32x32xf32> to vector<32xf32>
    %344 = vector.shape_cast %343 : vector<32xf32> to vector<32x1xf32>
    %345 = vector.broadcast %344 : vector<32x1xf32> to vector<32x32xf32>
    %346 = arith.subf %342, %345 : vector<32x32xf32>
    %347 = math.exp %346 : vector<32x32xf32>
    %cst_123 = arith.constant dense<0.000000e+00> : vector<32xf32>
    %348 = vector.multi_reduction <add>, %347, %cst_123 [1] : vector<32x32xf32> to vector<32xf32>
    %349 = vector.shape_cast %348 : vector<32xf32> to vector<32x1xf32>
    %350 = tpu.reciprocal %349 {approx = true} : vector<32x1xf32> -> vector<32x1xf32>
    %351 = vector.broadcast %350 : vector<32x1xf32> to vector<32x32xf32>
    %352 = arith.mulf %347, %351 : vector<32x32xf32>
    %353 = arith.truncf %352 : vector<32x32xf32> to vector<32x32xbf16>
    %cst_124 = arith.constant dense<0.000000e+00> : vector<32x32xf32>
    %354 = tpu.matmul %353, %340, %cst_124 {dimension_numbers = #tpu.dot_dimension_numbers<[1], [0], [0], [1], [0, 0, 1, 1], [], []>} : vector<32x32xbf16>, vector<32x32xbf16>, vector<32x32xf32> -> vector<32x32xf32>
    %355 = tpu.concatenate %303, %320, %337, %354 in 1 : vector<32x32xf32>, vector<32x32xf32>, vector<32x32xf32>, vector<32x32xf32> -> vector<32x128xf32>
    %356 = arith.truncf %355 : vector<32x128xf32> to vector<32x128xbf16>
    %cst_125 = arith.constant dense<0.000000e+00> : vector<32x128xf32>
    %357 = tpu.matmul %356, %3, %cst_125 {dimension_numbers = #tpu.dot_dimension_numbers<[1], [0], [0], [1], [0, 0, 1, 1], [], []>} : vector<32x128xbf16>, vector<128x128xbf16>, vector<32x128xf32> -> vector<32x128xf32>
    %358 = vector.broadcast %4 : vector<1x128xf32> to vector<32x128xf32>
    %359 = arith.addf %357, %358 : vector<32x128xf32>
    %360 = arith.addf %274, %359 : vector<32x128xf32>
    %cst_126 = arith.constant dense<0.000000e+00> : vector<32xf32>
    %361 = vector.multi_reduction <add>, %360, %cst_126 [1] : vector<32x128xf32> to vector<32xf32>
    %362 = vector.shape_cast %361 : vector<32xf32> to vector<32x1xf32>
    %cst_127 = arith.constant 1.280000e+02 : f32
    %363 = vector.broadcast %cst_127 : f32 to vector<32x1xf32>
    %364 = arith.divf %362, %363 : vector<32x1xf32>
    %365 = arith.mulf %360, %360 : vector<32x128xf32>
    %cst_128 = arith.constant dense<0.000000e+00> : vector<32xf32>
    %366 = vector.multi_reduction <add>, %365, %cst_128 [1] : vector<32x128xf32> to vector<32xf32>
    %367 = vector.shape_cast %366 : vector<32xf32> to vector<32x1xf32>
    %cst_129 = arith.constant 1.280000e+02 : f32
    %368 = vector.broadcast %cst_129 : f32 to vector<32x1xf32>
    %369 = arith.divf %367, %368 : vector<32x1xf32>
    %370 = arith.mulf %364, %364 : vector<32x1xf32>
    %371 = arith.subf %369, %370 : vector<32x1xf32>
    %372 = vector.broadcast %364 : vector<32x1xf32> to vector<32x128xf32>
    %373 = arith.subf %360, %372 : vector<32x128xf32>
    %cst_130 = arith.constant 9.99999974E-6 : f32
    %374 = vector.broadcast %cst_130 : f32 to vector<32x1xf32>
    %375 = arith.addf %371, %374 : vector<32x1xf32>
    %376 = math.rsqrt %375 : vector<32x1xf32>
    %377 = vector.broadcast %376 : vector<32x1xf32> to vector<32x128xf32>
    %378 = arith.mulf %373, %377 : vector<32x128xf32>
    %379 = vector.broadcast %5 : vector<1x128xf32> to vector<32x128xf32>
    %380 = arith.mulf %378, %379 : vector<32x128xf32>
    %381 = vector.broadcast %6 : vector<1x128xf32> to vector<32x128xf32>
    %382 = arith.addf %380, %381 : vector<32x128xf32>
    %383 = arith.truncf %382 : vector<32x128xf32> to vector<32x128xbf16>
    %cst_131 = arith.constant dense<0.000000e+00> : vector<32x128xf32>
    %384 = tpu.matmul %383, %7, %cst_131 {dimension_numbers = #tpu.dot_dimension_numbers<[1], [0], [0], [1], [0, 0, 1, 1], [], []>} : vector<32x128xbf16>, vector<128x128xbf16>, vector<32x128xf32> -> vector<32x128xf32>
    %385 = vector.broadcast %8 : vector<1x128xf32> to vector<32x128xf32>
    %386 = arith.addf %384, %385 : vector<32x128xf32>
    %cst_132 = arith.constant 0.176776692 : f32
    %387 = vector.broadcast %cst_132 : f32 to vector<32x128xf32>
    %388 = arith.mulf %386, %387 : vector<32x128xf32>
    %389 = arith.truncf %388 : vector<32x128xf32> to vector<32x128xbf16>
    %390 = vector.extract_strided_slice %389 {offsets = [0, 0], sizes = [32, 32], strides = [1, 1]} : vector<32x128xbf16> to vector<32x32xbf16>
    %391 = vector.extract_strided_slice %32 {offsets = [0, 0], sizes = [32, 32], strides = [1, 1]} : vector<32x128xbf16> to vector<32x32xbf16>
    %392 = vector.extract_strided_slice %34 {offsets = [0, 0], sizes = [32, 32], strides = [1, 1]} : vector<32x128xbf16> to vector<32x32xbf16>
    %cst_133 = arith.constant dense<0.000000e+00> : vector<32x32xf32>
    %393 = tpu.matmul %390, %391, %cst_133 {dimension_numbers = #tpu.dot_dimension_numbers<[1], [1], [0], [0], [0, 0, 1, 0], [], []>} : vector<32x32xbf16>, vector<32x32xbf16>, vector<32x32xf32> -> vector<32x32xf32>
    %cst_134 = arith.constant dense<0xFF800000> : vector<32xf32>
    %394 = vector.multi_reduction <maximumf>, %393, %cst_134 [1] : vector<32x32xf32> to vector<32xf32>
    %395 = vector.shape_cast %394 : vector<32xf32> to vector<32x1xf32>
    %396 = vector.broadcast %395 : vector<32x1xf32> to vector<32x32xf32>
    %397 = arith.subf %393, %396 : vector<32x32xf32>
    %398 = math.exp %397 : vector<32x32xf32>
    %cst_135 = arith.constant dense<0.000000e+00> : vector<32xf32>
    %399 = vector.multi_reduction <add>, %398, %cst_135 [1] : vector<32x32xf32> to vector<32xf32>
    %400 = vector.shape_cast %399 : vector<32xf32> to vector<32x1xf32>
    %401 = tpu.reciprocal %400 {approx = true} : vector<32x1xf32> -> vector<32x1xf32>
    %402 = vector.broadcast %401 : vector<32x1xf32> to vector<32x32xf32>
    %403 = arith.mulf %398, %402 : vector<32x32xf32>
    %404 = arith.truncf %403 : vector<32x32xf32> to vector<32x32xbf16>
    %cst_136 = arith.constant dense<0.000000e+00> : vector<32x32xf32>
    %405 = tpu.matmul %404, %392, %cst_136 {dimension_numbers = #tpu.dot_dimension_numbers<[1], [0], [0], [1], [0, 0, 1, 1], [], []>} : vector<32x32xbf16>, vector<32x32xbf16>, vector<32x32xf32> -> vector<32x32xf32>
    %406 = vector.extract_strided_slice %389 {offsets = [0, 32], sizes = [32, 32], strides = [1, 1]} : vector<32x128xbf16> to vector<32x32xbf16>
    %407 = vector.extract_strided_slice %32 {offsets = [0, 32], sizes = [32, 32], strides = [1, 1]} : vector<32x128xbf16> to vector<32x32xbf16>
    %408 = vector.extract_strided_slice %34 {offsets = [0, 32], sizes = [32, 32], strides = [1, 1]} : vector<32x128xbf16> to vector<32x32xbf16>
    %cst_137 = arith.constant dense<0.000000e+00> : vector<32x32xf32>
    %409 = tpu.matmul %406, %407, %cst_137 {dimension_numbers = #tpu.dot_dimension_numbers<[1], [1], [0], [0], [0, 0, 1, 0], [], []>} : vector<32x32xbf16>, vector<32x32xbf16>, vector<32x32xf32> -> vector<32x32xf32>
    %cst_138 = arith.constant dense<0xFF800000> : vector<32xf32>
    %410 = vector.multi_reduction <maximumf>, %409, %cst_138 [1] : vector<32x32xf32> to vector<32xf32>
    %411 = vector.shape_cast %410 : vector<32xf32> to vector<32x1xf32>
    %412 = vector.broadcast %411 : vector<32x1xf32> to vector<32x32xf32>
    %413 = arith.subf %409, %412 : vector<32x32xf32>
    %414 = math.exp %413 : vector<32x32xf32>
    %cst_139 = arith.constant dense<0.000000e+00> : vector<32xf32>
    %415 = vector.multi_reduction <add>, %414, %cst_139 [1] : vector<32x32xf32> to vector<32xf32>
    %416 = vector.shape_cast %415 : vector<32xf32> to vector<32x1xf32>
    %417 = tpu.reciprocal %416 {approx = true} : vector<32x1xf32> -> vector<32x1xf32>
    %418 = vector.broadcast %417 : vector<32x1xf32> to vector<32x32xf32>
    %419 = arith.mulf %414, %418 : vector<32x32xf32>
    %420 = arith.truncf %419 : vector<32x32xf32> to vector<32x32xbf16>
    %cst_140 = arith.constant dense<0.000000e+00> : vector<32x32xf32>
    %421 = tpu.matmul %420, %408, %cst_140 {dimension_numbers = #tpu.dot_dimension_numbers<[1], [0], [0], [1], [0, 0, 1, 1], [], []>} : vector<32x32xbf16>, vector<32x32xbf16>, vector<32x32xf32> -> vector<32x32xf32>
    %422 = vector.extract_strided_slice %389 {offsets = [0, 64], sizes = [32, 32], strides = [1, 1]} : vector<32x128xbf16> to vector<32x32xbf16>
    %423 = vector.extract_strided_slice %32 {offsets = [0, 64], sizes = [32, 32], strides = [1, 1]} : vector<32x128xbf16> to vector<32x32xbf16>
    %424 = vector.extract_strided_slice %34 {offsets = [0, 64], sizes = [32, 32], strides = [1, 1]} : vector<32x128xbf16> to vector<32x32xbf16>
    %cst_141 = arith.constant dense<0.000000e+00> : vector<32x32xf32>
    %425 = tpu.matmul %422, %423, %cst_141 {dimension_numbers = #tpu.dot_dimension_numbers<[1], [1], [0], [0], [0, 0, 1, 0], [], []>} : vector<32x32xbf16>, vector<32x32xbf16>, vector<32x32xf32> -> vector<32x32xf32>
    %cst_142 = arith.constant dense<0xFF800000> : vector<32xf32>
    %426 = vector.multi_reduction <maximumf>, %425, %cst_142 [1] : vector<32x32xf32> to vector<32xf32>
    %427 = vector.shape_cast %426 : vector<32xf32> to vector<32x1xf32>
    %428 = vector.broadcast %427 : vector<32x1xf32> to vector<32x32xf32>
    %429 = arith.subf %425, %428 : vector<32x32xf32>
    %430 = math.exp %429 : vector<32x32xf32>
    %cst_143 = arith.constant dense<0.000000e+00> : vector<32xf32>
    %431 = vector.multi_reduction <add>, %430, %cst_143 [1] : vector<32x32xf32> to vector<32xf32>
    %432 = vector.shape_cast %431 : vector<32xf32> to vector<32x1xf32>
    %433 = tpu.reciprocal %432 {approx = true} : vector<32x1xf32> -> vector<32x1xf32>
    %434 = vector.broadcast %433 : vector<32x1xf32> to vector<32x32xf32>
    %435 = arith.mulf %430, %434 : vector<32x32xf32>
    %436 = arith.truncf %435 : vector<32x32xf32> to vector<32x32xbf16>
    %cst_144 = arith.constant dense<0.000000e+00> : vector<32x32xf32>
    %437 = tpu.matmul %436, %424, %cst_144 {dimension_numbers = #tpu.dot_dimension_numbers<[1], [0], [0], [1], [0, 0, 1, 1], [], []>} : vector<32x32xbf16>, vector<32x32xbf16>, vector<32x32xf32> -> vector<32x32xf32>
    %438 = vector.extract_strided_slice %389 {offsets = [0, 96], sizes = [32, 32], strides = [1, 1]} : vector<32x128xbf16> to vector<32x32xbf16>
    %439 = vector.extract_strided_slice %32 {offsets = [0, 96], sizes = [32, 32], strides = [1, 1]} : vector<32x128xbf16> to vector<32x32xbf16>
    %440 = vector.extract_strided_slice %34 {offsets = [0, 96], sizes = [32, 32], strides = [1, 1]} : vector<32x128xbf16> to vector<32x32xbf16>
    %cst_145 = arith.constant dense<0.000000e+00> : vector<32x32xf32>
    %441 = tpu.matmul %438, %439, %cst_145 {dimension_numbers = #tpu.dot_dimension_numbers<[1], [1], [0], [0], [0, 0, 1, 0], [], []>} : vector<32x32xbf16>, vector<32x32xbf16>, vector<32x32xf32> -> vector<32x32xf32>
    %cst_146 = arith.constant dense<0xFF800000> : vector<32xf32>
    %442 = vector.multi_reduction <maximumf>, %441, %cst_146 [1] : vector<32x32xf32> to vector<32xf32>
    %443 = vector.shape_cast %442 : vector<32xf32> to vector<32x1xf32>
    %444 = vector.broadcast %443 : vector<32x1xf32> to vector<32x32xf32>
    %445 = arith.subf %441, %444 : vector<32x32xf32>
    %446 = math.exp %445 : vector<32x32xf32>
    %cst_147 = arith.constant dense<0.000000e+00> : vector<32xf32>
    %447 = vector.multi_reduction <add>, %446, %cst_147 [1] : vector<32x32xf32> to vector<32xf32>
    %448 = vector.shape_cast %447 : vector<32xf32> to vector<32x1xf32>
    %449 = tpu.reciprocal %448 {approx = true} : vector<32x1xf32> -> vector<32x1xf32>
    %450 = vector.broadcast %449 : vector<32x1xf32> to vector<32x32xf32>
    %451 = arith.mulf %446, %450 : vector<32x32xf32>
    %452 = arith.truncf %451 : vector<32x32xf32> to vector<32x32xbf16>
    %cst_148 = arith.constant dense<0.000000e+00> : vector<32x32xf32>
    %453 = tpu.matmul %452, %440, %cst_148 {dimension_numbers = #tpu.dot_dimension_numbers<[1], [0], [0], [1], [0, 0, 1, 1], [], []>} : vector<32x32xbf16>, vector<32x32xbf16>, vector<32x32xf32> -> vector<32x32xf32>
    %454 = tpu.concatenate %405, %421, %437, %453 in 1 : vector<32x32xf32>, vector<32x32xf32>, vector<32x32xf32>, vector<32x32xf32> -> vector<32x128xf32>
    %455 = arith.truncf %454 : vector<32x128xf32> to vector<32x128xbf16>
    %cst_149 = arith.constant dense<0.000000e+00> : vector<32x128xf32>
    %456 = tpu.matmul %455, %11, %cst_149 {dimension_numbers = #tpu.dot_dimension_numbers<[1], [0], [0], [1], [0, 0, 1, 1], [], []>} : vector<32x128xbf16>, vector<128x128xbf16>, vector<32x128xf32> -> vector<32x128xf32>
    %457 = vector.broadcast %12 : vector<1x128xf32> to vector<32x128xf32>
    %458 = arith.addf %456, %457 : vector<32x128xf32>
    %459 = arith.addf %382, %458 : vector<32x128xf32>
    %cst_150 = arith.constant dense<0.000000e+00> : vector<32xf32>
    %460 = vector.multi_reduction <add>, %459, %cst_150 [1] : vector<32x128xf32> to vector<32xf32>
    %461 = vector.shape_cast %460 : vector<32xf32> to vector<32x1xf32>
    %cst_151 = arith.constant 1.280000e+02 : f32
    %462 = vector.broadcast %cst_151 : f32 to vector<32x1xf32>
    %463 = arith.divf %461, %462 : vector<32x1xf32>
    %464 = arith.mulf %459, %459 : vector<32x128xf32>
    %cst_152 = arith.constant dense<0.000000e+00> : vector<32xf32>
    %465 = vector.multi_reduction <add>, %464, %cst_152 [1] : vector<32x128xf32> to vector<32xf32>
    %466 = vector.shape_cast %465 : vector<32xf32> to vector<32x1xf32>
    %cst_153 = arith.constant 1.280000e+02 : f32
    %467 = vector.broadcast %cst_153 : f32 to vector<32x1xf32>
    %468 = arith.divf %466, %467 : vector<32x1xf32>
    %469 = arith.mulf %463, %463 : vector<32x1xf32>
    %470 = arith.subf %468, %469 : vector<32x1xf32>
    %471 = vector.broadcast %463 : vector<32x1xf32> to vector<32x128xf32>
    %472 = arith.subf %459, %471 : vector<32x128xf32>
    %cst_154 = arith.constant 9.99999974E-6 : f32
    %473 = vector.broadcast %cst_154 : f32 to vector<32x1xf32>
    %474 = arith.addf %470, %473 : vector<32x1xf32>
    %475 = math.rsqrt %474 : vector<32x1xf32>
    %476 = vector.broadcast %475 : vector<32x1xf32> to vector<32x128xf32>
    %477 = arith.mulf %472, %476 : vector<32x128xf32>
    %478 = vector.broadcast %13 : vector<1x128xf32> to vector<32x128xf32>
    %479 = arith.mulf %477, %478 : vector<32x128xf32>
    %480 = vector.broadcast %14 : vector<1x128xf32> to vector<32x128xf32>
    %481 = arith.addf %479, %480 : vector<32x128xf32>
    %482 = arith.truncf %481 : vector<32x128xf32> to vector<32x128xbf16>
    %cst_155 = arith.constant dense<0.000000e+00> : vector<32x256xf32>
    %483 = tpu.matmul %482, %15, %cst_155 {dimension_numbers = #tpu.dot_dimension_numbers<[1], [0], [0], [1], [0, 0, 1, 1], [], []>} : vector<32x128xbf16>, vector<128x256xbf16>, vector<32x256xf32> -> vector<32x256xf32>
    %484 = vector.broadcast %16 : vector<1x256xf32> to vector<32x256xf32>
    %485 = arith.addf %483, %484 : vector<32x256xf32>
    %cst_156 = arith.constant 0.000000e+00 : f32
    %486 = vector.broadcast %cst_156 : f32 to vector<32x256xf32>
    %487 = arith.maximumf %485, %486 : vector<32x256xf32>
    %488 = arith.truncf %487 : vector<32x256xf32> to vector<32x256xbf16>
    %cst_157 = arith.constant dense<0.000000e+00> : vector<32x128xf32>
    %489 = tpu.matmul %488, %17, %cst_157 {dimension_numbers = #tpu.dot_dimension_numbers<[1], [0], [0], [1], [0, 0, 1, 1], [], []>} : vector<32x256xbf16>, vector<256x128xbf16>, vector<32x128xf32> -> vector<32x128xf32>
    %490 = vector.broadcast %18 : vector<1x128xf32> to vector<32x128xf32>
    %491 = arith.addf %489, %490 : vector<32x128xf32>
    %492 = arith.addf %481, %491 : vector<32x128xf32>
    %cst_158 = arith.constant dense<0.000000e+00> : vector<32xf32>
    %493 = vector.multi_reduction <add>, %492, %cst_158 [1] : vector<32x128xf32> to vector<32xf32>
    %494 = vector.shape_cast %493 : vector<32xf32> to vector<32x1xf32>
    %cst_159 = arith.constant 1.280000e+02 : f32
    %495 = vector.broadcast %cst_159 : f32 to vector<32x1xf32>
    %496 = arith.divf %494, %495 : vector<32x1xf32>
    %497 = arith.mulf %492, %492 : vector<32x128xf32>
    %cst_160 = arith.constant dense<0.000000e+00> : vector<32xf32>
    %498 = vector.multi_reduction <add>, %497, %cst_160 [1] : vector<32x128xf32> to vector<32xf32>
    %499 = vector.shape_cast %498 : vector<32xf32> to vector<32x1xf32>
    %cst_161 = arith.constant 1.280000e+02 : f32
    %500 = vector.broadcast %cst_161 : f32 to vector<32x1xf32>
    %501 = arith.divf %499, %500 : vector<32x1xf32>
    %502 = arith.mulf %496, %496 : vector<32x1xf32>
    %503 = arith.subf %501, %502 : vector<32x1xf32>
    %504 = vector.broadcast %496 : vector<32x1xf32> to vector<32x128xf32>
    %505 = arith.subf %492, %504 : vector<32x128xf32>
    %cst_162 = arith.constant 9.99999974E-6 : f32
    %506 = vector.broadcast %cst_162 : f32 to vector<32x1xf32>
    %507 = arith.addf %503, %506 : vector<32x1xf32>
    %508 = math.rsqrt %507 : vector<32x1xf32>
    %509 = vector.broadcast %508 : vector<32x1xf32> to vector<32x128xf32>
    %510 = arith.mulf %505, %509 : vector<32x128xf32>
    %511 = vector.broadcast %19 : vector<1x128xf32> to vector<32x128xf32>
    %512 = arith.mulf %510, %511 : vector<32x128xf32>
    %513 = vector.broadcast %20 : vector<1x128xf32> to vector<32x128xf32>
    %514 = arith.addf %512, %513 : vector<32x128xf32>
    %cst_163 = arith.constant dense<0.000000e+00> : vector<32xf32>
    %515 = vector.multi_reduction <add>, %514, %cst_163 [1] : vector<32x128xf32> to vector<32xf32>
    %516 = vector.shape_cast %515 : vector<32xf32> to vector<32x1xf32>
    %cst_164 = arith.constant 1.280000e+02 : f32
    %517 = vector.broadcast %cst_164 : f32 to vector<32x1xf32>
    %518 = arith.divf %516, %517 : vector<32x1xf32>
    %519 = arith.mulf %514, %514 : vector<32x128xf32>
    %cst_165 = arith.constant dense<0.000000e+00> : vector<32xf32>
    %520 = vector.multi_reduction <add>, %519, %cst_165 [1] : vector<32x128xf32> to vector<32xf32>
    %521 = vector.shape_cast %520 : vector<32xf32> to vector<32x1xf32>
    %cst_166 = arith.constant 1.280000e+02 : f32
    %522 = vector.broadcast %cst_166 : f32 to vector<32x1xf32>
    %523 = arith.divf %521, %522 : vector<32x1xf32>
    %524 = arith.mulf %518, %518 : vector<32x1xf32>
    %525 = arith.subf %523, %524 : vector<32x1xf32>
    %526 = vector.broadcast %518 : vector<32x1xf32> to vector<32x128xf32>
    %527 = arith.subf %514, %526 : vector<32x128xf32>
    %cst_167 = arith.constant 9.99999974E-6 : f32
    %528 = vector.broadcast %cst_167 : f32 to vector<32x1xf32>
    %529 = arith.addf %525, %528 : vector<32x1xf32>
    %530 = math.rsqrt %529 : vector<32x1xf32>
    %531 = vector.broadcast %530 : vector<32x1xf32> to vector<32x128xf32>
    %532 = arith.mulf %527, %531 : vector<32x128xf32>
    %533 = vector.broadcast %21 : vector<1x128xf32> to vector<32x128xf32>
    %534 = arith.mulf %532, %533 : vector<32x128xf32>
    %535 = vector.broadcast %22 : vector<1x128xf32> to vector<32x128xf32>
    %536 = arith.addf %534, %535 : vector<32x128xf32>
    %537 = vector.shape_cast %536 : vector<32x128xf32> to vector<1x32x128xf32>
    %c0_168 = arith.constant 0 : index
    %c0_169 = arith.constant 0 : index
    %c0_170 = arith.constant 0 : index
    %538 = vector.load %arg26[%c0_168, %c0_169, %c0_170] : memref<1x32x128xf32, #tpu.memory_space<vmem>>, vector<1x32x128xf32>
    tpu.vector_store %arg26[%c0_168, %c0_169, %c0_170], %537 {strides = array<i32>} : memref<1x32x128xf32, #tpu.memory_space<vmem>>, vector<1x32x128xf32>,
    return
  }
  func.func @transform_0(%arg0: i32) -> (i32, i32, i32) {
    %c0_i32 = arith.constant 0 : i32
    %c0_i32_0 = arith.constant 0 : i32
    %c0_i32_1 = arith.constant 0 : i32
    return %arg0, %c0_i32, %c0_i32_0 : i32, i32, i32
  }
  func.func @transform_1(%arg0: i32) -> (i32, i32, i32) {
    %c0_i32 = arith.constant 0 : i32
    %c0_i32_0 = arith.constant 0 : i32
    %c0_i32_1 = arith.constant 0 : i32
    return %arg0, %c0_i32, %c0_i32_0 : i32, i32, i32
  }
  func.func @transform_2(%arg0: i32) -> (i32, i32) {
    %c0_i32 = arith.constant 0 : i32
    %c0_i32_0 = arith.constant 0 : i32
    %c0_i32_1 = arith.constant 0 : i32
    return %c0_i32, %c0_i32_0 : i32, i32
  }
  func.func @transform_3(%arg0: i32) -> (i32, i32) {
    %c0_i32 = arith.constant 0 : i32
    %c0_i32_0 = arith.constant 0 : i32
    %c0_i32_1 = arith.constant 0 : i32
    return %c0_i32, %c0_i32_0 : i32, i32
  }
  func.func @transform_4(%arg0: i32) -> (i32, i32) {
    %c0_i32 = arith.constant 0 : i32
    %c0_i32_0 = arith.constant 0 : i32
    %c0_i32_1 = arith.constant 0 : i32
    return %c0_i32, %c0_i32_0 : i32, i32
  }
  func.func @transform_5(%arg0: i32) -> (i32, i32) {
    %c0_i32 = arith.constant 0 : i32
    %c0_i32_0 = arith.constant 0 : i32
    %c0_i32_1 = arith.constant 0 : i32
    return %c0_i32, %c0_i32_0 : i32, i32
  }
  func.func @transform_6(%arg0: i32) -> (i32, i32) {
    %c0_i32 = arith.constant 0 : i32
    %c0_i32_0 = arith.constant 0 : i32
    %c0_i32_1 = arith.constant 0 : i32
    return %c0_i32, %c0_i32_0 : i32, i32
  }
  func.func @transform_7(%arg0: i32) -> (i32, i32) {
    %c0_i32 = arith.constant 0 : i32
    %c0_i32_0 = arith.constant 0 : i32
    %c0_i32_1 = arith.constant 0 : i32
    return %c0_i32, %c0_i32_0 : i32, i32
  }
  func.func @transform_8(%arg0: i32) -> (i32, i32) {
    %c0_i32 = arith.constant 0 : i32
    %c0_i32_0 = arith.constant 0 : i32
    %c0_i32_1 = arith.constant 0 : i32
    return %c0_i32, %c0_i32_0 : i32, i32
  }
  func.func @transform_9(%arg0: i32) -> (i32, i32) {
    %c0_i32 = arith.constant 0 : i32
    %c0_i32_0 = arith.constant 0 : i32
    %c0_i32_1 = arith.constant 0 : i32
    return %c0_i32, %c0_i32_0 : i32, i32
  }
  func.func @transform_10(%arg0: i32) -> (i32, i32) {
    %c0_i32 = arith.constant 0 : i32
    %c0_i32_0 = arith.constant 0 : i32
    %c0_i32_1 = arith.constant 0 : i32
    return %c0_i32, %c0_i32_0 : i32, i32
  }
  func.func @transform_11(%arg0: i32) -> (i32, i32) {
    %c0_i32 = arith.constant 0 : i32
    %c0_i32_0 = arith.constant 0 : i32
    %c0_i32_1 = arith.constant 0 : i32
    return %c0_i32, %c0_i32_0 : i32, i32
  }
  func.func @transform_12(%arg0: i32) -> (i32, i32) {
    %c0_i32 = arith.constant 0 : i32
    %c0_i32_0 = arith.constant 0 : i32
    %c0_i32_1 = arith.constant 0 : i32
    return %c0_i32, %c0_i32_0 : i32, i32
  }
  func.func @transform_13(%arg0: i32) -> (i32, i32) {
    %c0_i32 = arith.constant 0 : i32
    %c0_i32_0 = arith.constant 0 : i32
    %c0_i32_1 = arith.constant 0 : i32
    return %c0_i32, %c0_i32_0 : i32, i32
  }
  func.func @transform_14(%arg0: i32) -> (i32, i32) {
    %c0_i32 = arith.constant 0 : i32
    %c0_i32_0 = arith.constant 0 : i32
    %c0_i32_1 = arith.constant 0 : i32
    return %c0_i32, %c0_i32_0 : i32, i32
  }
  func.func @transform_15(%arg0: i32) -> (i32, i32) {
    %c0_i32 = arith.constant 0 : i32
    %c0_i32_0 = arith.constant 0 : i32
    %c0_i32_1 = arith.constant 0 : i32
    return %c0_i32, %c0_i32_0 : i32, i32
  }
  func.func @transform_16(%arg0: i32) -> (i32, i32) {
    %c0_i32 = arith.constant 0 : i32
    %c0_i32_0 = arith.constant 0 : i32
    %c0_i32_1 = arith.constant 0 : i32
    return %c0_i32, %c0_i32_0 : i32, i32
  }
  func.func @transform_17(%arg0: i32) -> (i32, i32) {
    %c0_i32 = arith.constant 0 : i32
    %c0_i32_0 = arith.constant 0 : i32
    %c0_i32_1 = arith.constant 0 : i32
    return %c0_i32, %c0_i32_0 : i32, i32
  }
  func.func @transform_18(%arg0: i32) -> (i32, i32) {
    %c0_i32 = arith.constant 0 : i32
    %c0_i32_0 = arith.constant 0 : i32
    %c0_i32_1 = arith.constant 0 : i32
    return %c0_i32, %c0_i32_0 : i32, i32
  }
  func.func @transform_19(%arg0: i32) -> (i32, i32) {
    %c0_i32 = arith.constant 0 : i32
    %c0_i32_0 = arith.constant 0 : i32
    %c0_i32_1 = arith.constant 0 : i32
    return %c0_i32, %c0_i32_0 : i32, i32
  }
  func.func @transform_20(%arg0: i32) -> (i32, i32) {
    %c0_i32 = arith.constant 0 : i32
    %c0_i32_0 = arith.constant 0 : i32
    %c0_i32_1 = arith.constant 0 : i32
    return %c0_i32, %c0_i32_0 : i32, i32
  }
  func.func @transform_21(%arg0: i32) -> (i32, i32) {
    %c0_i32 = arith.constant 0 : i32
    %c0_i32_0 = arith.constant 0 : i32
    %c0_i32_1 = arith.constant 0 : i32
    return %c0_i32, %c0_i32_0 : i32, i32
  }
  func.func @transform_22(%arg0: i32) -> (i32, i32) {
    %c0_i32 = arith.constant 0 : i32
    %c0_i32_0 = arith.constant 0 : i32
    %c0_i32_1 = arith.constant 0 : i32
    return %c0_i32, %c0_i32_0 : i32, i32
  }
  func.func @transform_23(%arg0: i32) -> (i32, i32) {
    %c0_i32 = arith.constant 0 : i32
    %c0_i32_0 = arith.constant 0 : i32
    %c0_i32_1 = arith.constant 0 : i32
    return %c0_i32, %c0_i32_0 : i32, i32
  }
  func.func @transform_24(%arg0: i32) -> (i32, i32) {
    %c0_i32 = arith.constant 0 : i32
    %c0_i32_0 = arith.constant 0 : i32
    %c0_i32_1 = arith.constant 0 : i32
    return %c0_i32, %c0_i32_0 : i32, i32
  }
  func.func @transform_25(%arg0: i32) -> (i32, i32, i32) {
    %c0_i32 = arith.constant 0 : i32
    %c0_i32_0 = arith.constant 0 : i32
    %c0_i32_1 = arith.constant 0 : i32
    return %arg0, %c0_i32, %c0_i32_0 : i32, i32, i32
  }
}

</mosaic_0001>

<bundles_post_ra>
// kernel: tpu_custom_call.1
= control target key start
LH: loop header
LB: loop body
LE: loop exit
PB: predicated region body
PF: predicated region fallthrough
CT: control target
= control target key end

     0   :  { %s9982_s0 = inlined_call_operand.hbm [shape: f32[2,32,128], index: 0, kind: input, shape index: {}]   ;;  %s9983_s1 = inlined_call_operand.hbm [shape: f32[2,32,128], index: 1, kind: input, shape index: {}]   ;;  %s9984_s2 = inlined_call_operand.hbm [shape: f32[32,32], index: 2, kind: input, shape index: {}]   ;;  %s9985_s3 = inlined_call_operand.hbm [shape: bf16[128,384], index: 3, kind: input, shape index: {}]   ;;  %s9986_s4 = inlined_call_operand.vmem [shape: f32[1,384], index: 4, kind: input, shape index: {}]   ;;  %s9987_s5 = inlined_call_operand.hbm [shape: bf16[128,128], index: 5, kind: input, shape index: {}]   ;;  %s9988_s6 = inlined_call_operand.vmem [shape: f32[1,128], index: 6, kind: input, shape index: {}]   ;;  %s9989_s7 = inlined_call_operand.vmem [shape: f32[1,128], index: 7, kind: input, shape index: {}]   ;;  %s9990_s8 = inlined_call_operand.vmem [shape: f32[1,128], index: 8, kind: input, shape index: {}]   ;;  %s9991_s9 = inlined_call_operand.hbm [shape: bf16[128,128], index: 9, kind: input, shape index: {}]   ;;  %s9992_s10 = inlined_call_operand.vmem [shape: f32[1,128], index: 10, kind: input, shape index: {}]   ;;  %s9993_s11 = inlined_call_operand.hbm [shape: bf16[128,256], index: 11, kind: input, shape index: {}]   ;;  %s9994_s12 = inlined_call_operand.vmem [shape: f32[1,256], index: 12, kind: input, shape index: {}]   ;;  %s9995_s13 = inlined_call_operand.hbm [shape: bf16[128,128], index: 13, kind: input, shape index: {}]   ;;  %s9996_s14 = inlined_call_operand.vmem [shape: f32[1,128], index: 14, kind: input, shape index: {}]   ;;  %s9997_s15 = inlined_call_operand.vmem [shape: f32[1,128], index: 15, kind: input, shape index: {}]   ;;  %s9998_s16 = inlined_call_operand.vmem [shape: f32[1,128], index: 16, kind: input, shape index: {}]   ;;  %s9999_s17 = inlined_call_operand.hbm [shape: bf16[128,256], index: 17, kind: input, shape index: {}]   ;;  %s10000_s18 = inlined_call_operand.vmem [shape: f32[1,256], index: 18, kind: input, shape index: {}]   ;;  %s10001_s19 = inlined_call_operand.hbm [shape: bf16[256,128], index: 19, kind: input, shape index: {}]   ;;  %s10002_s20 = inlined_call_operand.vmem [shape: f32[1,128], index: 20, kind: input, shape index: {}]   ;;  %s10003_s21 = inlined_call_operand.vmem [shape: f32[1,128], index: 21, kind: input, shape index: {}]   ;;  %s10004_s22 = inlined_call_operand.vmem [shape: f32[1,128], index: 22, kind: input, shape index: {}]   ;;  %s10005_s23 = inlined_call_operand.vmem [shape: f32[1,128], index: 23, kind: input, shape index: {}]   ;;  %s10006_s24 = inlined_call_operand.vmem [shape: f32[1,128], index: 24, kind: input, shape index: {}]   ;;  %s10007_s25 = inlined_call_operand.hbm [shape: f32[2,32,128], index: 25, kind: output, shape index: {}]  }
   0x1   :  { %10045 = sst [smem:[#allocation33_spill]] %s9982_s0 }
   0x2   :  { %10046 = sst [smem:[#allocation34_spill]] %s9983_s1 }
   0x3   :  { %10047 = sst [smem:[#allocation35_spill]] %s9984_s2 }
   0x4   :  { %10048 = sst [smem:[#allocation36_spill]] %s9985_s3 }
   0x5   :  { %10049 = sst [smem:[#allocation37_spill]] %s9986_s4 }
   0x6   :  { %10050 = sst [smem:[#allocation38_spill]] %s9987_s5 }
   0x7   :  { %10051 = sst [smem:[#allocation39_spill]] %s9988_s6 }
   0x8   :  { %10052 = sst [smem:[#allocation40_spill]] %s9989_s7 }
   0x9   :  { %10053 = sst [smem:[#allocation41_spill]] %s9990_s8 }
   0xa   :  { %10054 = sst [smem:[#allocation42_spill]] %s9991_s9 }
   0xb   :  { %10055 = sst [smem:[#allocation43_spill]] %s9993_s11 }
   0xc   :  { %10056 = sst [smem:[#allocation44_spill]] %s9995_s13 }
   0xd   :  { %10057 = sst [smem:[#allocation45_spill]] %s9997_s15 }
   0xe   :  { %10058 = sst [smem:[#allocation46_spill]] %s9998_s16 }
   0xf   :  { %10059 = sst [smem:[#allocation47_spill]] %s9999_s17 }
  0x10   :  { %10060 = sst [smem:[#allocation48_spill]] %s10000_s18 }
  0x11   :  { %10061 = sst [smem:[#allocation49_spill]] %s10001_s19 }
  0x12   :  { %10062 = sst [smem:[#allocation50_spill]] %s10002_s20 }
  0x13   :  { %10063 = sst [smem:[#allocation51_spill]] %s10003_s21 }
  0x14   :  { %10064 = sst [smem:[#allocation52_spill]] %s10004_s22 }
  0x15   :  { %10065 = sst [smem:[#allocation53_spill]] %s10005_s23 }
  0x16   :  { %10066 = sst [smem:[#allocation54_spill]] %s10006_s24 }
  0x17   :  { %10067 = sst [smem:[#allocation55_spill]] %s10007_s25 }
  0x18   :  { %30 = vsyncpa [#allocation3], 0 }
  0x19   :  { %32 = vsyncpa [#allocation3 + $0x1], 0 }
  0x1a   :  { %33 = vsyncpa [#allocation6], 0 }
  0x1b   :  { %35 = vsyncpa [#allocation6 + $0x1], 0 }
  0x1c   :  { %36 = vsyncpa [#allocation9], 0 }
  0x1d   :  { %37 = vsyncpa [#allocation12], 0 }
  0x1e   :  { %38 = vsyncpa [#allocation15], 0 }
  0x1f   :  { %39 = vsyncpa [#allocation18], 0 }
  0x20   :  { %40 = vsyncpa [#allocation4], 0 }
  0x21   :  { %42 = vsyncpa [#allocation4 + $0x1], 0  ;;  %s8434_s29 = smov 0   ;;  %s8436_s2 = smov 0  }
  0x22   :  { %s8438_s6 = smov 0   ;;  %s8440_s30 = smov 0  }
  0x23 LB: > { %10068 = sst [smem:[#allocation28_spill]] %s8275_s6  ;;  %s8281_s7 = smov [#allocation7]   ;;  %s8279_s30 = sphi %s8440_s30, %s10135_s30   ;;  %s8275_s6 = sphi %s8438_s6, %s10134_s6   ;;  %s8271_s2 = sphi %s8436_s2, %s10133_s2   ;;  %s8267_s29 = sphi %s8434_s29, %s10132_s29  }
  0x24   : > { %s626_s3 = sshll.u32 %s8281_s7, 4  ;;  %s8455_s26 = sadd.s32 4294967295, %s8279_s30   ;;  %s8460_s3 = int_to_ptr.vmem [resolvable:$true] %s626_s3 }
  0x25   : > { %p6191_p0 = scmp.ge.s32.totalorder %s8279_s30, 1  ;;  %p10028_p1 = scmp.eq.s32.totalorder %s8455_s26, 0 }
  0x26   : > { %p614_p2 = scmp.lt.s32.totalorder %s8279_s30, 3  ;;  %s8282_s8 = smov [#allocation8]  }
  0x27   : > { %s639_s27 = sshll.u32 %s8282_s8, 4  ;;  %s10071_s5 = sld [smem:[#allocation35_spill]]  ;;  %s8475_s27 = int_to_ptr.vmem [resolvable:$true] %s639_s27 }
  0x28   : > { %p8462_p3 = pnand %p6191_p0, %p614_p2 }
  0x2a   : > { %s10069_s1 = scalar_select %p8462_p3, 1, 0 }
  0x2b   : > { %p7149_p5 = pneg %p8462_p3 }
  0x2d   : > { %p8471_p6 = pnand %p7149_p5, %p10028_p1  ;;  %s7905_s0 = scalar_lea.hbm %s10071_s5, 512 }
  0x2e   : > { %p7906_p7 = scmp.ne.s32.totalorder %s10071_s5, %s7905_s0  ;;  %p7912_p11 = scmp.lt.u32.totalorder %s7905_s0, %s10071_s5 }
  0x2f   : > { %p8485_p8 = pneg %p8471_p6 }
  0x31   : > { %p7908_p9 = pnand %p8485_p8, %p7906_p7 }
  0x33   : > { %p7909_p10 = pneg %p7908_p9 }
  0x35   : > { %p7914_p12 = pnand %p7912_p11, %p7909_p10 }
  0x37   : > { %7917 = shalt.err (!%p7914_p12)
}
  0x38   : > { %s7918_s25 = scalar_lea.vmem %s8460_s3, 512  ;;  %p7926_p5 = scmp.lt.s32.totalorder %s8460_s3, %s8460_s3 }
  0x39   : > { %p7919_p13 = scmp.ne.s32.totalorder %s8460_s3, %s7918_s25  ;;  %p7927_p4 = scmp.lt.s32.totalorder %s7918_s25, %s7918_s25 }
  0x3b   : > { %p7921_p0 = pnand %p7919_p13, %p8485_p8  ;;  %p7928_p7 = por %p7927_p4, %p7926_p5 }
  0x3d   : > { %p7922_p2 = pneg %p7921_p0 }
  0x3f   : > { %p7929_p9 = pnand %p7928_p7, %p7922_p2 }
  0x41   : > { %7932 = shalt.err (!%p7929_p9)
}
  0x42   : > { %s10022_s28 = smov 128   ;;  %s10024_s23 = smov 8  }
  0x43   : > { %7152 = dma.hbm_to_vmem [thread:$0]  (!%p8471_p6), %s10071_s5, 512, %s8460_s3, [#allocation6], %s10022_s28, %s10022_s28, %s10024_s23  }
  0x44   : > { %s10073_s22 = sld [smem:[#allocation36_spill]] }
  0x4a   : > { %s7933_s25 = scalar_lea.hbm %s10073_s22, 3072 }
  0x4b   : > { %p7934_p4 = scmp.ne.s32.totalorder %s10073_s22, %s7933_s25  ;;  %p7940_p12 = scmp.lt.u32.totalorder %s7933_s25, %s10073_s22 }
  0x4d   : > { %p7936_p10 = pnand %p7934_p4, %p8485_p8 }
  0x4f   : > { %p7937_p11 = pneg %p7936_p10 }
  0x51   : > { %p7942_p13 = pnand %p7940_p12, %p7937_p11 }
  0x53   : > { %7945 = shalt.err (!%p7942_p13)
}
  0x54   : > { %s7946_s3 = scalar_lea.vmem %s8475_s27, 3072  ;;  %p7954_p7 = scmp.lt.s32.totalorder %s8475_s27, %s8475_s27 }
  0x55   : > { %p7947_p0 = scmp.ne.s32.totalorder %s8475_s27, %s7946_s3  ;;  %p7955_p9 = scmp.lt.s32.totalorder %s7946_s3, %s7946_s3 }
  0x57   : > { %p7949_p2 = pnand %p7947_p0, %p8485_p8  ;;  %p7956_p4 = por %p7955_p9, %p7954_p7 }
  0x59   : > { %p7950_p5 = pneg %p7949_p2 }
  0x5b   : > { %p7957_p10 = pnand %p7956_p4, %p7950_p5 }
  0x5d   : > { %7960 = shalt.err (!%p7957_p10)
}
  0x5e   : > { %s8285_s20 = smov 192   ;;  %s8286_s16 = smov 12  }
  0x5f   : > { %7155 = dma.hbm_to_vmem [thread:$0]  (!%p8471_p6), %s10073_s22, 3072, %s8475_s27, [#allocation9], %s8285_s20, %s8285_s20, %s8286_s16  }
  0x60   : > { %s8287_s9 = smov [#allocation11]   ;;  %s8288_s7 = smov [#allocation14]  }
  0x61   : > { %s677_s0 = sshll.u32 %s8287_s9, 4  ;;  %s709_s8 = sshll.u32 %s8288_s7, 4  ;;  %s678_s0 = int_to_ptr.vmem [resolvable:$true] %s677_s0  ;;  %s8532_s8 = int_to_ptr.vmem [resolvable:$true] %s709_s8 }
  0x62   : > { %s10074_s28 = sld [smem:[#allocation42_spill]] }
  0x68   : > { %s7961_s23 = scalar_lea.hbm %s10074_s28, 1024 }
  0x69   : > { %p7962_p11 = scmp.ne.s32.totalorder %s10074_s28, %s7961_s23  ;;  %p7968_p0 = scmp.lt.u32.totalorder %s7961_s23, %s10074_s28 }
  0x6b   : > { %p7964_p12 = pnand %p7962_p11, %p8485_p8 }
  0x6d   : > { %p7965_p13 = pneg %p7964_p12 }
  0x6f   : > { %p7970_p2 = pnand %p7968_p0, %p7965_p13 }
  0x71   : > { %7973 = shalt.err (!%p7970_p2)
}
  0x72   : > { %s7974_s20 = scalar_lea.vmem %s678_s0, 1024  ;;  %p7982_p4 = scmp.lt.s32.totalorder %s678_s0, %s678_s0 }
  0x73   : > { %p7975_p5 = scmp.ne.s32.totalorder %s678_s0, %s7974_s20  ;;  %p7983_p10 = scmp.lt.s32.totalorder %s7974_s20, %s7974_s20 }
  0x75   : > { %p7977_p7 = pnand %p7975_p5, %p8485_p8  ;;  %p7984_p1 = por %p7983_p10, %p7982_p4 }
  0x77   : > { %p7978_p9 = pneg %p7977_p7 }
  0x79   : > { %p7985_p3 = pnand %p7984_p1, %p7978_p9 }
  0x7b   : > { %7988 = shalt.err (!%p7985_p3)
}
  0x7c   : > { %s10031_s15 = smov 64   ;;  %s10032_s5 = smov 4  }
  0x7d   : > { %7161 = dma.hbm_to_vmem [thread:$0]  (!%p8471_p6), %s10074_s28, 1024, %s678_s0, [#allocation12], %s10031_s15, %s10031_s15, %s10032_s5  }
  0x7e   : > { %s10075_s13 = sld [smem:[#allocation44_spill]] }
  0x84   : > { %s7989_s7 = scalar_lea.hbm %s10075_s13, 1024 }
  0x85   : > { %p7990_p1 = scmp.ne.s32.totalorder %s10075_s13, %s7989_s7  ;;  %p7996_p12 = scmp.lt.u32.totalorder %s7989_s7, %s10075_s13 }
  0x87   : > { %p7992_p3 = pnand %p7990_p1, %p8485_p8 }
  0x89   : > { %p7993_p11 = pneg %p7992_p3 }
  0x8b   : > { %p7998_p13 = pnand %p7996_p12, %p7993_p11 }
  0x8d   : > { %8001 = shalt.err (!%p7998_p13)
}
  0x8e   : > { %s8002_s0 = scalar_lea.vmem %s8532_s8, 1024  ;;  %p8010_p7 = scmp.lt.s32.totalorder %s8532_s8, %s8532_s8 }
  0x8f   : > { %p8003_p0 = scmp.ne.s32.totalorder %s8532_s8, %s8002_s0  ;;  %p8011_p9 = scmp.lt.s32.totalorder %s8002_s0, %s8002_s0 }
  0x91   : > { %p8005_p2 = pnand %p8003_p0, %p8485_p8  ;;  %p8012_p4 = por %p8011_p9, %p8010_p7 }
  0x93   : > { %p8006_p5 = pneg %p8005_p2 }
  0x95   : > { %p8013_p10 = pnand %p8012_p4, %p8006_p5 }
  0x97   : > { %8016 = shalt.err (!%p8013_p10)
}
  0x98   : > { %7167 = dma.hbm_to_vmem [thread:$0]  (!%p8471_p6), %s10075_s13, 1024, %s8532_s8, [#allocation15], %s10031_s15, %s10031_s15, %s10032_s5  }
  0x99   : > { %s8291_s16 = smov [#allocation10]   ;;  %s8292_s9 = smov [#allocation13]  }
  0x9a   : > { %s655_s21 = sshll.u32 %s8291_s16, 4  ;;  %s693_s7 = sshll.u32 %s8292_s9, 4  ;;  %s656_s21 = int_to_ptr.vmem [resolvable:$true] %s655_s21  ;;  %s8581_s7 = int_to_ptr.vmem [resolvable:$true] %s693_s7 }
  0x9b   : > { %s10076_s18 = sld [smem:[#allocation38_spill]] }
  0xa1   : > { %s8017_s27 = scalar_lea.hbm %s10076_s18, 1024 }
  0xa2   : > { %p8018_p1 = scmp.ne.s32.totalorder %s10076_s18, %s8017_s27  ;;  %p8024_p12 = scmp.lt.u32.totalorder %s8017_s27, %s10076_s18 }
  0xa4   : > { %p8020_p3 = pnand %p8018_p1, %p8485_p8 }
  0xa6   : > { %p8021_p11 = pneg %p8020_p3 }
  0xa8   : > { %p8026_p13 = pnand %p8024_p12, %p8021_p11 }
  0xaa   : > { %8029 = shalt.err (!%p8026_p13)
}
  0xab   : > { %s8030_s23 = scalar_lea.vmem %s656_s21, 1024  ;;  %p8038_p7 = scmp.lt.s32.totalorder %s656_s21, %s656_s21 }
  0xac   : > { %p8031_p0 = scmp.ne.s32.totalorder %s656_s21, %s8030_s23  ;;  %p8039_p9 = scmp.lt.s32.totalorder %s8030_s23, %s8030_s23 }
  0xae   : > { %p8033_p2 = pnand %p8031_p0, %p8485_p8  ;;  %p8040_p4 = por %p8039_p9, %p8038_p7 }
  0xb0   : > { %p8034_p5 = pneg %p8033_p2 }
  0xb2   : > { %p8041_p10 = pnand %p8040_p4, %p8034_p5 }
  0xb4   : > { %8044 = shalt.err (!%p8041_p10)
}
  0xb5   : > { %7158 = dma.hbm_to_vmem [thread:$0]  (!%p8471_p6), %s10076_s18, 1024, %s656_s21, [#allocation9], %s10031_s15, %s10031_s15, %s10032_s5  }
  0xb6   : > { %s10077_s11 = sld [smem:[#allocation43_spill]] }
  0xbc   : > { %s8045_s3 = scalar_lea.hbm %s10077_s11, 2048 }
  0xbd   : > { %p8046_p1 = scmp.ne.s32.totalorder %s10077_s11, %s8045_s3  ;;  %p8052_p12 = scmp.lt.u32.totalorder %s8045_s3, %s10077_s11 }
  0xbf   : > { %p8048_p3 = pnand %p8046_p1, %p8485_p8 }
  0xc1   : > { %p8049_p11 = pneg %p8048_p3 }
  0xc3   : > { %p8054_p13 = pnand %p8052_p12, %p8049_p11 }
  0xc5   : > { %8057 = shalt.err (!%p8054_p13)
}
  0xc6   : > { %s8058_s21 = scalar_lea.vmem %s8581_s7, 2048  ;;  %p8066_p7 = scmp.lt.s32.totalorder %s8581_s7, %s8581_s7 }
  0xc7   : > { %p8059_p0 = scmp.ne.s32.totalorder %s8581_s7, %s8058_s21  ;;  %p8067_p9 = scmp.lt.s32.totalorder %s8058_s21, %s8058_s21 }
  0xc9   : > { %p8061_p2 = pnand %p8059_p0, %p8485_p8  ;;  %p8068_p4 = por %p8067_p9, %p8066_p7 }
  0xcb   : > { %p8062_p5 = pneg %p8061_p2 }
  0xcd   : > { %p8069_p10 = pnand %p8068_p4, %p8062_p5 }
  0xcf   : > { %8072 = shalt.err (!%p8069_p10)
}
  0xd0   : > { %s10078_s23 = smov 8   ;;  %s10079_s22 = smov 128  }
  0xd1   : > { %7164 = dma.hbm_to_vmem [thread:$0]  (!%p8471_p6), %s10077_s11, 2048, %s8581_s7, [#allocation12], %s10079_s22, %s10079_s22, %s10078_s23  }
  0xd2   : > { %s8293_s25 = smov [#allocation16]   ;;  %s8294_s27 = smov [#allocation17]  }
  0xd3   : > { %s731_s3 = sshll.u32 %s8293_s25, 4  ;;  %s747_s0 = sshll.u32 %s8294_s27, 4  ;;  %s732_s3 = int_to_ptr.vmem [resolvable:$true] %s731_s3  ;;  %s8630_s0 = int_to_ptr.vmem [resolvable:$true] %s747_s0 }
  0xd4   : > { %s10080_s17 = sld [smem:[#allocation47_spill]] }
  0xda   : > { %s8073_s21 = scalar_lea.hbm %s10080_s17, 2048 }
  0xdb   : > { %p8074_p1 = scmp.ne.s32.totalorder %s10080_s17, %s8073_s21  ;;  %p8080_p12 = scmp.lt.u32.totalorder %s8073_s21, %s10080_s17 }
  0xdd   : > { %p8076_p3 = pnand %p8074_p1, %p8485_p8 }
  0xdf   : > { %p8077_p11 = pneg %p8076_p3 }
  0xe1   : > { %p8082_p13 = pnand %p8080_p12, %p8077_p11 }
  0xe3   : > { %8085 = shalt.err (!%p8082_p13)
}
  0xe4   : > { %s8086_s9 = scalar_lea.vmem %s732_s3, 2048  ;;  %p8094_p7 = scmp.lt.s32.totalorder %s732_s3, %s732_s3 }
  0xe5   : > { %p8087_p0 = scmp.ne.s32.totalorder %s732_s3, %s8086_s9  ;;  %p8095_p9 = scmp.lt.s32.totalorder %s8086_s9, %s8086_s9 }
  0xe7   : > { %p8089_p2 = pnand %p8087_p0, %p8485_p8  ;;  %p8096_p4 = por %p8095_p9, %p8094_p7 }
  0xe9   : > { %p8090_p5 = pneg %p8089_p2 }
  0xeb   : > { %p8097_p10 = pnand %p8096_p4, %p8090_p5 }
  0xed   : > { %8100 = shalt.err (!%p8097_p10)
}
  0xee   : > { %7170 = dma.hbm_to_vmem [thread:$0]  (!%p8471_p6), %s10080_s17, 2048, %s732_s3, [#allocation15], %s10079_s22, %s10079_s22, %s10078_s23  }
  0xef   : > { %s10081_s19 = sld [smem:[#allocation49_spill]] }
  0xf5   : > { %s8101_s20 = scalar_lea.hbm %s10081_s19, 2048 }
  0xf6   : > { %p8102_p1 = scmp.ne.s32.totalorder %s10081_s19, %s8101_s20  ;;  %p8108_p12 = scmp.lt.u32.totalorder %s8101_s20, %s10081_s19 }
  0xf8   : > { %p8104_p3 = pnand %p8102_p1, %p8485_p8 }
  0xfa   : > { %p8105_p11 = pneg %p8104_p3 }
  0xfc   : > { %p8110_p13 = pnand %p8108_p12, %p8105_p11 }
  0xfe   : > { %8113 = shalt.err (!%p8110_p13)
}
  0xff   : > { %s8114_s3 = scalar_lea.vmem %s8630_s0, 2048  ;;  %p8122_p7 = scmp.lt.s32.totalorder %s8630_s0, %s8630_s0 }
 0x100   : > { %p8115_p0 = scmp.ne.s32.totalorder %s8630_s0, %s8114_s3  ;;  %p8123_p9 = scmp.lt.s32.totalorder %s8114_s3, %s8114_s3 }
 0x102   : > { %p8117_p2 = pnand %p8115_p0, %p8485_p8  ;;  %p8124_p4 = por %p8123_p9, %p8122_p7 }
 0x104   : > { %p8118_p5 = pneg %p8117_p2 }
 0x106   : > { %p8125_p10 = pnand %p8124_p4, %p8118_p5 }
 0x108   : > { %8128 = shalt.err (!%p8125_p10)
}
 0x109   : > { %s10082_s9 = smov 4   ;;  %s10083_s15 = smov 64  }
 0x10a   : > { %7173 = dma.hbm_to_vmem [thread:$0]  (!%p8471_p6), %s10081_s19, 2048, %s8630_s0, [#allocation18], %s10083_s15, %s10083_s15, %s10082_s9  }
 0x10b   : > { %s6190_s24 = sadd.s32 4294967294, %s8279_s30   ;;  %s8681_s4 = sadd.s32 1, %s8279_s30  }
 0x10c   : > { %s52_s27 = ssub.s32 %s8279_s30, %s8681_s4  ;;  %s55_s20 = sadd.s32 1, %s8275_s6 }
 0x10d   : > { %p53_p8 = scmp.eq.s32.totalorder %s52_s27, 0  ;;  %p62_p1 = scmp.ne.s32.totalorder %s8275_s6, %s8271_s2 }
 0x10e   : > { %p63_p3 = scmp.eq.s32.totalorder %s8279_s30, 0  ;;  %p68_p11 = scmp.ne.s32.totalorder %s8271_s2, %s8267_s29 }
 0x10f   : > { %s8692_s8 = scalar_select %p53_p8, %s8275_s6, %s55_s20  }
 0x110   : > { %p8694_p12 = por %p63_p3, %p62_p1  ;;  %p10086_p13 = scmp.eq.s32.totalorder %s8455_s26, 0 }
 0x111   : > { %10084 = sst [smem:[#allocation29_spill]] %s8692_s8  ;;  %p601_p0 = scmp.eq.s32.totalorder %s8455_s26, 1 }
 0x112   : > { %p8700_p6 = por %p10086_p13, %p68_p11  ;;  %p607_p2 = scmp.eq.s32.totalorder %s6190_s24, 1 }
 0x113   : > { %p7193_p5 = scmp.lt.s32.totalorder %s8279_s30, 2  ;;  %s776_s16 = sand.u32 1, %s8275_s6  }
 0x114   : > { %p8707_p7 = por %p601_p0, %p62_p1  ;;  %p8711_p9 = por %p607_p2, %p68_p11 }
 0x115   : > { %s6201_s9 = sshll.u32 %s776_s16, 5  ;;  %s6396_s15 = sshll.u32 %s8279_s30, 9 }
 0x116   : > { %s10088_s7 = scalar_select %p8707_p7, 1, 0 }
 0x117   : > { %s10089_s3 = scalar_select %p8711_p9, 1, 0 }
 0x118   : > { %s10090_s27 = sld [smem:[#allocation33_spill]]  ;;  %s780_s24 = scalar_lea.vmem [#allocation2], %s6201_s9 }
 0x119   : > { %s787_s11 = sshll.u32 %s780_s24, 4  ;;  %p8725_p4 = pnand %p7193_p5, %p8694_p12  ;;  %s8721_s11 = int_to_ptr.vmem [resolvable:$true] %s787_s11 }
 0x11a   : > { %s10092_s19 = sld [smem:[#allocation34_spill]]  ;;  %s801_s25 = scalar_lea.vmem [#allocation5], %s6201_s9 }
 0x11b   : > { %s8734_s28 = sshll.u32 %s801_s25, 4  ;;  %s8736_s8 = scalar_lea.sflag [#allocation3], %s776_s16  ;;  %s8768_s28 = int_to_ptr.vmem [resolvable:$true] %s8734_s28 }
 0x11c   : > { %p8131_p8 = pneg %p8725_p4 }
 0x11e   : > { %s8719_s20 = scalar_lea.hbm %s10090_s27, %s6396_s15  ;;  %s8134_s17 = scalar_lea.hbm %s10090_s27, 1024 }
 0x11f   : > { %s8129_s24 = scalar_lea.hbm %s8719_s20, 512  ;;  %p8135_p11 = scmp.lt.u32.totalorder %s8719_s20, %s10090_s27 }
 0x120   : > { %s8732_s5 = scalar_lea.hbm %s10092_s19, %s6396_s15  ;;  %p8130_p10 = scmp.ne.s32.totalorder %s8719_s20, %s8129_s24 }
 0x121   : > { %p8136_p12 = scmp.lt.u32.totalorder %s8134_s17, %s8129_s24  ;;  %p8138_p0 = scmp.lt.u32.totalorder %s8129_s24, %s8719_s20 }
 0x122   : > { %p8132_p1 = pnand %p8131_p8, %p8130_p10 }
 0x123   : > { %p8137_p13 = por %p8136_p12, %p8135_p11 }
 0x124   : > { %p8133_p3 = pneg %p8132_p1 }
 0x125   : > { %p8139_p2 = por %p8138_p0, %p8137_p13 }
 0x127   : > { %p8140_p5 = pnand %p8139_p2, %p8133_p3 }
 0x129   : > { %8143 = shalt.err (!%p8140_p5)
}
 0x12a   : > { %s8144_s16 = scalar_lea.vmem %s8721_s11, 512  ;;  %s8295_s6 = smov [#allocation2]  }
 0x12b   : > { %p8145_p10 = scmp.ne.s32.totalorder %s8721_s11, %s8144_s16  ;;  %s8149_s9 = sshll.u32 %s8295_s6, 4  ;;  %s8150_s9 = int_to_ptr.vmem [resolvable:$false] %s8149_s9 }
 0x12c   : > { %s8151_s25 = scalar_lea.vmem %s8150_s9, 1024  ;;  %p8152_p7 = scmp.lt.s32.totalorder %s8721_s11, %s8150_s9 }
 0x12d   : > { %p8147_p1 = pnand %p8145_p10, %p8131_p8  ;;  %p8153_p11 = scmp.lt.s32.totalorder %s8151_s25, %s8144_s16 }
 0x12f   : > { %p8148_p9 = pneg %p8147_p1  ;;  %p8154_p12 = por %p8153_p11, %p8152_p7 }
 0x131   : > { %p8155_p13 = pnand %p8154_p12, %p8148_p9 }
 0x133   : > { %8158 = shalt.err (!%p8155_p13)
}
 0x134   : > { %7177 = dma.hbm_to_vmem [thread:$0]  (!%p8725_p4), %s8719_s20, 512, %s8721_s11, %s8736_s8, %s10079_s22, %s10079_s22, %s10078_s23  }
 0x135   : > { %s797_s24 = sand.u32 1, %s8279_s30   ;;  %s8159_s17 = scalar_lea.hbm %s8732_s5, 512 }
 0x136   : > { %s8771_s21 = scalar_lea.sflag [#allocation6], %s797_s24  ;;  %p8160_p7 = scmp.ne.s32.totalorder %s8732_s5, %s8159_s17 }
 0x137   : > { %s8164_s16 = scalar_lea.hbm %s10092_s19, 1024  ;;  %p8165_p0 = scmp.lt.u32.totalorder %s8732_s5, %s10092_s19 }
 0x138   : > { %p8162_p9 = pnand %p8160_p7, %p8131_p8  ;;  %p8166_p2 = scmp.lt.u32.totalorder %s8164_s16, %s8159_s17 }
 0x139   : > { %p8168_p10 = scmp.lt.u32.totalorder %s8159_s17, %s8732_s5 }
 0x13a   : > { %p8163_p3 = pneg %p8162_p9  ;;  %p8167_p5 = por %p8166_p2, %p8165_p0 }
 0x13c   : > { %p8169_p1 = por %p8168_p10, %p8167_p5 }
 0x13e   : > { %p8170_p11 = pnand %p8169_p1, %p8163_p3 }
 0x140   : > { %8173 = shalt.err (!%p8170_p11)
}
 0x141   : > { %s8174_s11 = scalar_lea.vmem %s8768_s28, 512  ;;  %s8296_s8 = smov [#allocation5]  }
 0x142   : > { %p8175_p12 = scmp.ne.s32.totalorder %s8768_s28, %s8174_s11  ;;  %s8179_s20 = sshll.u32 %s8296_s8, 4  ;;  %s8180_s20 = int_to_ptr.vmem [resolvable:$false] %s8179_s20 }
 0x143   : > { %s8181_s25 = scalar_lea.vmem %s8180_s20, 1024  ;;  %p8182_p9 = scmp.lt.s32.totalorder %s8768_s28, %s8180_s20 }
 0x144   : > { %p8177_p13 = pnand %p8175_p12, %p8131_p8  ;;  %p8183_p0 = scmp.lt.s32.totalorder %s8181_s25, %s8174_s11 }
 0x146   : > { %p8178_p7 = pneg %p8177_p13  ;;  %p8184_p2 = por %p8183_p0, %p8182_p9 }
 0x148   : > { %p8185_p5 = pnand %p8184_p2, %p8178_p7 }
 0x14a   : > { %8188 = shalt.err (!%p8185_p5)
}
 0x14b   : > { %7180 = dma.hbm_to_vmem [thread:$0]  (!%p8725_p4), %s8732_s5, 512, %s8768_s28, %s8771_s21, %s10079_s22, %s10079_s22, %s10078_s23  }
 0x14c   : > { %p10093_p8 = scmp.ne.s32.totalorder %s10069_s1, 0 }
 0x14e   : > { %820 = sbr.rel (%p10093_p8) target bundleno = 13963 (0x368b), region = 120 }
 0x155   : > { %s8803_s24 = sand.u32 1, %s8271_s2  }
 0x156   : > { %s8806_s17 = sshll.u32 %s8803_s24, 5  ;;  %s823_s13 = scalar_lea.sflag [#allocation3], %s8803_s24 }
 0x157   : > { %s8810_s18 = scalar_lea.vmem [#allocation2], %s8806_s17 }
 0x158   : > { %8234 = dma.done.wait (%p8700_p6), %s823_s13, 512  }
 0x159   : > { %8236 = vsyncadd (%p8700_p6), %s823_s13, 4294966784  ;;  %s831_s1 = sand.u32 1, %s8455_s26   ;;  %s8818_s23 = scalar_lea.vmem [#allocation5], %s8806_s17 }
 0x15a   : > { %s832_s28 = scalar_lea.sflag [#allocation6], %s831_s1 }
 0x15b   : > { %8238 = dma.done.wait (%p8700_p6), %s832_s28, 512  }
 0x15c   : > { %8240 = vsyncadd (%p8700_p6), %s832_s28, 4294966784  ;;  %p10094_p4 = scmp.eq.s32.totalorder %s8455_s26, 0 }
 0x15e   : > { %8242 = dma.done.wait (%p10094_p4), [#allocation6], 512   ;;  %p10095_p3 = pmov %p10094_p4 }
 0x160   : > { %8244 = vsyncadd (%p10095_p3), [#allocation6], 4294966784  ;;  %p10096_p10 = pmov %p10095_p3 }
 0x161   : > { %p10097_p1 = pmov %p10095_p3 }
 0x162   : > { %8246 = dma.done.wait (%p10096_p10), [#allocation9], 4096  }
 0x163   : > { %8248 = vsyncadd (%p10097_p1), [#allocation9], 4294963200  ;;  %p10098_p11 = pmov %p10097_p1 }
 0x164   : > { %p10099_p12 = pmov %p10097_p1 }
 0x165   : > { %8250 = dma.done.wait (%p10098_p11), [#allocation12], 3072  }
 0x166   : > { %8252 = vsyncadd (%p10099_p12), [#allocation12], 4294964224  ;;  %p10100_p6 = pmov %p10097_p1 }
 0x167   : > { %p10101_p13 = pmov %p10097_p1 }
 0x168   : > { %8254 = dma.done.wait (%p10100_p6), [#allocation15], 3072  }
 0x169   : > { %8256 = vsyncadd (%p10101_p13), [#allocation15], 4294964224  ;;  %p10102_p7 = pmov %p10097_p1 }
 0x16a   : > { %p10103_p9 = pmov %p10097_p1 }
 0x16b   : > { %8258 = dma.done.wait (%p10102_p7), [#allocation18], 2048  }
 0x16c   : > { %8260 = vsyncadd (%p10103_p9), [#allocation18], 4294965248  ;;  %v10037_v0 = vmov 0   ;;  %v7375_v1 = vld [vmem:[#allocation8 + $0x4] ss:$12 sps:$4 sm:$0xff]   ;;  %v1104_v18 = vld [vmem:[%s8810_s18 + $0x8] sm:$0xff]  ;;  %v1114_v23 = vlaneseq }
 0x16d   : > { %1439 = vmatprep.mubr.bf16.mxu1 %v10037_v0  ;;  %1236 = vmatprep.mubr.bf16.mxu0 %v10037_v0  ;;  %v7377_v2 = vld [vmem:[#allocation8] ss:$12 sps:$4 sm:$0xff]   ;;  %v7378_v3 = vld [vmem:[#allocation8 + $0x1c] ss:$12 sps:$4 sm:$0xff]   ;;  %v7380_v4 = vld [vmem:[#allocation8 + $0x18] ss:$12 sps:$4 sm:$0xff]  }
 0x16e   : > { %1407 = vmatprep.subr.bf16.mxu1 %v7375_v1  ;;  %v7381_v5 = vld [vmem:[#allocation8 + $0x34] ss:$12 sps:$4 sm:$0xff]   ;;  %v7383_v6 = vld [vmem:[#allocation8 + $0x30] ss:$12 sps:$4 sm:$0xff]   ;;  %v7384_v7 = vld [vmem:[#allocation8 + $0x4c] ss:$12 sps:$4 sm:$0xff]  }
 0x16f   : > { %1408 = vmatpush1.bf16.msra.mxu1 %v7377_v2  ;;  %v7386_v8 = vld [vmem:[#allocation8 + $0x48] ss:$12 sps:$4 sm:$0xff]   ;;  %v7387_v9 = vld [vmem:[#allocation8 + $0x64] ss:$12 sps:$4 sm:$0xff]   ;;  %v7389_v10 = vld [vmem:[#allocation8 + $0x60] ss:$12 sps:$4 sm:$0xff]  }
 0x170   : > { %1409 = vmatprep.subr.bf16.mxu1 %v7378_v3  ;;  %v7390_v11 = vld [vmem:[#allocation8 + $0x7c] ss:$12 sps:$4 sm:$0xff]   ;;  %v7392_v12 = vld [vmem:[#allocation8 + $0x78] ss:$12 sps:$4 sm:$0xff]   ;;  %v7393_v13 = vld [vmem:[#allocation8 + $0x94] ss:$12 sps:$4 sm:$0xff]  }
 0x171   : > { %v7395_v14 = vld [vmem:[#allocation8 + $0x90] ss:$12 sps:$4 sm:$0xff]   ;;  %v7396_v15 = vld [vmem:[#allocation8 + $0xac] ss:$12 sps:$4 sm:$0xff]   ;;  %v7398_v16 = vld [vmem:[#allocation8 + $0xa8] ss:$12 sps:$4 sm:$0xff]  }
 0x172   : > { %v1103_v17 = vld [vmem:[%s8810_s18] sm:$0xff]  ;;  %v1105_v20 = vld [vmem:[%s8810_s18 + $0x10] sm:$0xff]  ;;  %v1106_v21 = vld [vmem:[%s8810_s18 + $0x18] sm:$0xff]  ;;  %v8857_v24 = vshrl.u32 %v1114_v23, 7  ;;  %s10104_s5 = sld [smem:[#allocation37_spill]]  ;;  %vm1519_vm0 = vcmask 261120  }
 0x173   : > { %1410 = vmatpush1.bf16.msra.mxu1 %v7380_v4  ;;  %v8848_v19 = vpack.c.bf16 %v1104_v18, %v1103_v17  ;;  %v8854_v22 = vpack.c.bf16 %v1106_v21, %v1105_v20  ;;  %v7399_v56 = vld [vmem:[#allocation13 + $0x4] ss:$8 sps:$4 sm:$0xff]   ;;  %v7401_v57 = vld [vmem:[#allocation13] ss:$8 sps:$4 sm:$0xff]   ;;  %v7402_v58 = vld [vmem:[#allocation13 + $0x14] ss:$8 sps:$4 sm:$0xff]  }
 0x174   : > { %1411 = vmatprep.subr.bf16.mxu1 %v7381_v5  ;;  %v8860_v25 = vsub.s32 0, %v8857_v24  ;;  %v8868_v27 = vsub.s32 1, %v8857_v24  ;;  %1204 = vmatprep.subr.bf16.mxu0 %v7399_v56  ;;  %v7404_v59 = vld [vmem:[#allocation13 + $0x10] ss:$8 sps:$4 sm:$0xff]   ;;  %v7405_v60 = vld [vmem:[#allocation13 + $0x24] ss:$8 sps:$4 sm:$0xff]  }
 0x175   : > { %1205 = vmatpush1.bf16.msra.mxu0 %v7401_v57  ;;  %v7407_v61 = vld [vmem:[#allocation13 + $0x20] ss:$8 sps:$4 sm:$0xff]   ;;  %v7408_v62 = vld [vmem:[#allocation13 + $0x34] ss:$8 sps:$4 sm:$0xff]   ;;  %v7410_v63 = vld [vmem:[#allocation13 + $0x30] ss:$8 sps:$4 sm:$0xff]  }
 0x176   : > { %1206 = vmatprep.subr.bf16.mxu0 %v7402_v58  ;;  %v7411_v1 = vld [vmem:[#allocation13 + $0x44] ss:$8 sps:$4 sm:$0xff]   ;;  %v7413_v2 = vld [vmem:[#allocation13 + $0x40] ss:$8 sps:$4 sm:$0xff]   ;;  %v7414_v3 = vld [vmem:[#allocation13 + $0x54] ss:$8 sps:$4 sm:$0xff]  }
 0x177   : > { %1412 = vmatpush1.bf16.msra.mxu1 %v7383_v6  ;;  %v7416_v4 = vld [vmem:[#allocation13 + $0x50] ss:$8 sps:$4 sm:$0xff]   ;;  %v7417_v5 = vld [vmem:[#allocation13 + $0x64] ss:$8 sps:$4 sm:$0xff]   ;;  %v7419_v6 = vld [vmem:[#allocation13 + $0x60] ss:$8 sps:$4 sm:$0xff]  }
 0x178   : > { %1413 = vmatprep.subr.bf16.mxu1 %v7384_v7  ;;  %v8865_v26 = vld [vmem:[%s10104_s5] sm:$0x7]  ;;  %v7420_v7 = vld [vmem:[#allocation13 + $0x74] ss:$8 sps:$4 sm:$0xff]   ;;  %v7429_v23 = vld [vmem:[#allocation8 + $0x98] ss:$12 sps:$4 sm:$0xff]  }
 0x179   : > { %v8872_v28 = vrot.slane %v8865_v26, %v8860_v25  ;;  %v8876_v30 = vrot.slane %v8865_v26, %v8868_v27  ;;  %1207 = vmatpush1.bf16.msra.mxu0 %v7404_v59  ;;  %v7426_v18 = vld [vmem:[#allocation8 + $0x50] ss:$12 sps:$4 sm:$0xff]   ;;  %v7427_v20 = vld [vmem:[#allocation8 + $0x68] ss:$12 sps:$4 sm:$0xff]   ;;  %v7428_v21 = vld [vmem:[#allocation8 + $0x80] ss:$12 sps:$4 sm:$0xff]  }
 0x17a   : > { %1208 = vmatprep.subr.bf16.mxu0 %v7405_v60  ;;  %s8298_s16 = smov 96   ;;  %s8299_s6 = smov 64   ;;  %vm2268_vm1 = vcmask 523264   ;;  %vm2273_vm2 = vcmask 785408  }
 0x17b   : > { %1414 = vmatpush1.bf16.msra.mxu1 %v7386_v8  ;;  %v7422_v8 = vld [vmem:[#allocation13 + $0x70] ss:$8 sps:$4 sm:$0xff]   ;;  %s8300_s9 = smov 32   ;;  %s10105_s20 = sld [smem:[#allocation39_spill]] }
 0x17c   : > { %1415 = vmatprep.subr.bf16.mxu1 %v7387_v9  ;;  %v1107_v9 = vld [vmem:[%s8818_s23] sm:$0xff]  ;;  %s10109_s8 = sld [smem:[#allocation45_spill]]  ;;  %s10110_s1 = sld [smem:[#allocation46_spill]] }
 0x17d   : > { %1209 = vmatpush1.bf16.msra.mxu0 %v7407_v61  ;;  %s10111_s0 = sld [smem:[#allocation48_spill]]  ;;  %s10114_s15 = sld [smem:[#allocation50_spill]] }
 0x17e   : > { %1210 = vmatprep.subr.bf16.mxu0 %v7408_v62  ;;  %s10115_s13 = sld [smem:[#allocation51_spill]]  ;;  %s10123_s28 = sld [smem:[#allocation53_spill]] }
 0x17f   : > { %1416 = vmatpush1.bf16.msra.mxu1 %v7389_v10  ;;  %v1108_v10 = vld [vmem:[%s8818_s23 + $0x8] sm:$0xff]  ;;  %s10124_s21 = sld [smem:[#allocation54_spill]]  ;;  %p10126_p2 = scmp.ne.s32.totalorder %s10088_s7, 0 }
 0x180   : > { %1417 = vmatprep.subr.bf16.mxu1 %v7390_v11  ;;  %v7423_v11 = vld [vmem:[#allocation8 + $0x8] ss:$12 sps:$4 sm:$0xff]  }
 0x181   : > { %1211 = vmatpush1.bf16.msra.mxu0 %v7410_v63 }
 0x182   : > { %1212 = vmatprep.subr.bf16.mxu0 %v7411_v1 }
 0x183   : > { %1418 = vmatpush1.bf16.msra.mxu1 %v7392_v12  ;;  %v1111_v12 = vpack.c.bf16 %v1108_v10, %v1107_v9 }
 0x184   : > { %1419 = vmatprep.subr.bf16.mxu1 %v7393_v13  ;;  %v7424_v13 = vld [vmem:[#allocation8 + $0x20] ss:$12 sps:$4 sm:$0xff]  }
 0x185   : > { %1213 = vmatpush1.bf16.msra.mxu0 %v7413_v2 }
 0x186   : > { %1214 = vmatprep.subr.bf16.mxu0 %v7414_v3 }
 0x187   : > { %1420 = vmatpush1.bf16.msra.mxu1 %v7395_v14  ;;  %v1109_v14 = vld [vmem:[%s8818_s23 + $0x10] sm:$0xff] }
 0x188   : > { %1421 = vmatprep.subr.bf16.mxu1 %v7396_v15  ;;  %v1110_v15 = vld [vmem:[%s8818_s23 + $0x18] sm:$0xff]  ;;  %s10107_s23 = sld [smem:[#allocation41_spill]] }
 0x189   : > { %1215 = vmatpush1.bf16.msra.mxu0 %v7416_v4  ;;  %v1112_v17 = vpack.c.bf16 %v1110_v15, %v1109_v14 }
 0x18a   : > { %1216 = vmatprep.subr.bf16.mxu0 %v7417_v5 }
 0x18b   : > { %1422 = vmatpush1.bf16.msra.mxu1 %v7398_v16  ;;  %v7425_v16 = vld [vmem:[#allocation8 + $0x38] ss:$12 sps:$4 sm:$0xff]  }
 0x18d   : > { %1217 = vmatpush1.bf16.msra.mxu0 %v7419_v6 }
 0x18e   : > { %1440 = vmatmul.mubr.bf16.vlgmr.msra.gmra.mrb[0].mxu1 %v8848_v19  ;;  %1218 = vmatprep.subr.bf16.mxu0 %v7420_v7 }
 0x18f   : > { %1449 = vmatprep.mubr.bf16.mxu1 %v10037_v0 }
 0x191   : > { %1219 = vmatpush1.bf16.msra.mxu0 %v7422_v8 }
 0x192   : > { %6663 = vmatprep.subr.bf16.mxu0 %v7423_v11 }
 0x194   : > { %1237 = vmatmul.mubr.bf16.vlgmr.msra.gmra.mrb[0].mxu0 %v1111_v12 }
 0x195   : > { %6664 = vmatpush3.bf16.msra.mxu0 %v7423_v11  ;;  %1246 = vmatprep.mubr.bf16.mxu0 %v10037_v0 }
 0x196   : > { %1450 = vmatmul.mubr.bf16.gmra.mrb[4].mxu1 %v8854_v22  ;;  %6665 = vmatprep.subr.bf16.mxu0 %v7424_v13 }
 0x199   : > { %6666 = vmatpush3.bf16.msra.mxu0 %v7424_v13 }
 0x19a   : > { %6667 = vmatprep.subr.bf16.mxu0 %v7425_v16 }
 0x19c   : > { %1247 = vmatmul.mubr.bf16.gmra.mrb[4].mxu0 %v1112_v17 }
 0x19d   : > { %6668 = vmatpush3.bf16.msra.mxu0 %v7425_v16  ;;  %6679 = vmatprep.mubr.bf16.mxu0 %v8848_v19 }
 0x19e   : > { %6669 = vmatprep.subr.bf16.mxu0 %v7426_v18 }
 0x1a1   : > { %6670 = vmatpush3.bf16.msra.mxu0 %v7426_v18 }
 0x1a2   : > { %6671 = vmatprep.subr.bf16.mxu0 %v7427_v20 }
 0x1a5   : > { %6672 = vmatpush3.bf16.msra.mxu0 %v7427_v20  ;;  %v1274_v20 = vsub.s32 2, %v8857_v24 }
 0x1a6   : > { %6673 = vmatprep.subr.bf16.mxu0 %v7428_v21 }
 0x1a9   : > { %6674 = vmatpush3.bf16.msra.mxu0 %v7428_v21 }
 0x1aa   : > { %6675 = vmatprep.subr.bf16.mxu0 %v7429_v23 }
 0x1ad   : > { %6676 = vmatpush3.bf16.msra.mxu0 %v7429_v23 }
 0x261   : > { %v1441_v29 = vpop.f32.mrb[0].mxu1 }
 0x262   : > { %v1442_v31 = vadd.f32 %v1441_v29, %v8872_v28  ;;  %v1443_v32 = vpop.f32.mrb[1].mxu1  ;;  %v7430_v29 = vld [vmem:[#allocation8 + $0xb0] ss:$12 sps:$4 sm:$0xff]  }
 0x263   : > { %v1445_v33 = vpop.f32.mrb[2].mxu1  ;;  %v1444_v36 = vadd.f32 %v1443_v32, %v8876_v30  ;;  %6677 = vmatprep.subr.bf16.mxu0 %v7430_v29  ;;  %v8915_v32 = vld [vmem:[#allocation7] sm:$0xff] }
 0x264   : > { %v1446_v34 = vadd.f32 %v1445_v33, %v8872_v28  ;;  %v1447_v35 = vpop.f32.mrb[3].mxu1  ;;  %v1509_v38 = vmul.f32 0.17677669, %v1442_v31  ;;  %6678 = vmatpush3.bf16.msra.mxu0 %v7430_v29  ;;  %v8913_v31 = vld [vmem:[#allocation7 + $0x10] sm:$0xff]  ;;  %v8917_v33 = vld [vmem:[#allocation7 + $0x18] sm:$0xff]  ;;  %v8944_v29 = vrot.slane %v8865_v26, %v1274_v20 }
 0x265   : > { %v1448_v37 = vadd.f32 %v1447_v35, %v8876_v30 }
 0x266   : > { %v1510_v39 = vmul.f32 0.17677669, %v1446_v34 }
 0x267   : > { %v8882_v40 = vpack.c.bf16 %v1448_v37, %v1444_v36  ;;  %6680 = vmatmul.mubr.bf16.vlgmr.msra.gmra.mrb[8].mxu0 %v8854_v22  ;;  %v8920_v36 = vld [vmem:[#allocation7 + $0x8] sm:$0xff] }
 0x268   : > { %v8884_v41 = vpack.c.bf16 %v1510_v39, %v1509_v38 }
 0x269   : > { %v1451_v42 = vpop.f32.mrb[4].mxu1  ;;  %7079 = vmatprep.subr.msk.bf16.mxu1 %vm1519_vm0, %v8882_v40  ;;  %v1527_v43 = vsel %vm1519_vm0, %v8882_v40, 0 }
 0x26a   : > { %v1452_v44 = vadd.f32 %v1451_v42, %v8872_v28  ;;  %v1453_v45 = vpop.f32.mrb[5].mxu1  ;;  %6684 = vmatpush3.bf16.xpose.msra.mxu1 %v1527_v43  ;;  %6687 = vmatprep.mubr.msk.bf16.mxu1 %vm1519_vm0, %v8884_v41 }
 0x26b   : > { %v1455_v46 = vpop.f32.mrb[6].mxu1  ;;  %v1454_v49 = vadd.f32 %v1453_v45, %v8876_v30 }
 0x26c   : > { %v1456_v47 = vadd.f32 %v1455_v46, %v8872_v28  ;;  %v1457_v48 = vpop.f32.mrb[7].mxu1  ;;  %v1511_v51 = vmul.f32 0.17677669, %v1452_v44 }
 0x26d   : > { %v1458_v50 = vadd.f32 %v1457_v48, %v8876_v30 }
 0x26e   : > { %v1512_v52 = vmul.f32 0.17677669, %v1456_v47  ;;  %v1029_v47 = vld [vmem:[%s9994_s12] sm:$0x3] }
 0x26f   : > { %v8896_v53 = vpack.c.bf16 %v1458_v50, %v1454_v49  ;;  %v1117_v48 = vrot.slane %v1029_v47, %v8860_v25  ;;  %v1121_v49 = vrot.slane %v1029_v47, %v8868_v27  ;;  %v1238_v50 = vpop.f32.mrb[0].mxu0 }
 0x270   : > { %v8898_v54 = vpack.c.bf16 %v1512_v52, %v1511_v51  ;;  %v1240_v52 = vpop.f32.mrb[1].mxu0 }
 0x271   : > { %7080 = vmatprep.subr.msk.bf16.mxu1 %vm1519_vm0, %v8896_v53  ;;  %v1530_v55 = vsel %vm1519_vm0, %v8896_v53, 0  ;;  %v1239_v51 = vadd.f32 %v1238_v50, %v1117_v48  ;;  %v1242_v56 = vpop.f32.mrb[2].mxu0 }
 0x272   : > { %6686 = vmatpush3.bf16.xpose.msra.mxu1 %v1530_v55  ;;  %v1241_v55 = vadd.f32 %v1240_v52, %v1121_v49  ;;  %v1243_v57 = vadd.f32 %v1242_v56, %v1117_v48  ;;  %v1244_v58 = vpop.f32.mrb[3].mxu0 }
 0x273   : > { %v1245_v59 = vadd.f32 %v1244_v58, %v1121_v49  ;;  %v1248_v62 = vpop.f32.mrb[4].mxu0 }
 0x274   : > { %v8934_v60 = vpack.c.bf16 %v1243_v57, %v1239_v51  ;;  %v1249_v63 = vadd.f32 %v1248_v62, %v1117_v48  ;;  %v1250_v1 = vpop.f32.mrb[5].mxu0 }
 0x275   : > { %v8936_v61 = vpack.c.bf16 %v1245_v59, %v1241_v55  ;;  %v1251_v2 = vadd.f32 %v1250_v1, %v1121_v49  ;;  %v1252_v3 = vpop.f32.mrb[6].mxu0 }
 0x276   : > { %v1253_v4 = vadd.f32 %v1252_v3, %v1117_v48  ;;  %v1254_v5 = vpop.f32.mrb[7].mxu0 }
 0x277   : > { %v1255_v6 = vadd.f32 %v1254_v5, %v1121_v49 }
 0x278   : > { %v8938_v7 = vpack.c.bf16 %v1253_v4, %v1249_v63 }
 0x279   : > { %6688 = vmatmul.mubr.msk.bf16.vlgmr.msra.gmra.mrb[8].mxu1 %vm1519_vm0, %v8898_v54  ;;  %v8940_v8 = vpack.c.bf16 %v1255_v6, %v1251_v2 }
 0x34c   : > { %v6689_v19 = vpop.f32.mrb[8].mxu1 }
 0x34d   : > { %v1575_v34 = vadd.f32 %v6689_v19, %v8913_v31  ;;  %v1566_v35 = vpop.f32.mrb[9].mxu1  ;;  %v6681_v19 = vpop.f32.mrb[8].mxu0 }
 0x34e   : > { %v1567_v37 = vadd.f32 %v1566_v35, %v8915_v32  ;;  %v6690_v38 = vpop.f32.mrb[10].mxu1  ;;  %v1494_v35 = vpop.f32.mrb[9].mxu0 }
 0x34f   : > { %v1578_v39 = vadd.f32 %v6690_v38, %v8917_v33  ;;  %v1569_v42 = vpop.f32.mrb[11].mxu1  ;;  %v1587_v22 = vsel %vm1519_vm0, %v1575_v34, -inf  ;;  %v1495_v38 = vadd.f32 %v1494_v35, %v8944_v29 }
 0x350   : > { %v1570_v43 = vadd.f32 %v1569_v42, %v8920_v36  ;;  %1588 = vmax.xlane.f32.xlu1 %v1587_v22  ;;  %v1581_v44 = vsel %vm1519_vm0, %v1567_v37, -inf }
 0x351   : > { %1582 = vmax.xlane.f32.xlu0 %v1581_v44  ;;  %v1590_v45 = vsel %vm1519_vm0, %v1578_v39, -inf }
 0x352   : > { %v1584_v46 = vsel %vm1519_vm0, %v1570_v43, -inf }
 0x354   : > { %1591 = vmax.xlane.f32.xlu1 %v1590_v45 }
 0x355   : > { %1585 = vmax.xlane.f32.xlu0 %v1584_v46 }
 0x3dd   : > { %v1589_v9 = vpop.xlane.xlu1 %1588 }
 0x3de   : > { %v1595_v10 = vsub.f32 %v1575_v34, %v1589_v9  ;;  %v1583_v11 = vpop.xlane.xlu0 %1582  ;;  %v1503_v34 = vadd.f32 %v6681_v19, %v8944_v29 }
 0x3df   : > { %v1593_v12 = vsub.f32 %v1567_v37, %v1583_v11 }
 0x3e0   : > { %v1601_v13 = vmul.f32 1.442695, %v1595_v10 }
 0x3e1   : > { %v1597_v14 = vmul.f32 1.442695, %v1593_v12  ;;  %v1592_v15 = vpop.xlane.xlu1 %1591 }
 0x3e2   : > { %7495 = vpow2.f32 %v1601_v13  ;;  %v1596_v16 = vsub.f32 %v1578_v39, %v1592_v15  ;;  %v1586_v17 = vpop.xlane.xlu0 %1585  ;;  %v6682_v39 = vpop.f32.mrb[10].mxu0 }
 0x3e3   : > { %v1594_v18 = vsub.f32 %v1570_v43, %v1586_v17  ;;  %7497 = vpow2.f32 %v1597_v14  ;;  %v1506_v22 = vadd.f32 %v6682_v39, %v8944_v29  ;;  %v1497_v24 = vpop.f32.mrb[11].mxu0 }
 0x3e4   : > { %v1603_v21 = vmul.f32 1.442695, %v1596_v16  ;;  %v1498_v44 = vadd.f32 %v1497_v24, %v8944_v29 }
 0x3e5   : > { %v1599_v23 = vmul.f32 1.442695, %v1594_v18  ;;  %v8951_v26 = vpack.c.bf16 %v1506_v22, %v1503_v34 }
 0x3e6   : > { %v8953_v45 = vpack.c.bf16 %v1498_v44, %v1495_v38 }
 0x3e7   : > { %7499 = vpow2.f32 %v1599_v23 }
 0x3e8   : > { %7501 = vpow2.f32 %v1603_v21  ;;  %6691 = vmatprep.subr.bf16.mxu1 %v8953_v45 }
 0x3e9   : > { %6692 = vmatpush3.bf16.msra.mxu1 %v8953_v45 }
 0x3ea   : > { %6693 = vmatprep.subr.bf16.mxu1 %v8951_v26 }
 0x3ec   : > { %v7496_v37 = vpop.eup %7495 }
 0x3ed   : > { %v1611_v42 = vsel %vm1519_vm0, %v7496_v37, 0.0  ;;  %v7498_v43 = vpop.eup %7497  ;;  %6694 = vmatpush3.bf16.msra.mxu1 %v8951_v26 }
 0x3ee   : > { %1612 = vadd.xlane.f32.xlu0 %v1611_v42  ;;  %v1605_v47 = vsel %vm1519_vm0, %v7498_v43, 0.0 }
 0x3f1   : > { %v7500_v46 = vpop.eup %7499 }
 0x3f2   : > { %1606 = vadd.xlane.f32.xlu0 %v1605_v47  ;;  %v1608_v48 = vsel %vm1519_vm0, %v7500_v46, 0.0  ;;  %v7502_v49 = vpop.eup %7501 }
 0x3f3   : > { %1609 = vadd.xlane.f32.xlu1 %v1608_v48  ;;  %v1614_v50 = vsel %vm1519_vm0, %v7502_v49, 0.0 }
 0x3f7   : > { %1615 = vadd.xlane.f32.xlu1 %v1614_v50 }
 0x408   : > { %1690 = vrot.lane.b32.xlu0 %v8882_v40, %s8298_s16  ;;  %1692 = vrot.lane.b32.xlu1 %v8896_v53, %s8298_s16 }
 0x40c   : > { %1686 = vrot.lane.b32.xlu0 %v8898_v54, %s8298_s16  ;;  %1684 = vrot.lane.b32.xlu1 %v8884_v41, %s8298_s16 }
 0x410   : > { %1864 = vrot.lane.b32.xlu0 %v8884_v41, %s8299_s6  ;;  %1868 = vrot.lane.b32.xlu1 %v8882_v40, %s8299_s6 }
 0x414   : > { %1870 = vrot.lane.b32.xlu1 %v8896_v53, %s8299_s6 }
 0x418   : > { %1866 = vrot.lane.b32.xlu1 %v8898_v54, %s8299_s6 }
 0x47b   : > { %v1613_v51 = vpop.xlane.xlu0 %1612 }
 0x47f   : > { %v1607_v52 = vpop.xlane.xlu0 %1606 }
 0x480   : > { %7503 = vrcp.f32 %v1607_v52  ;;  %v1610_v55 = vpop.xlane.xlu1 %1609 }
 0x481   : > { %7505 = vrcp.f32 %v1610_v55 }
 0x482   : > { %7507 = vrcp.f32 %v1613_v51 }
 0x483   : > { %v1691_v56 = vpop.permute.xlu0 %1690 }
 0x484   : > { %7081 = vmatprep.subr.msk.bf16.mxu1 %vm1519_vm0, %v1691_v56  ;;  %v1616_v57 = vpop.xlane.xlu1 %1615  ;;  %v1701_v11 = vsel %vm1519_vm0, %v1691_v56, 0 }
 0x485   : > { %7509 = vrcp.f32 %v1616_v57 }
 0x487   : > { %v1687_v14 = vpop.permute.xlu0 %1686 }
 0x488   : > { %v1693_v2 = vpop.permute.xlu1 %1692 }
 0x489   : > { %v1704_v12 = vsel %vm1519_vm0, %v1693_v2, 0 }
 0x48a   : > { %v7504_v58 = vpop.eup %7503 }
 0x48b   : > { %v7506_v59 = vpop.eup %7505  ;;  %v1621_v62 = vmul.f32 %v7504_v58, %v7498_v43  ;;  %v1865_v15 = vpop.permute.xlu0 %1864 }
 0x48c   : > { %v1622_v63 = vmul.f32 %v7506_v59, %v7500_v46  ;;  %v7508_v1 = vpop.eup %7507  ;;  %v1685_v10 = vpop.permute.xlu1 %1684 }
 0x48d   : > { %v1623_v5 = vmul.f32 %v7508_v1, %v7496_v37 }
 0x48e   : > { %v1625_v3 = vpack.c.bf16 %v1622_v63, %v1621_v62 }
 0x48f   : > { %v7510_v4 = vpop.eup %7509 }
 0x490   : > { %v1624_v6 = vmul.f32 %v7510_v4, %v7502_v49  ;;  %6695 = vmatprep.mubr.msk.bf16.mxu1 %vm1519_vm0, %v1625_v3  ;;  %v1869_v13 = vpop.permute.xlu1 %1868 }
 0x491   : > { %v1879_v16 = vsel %vm1519_vm0, %v1869_v13, 0 }
 0x492   : > { %v1626_v9 = vpack.c.bf16 %v1624_v6, %v1623_v5 }
 0x494   : > { %6696 = vmatmul.mubr.msk.bf16.vlgmr.msra.gmra.mrb[12].mxu1 %vm1519_vm0, %v1626_v9  ;;  %v1871_v17 = vpop.permute.xlu1 %1870 }
 0x495   : > { %6700 = vmatpush3.bf16.xpose.msra.mxu1 %v1701_v11  ;;  %6703 = vmatprep.mubr.msk.bf16.mxu1 %vm1519_vm0, %v1685_v10  ;;  %v1882_v18 = vsel %vm1519_vm0, %v1871_v17, 0 }
 0x496   : > { %7082 = vmatprep.subr.msk.bf16.mxu1 %vm1519_vm0, %v1693_v2 }
 0x498   : > { %v1867_v20 = vpop.permute.xlu1 %1866 }
 0x49d   : > { %6702 = vmatpush3.bf16.xpose.msra.mxu1 %v1704_v12 }
 0x49e   : > { %7083 = vmatprep.subr.msk.bf16.mxu1 %vm1519_vm0, %v1869_v13 }
 0x4a4   : > { %6704 = vmatmul.mubr.msk.bf16.vlgmr.msra.gmra.mrb[16].mxu1 %vm1519_vm0, %v1687_v14 }
 0x4a5   : > { %6716 = vmatpush3.bf16.xpose.msra.mxu1 %v1879_v16  ;;  %6719 = vmatprep.mubr.msk.bf16.mxu1 %vm1519_vm0, %v1865_v15 }
 0x4a6   : > { %7084 = vmatprep.subr.msk.bf16.mxu1 %vm1519_vm0, %v1871_v17 }
 0x4ad   : > { %6718 = vmatpush3.bf16.xpose.msra.mxu1 %v1882_v18 }
 0x4b4   : > { %6720 = vmatmul.mubr.msk.bf16.vlgmr.msra.gmra.mrb[20].mxu1 %vm1519_vm0, %v1867_v20 }
 0x567   : > { %v8992_v21 = vpop.f32.mrb[12].mxu1 }
 0x568   : > { %v8994_v23 = vpop.f32.mrb[13].mxu1 }
 0x569   : > { %v8996_v19 = vpop.f32.mrb[14].mxu1 }
 0x56a   : > { %v8998_v34 = vpop.f32.mrb[15].mxu1 }
 0x577   : > { %v6705_v35 = vpop.f32.mrb[16].mxu1 }
 0x578   : > { %v1740_v37 = vpop.f32.mrb[17].mxu1  ;;  %v9028_v17 = vadd.f32 %v6705_v35, %v8913_v31 }
 0x579   : > { %v6706_v38 = vpop.f32.mrb[18].mxu1  ;;  %v9025_v16 = vadd.f32 %v1740_v37, %v8915_v32 }
 0x57a   : > { %v1743_v39 = vpop.f32.mrb[19].mxu1  ;;  %v9033_v18 = vadd.f32 %v6706_v38, %v8917_v33 }
 0x587   : > { %v6721_v42 = vpop.f32.mrb[20].mxu1 }
 0x588   : > { %v1918_v22 = vpop.f32.mrb[21].mxu1  ;;  %v1927_v46 = vadd.f32 %v6721_v42, %v8913_v31 }
 0x589   : > { %v1919_v24 = vadd.f32 %v1918_v22, %v8915_v32  ;;  %v6722_v43 = vpop.f32.mrb[22].mxu1 }
 0x58a   : > { %v1921_v44 = vpop.f32.mrb[23].mxu1  ;;  %v1930_v50 = vadd.f32 %v6722_v43, %v8917_v33  ;;  %v1939_v51 = vsel %vm1519_vm0, %v1927_v46, -inf }
 0x58b   : > { %v1922_v47 = vadd.f32 %v1921_v44, %v8920_v36  ;;  %v1933_v48 = vsel %vm1519_vm0, %v1919_v24, -inf }
 0x58c   : > { %1934 = vmax.xlane.f32.xlu0 %v1933_v48  ;;  %v1942_v52 = vsel %vm1519_vm0, %v1930_v50, -inf }
 0x58d   : > { %v1936_v49 = vsel %vm1519_vm0, %v1922_v47, -inf }
 0x58e   : > { %1937 = vmax.xlane.f32.xlu1 %v1936_v49 }
 0x590   : > { %1940 = vmax.xlane.f32.xlu0 %v1939_v51 }
 0x594   : > { %1943 = vmax.xlane.f32.xlu0 %v1942_v52 }
 0x59f   : > { %1981 = vrot.lane.b32.xlu1 %v8951_v26, %s8299_s6 }
 0x619   : > { %v1935_v55 = vpop.xlane.xlu0 %1934 }
 0x61a   : > { %v1945_v56 = vsub.f32 %v1919_v24, %v1935_v55 }
 0x61b   : > { %v1938_v57 = vpop.xlane.xlu1 %1937 }
 0x61c   : > { %v1949_v62 = vmul.f32 1.442695, %v1945_v56  ;;  %v1946_v63 = vsub.f32 %v1922_v47, %v1938_v57 }
 0x61d   : > { %v1941_v58 = vpop.xlane.xlu0 %1940 }
 0x61e   : > { %v1947_v59 = vsub.f32 %v1927_v46, %v1941_v58  ;;  %v1951_v4 = vmul.f32 1.442695, %v1946_v63  ;;  %v7432_v63 = vld [vmem:[#allocation11 + $0x8] sm:$0xff]  }
 0x61f   : > { %v1982_v35 = vpop.permute.xlu1 %1981 }
 0x620   : > { %v1953_v1 = vmul.f32 1.442695, %v1947_v59  ;;  %v7431_v59 = vld [vmem:[#allocation11] sm:$0xff]  }
 0x621   : > { %v1944_v2 = vpop.xlane.xlu0 %1943 }
 0x622   : > { %7511 = vpow2.f32 %v1953_v1  ;;  %v1948_v3 = vsub.f32 %v1930_v50, %v1944_v2  ;;  %v7433_v2 = vld [vmem:[#allocation11 + $0x10] sm:$0xff]  }
 0x623   : > { %7513 = vpow2.f32 %v1949_v62 }
 0x624   : > { %v1955_v5 = vmul.f32 1.442695, %v1948_v3  ;;  %v7434_v3 = vld [vmem:[#allocation11 + $0x18] sm:$0xff]  }
 0x626   : > { %7515 = vpow2.f32 %v1955_v5  ;;  %v7436_v5 = vld [vmem:[#allocation11 + $0x28] sm:$0xff]  }
 0x627   : > { %7517 = vpow2.f32 %v1951_v4  ;;  %v7435_v4 = vld [vmem:[#allocation11 + $0x20] sm:$0xff]  }
 0x62c   : > { %v7512_v6 = vpop.eup %7511 }
 0x62d   : > { %v1963_v9 = vsel %vm1519_vm0, %v7512_v6, 0.0  ;;  %v7514_v10 = vpop.eup %7513 }
 0x62e   : > { %1964 = vadd.xlane.f32.xlu0 %v1963_v9  ;;  %v1957_v12 = vsel %vm1519_vm0, %v7514_v10, 0.0  ;;  %v7438_v9 = vld [vmem:[#allocation11 + $0x38] sm:$0xff]  }
 0x630   : > { %v7516_v11 = vpop.eup %7515 }
 0x631   : > { %v1966_v13 = vsel %vm1519_vm0, %v7516_v11, 0.0  ;;  %v7518_v14 = vpop.eup %7517 }
 0x632   : > { %1958 = vadd.xlane.f32.xlu0 %v1957_v12  ;;  %1967 = vadd.xlane.f32.xlu1 %v1966_v13  ;;  %v1960_v15 = vsel %vm1519_vm0, %v7518_v14, 0.0 }
 0x636   : > { %1961 = vadd.xlane.f32.xlu1 %v1960_v15 }
 0x647   : > { %2044 = vrot.lane.b32.xlu1 %v8882_v40, %s8300_s9  ;;  %v1755_v40 = vsel %vm1519_vm0, %v9025_v16, -inf }
 0x648   : > { %1979 = vrot.lane.b32.xlu0 %v8953_v45, %s8299_s6 }
 0x64b   : > { %2046 = vrot.lane.b32.xlu1 %v8896_v53, %s8300_s9  ;;  %v9036_v53 = vadd.f32 %v1743_v39, %v8920_v36 }
 0x64c   : > { %2040 = vrot.lane.b32.xlu0 %v8884_v41, %s8300_s9  ;;  %v1761_v41 = vsel %vm1519_vm0, %v9028_v17, -inf }
 0x64d   : > { %v1758_v20 = vsel %vm1519_vm0, %v9036_v53, -inf }
 0x64f   : > { %2042 = vrot.lane.b32.xlu1 %v8898_v54, %s8300_s9  ;;  %v1764_v54 = vsel %vm1519_vm0, %v9033_v18, -inf }
 0x66b   : > { %1756 = vmax.xlane.f32.xlu0 %v1755_v40 }
 0x66f   : > { %1762 = vmax.xlane.f32.xlu0 %v1761_v41 }
 0x673   : > { %1765 = vmax.xlane.f32.xlu0 %v1764_v54  ;;  %1759 = vmax.xlane.f32.xlu1 %v1758_v20 }
 0x6bb   : > { %v1965_v37 = vpop.xlane.xlu0 %1964 }
 0x6bf   : > { %v1968_v42 = vpop.xlane.xlu1 %1967  ;;  %v1959_v38 = vpop.xlane.xlu0 %1958 }
 0x6c0   : > { %7519 = vrcp.f32 %v1968_v42 }
 0x6c1   : > { %7521 = vrcp.f32 %v1959_v38 }
 0x6c2   : > { %7523 = vrcp.f32 %v1965_v37 }
 0x6c3   : > { %v1962_v39 = vpop.xlane.xlu1 %1961  ;;  %v1980_v22 = vpop.permute.xlu0 %1979 }
 0x6c4   : > { %7525 = vrcp.f32 %v1962_v39  ;;  %6723 = vmatprep.subr.bf16.mxu1 %v1980_v22 }
 0x6c5   : > { %6724 = vmatpush3.bf16.msra.mxu1 %v1980_v22 }
 0x6c6   : > { %6725 = vmatprep.subr.bf16.mxu1 %v1982_v35 }
 0x6c7   : > { %v2045_v24 = vpop.permute.xlu1 %2044  ;;  %v2041_v56 = vpop.permute.xlu0 %2040 }
 0x6c8   : > { %v2055_v57 = vsel %vm1519_vm0, %v2045_v24, 0 }
 0x6c9   : > { %6726 = vmatpush3.bf16.msra.mxu1 %v1982_v35 }
 0x6ca   : > { %7085 = vmatprep.subr.msk.bf16.mxu1 %vm1519_vm0, %v2045_v24  ;;  %v7520_v43 = vpop.eup %7519 }
 0x6cb   : > { %v7522_v44 = vpop.eup %7521  ;;  %v1976_v48 = vmul.f32 %v7520_v43, %v7516_v11  ;;  %v2047_v58 = vpop.permute.xlu1 %2046 }
 0x6cc   : > { %v7524_v46 = vpop.eup %7523  ;;  %v1973_v49 = vmul.f32 %v7522_v44, %v7514_v10  ;;  %v2058_v62 = vsel %vm1519_vm0, %v2047_v58, 0 }
 0x6cd   : > { %v1975_v51 = vmul.f32 %v7524_v46, %v7512_v6  ;;  %v7437_v6 = vld [vmem:[#allocation11 + $0x30] sm:$0xff]  }
 0x6ce   : > { %v7526_v47 = vpop.eup %7525 }
 0x6cf   : > { %v1974_v50 = vmul.f32 %v7526_v47, %v7518_v14  ;;  %v1978_v55 = vpack.c.bf16 %v1976_v48, %v1975_v51  ;;  %v2043_v1 = vpop.permute.xlu1 %2042 }
 0x6d1   : > { %v1977_v52 = vpack.c.bf16 %v1974_v50, %v1973_v49 }
 0x6d3   : > { %6727 = vmatprep.mubr.msk.bf16.mxu1 %vm1519_vm0, %v1977_v52 }
 0x6d4   : > { %6728 = vmatmul.mubr.msk.bf16.vlgmr.msra.gmra.mrb[24].mxu1 %vm1519_vm0, %v1978_v55 }
 0x6d5   : > { %6732 = vmatpush3.bf16.xpose.msra.mxu1 %v2055_v57  ;;  %6735 = vmatprep.mubr.msk.bf16.mxu1 %vm1519_vm0, %v2041_v56 }
 0x6d6   : > { %7086 = vmatprep.subr.msk.bf16.mxu1 %vm1519_vm0, %v2047_v58 }
 0x6dd   : > { %6734 = vmatpush3.bf16.xpose.msra.mxu1 %v2058_v62 }
 0x6de   : > { %6767 = vmatprep.subr.bf16.mxu1 %v7431_v59 }
 0x6e4   : > { %6736 = vmatmul.mubr.msk.bf16.vlgmr.msra.gmra.mrb[28].mxu1 %vm1519_vm0, %v2043_v1 }
 0x6e5   : > { %6768 = vmatpush3.bf16.msra.mxu1 %v7431_v59 }
 0x6e6   : > { %6769 = vmatprep.subr.bf16.mxu1 %v7432_v63 }
 0x6e9   : > { %6770 = vmatpush3.bf16.msra.mxu1 %v7432_v63 }
 0x6ea   : > { %6771 = vmatprep.subr.bf16.mxu1 %v7433_v2 }
 0x6ed   : > { %6772 = vmatpush3.bf16.msra.mxu1 %v7433_v2 }
 0x6ee   : > { %6773 = vmatprep.subr.bf16.mxu1 %v7434_v3 }
 0x6f1   : > { %6774 = vmatpush3.bf16.msra.mxu1 %v7434_v3 }
 0x6f2   : > { %6775 = vmatprep.subr.bf16.mxu1 %v7435_v4 }
 0x6f5   : > { %6776 = vmatpush3.bf16.msra.mxu1 %v7435_v4 }
 0x6f6   : > { %6777 = vmatprep.subr.bf16.mxu1 %v7436_v5 }
 0x6f8   : > { %v1757_v10 = vpop.xlane.xlu0 %1756 }
 0x6f9   : > { %6778 = vmatpush3.bf16.msra.mxu1 %v7436_v5  ;;  %v1767_v20 = vsub.f32 %v9025_v16, %v1757_v10 }
 0x6fa   : > { %6779 = vmatprep.subr.bf16.mxu1 %v7437_v6 }
 0x6fb   : > { %v1771_v42 = vmul.f32 1.442695, %v1767_v20 }
 0x6fc   : > { %v1763_v40 = vpop.xlane.xlu0 %1762 }
 0x6fd   : > { %6780 = vmatpush3.bf16.msra.mxu1 %v7437_v6  ;;  %v1769_v38 = vsub.f32 %v9028_v17, %v1763_v40  ;;  %7527 = vpow2.f32 %v1771_v42 }
 0x6fe   : > { %6781 = vmatprep.subr.bf16.mxu1 %v7438_v9 }
 0x6ff   : > { %v1775_v24 = vmul.f32 1.442695, %v1769_v38 }
 0x700   : > { %v1760_v54 = vpop.xlane.xlu1 %1759  ;;  %v1766_v37 = vpop.xlane.xlu0 %1765 }
 0x701   : > { %6782 = vmatpush3.bf16.msra.mxu1 %v7438_v9  ;;  %v1768_v35 = vsub.f32 %v9036_v53, %v1760_v54  ;;  %v1770_v22 = vsub.f32 %v9033_v18, %v1766_v37 }
 0x702   : > { %6795 = vmatprep.subr.bf16.mxu1 %v8936_v61 }
 0x703   : > { %v1773_v39 = vmul.f32 1.442695, %v1768_v35  ;;  %v1777_v44 = vmul.f32 1.442695, %v1770_v22 }
 0x705   : > { %7529 = vpow2.f32 %v1773_v39 }
 0x706   : > { %7531 = vpow2.f32 %v1775_v24 }
 0x707   : > { %7533 = vpow2.f32 %v1777_v44  ;;  %v7528_v52 = vpop.eup %7527 }
 0x70f   : > { %v7530_v55 = vpop.eup %7529 }
 0x710   : > { %v1782_v56 = vsel %vm1519_vm0, %v7530_v55, 0.0 }
 0x7a7   : > { %v9053_v11 = vpop.f32.mrb[24].mxu1 }
 0x7a8   : > { %v9055_v12 = vpop.f32.mrb[25].mxu1 }
 0x7a9   : > { %v9057_v13 = vpop.f32.mrb[26].mxu1 }
 0x7aa   : > { %v7270_v14 = vpack.i.bf16 %v9057_v13, %v9053_v11  ;;  %v9061_v15 = vpop.f32.mrb[27].mxu1 }
 0x7ab   : > { %v7265_v41 = vpack.i.bf16 %v9061_v15, %v9055_v12 }
 0x7b7   : > { %v6737_v43 = vpop.f32.mrb[28].mxu1 }
 0x7b8   : > { %v2094_v46 = vpop.f32.mrb[29].mxu1  ;;  %v2103_v53 = vadd.f32 %v6737_v43, %v8913_v31  ;;  %v1779_v31 = vsel %vm1519_vm0, %v7528_v52, 0.0 }
 0x7b9   : > { %v2095_v47 = vadd.f32 %v2094_v46, %v8915_v32  ;;  %v6738_v48 = vpop.f32.mrb[30].mxu1 }
 0x7ba   : > { %v2097_v16 = vpop.f32.mrb[31].mxu1  ;;  %v2106_v18 = vadd.f32 %v6738_v48, %v8917_v33  ;;  %v2115_v51 = vsel %vm1519_vm0, %v2103_v53, -inf }
 0x7bb   : > { %v2098_v49 = vadd.f32 %v2097_v16, %v8920_v36  ;;  %v2109_v17 = vsel %vm1519_vm0, %v2095_v47, -inf  ;;  %v9078_v36 = vpop.eup %7531 }
 0x7bc   : > { %2110 = vmax.xlane.f32.xlu0 %v2109_v17  ;;  %v2118_v32 = vsel %vm1519_vm0, %v2106_v18, -inf  ;;  %v9081_v57 = vpop.eup %7533  ;;  %v1785_v33 = vsel %vm1519_vm0, %v9078_v36, 0.0 }
 0x7bd   : > { %v2112_v50 = vsel %vm1519_vm0, %v2098_v49, -inf  ;;  %v1788_v58 = vsel %vm1519_vm0, %v9081_v57, 0.0 }
 0x7be   : > { %2113 = vmax.xlane.f32.xlu1 %v2112_v50 }
 0x7c0   : > { %2116 = vmax.xlane.f32.xlu0 %v2115_v51 }
 0x7c2   : > { %2119 = vmax.xlane.f32.xlu1 %v2118_v32 }
 0x7c4   : > { %1780 = vadd.xlane.f32.xlu0 %v1779_v31 }
 0x7c6   : > { %1783 = vadd.xlane.f32.xlu1 %v1782_v56 }
 0x7c8   : > { %1786 = vadd.xlane.f32.xlu0 %v1785_v33 }
 0x7ca   : > { %1789 = vadd.xlane.f32.xlu1 %v1788_v58 }
 0x7db   : > { %1805 = vrot.lane.b32.xlu1 %v8951_v26, %s8298_s16 }
 0x7df   : > { %2155 = vrot.lane.b32.xlu1 %v8953_v45, %s8300_s9 }
 0x849   : > { %v2111_v59 = vpop.xlane.xlu0 %2110 }
 0x84a   : > { %v2121_v62 = vsub.f32 %v2095_v47, %v2111_v59 }
 0x84b   : > { %v2114_v63 = vpop.xlane.xlu1 %2113 }
 0x84c   : > { %v2125_v1 = vmul.f32 1.442695, %v2121_v62  ;;  %v2122_v3 = vsub.f32 %v2098_v49, %v2114_v63 }
 0x84d   : > { %v2117_v2 = vpop.xlane.xlu0 %2116 }
 0x84e   : > { %v2123_v4 = vsub.f32 %v2103_v53, %v2117_v2  ;;  %7535 = vpow2.f32 %v2125_v1  ;;  %v2127_v40 = vmul.f32 1.442695, %v2122_v3 }
 0x84f   : > { %v2120_v5 = vpop.xlane.xlu1 %2119 }
 0x850   : > { %v2129_v6 = vmul.f32 1.442695, %v2123_v4  ;;  %v2124_v9 = vsub.f32 %v2106_v18, %v2120_v5  ;;  %v7439_v5 = vld [vmem:[#allocation10] sm:$0xff]  }
 0x851   : > { %v1781_v10 = vpop.xlane.xlu0 %1780 }
 0x852   : > { %7537 = vpow2.f32 %v2129_v6  ;;  %v2131_v54 = vmul.f32 1.442695, %v2124_v9  ;;  %v7440_v9 = vld [vmem:[#allocation10 + $0x8] sm:$0xff]  }
 0x853   : > { %7539 = vrcp.f32 %v1781_v10  ;;  %v1784_v20 = vpop.xlane.xlu1 %1783  ;;  %v7441_v10 = vld [vmem:[#allocation10 + $0x10] sm:$0xff]  }
 0x854   : > { %7541 = vpow2.f32 %v2131_v54  ;;  %v7443_v54 = vld [vmem:[#allocation10 + $0x20] sm:$0xff]  }
 0x855   : > { %7543 = vrcp.f32 %v1784_v20  ;;  %v1787_v17 = vpop.xlane.xlu0 %1786  ;;  %v7444_v20 = vld [vmem:[#allocation10 + $0x28] sm:$0xff]  }
 0x856   : > { %7545 = vpow2.f32 %v2127_v40  ;;  %v7442_v40 = vld [vmem:[#allocation10 + $0x18] sm:$0xff]  }
 0x857   : > { %v1790_v53 = vpop.xlane.xlu1 %1789 }
 0x858   : > { %v7536_v35 = vpop.eup %7535  ;;  %7547 = vrcp.f32 %v1790_v53 }
 0x859   : > { %v2133_v47 = vsel %vm1519_vm0, %v7536_v35, 0.0  ;;  %7549 = vrcp.f32 %v1787_v17 }
 0x85b   : > { %v1806_v49 = vpop.permute.xlu1 %1805 }
 0x85c   : > { %v7538_v37 = vpop.eup %7537 }
 0x85d   : > { %v7540_v42 = vpop.eup %7539  ;;  %v2139_v38 = vsel %vm1519_vm0, %v7538_v37, 0.0 }
 0x85e   : > { %v7542_v39 = vpop.eup %7541  ;;  %2140 = vadd.xlane.f32.xlu0 %v2139_v38  ;;  %v1795_v44 = vmul.f32 %v7540_v42, %v7528_v52 }
 0x85f   : > { %v7544_v22 = vpop.eup %7543  ;;  %v2142_v24 = vsel %vm1519_vm0, %v7542_v39, 0.0  ;;  %v2156_v18 = vpop.permute.xlu1 %2155 }
 0x860   : > { %v7546_v43 = vpop.eup %7545  ;;  %2143 = vadd.xlane.f32.xlu1 %v2142_v24  ;;  %v1796_v46 = vmul.f32 %v7544_v22, %v7530_v55 }
 0x861   : > { %v2136_v16 = vsel %vm1519_vm0, %v7546_v43, 0.0 }
 0x862   : > { %2134 = vadd.xlane.f32.xlu0 %v2133_v47  ;;  %v1799_v48 = vpack.c.bf16 %v1796_v46, %v1795_v44  ;;  %v7548_v55 = vpop.eup %7547 }
 0x864   : > { %6711 = vmatprep.mubr.msk.bf16.mxu0 %vm1519_vm0, %v1799_v48  ;;  %2137 = vadd.xlane.f32.xlu1 %v2136_v16 }
 0x875   : > { %2157 = vrot.lane.b32.xlu1 %v8951_v26, %s8300_s9  ;;  %v7550_v26 = vpop.eup %7549 }
 0x876   : > { %v1797_v56 = vmul.f32 %v7550_v26, %v9078_v36 }
 0x878   : > { %1803 = vrot.lane.b32.xlu0 %v8953_v45, %s8298_s16  ;;  %v1798_v45 = vmul.f32 %v7548_v55, %v9081_v57 }
 0x87a   : > { %v1800_v58 = vpack.c.bf16 %v1798_v45, %v1797_v56 }
 0x8eb   : > { %v2141_v50 = vpop.xlane.xlu0 %2140 }
 0x8ed   : > { %v2144_v51 = vpop.xlane.xlu1 %2143 }
 0x8ef   : > { %v2135_v52 = vpop.xlane.xlu0 %2134 }
 0x8f0   : > { %7551 = vrcp.f32 %v2135_v52 }
 0x8f1   : > { %7553 = vrcp.f32 %v2144_v51  ;;  %v2138_v32 = vpop.xlane.xlu1 %2137 }
 0x8f2   : > { %7555 = vrcp.f32 %v2138_v32 }
 0x8f3   : > { %7557 = vrcp.f32 %v2141_v50  ;;  %v1804_v31 = vpop.permute.xlu0 %1803 }
 0x8f4   : > { %6707 = vmatprep.subr.bf16.mxu0 %v1804_v31 }
 0x8f5   : > { %6708 = vmatpush3.bf16.msra.mxu0 %v1804_v31  ;;  %v2158_v1 = vpop.permute.xlu1 %2157 }
 0x8f6   : > { %6709 = vmatprep.subr.bf16.mxu0 %v1806_v49 }
 0x8f9   : > { %6710 = vmatpush3.bf16.msra.mxu0 %v1806_v49 }
 0x8fa   : > { %v7552_v33 = vpop.eup %7551  ;;  %6739 = vmatprep.subr.bf16.mxu0 %v2156_v18 }
 0x8fb   : > { %v7554_v59 = vpop.eup %7553  ;;  %v2149_v2 = vmul.f32 %v7552_v33, %v7536_v35  ;;  %v7445_v35 = vld [vmem:[#allocation10 + $0x30] sm:$0xff]  }
 0x8fc   : > { %v7556_v62 = vpop.eup %7555  ;;  %6712 = vmatmul.mubr.msk.bf16.vlgmr.msra.gmra.mrb[12].mxu0 %vm1519_vm0, %v1800_v58  ;;  %v2152_v4 = vmul.f32 %v7554_v59, %v7542_v39 }
 0x8fd   : > { %v7558_v63 = vpop.eup %7557  ;;  %6740 = vmatpush3.bf16.msra.mxu0 %v2156_v18  ;;  %v2150_v3 = vmul.f32 %v7556_v62, %v7546_v43 }
 0x8fe   : > { %6741 = vmatprep.subr.bf16.mxu0 %v2158_v1  ;;  %v2151_v6 = vmul.f32 %v7558_v63, %v7538_v37  ;;  %v7446_v37 = vld [vmem:[#allocation10 + $0x38] sm:$0xff]  }
 0x8ff   : > { %v2153_v57 = vpack.c.bf16 %v2150_v3, %v2149_v2 }
 0x900   : > { %v2154_v36 = vpack.c.bf16 %v2152_v4, %v2151_v6  ;;  %v9144_v6 = vsel %vm1519_vm0, %v8938_v7, 0 }
 0x901   : > { %6742 = vmatpush3.bf16.msra.mxu0 %v2158_v1  ;;  %6743 = vmatprep.mubr.msk.bf16.mxu0 %vm1519_vm0, %v2153_v57  ;;  %v9137_v57 = vsel %vm1519_vm0, %v8934_v60, 0 }
 0x902   : > { %6747 = vmatprep.subr.bf16.mxu0 %v7439_v5 }
 0x904   : > { %6744 = vmatmul.mubr.msk.bf16.vlgmr.msra.gmra.mrb[16].mxu0 %vm1519_vm0, %v2154_v36  ;;  %v6275_v36 = vld [vmem:[%s10105_s20] ss:$0 sm:$0xff] }
 0x905   : > { %6748 = vmatpush3.bf16.msra.mxu0 %v7439_v5 }
 0x906   : > { %6749 = vmatprep.subr.bf16.mxu0 %v7440_v9 }
 0x909   : > { %6750 = vmatpush3.bf16.msra.mxu0 %v7440_v9 }
 0x90a   : > { %6751 = vmatprep.subr.bf16.mxu0 %v7441_v10 }
 0x90d   : > { %6752 = vmatpush3.bf16.msra.mxu0 %v7441_v10 }
 0x90e   : > { %6753 = vmatprep.subr.bf16.mxu0 %v7442_v40 }
 0x911   : > { %6754 = vmatpush3.bf16.msra.mxu0 %v7442_v40 }
 0x912   : > { %6755 = vmatprep.subr.bf16.mxu0 %v7443_v54 }
 0x915   : > { %6756 = vmatpush3.bf16.msra.mxu0 %v7443_v54 }
 0x916   : > { %6757 = vmatprep.subr.bf16.mxu0 %v7444_v20 }
 0x919   : > { %6758 = vmatpush3.bf16.msra.mxu0 %v7444_v20  ;;  %v7807_v20 = vld [vmem:[%s8810_s18 + $0x10] sm:$0xff] }
 0x91a   : > { %6759 = vmatprep.subr.bf16.mxu0 %v7445_v35 }
 0x91d   : > { %6760 = vmatpush3.bf16.msra.mxu0 %v7445_v35 }
 0x91e   : > { %6761 = vmatprep.subr.bf16.mxu0 %v7446_v37 }
 0x921   : > { %6762 = vmatpush3.bf16.msra.mxu0 %v7446_v37 }
 0x922   : > { %7087 = vmatprep.subr.msk.bf16.mxu0 %vm1519_vm0, %v8934_v60 }
 0x9cf   : > { %v6713_v42 = vpop.f32.mrb[12].mxu0 }
 0x9d0   : > { %v1849_v38 = vpop.f32.mrb[13].mxu0 }
 0x9d1   : > { %v6714_v39 = vpop.f32.mrb[14].mxu0 }
 0x9d2   : > { %v7260_v22 = vpack.i.bf16 %v6714_v39, %v6713_v42  ;;  %v1852_v24 = vpop.f32.mrb[15].mxu0 }
 0x9d3   : > { %v7255_v43 = vpack.i.bf16 %v1852_v24, %v1849_v38 }
 0x9d4   : > { %7261 = vrot.lane.b32.xlu1 %v7260_v22, %s8300_s9  ;;  %v7808_v22 = vld [vmem:[%s8810_s18 + $0x8] sm:$0xff] }
 0x9d5   : > { %7256 = vrot.lane.b32.xlu0 %v7255_v43, %s8300_s9  ;;  %v7809_v43 = vld [vmem:[%s8810_s18] sm:$0xff] }
 0x9d7   : > { %v6745_v44 = vpop.f32.mrb[16].mxu0 }
 0x9d8   : > { %7271 = vrot.lane.b32.xlu1 %v7270_v14, %s8299_s6  ;;  %v2201_v46 = vpop.f32.mrb[17].mxu0 }
 0x9d9   : > { %7266 = vrot.lane.b32.xlu0 %v7265_v41, %s8299_s6  ;;  %v6746_v47 = vpop.f32.mrb[18].mxu0 }
 0x9da   : > { %v7280_v48 = vpack.i.bf16 %v6746_v47, %v6745_v44  ;;  %v2204_v16 = vpop.f32.mrb[19].mxu0 }
 0x9db   : > { %v7275_v53 = vpack.i.bf16 %v2204_v16, %v2201_v46  ;;  %v7810_v46 = vld [vmem:[%s8810_s18 + $0x18] sm:$0xff]  ;;  %s10106_s18 = sld [smem:[#allocation40_spill]] }
 0x9dc   : > { %7281 = vrot.lane.b32.xlu1 %v7280_v48, %s8298_s16 }
 0x9dd   : > { %7276 = vrot.lane.b32.xlu0 %v7275_v53, %s8298_s16 }
 0xa46   : > { %v7262_v49 = vpop.permute.xlu1 %7261 }
 0xa47   : > { %v7257_v17 = vpop.permute.xlu0 %7256  ;;  %v7264_v18 = vunpack.i.h.bf16 %v7262_v49  ;;  %v7263_v50 = vunpack.i.l.bf16 %v7262_v49 }
 0xa48   : > { %v7259_v13 = vunpack.i.h.bf16 %v7257_v17  ;;  %v7258_v14 = vunpack.i.l.bf16 %v7257_v17 }
 0xa49   : > { %v2267_v41 = vsel %vm1519_vm0, %v8996_v19, %v7264_v18  ;;  %v2266_v55 = vsel %vm1519_vm0, %v8992_v21, %v7263_v50 }
 0xa4a   : > { %v7272_v11 = vpop.permute.xlu1 %7271  ;;  %v2265_v26 = vsel %vm1519_vm0, %v8998_v34, %v7259_v13  ;;  %v2264_v45 = vsel %vm1519_vm0, %v8994_v23, %v7258_v14 }
 0xa4b   : > { %v7267_v51 = vpop.permute.xlu0 %7266  ;;  %v7274_v52 = vunpack.i.h.bf16 %v7272_v11  ;;  %v7273_v32 = vunpack.i.l.bf16 %v7272_v11 }
 0xa4c   : > { %v7269_v12 = vunpack.i.h.bf16 %v7267_v51  ;;  %v7268_v15 = vunpack.i.l.bf16 %v7267_v51 }
 0xa4d   : > { %v2271_v59 = vsel %vm2268_vm1, %v2266_v55, %v7273_v32  ;;  %v2272_v62 = vsel %vm2268_vm1, %v2267_v41, %v7274_v52 }
 0xa4e   : > { %v7282_v31 = vpop.permute.xlu1 %7281  ;;  %v2269_v2 = vsel %vm2268_vm1, %v2264_v45, %v7268_v15  ;;  %v2270_v34 = vsel %vm2268_vm1, %v2265_v26, %v7269_v12 }
 0xa4f   : > { %v7284_v56 = vunpack.i.h.bf16 %v7282_v31  ;;  %v7283_v33 = vunpack.i.l.bf16 %v7282_v31  ;;  %v7277_v58 = vpop.permute.xlu0 %7276 }
 0xa50   : > { %v7279_v63 = vunpack.i.h.bf16 %v7277_v58  ;;  %v7278_v19 = vunpack.i.l.bf16 %v7277_v58 }
 0xa51   : > { %v2277_v1 = vsel %vm2273_vm2, %v2272_v62, %v7284_v56  ;;  %v2276_v21 = vsel %vm2273_vm2, %v2271_v59, %v7283_v33 }
 0xa52   : > { %v2274_v3 = vsel %vm2273_vm2, %v2269_v2, %v7278_v19  ;;  %v2275_v23 = vsel %vm2273_vm2, %v2270_v34, %v7279_v63  ;;  %v2279_v4 = vpack.c.bf16 %v2277_v1, %v2276_v21 }
 0xa53   : > { %v2278_v5 = vpack.c.bf16 %v2275_v23, %v2274_v3 }
 0xa55   : > { %6763 = vmatprep.mubr.bf16.mxu0 %v2278_v5 }
 0xa56   : > { %6764 = vmatmul.mubr.bf16.vlgmr.msra.gmra.mrb[20].mxu0 %v2279_v4 }
 0xa57   : > { %6788 = vmatpush3.bf16.xpose.msra.mxu0 %v9137_v57 }
 0xa58   : > { %7088 = vmatprep.subr.msk.bf16.mxu0 %vm1519_vm0, %v8938_v7 }
 0xa5f   : > { %6790 = vmatpush3.bf16.xpose.msra.mxu0 %v9144_v6 }
 0xb29   : > { %v6765_v9 = vpop.f32.mrb[20].mxu0 }
 0xb2a   : > { %v2377_v10 = vadd.f32 %v6765_v9, %v6275_v36  ;;  %v2368_v40 = vpop.f32.mrb[21].mxu0 }
 0xb2b   : > { %v6766_v54 = vpop.f32.mrb[22].mxu0  ;;  %v2369_v37 = vadd.f32 %v6275_v36, %v2368_v40 }
 0xb2c   : > { %v9151_v35 = vadd.f32 %v7807_v20, %v2377_v10  ;;  %v2371_v42 = vpop.f32.mrb[23].mxu0  ;;  %v2380_v39 = vadd.f32 %v6766_v54, %v6275_v36 }
 0xb2d   : > { %v2372_v38 = vadd.f32 %v6275_v36, %v2371_v42  ;;  %v2383_v44 = vadd.f32 %v7809_v43, %v2369_v37  ;;  %v6284_v36 = vld [vmem:[%s10106_s18] ss:$0 sm:$0xff] }
 0xb2e   : > { %2391 = vadd.xlane.f32.xlu0 %v9151_v35  ;;  %v2386_v47 = vadd.f32 %v7810_v46, %v2380_v39  ;;  %v2402_v49 = vmul.f32 %v9151_v35, %v9151_v35 }
 0xb2f   : > { %v2384_v24 = vadd.f32 %v7808_v22, %v2372_v38  ;;  %v2400_v53 = vmul.f32 %v2383_v44, %v2383_v44  ;;  %v6285_v38 = vld [vmem:[%s10107_s23] ss:$0 sm:$0xff] }
 0xb30   : > { %v2403_v16 = vmul.f32 %v2386_v47, %v2386_v47 }
 0xb31   : > { %2389 = vadd.xlane.f32.xlu1 %v2384_v24  ;;  %v2401_v48 = vmul.f32 %v2384_v24, %v2384_v24 }
 0xb32   : > { %2387 = vadd.xlane.f32.xlu0 %v2383_v44 }
 0xb35   : > { %2406 = vadd.xlane.f32.xlu1 %v2401_v48 }
 0xb36   : > { %2393 = vadd.xlane.f32.xlu0 %v2386_v47 }
 0xb39   : > { %2410 = vadd.xlane.f32.xlu1 %v2403_v16 }
 0xb3a   : > { %2404 = vadd.xlane.f32.xlu0 %v2400_v53 }
 0xb3e   : > { %2408 = vadd.xlane.f32.xlu0 %v2402_v49 }
 0xbbb   : > { %v2392_v17 = vpop.xlane.xlu0 %2391 }
 0xbbc   : > { %v2398_v56 = vmul.f32 0.0078125, %v2392_v17  ;;  %v6286_v17 = vld [vmem:[%s9992_s10] ss:$0 sm:$0xff] }
 0xbbe   : > { %v2390_v18 = vpop.xlane.xlu1 %2389  ;;  %v2418_v1 = vmul.f32 %v2398_v56, %v2398_v56  ;;  %v2426_v39 = vsub.f32 %v9151_v35, %v2398_v56 }
 0xbbf   : > { %v2397_v50 = vmul.f32 0.0078125, %v2390_v18  ;;  %v2388_v11 = vpop.xlane.xlu0 %2387 }
 0xbc0   : > { %v2396_v32 = vmul.f32 0.0078125, %v2388_v11 }
 0xbc1   : > { %v2417_v14 = vmul.f32 %v2397_v50, %v2397_v50  ;;  %v2425_v4 = vsub.f32 %v2384_v24, %v2397_v50 }
 0xbc2   : > { %v2407_v13 = vpop.xlane.xlu1 %2406  ;;  %v2416_v33 = vmul.f32 %v2396_v32, %v2396_v32  ;;  %v2424_v10 = vsub.f32 %v2383_v44, %v2396_v32 }
 0xbc3   : > { %v2413_v51 = vmul.f32 0.0078125, %v2407_v13  ;;  %v2394_v52 = vpop.xlane.xlu0 %2393 }
 0xbc4   : > { %v2399_v12 = vmul.f32 0.0078125, %v2394_v52 }
 0xbc5   : > { %v2421_v15 = vsub.f32 %v2413_v51, %v2417_v14 }
 0xbc6   : > { %v2419_v41 = vmul.f32 %v2399_v12, %v2399_v12  ;;  %v2411_v55 = vpop.xlane.xlu1 %2410  ;;  %v2427_v40 = vsub.f32 %v2386_v47, %v2399_v12 }
 0xbc7   : > { %v2429_v31 = vadd.f32 1e-05, %v2421_v15  ;;  %v2415_v26 = vmul.f32 0.0078125, %v2411_v55  ;;  %v2405_v45 = vpop.xlane.xlu0 %2404 }
 0xbc8   : > { %v2412_v58 = vmul.f32 0.0078125, %v2405_v45 }
 0xbc9   : > { %7559 = vrsqrt.f32 %v2429_v31  ;;  %v2423_v59 = vsub.f32 %v2415_v26, %v2419_v41 }
 0xbca   : > { %v2420_v62 = vsub.f32 %v2412_v58, %v2416_v33 }
 0xbcb   : > { %v2431_v63 = vadd.f32 1e-05, %v2423_v59  ;;  %v2409_v19 = vpop.xlane.xlu0 %2408 }
 0xbcc   : > { %v2428_v21 = vadd.f32 1e-05, %v2420_v62  ;;  %v2414_v2 = vmul.f32 0.0078125, %v2409_v19 }
 0xbcd   : > { %7561 = vrsqrt.f32 %v2431_v63 }
 0xbce   : > { %7563 = vrsqrt.f32 %v2428_v21  ;;  %v2422_v34 = vsub.f32 %v2414_v2, %v2418_v1 }
 0xbd0   : > { %v2430_v3 = vadd.f32 1e-05, %v2422_v34 }
 0xbd2   : > { %7565 = vrsqrt.f32 %v2430_v3 }
 0xbd3   : > { %v7560_v23 = vpop.eup %7559 }
 0xbd4   : > { %v2437_v5 = vmul.f32 %v7560_v23, %v2425_v4 }
 0xbd6   : > { %v2447_v37 = vmul.f32 %v6284_v36, %v2437_v5 }
 0xbd7   : > { %v7562_v9 = vpop.eup %7561 }
 0xbd8   : > { %v7564_v54 = vpop.eup %7563  ;;  %v2439_v42 = vmul.f32 %v7562_v9, %v2427_v40  ;;  %v9168_v46 = vadd.f32 %v6285_v38, %v2447_v37 }
 0xbd9   : > { %v2436_v20 = vmul.f32 %v7564_v54, %v2424_v10 }
 0xbda   : > { %v2449_v16 = vmul.f32 %v6284_v36, %v2439_v42 }
 0xbdb   : > { %v2446_v22 = vmul.f32 %v6284_v36, %v2436_v20 }
 0xbdc   : > { %v7566_v24 = vpop.eup %7565  ;;  %v9174_v49 = vadd.f32 %v6285_v38, %v2449_v16 }
 0xbdd   : > { %v9166_v43 = vadd.f32 %v6285_v38, %v2446_v22  ;;  %v2438_v48 = vmul.f32 %v7566_v24, %v2426_v39 }
 0xbdf   : > { %v2460_v44 = vpack.c.bf16 %v9168_v46, %v9166_v43  ;;  %v2448_v47 = vmul.f32 %v6284_v36, %v2438_v48 }
 0xbe1   : > { %6783 = vmatprep.mubr.bf16.mxu1 %v2460_v44  ;;  %v9172_v53 = vadd.f32 %v6285_v38, %v2448_v47 }
 0xbe3   : > { %v2461_v35 = vpack.c.bf16 %v9174_v49, %v9172_v53 }
 0xbe5   : > { %6784 = vmatmul.mubr.bf16.vlgmr.msra.gmra.mrb[32].mxu1 %v2461_v35 }
 0xbe6   : > { %6796 = vmatpush3.bf16.msra.mxu1 %v8936_v61 }
 0xbe7   : > { %6797 = vmatprep.subr.bf16.mxu1 %v8940_v8 }
 0xbea   : > { %6798 = vmatpush3.bf16.msra.mxu1 %v8940_v8 }
 0xcb8   : > { %v6785_v18 = vpop.f32.mrb[32].mxu1 }
 0xcb9   : > { %v2559_v50 = vadd.f32 %v6785_v18, %v6286_v17  ;;  %v2550_v11 = vpop.f32.mrb[33].mxu1 }
 0xcba   : > { %v2551_v13 = vadd.f32 %v6286_v17, %v2550_v11  ;;  %v6786_v14 = vpop.f32.mrb[34].mxu1 }
 0xcbb   : > { %v2562_v51 = vadd.f32 %v6786_v14, %v6286_v17  ;;  %v2553_v52 = vpop.f32.mrb[35].mxu1  ;;  %v2567_v12 = vmul.f32 0.17677669, %v2559_v50 }
 0xcbc   : > { %v2554_v32 = vadd.f32 %v6286_v17, %v2553_v52  ;;  %v2565_v41 = vmul.f32 0.17677669, %v2551_v13 }
 0xcbd   : > { %v2568_v15 = vmul.f32 0.17677669, %v2562_v51 }
 0xcbe   : > { %v2566_v55 = vmul.f32 0.17677669, %v2554_v32 }
 0xcbf   : > { %v9184_v31 = vpack.c.bf16 %v2568_v15, %v2567_v12 }
 0xcc0   : > { %v9186_v26 = vpack.c.bf16 %v2566_v55, %v2565_v41 }
 0xcc2   : > { %6791 = vmatprep.mubr.msk.bf16.mxu0 %vm1519_vm0, %v9186_v26 }
 0xcc3   : > { %6792 = vmatmul.mubr.msk.bf16.vlgmr.msra.gmra.mrb[24].mxu0 %vm1519_vm0, %v9184_v31 }
 0xd96   : > { %v6793_v45 = vpop.f32.mrb[24].mxu0 }
 0xd97   : > { %v2617_v56 = vpop.f32.mrb[25].mxu0  ;;  %v2638_v63 = vsel %vm1519_vm0, %v6793_v45, -inf }
 0xd98   : > { %v6794_v33 = vpop.f32.mrb[26].mxu0  ;;  %v2632_v58 = vsel %vm1519_vm0, %v2617_v56, -inf }
 0xd99   : > { %2633 = vmax.xlane.f32.xlu0 %v2632_v58  ;;  %v2620_v59 = vpop.f32.mrb[27].mxu0  ;;  %v2641_v19 = vsel %vm1519_vm0, %v6794_v33, -inf }
 0xd9a   : > { %v2635_v62 = vsel %vm1519_vm0, %v2620_v59, -inf }
 0xd9b   : > { %2636 = vmax.xlane.f32.xlu1 %v2635_v62 }
 0xd9d   : > { %2639 = vmax.xlane.f32.xlu0 %v2638_v63 }
 0xd9f   : > { %2642 = vmax.xlane.f32.xlu1 %v2641_v19 }
 0xe26   : > { %v2634_v1 = vpop.xlane.xlu0 %2633 }
 0xe27   : > { %v2644_v21 = vsub.f32 %v2617_v56, %v2634_v1 }
 0xe28   : > { %v2637_v2 = vpop.xlane.xlu1 %2636 }
 0xe29   : > { %v2645_v34 = vsub.f32 %v2620_v59, %v2637_v2  ;;  %v2648_v5 = vmul.f32 1.442695, %v2644_v21 }
 0xe2a   : > { %v2640_v3 = vpop.xlane.xlu0 %2639 }
 0xe2b   : > { %v2650_v23 = vmul.f32 1.442695, %v2645_v34  ;;  %v2646_v4 = vsub.f32 %v6793_v45, %v2640_v3 }
 0xe2c   : > { %v2643_v36 = vpop.xlane.xlu1 %2642 }
 0xe2d   : > { %7567 = vpow2.f32 %v2650_v23  ;;  %v2652_v9 = vmul.f32 1.442695, %v2646_v4  ;;  %v2647_v10 = vsub.f32 %v6794_v33, %v2643_v36 }
 0xe2f   : > { %7569 = vpow2.f32 %v2652_v9  ;;  %v2654_v40 = vmul.f32 1.442695, %v2647_v10 }
 0xe30   : > { %7571 = vpow2.f32 %v2648_v5 }
 0xe31   : > { %7573 = vpow2.f32 %v2654_v40 }
 0xe37   : > { %v7568_v54 = vpop.eup %7567 }
 0xe38   : > { %v2659_v20 = vsel %vm1519_vm0, %v7568_v54, 0.0 }
 0xe39   : > { %v7570_v37 = vpop.eup %7569  ;;  %2660 = vadd.xlane.f32.xlu1 %v2659_v20 }
 0xe3a   : > { %v7572_v42 = vpop.eup %7571  ;;  %v2662_v38 = vsel %vm1519_vm0, %v7570_v37, 0.0 }
 0xe3b   : > { %v7574_v39 = vpop.eup %7573  ;;  %2663 = vadd.xlane.f32.xlu0 %v2662_v38  ;;  %v2656_v24 = vsel %vm1519_vm0, %v7572_v42, 0.0 }
 0xe3c   : > { %v2665_v22 = vsel %vm1519_vm0, %v7574_v39, 0.0 }
 0xe3d   : > { %2666 = vadd.xlane.f32.xlu1 %v2665_v22 }
 0xe3f   : > { %2657 = vadd.xlane.f32.xlu0 %v2656_v24 }
 0xe4e   : > { %2743 = vrot.lane.b32.xlu1 %v8938_v7, %s8298_s16 }
 0xe52   : > { %2735 = vrot.lane.b32.xlu1 %v9186_v26, %s8298_s16 }
 0xe55   : > { %2741 = vrot.lane.b32.xlu0 %v8934_v60, %s8298_s16 }
 0xe56   : > { %2737 = vrot.lane.b32.xlu1 %v9184_v31, %s8298_s16 }
 0xec6   : > { %v2661_v48 = vpop.xlane.xlu1 %2660 }
 0xec7   : > { %7575 = vrcp.f32 %v2661_v48 }
 0xec8   : > { %v2664_v16 = vpop.xlane.xlu0 %2663 }
 0xeca   : > { %v2667_v44 = vpop.xlane.xlu1 %2666 }
 0xecb   : > { %7577 = vrcp.f32 %v2667_v44 }
 0xecc   : > { %7579 = vrcp.f32 %v2664_v16  ;;  %v2658_v47 = vpop.xlane.xlu0 %2657 }
 0xecd   : > { %7581 = vrcp.f32 %v2658_v47 }
 0xece   : > { %v9212_v14 = vpop.permute.xlu1 %2743 }
 0xecf   : > { %v9226_v45 = vsel %vm1519_vm0, %v9212_v14, 0 }
 0xed0   : > { %v9208_v35 = vpop.permute.xlu0 %2741 }
 0xed1   : > { %7089 = vmatprep.subr.msk.bf16.mxu1 %vm1519_vm0, %v9208_v35  ;;  %v7576_v17 = vpop.eup %7575  ;;  %v9218_v55 = vsel %vm1519_vm0, %v9208_v35, 0 }
 0xed2   : > { %v2673_v52 = vmul.f32 %v7576_v17, %v7568_v54  ;;  %v2736_v41 = vpop.permute.xlu1 %2735 }
 0xed5   : > { %v7578_v18 = vpop.eup %7577 }
 0xed6   : > { %v7580_v50 = vpop.eup %7579  ;;  %v2675_v13 = vmul.f32 %v7578_v18, %v7574_v39  ;;  %v2738_v56 = vpop.permute.xlu1 %2737 }
 0xed7   : > { %v7582_v11 = vpop.eup %7581  ;;  %v2674_v32 = vmul.f32 %v7580_v50, %v7570_v37 }
 0xed8   : > { %v2672_v51 = vmul.f32 %v7582_v11, %v7572_v42 }
 0xed9   : > { %v2677_v15 = vpack.c.bf16 %v2675_v13, %v2674_v32 }
 0xeda   : > { %v2676_v12 = vpack.c.bf16 %v2673_v52, %v2672_v51 }
 0xedc   : > { %6799 = vmatprep.mubr.msk.bf16.mxu1 %vm1519_vm0, %v2676_v12 }
 0xedd   : > { %6800 = vmatmul.mubr.msk.bf16.vlgmr.msra.gmra.mrb[36].mxu1 %vm1519_vm0, %v2677_v15 }
 0xede   : > { %6804 = vmatpush3.bf16.xpose.msra.mxu1 %v9218_v55  ;;  %6807 = vmatprep.mubr.msk.bf16.mxu1 %vm1519_vm0, %v2736_v41 }
 0xedf   : > { %7090 = vmatprep.subr.msk.bf16.mxu1 %vm1519_vm0, %v9212_v14 }
 0xee6   : > { %6806 = vmatpush3.bf16.xpose.msra.mxu1 %v9226_v45 }
 0xeed   : > { %6808 = vmatmul.mubr.msk.bf16.vlgmr.msra.gmra.mrb[40].mxu1 %vm1519_vm0, %v2738_v56 }
 0xfb0   : > { %v9230_v33 = vpop.f32.mrb[36].mxu1 }
 0xfb1   : > { %v9232_v58 = vpop.f32.mrb[37].mxu1 }
 0xfb2   : > { %v9234_v59 = vpop.f32.mrb[38].mxu1 }
 0xfb3   : > { %v9236_v62 = vpop.f32.mrb[39].mxu1 }
 0xfc0   : > { %v6809_v63 = vpop.f32.mrb[40].mxu1 }
 0xfc1   : > { %v2791_v19 = vpop.f32.mrb[41].mxu1  ;;  %v2812_v3 = vsel %vm1519_vm0, %v6809_v63, -inf }
 0xfc2   : > { %v6810_v1 = vpop.f32.mrb[42].mxu1  ;;  %v2806_v21 = vsel %vm1519_vm0, %v2791_v19, -inf }
 0xfc3   : > { %2807 = vmax.xlane.f32.xlu0 %v2806_v21  ;;  %v2794_v2 = vpop.f32.mrb[43].mxu1  ;;  %v2815_v23 = vsel %vm1519_vm0, %v6810_v1, -inf }
 0xfc4   : > { %v2809_v34 = vsel %vm1519_vm0, %v2794_v2, -inf }
 0xfc5   : > { %2810 = vmax.xlane.f32.xlu1 %v2809_v34 }
 0xfc7   : > { %2813 = vmax.xlane.f32.xlu0 %v2812_v3 }
 0xfcb   : > { %2816 = vmax.xlane.f32.xlu0 %v2815_v23 }
 0xfd6   : > { %2856 = vrot.lane.b32.xlu1 %v8940_v8, %s8298_s16 }
0x1050   : > { %v2808_v4 = vpop.xlane.xlu0 %2807 }
0x1051   : > { %v2818_v5 = vsub.f32 %v2791_v19, %v2808_v4 }
0x1052   : > { %v2811_v36 = vpop.xlane.xlu1 %2810 }
0x1053   : > { %v2822_v40 = vmul.f32 1.442695, %v2818_v5  ;;  %v2819_v54 = vsub.f32 %v2794_v2, %v2811_v36 }
0x1054   : > { %v2814_v9 = vpop.xlane.xlu0 %2813 }
0x1055   : > { %v2820_v10 = vsub.f32 %v6809_v63, %v2814_v9  ;;  %v2824_v38 = vmul.f32 1.442695, %v2819_v54 }
0x1056   : > { %v9258_v50 = vpop.permute.xlu1 %2856 }
0x1057   : > { %v2826_v20 = vmul.f32 1.442695, %v2820_v10 }
0x1058   : > { %v2817_v37 = vpop.xlane.xlu0 %2816 }
0x1059   : > { %7583 = vpow2.f32 %v2826_v20  ;;  %v2821_v42 = vsub.f32 %v6810_v1, %v2817_v37 }
0x105a   : > { %7585 = vpow2.f32 %v2822_v40 }
0x105b   : > { %v2828_v39 = vmul.f32 1.442695, %v2821_v42 }
0x105d   : > { %7587 = vpow2.f32 %v2828_v39 }
0x105e   : > { %7589 = vpow2.f32 %v2824_v38 }
0x1063   : > { %v7584_v22 = vpop.eup %7583 }
0x1064   : > { %v2836_v24 = vsel %vm1519_vm0, %v7584_v22, 0.0  ;;  %v7586_v48 = vpop.eup %7585 }
0x1065   : > { %2837 = vadd.xlane.f32.xlu0 %v2836_v24  ;;  %v2830_v44 = vsel %vm1519_vm0, %v7586_v48, 0.0 }
0x1067   : > { %v7588_v16 = vpop.eup %7587 }
0x1068   : > { %v2839_v47 = vsel %vm1519_vm0, %v7588_v16, 0.0  ;;  %v7590_v17 = vpop.eup %7589 }
0x1069   : > { %2831 = vadd.xlane.f32.xlu0 %v2830_v44  ;;  %2840 = vadd.xlane.f32.xlu1 %v2839_v47  ;;  %v2833_v18 = vsel %vm1519_vm0, %v7590_v17, 0.0 }
0x106d   : > { %2834 = vadd.xlane.f32.xlu1 %v2833_v18 }
0x107e   : > { %2919 = vrot.lane.b32.xlu1 %v8934_v60, %s8299_s6 }
0x107f   : > { %2854 = vrot.lane.b32.xlu0 %v8936_v61, %s8298_s16 }
0x1082   : > { %2921 = vrot.lane.b32.xlu1 %v8938_v7, %s8299_s6 }
0x1083   : > { %2915 = vrot.lane.b32.xlu0 %v9186_v26, %s8299_s6 }
0x1086   : > { %2917 = vrot.lane.b32.xlu1 %v9184_v31, %s8299_s6 }
0x10f2   : > { %v2838_v11 = vpop.xlane.xlu0 %2837 }
0x10f6   : > { %v2832_v13 = vpop.xlane.xlu0 %2831  ;;  %v2841_v51 = vpop.xlane.xlu1 %2840 }
0x10f7   : > { %7591 = vrcp.f32 %v2841_v51 }
0x10f8   : > { %7593 = vrcp.f32 %v2832_v13 }
0x10f9   : > { %7595 = vrcp.f32 %v2838_v11 }
0x10fa   : > { %v9260_v52 = vpop.permute.xlu0 %2854  ;;  %v2835_v32 = vpop.xlane.xlu1 %2834 }
0x10fb   : > { %7597 = vrcp.f32 %v2835_v32  ;;  %6811 = vmatprep.subr.bf16.mxu0 %v9260_v52 }
0x10fc   : > { %6812 = vmatpush3.bf16.msra.mxu0 %v9260_v52 }
0x10fd   : > { %6813 = vmatprep.subr.bf16.mxu0 %v9258_v50 }
0x10fe   : > { %v9265_v12 = vpop.permute.xlu1 %2919  ;;  %v2916_v23 = vpop.permute.xlu0 %2915 }
0x10ff   : > { %v9274_v4 = vsel %vm1519_vm0, %v9265_v12, 0 }
0x1100   : > { %6814 = vmatpush3.bf16.msra.mxu0 %v9258_v50 }
0x1101   : > { %7091 = vmatprep.subr.msk.bf16.mxu0 %vm1519_vm0, %v9265_v12  ;;  %v7592_v15 = vpop.eup %7591 }
0x1102   : > { %v7594_v41 = vpop.eup %7593  ;;  %v2849_v19 = vmul.f32 %v7592_v15, %v7588_v16  ;;  %v9276_v5 = vpop.permute.xlu1 %2921 }
0x1103   : > { %v7596_v56 = vpop.eup %7595  ;;  %v2846_v1 = vmul.f32 %v7594_v41, %v7586_v48  ;;  %v9284_v36 = vsel %vm1519_vm0, %v9276_v5, 0 }
0x1104   : > { %v2848_v2 = vmul.f32 %v7596_v56, %v7584_v22 }
0x1105   : > { %v7598_v63 = vpop.eup %7597 }
0x1106   : > { %v2847_v21 = vmul.f32 %v7598_v63, %v7590_v17  ;;  %v2851_v3 = vpack.c.bf16 %v2849_v19, %v2848_v2  ;;  %v2918_v9 = vpop.permute.xlu1 %2917 }
0x1108   : > { %v2850_v34 = vpack.c.bf16 %v2847_v21, %v2846_v1 }
0x110a   : > { %6815 = vmatprep.mubr.msk.bf16.mxu0 %vm1519_vm0, %v2850_v34 }
0x110b   : > { %6816 = vmatmul.mubr.msk.bf16.vlgmr.msra.gmra.mrb[28].mxu0 %vm1519_vm0, %v2851_v3 }
0x110c   : > { %6820 = vmatpush3.bf16.xpose.msra.mxu0 %v9274_v4  ;;  %6823 = vmatprep.mubr.msk.bf16.mxu0 %vm1519_vm0, %v2916_v23 }
0x110d   : > { %7092 = vmatprep.subr.msk.bf16.mxu0 %vm1519_vm0, %v9276_v5 }
0x1114   : > { %6822 = vmatpush3.bf16.xpose.msra.mxu0 %v9284_v36 }
0x111b   : > { %6824 = vmatmul.mubr.msk.bf16.vlgmr.msra.gmra.mrb[32].mxu0 %vm1519_vm0, %v2918_v9 }
0x11de   : > { %v9288_v10 = vpop.f32.mrb[28].mxu0 }
0x11df   : > { %v9290_v40 = vpop.f32.mrb[29].mxu0 }
0x11e0   : > { %v9292_v54 = vpop.f32.mrb[30].mxu0 }
0x11e1   : > { %v7290_v20 = vpack.i.bf16 %v9292_v54, %v9288_v10  ;;  %v9296_v37 = vpop.f32.mrb[31].mxu0 }
0x11e2   : > { %v7285_v42 = vpack.i.bf16 %v9296_v37, %v9290_v40 }
0x11ee   : > { %v6825_v38 = vpop.f32.mrb[32].mxu0 }
0x11ef   : > { %v2969_v39 = vpop.f32.mrb[33].mxu0  ;;  %v2990_v44 = vsel %vm1519_vm0, %v6825_v38, -inf }
0x11f0   : > { %v6826_v22 = vpop.f32.mrb[34].mxu0  ;;  %v2984_v24 = vsel %vm1519_vm0, %v2969_v39, -inf }
0x11f1   : > { %2985 = vmax.xlane.f32.xlu0 %v2984_v24  ;;  %v2972_v48 = vpop.f32.mrb[35].mxu0  ;;  %v2993_v47 = vsel %vm1519_vm0, %v6826_v22, -inf }
0x11f2   : > { %v2987_v16 = vsel %vm1519_vm0, %v2972_v48, -inf }
0x11f3   : > { %2988 = vmax.xlane.f32.xlu1 %v2987_v16 }
0x11f5   : > { %2991 = vmax.xlane.f32.xlu0 %v2990_v44 }
0x11f9   : > { %2994 = vmax.xlane.f32.xlu0 %v2993_v47 }
0x1204   : > { %3032 = vrot.lane.b32.xlu1 %v8940_v8, %s8299_s6 }
0x127e   : > { %v2986_v17 = vpop.xlane.xlu0 %2985 }
0x127f   : > { %v2996_v18 = vsub.f32 %v2969_v39, %v2986_v17 }
0x1280   : > { %v2989_v11 = vpop.xlane.xlu1 %2988 }
0x1281   : > { %v3000_v32 = vmul.f32 1.442695, %v2996_v18  ;;  %v2997_v15 = vsub.f32 %v2972_v48, %v2989_v11 }
0x1282   : > { %v2992_v13 = vpop.xlane.xlu0 %2991 }
0x1283   : > { %v2998_v51 = vsub.f32 %v6825_v38, %v2992_v13  ;;  %v3002_v19 = vmul.f32 1.442695, %v2997_v15 }
0x1285   : > { %v3004_v41 = vmul.f32 1.442695, %v2998_v51 }
0x1286   : > { %v2995_v56 = vpop.xlane.xlu0 %2994 }
0x1287   : > { %7599 = vpow2.f32 %v3004_v41  ;;  %v2999_v63 = vsub.f32 %v6826_v22, %v2995_v56  ;;  %v9320_v22 = vpop.permute.xlu1 %3032 }
0x1288   : > { %7601 = vpow2.f32 %v3000_v32 }
0x1289   : > { %v3006_v1 = vmul.f32 1.442695, %v2999_v63 }
0x128b   : > { %7603 = vpow2.f32 %v3006_v1 }
0x128c   : > { %7605 = vpow2.f32 %v3002_v19 }
0x1291   : > { %v7600_v21 = vpop.eup %7599 }
0x1292   : > { %v3014_v2 = vsel %vm1519_vm0, %v7600_v21, 0.0  ;;  %v7602_v34 = vpop.eup %7601 }
0x1293   : > { %3015 = vadd.xlane.f32.xlu0 %v3014_v2  ;;  %v3008_v23 = vsel %vm1519_vm0, %v7602_v34, 0.0 }
0x1295   : > { %v7604_v3 = vpop.eup %7603 }
0x1296   : > { %v3017_v9 = vsel %vm1519_vm0, %v7604_v3, 0.0  ;;  %v7606_v38 = vpop.eup %7605 }
0x1297   : > { %3009 = vadd.xlane.f32.xlu0 %v3008_v23  ;;  %3018 = vadd.xlane.f32.xlu1 %v3017_v9  ;;  %v3011_v39 = vsel %vm1519_vm0, %v7606_v38, 0.0 }
0x129b   : > { %3012 = vadd.xlane.f32.xlu1 %v3011_v39 }
0x12ac   : > { %3095 = vrot.lane.b32.xlu1 %v8934_v60, %s8300_s9 }
0x12ad   : > { %3030 = vrot.lane.b32.xlu0 %v8936_v61, %s8299_s6 }
0x12b0   : > { %3097 = vrot.lane.b32.xlu1 %v8938_v7, %s8300_s9 }
0x12b1   : > { %3091 = vrot.lane.b32.xlu0 %v9186_v26, %s8300_s9 }
0x12b4   : > { %3093 = vrot.lane.b32.xlu1 %v9184_v31, %s8300_s9 }
0x1320   : > { %v3016_v24 = vpop.xlane.xlu0 %3015 }
0x1324   : > { %v3010_v48 = vpop.xlane.xlu0 %3009  ;;  %v3019_v16 = vpop.xlane.xlu1 %3018 }
0x1325   : > { %7607 = vrcp.f32 %v3019_v16 }
0x1326   : > { %7609 = vrcp.f32 %v3010_v48 }
0x1327   : > { %7611 = vrcp.f32 %v3016_v24 }
0x1328   : > { %v9322_v44 = vpop.permute.xlu0 %3030  ;;  %v3013_v47 = vpop.xlane.xlu1 %3012 }
0x1329   : > { %7613 = vrcp.f32 %v3013_v47  ;;  %6827 = vmatprep.subr.bf16.mxu1 %v9322_v44 }
0x132a   : > { %6828 = vmatpush3.bf16.msra.mxu1 %v9322_v44 }
0x132b   : > { %6829 = vmatprep.subr.bf16.mxu1 %v9320_v22 }
0x132c   : > { %v9327_v26 = vpop.permute.xlu1 %3095  ;;  %v3092_v63 = vpop.permute.xlu0 %3091 }
0x132d   : > { %v9336_v19 = vsel %vm1519_vm0, %v9327_v26, 0 }
0x132e   : > { %6830 = vmatpush3.bf16.msra.mxu1 %v9320_v22 }
0x132f   : > { %7093 = vmatprep.subr.msk.bf16.mxu1 %vm1519_vm0, %v9327_v26  ;;  %v7608_v31 = vpop.eup %7607 }
0x1330   : > { %v7610_v17 = vpop.eup %7609  ;;  %v3027_v13 = vmul.f32 %v7608_v31, %v7604_v3  ;;  %v9338_v1 = vpop.permute.xlu1 %3097 }
0x1331   : > { %v7612_v18 = vpop.eup %7611  ;;  %v3024_v51 = vmul.f32 %v7610_v17, %v7602_v34 }
0x1332   : > { %v3026_v15 = vmul.f32 %v7612_v18, %v7600_v21  ;;  %v9346_v21 = vsel %vm1519_vm0, %v9338_v1, 0 }
0x1333   : > { %v7614_v11 = vpop.eup %7613  ;;  %10108 = vst [vmem:[#allocation30_spill] sm:$0xff] %v9346_v21 }
0x1334   : > { %v3025_v32 = vmul.f32 %v7614_v11, %v7606_v38  ;;  %v3029_v56 = vpack.c.bf16 %v3027_v13, %v3026_v15  ;;  %v3094_v2 = vpop.permute.xlu1 %3093 }
0x1336   : > { %v3028_v41 = vpack.c.bf16 %v3025_v32, %v3024_v51 }
0x1338   : > { %6831 = vmatprep.mubr.msk.bf16.mxu1 %vm1519_vm0, %v3028_v41 }
0x1339   : > { %6832 = vmatmul.mubr.msk.bf16.vlgmr.msra.gmra.mrb[44].mxu1 %vm1519_vm0, %v3029_v56 }
0x133a   : > { %6836 = vmatpush3.bf16.xpose.msra.mxu1 %v9336_v19  ;;  %6839 = vmatprep.mubr.msk.bf16.mxu1 %vm1519_vm0, %v3092_v63 }
0x133b   : > { %7094 = vmatprep.subr.msk.bf16.mxu1 %vm1519_vm0, %v9338_v1 }
0x1342   : > { %6838 = vmatpush3.bf16.xpose.msra.mxu1 %v9346_v21 }
0x1349   : > { %6840 = vmatmul.mubr.msk.bf16.vlgmr.msra.gmra.mrb[48].mxu1 %vm1519_vm0, %v3094_v2 }
0x134a   : > { %3633 = vmatprep.mubr.bf16.mxu1 %v10037_v0 }
0x140c   : > { %v6833_v34 = vpop.f32.mrb[44].mxu1 }
0x140d   : > { %v3076_v3 = vpop.f32.mrb[45].mxu1 }
0x140e   : > { %v6834_v23 = vpop.f32.mrb[46].mxu1 }
0x140f   : > { %v7300_v9 = vpack.i.bf16 %v6834_v23, %v6833_v34  ;;  %v3079_v38 = vpop.f32.mrb[47].mxu1 }
0x1410   : > { %v7295_v39 = vpack.i.bf16 %v3079_v38, %v3076_v3 }
0x141c   : > { %v6841_v24 = vpop.f32.mrb[48].mxu1 }
0x141d   : > { %v3145_v48 = vpop.f32.mrb[49].mxu1  ;;  %v3166_v18 = vsel %vm1519_vm0, %v6841_v24, -inf }
0x141e   : > { %v6842_v16 = vpop.f32.mrb[50].mxu1  ;;  %v3160_v47 = vsel %vm1519_vm0, %v3145_v48, -inf }
0x141f   : > { %3161 = vmax.xlane.f32.xlu0 %v3160_v47  ;;  %v3148_v31 = vpop.f32.mrb[51].mxu1  ;;  %v3169_v11 = vsel %vm1519_vm0, %v6842_v16, -inf }
0x1420   : > { %v3163_v17 = vsel %vm1519_vm0, %v3148_v31, -inf }
0x1421   : > { %3164 = vmax.xlane.f32.xlu1 %v3163_v17 }
0x1423   : > { %3167 = vmax.xlane.f32.xlu0 %v3166_v18 }
0x1427   : > { %3170 = vmax.xlane.f32.xlu0 %v3169_v11 }
0x14ac   : > { %v3162_v13 = vpop.xlane.xlu0 %3161 }
0x14ad   : > { %v3172_v51 = vsub.f32 %v3145_v48, %v3162_v13 }
0x14ae   : > { %v3165_v32 = vpop.xlane.xlu1 %3164 }
0x14af   : > { %v3176_v56 = vmul.f32 1.442695, %v3172_v51  ;;  %v3173_v63 = vsub.f32 %v3148_v31, %v3165_v32 }
0x14b0   : > { %v3168_v15 = vpop.xlane.xlu0 %3167 }
0x14b1   : > { %v3174_v41 = vsub.f32 %v6841_v24, %v3168_v15  ;;  %v3178_v23 = vmul.f32 1.442695, %v3173_v63 }
0x14b3   : > { %v3180_v2 = vmul.f32 1.442695, %v3174_v41 }
0x14b4   : > { %v3171_v34 = vpop.xlane.xlu0 %3170 }
0x14b5   : > { %7615 = vpow2.f32 %v3180_v2  ;;  %v3175_v3 = vsub.f32 %v6842_v16, %v3171_v34  ;;  %v7447_v34 = vld [vmem:[#allocation14] sm:$0xff]  }
0x14b6   : > { %7617 = vpow2.f32 %v3176_v56 }
0x14b7   : > { %v3182_v38 = vmul.f32 1.442695, %v3175_v3  ;;  %v7448_v3 = vld [vmem:[#allocation14 + $0x8] sm:$0xff]  }
0x14b9   : > { %7619 = vpow2.f32 %v3182_v38  ;;  %v7450_v38 = vld [vmem:[#allocation14 + $0x18] sm:$0xff]  }
0x14ba   : > { %7621 = vpow2.f32 %v3178_v23  ;;  %v7449_v23 = vld [vmem:[#allocation14 + $0x10] sm:$0xff]  }
0x14bf   : > { %v7616_v47 = vpop.eup %7615 }
0x14c0   : > { %v3190_v17 = vsel %vm1519_vm0, %v7616_v47, 0.0  ;;  %v7618_v18 = vpop.eup %7617 }
0x14c1   : > { %3191 = vadd.xlane.f32.xlu0 %v3190_v17  ;;  %v3184_v11 = vsel %vm1519_vm0, %v7618_v18, 0.0  ;;  %v7451_v17 = vld [vmem:[#allocation14 + $0x20] sm:$0xff]  }
0x14c3   : > { %v7620_v48 = vpop.eup %7619 }
0x14c4   : > { %v3193_v24 = vsel %vm1519_vm0, %v7620_v48, 0.0  ;;  %v7622_v31 = vpop.eup %7621 }
0x14c5   : > { %3185 = vadd.xlane.f32.xlu0 %v3184_v11  ;;  %3194 = vadd.xlane.f32.xlu1 %v3193_v24  ;;  %v3187_v16 = vsel %vm1519_vm0, %v7622_v31, 0.0 }
0x14c9   : > { %3188 = vadd.xlane.f32.xlu1 %v3187_v16 }
0x14da   : > { %3208 = vrot.lane.b32.xlu1 %v8940_v8, %s8300_s9 }
0x14db   : > { %3206 = vrot.lane.b32.xlu0 %v8936_v61, %s8300_s9 }
0x14de   : > { %7286 = vrot.lane.b32.xlu1 %v7285_v42, %s8300_s9 }
0x14df   : > { %7296 = vrot.lane.b32.xlu0 %v7295_v39, %s8299_s6 }
0x14e2   : > { %7291 = vrot.lane.b32.xlu1 %v7290_v20, %s8300_s9 }
0x14e6   : > { %7301 = vrot.lane.b32.xlu1 %v7300_v9, %s8299_s6 }
0x154e   : > { %v3192_v13 = vpop.xlane.xlu0 %3191 }
0x1552   : > { %v3186_v51 = vpop.xlane.xlu0 %3185  ;;  %v3195_v32 = vpop.xlane.xlu1 %3194 }
0x1553   : > { %7623 = vrcp.f32 %v3195_v32 }
0x1554   : > { %7625 = vrcp.f32 %v3186_v51 }
0x1555   : > { %7627 = vrcp.f32 %v3192_v13 }
0x1556   : > { %v9373_v15 = vpop.permute.xlu0 %3206  ;;  %v3189_v41 = vpop.xlane.xlu1 %3188 }
0x1557   : > { %7629 = vrcp.f32 %v3189_v41  ;;  %6843 = vmatprep.subr.bf16.mxu0 %v9373_v15 }
0x1558   : > { %6844 = vmatpush3.bf16.msra.mxu0 %v9373_v15 }
0x155a   : > { %v9377_v40 = vpop.permute.xlu1 %3208 }
0x155b   : > { %6845 = vmatprep.subr.bf16.mxu0 %v9377_v40 }
0x155c   : > { %6846 = vmatpush3.bf16.msra.mxu0 %v9377_v40 }
0x155d   : > { %v7624_v10 = vpop.eup %7623  ;;  %6851 = vmatprep.subr.bf16.mxu0 %v7447_v34 }
0x155e   : > { %v7626_v54 = vpop.eup %7625  ;;  %v3203_v42 = vmul.f32 %v7624_v10, %v7620_v48  ;;  %v7454_v48 = vld [vmem:[#allocation14 + $0x38] sm:$0xff]   ;;  %v7287_v32 = vpop.permute.xlu1 %7286 }
0x155f   : > { %v7628_v20 = vpop.eup %7627  ;;  %v3200_v9 = vmul.f32 %v7626_v54, %v7618_v18  ;;  %v7453_v18 = vld [vmem:[#allocation14 + $0x30] sm:$0xff]   ;;  %v7289_v54 = vunpack.i.h.bf16 %v7287_v32 }
0x1560   : > { %v3202_v56 = vmul.f32 %v7628_v20, %v7616_v47  ;;  %v7452_v47 = vld [vmem:[#allocation14 + $0x28] sm:$0xff]   ;;  %v7288_v20 = vunpack.i.l.bf16 %v7287_v32 }
0x1561   : > { %v7630_v37 = vpop.eup %7629 }
0x1562   : > { %v3201_v39 = vmul.f32 %v7630_v37, %v7622_v31  ;;  %v3205_v2 = vpack.c.bf16 %v3203_v42, %v3202_v56  ;;  %v7292_v41 = vpop.permute.xlu1 %7291  ;;  %v7297_v37 = vpop.permute.xlu0 %7296 }
0x1563   : > { %v7294_v42 = vunpack.i.h.bf16 %v7292_v41 }
0x1564   : > { %v3204_v63 = vpack.c.bf16 %v3201_v39, %v3200_v9  ;;  %v7293_v9 = vunpack.i.l.bf16 %v7292_v41 }
0x1566   : > { %6847 = vmatprep.mubr.msk.bf16.mxu0 %vm1519_vm0, %v3204_v63  ;;  %v7302_v10 = vpop.permute.xlu1 %7301  ;;  %v7299_v63 = vunpack.i.h.bf16 %v7297_v37 }
0x1567   : > { %6848 = vmatmul.mubr.msk.bf16.vlgmr.msra.gmra.mrb[36].mxu0 %vm1519_vm0, %v3205_v2  ;;  %v7304_v39 = vunpack.i.h.bf16 %v7302_v10  ;;  %v7303_v56 = vunpack.i.l.bf16 %v7302_v10  ;;  %v7298_v2 = vunpack.i.l.bf16 %v7297_v37  ;;  %v6311_v10 = vld [vmem:[%s9996_s14] ss:$0 sm:$0xff] }
0x1568   : > { %6852 = vmatpush3.bf16.msra.mxu0 %v7447_v34  ;;  %v3316_v34 = vsel %vm1519_vm0, %v9236_v62, %v7289_v54 }
0x1569   : > { %6853 = vmatprep.subr.bf16.mxu0 %v7448_v3 }
0x156c   : > { %6854 = vmatpush3.bf16.msra.mxu0 %v7448_v3  ;;  %v3315_v3 = vsel %vm1519_vm0, %v9232_v58, %v7288_v20 }
0x156d   : > { %6855 = vmatprep.subr.bf16.mxu0 %v7449_v23 }
0x1570   : > { %6856 = vmatpush3.bf16.msra.mxu0 %v7449_v23 }
0x1571   : > { %6857 = vmatprep.subr.bf16.mxu0 %v7450_v38 }
0x1574   : > { %6858 = vmatpush3.bf16.msra.mxu0 %v7450_v38  ;;  %v3318_v38 = vsel %vm1519_vm0, %v9234_v59, %v7294_v42  ;;  %v3320_v59 = vsel %vm2268_vm1, %v3316_v34, %v7299_v63 }
0x1575   : > { %6859 = vmatprep.subr.bf16.mxu0 %v7451_v17 }
0x1578   : > { %6860 = vmatpush3.bf16.msra.mxu0 %v7451_v17  ;;  %v3317_v17 = vsel %vm1519_vm0, %v9230_v33, %v7293_v9 }
0x1579   : > { %6861 = vmatprep.subr.bf16.mxu0 %v7452_v47 }
0x157c   : > { %6862 = vmatpush3.bf16.msra.mxu0 %v7452_v47 }
0x157d   : > { %6863 = vmatprep.subr.bf16.mxu0 %v7453_v18 }
0x1580   : > { %6864 = vmatpush3.bf16.msra.mxu0 %v7453_v18 }
0x1581   : > { %6865 = vmatprep.subr.bf16.mxu0 %v7454_v48 }
0x1584   : > { %6866 = vmatpush3.bf16.msra.mxu0 %v7454_v48 }
0x163a   : > { %v6849_v11 = vpop.f32.mrb[36].mxu0 }
0x163b   : > { %v3252_v24 = vpop.f32.mrb[37].mxu0 }
0x163c   : > { %v6850_v31 = vpop.f32.mrb[38].mxu0 }
0x163d   : > { %v7310_v16 = vpack.i.bf16 %v6850_v31, %v6849_v11  ;;  %v3255_v13 = vpop.f32.mrb[39].mxu0  ;;  %v3321_v11 = vsel %vm2268_vm1, %v3317_v17, %v7303_v56  ;;  %v7457_v17 = vld [vmem:[#allocation16 + $0x4] ss:$8 sps:$4 sm:$0xff]  }
0x163e   : > { %v7305_v51 = vpack.i.bf16 %v3255_v13, %v3252_v24  ;;  %v3322_v24 = vsel %vm2268_vm1, %v3318_v38, %v7304_v39  ;;  %v3319_v13 = vsel %vm2268_vm1, %v3315_v3, %v7298_v2  ;;  %3601 = vmatprep.subr.bf16.mxu1 %v7457_v17 }
0x163f   : > { %7311 = vrot.lane.b32.xlu1 %v7310_v16, %s8298_s16 }
0x1640   : > { %7306 = vrot.lane.b32.xlu0 %v7305_v51, %s8298_s16 }
0x16b1   : > { %v7312_v23 = vpop.permute.xlu1 %7311 }
0x16b2   : > { %v7314_v47 = vunpack.i.h.bf16 %v7312_v23  ;;  %v7313_v18 = vunpack.i.l.bf16 %v7312_v23  ;;  %v7307_v48 = vpop.permute.xlu0 %7306 }
0x16b3   : > { %v7309_v31 = vunpack.i.h.bf16 %v7307_v48  ;;  %v7308_v16 = vunpack.i.l.bf16 %v7307_v48  ;;  %v7458_v48 = vld [vmem:[#allocation16 + $0x10] ss:$8 sps:$4 sm:$0xff]  }
0x16b4   : > { %v3325_v62 = vsel %vm2273_vm2, %v3321_v11, %v7313_v18  ;;  %v3326_v58 = vsel %vm2273_vm2, %v3322_v24, %v7314_v47  ;;  %v7455_v47 = vld [vmem:[#allocation16] ss:$8 sps:$4 sm:$0xff]   ;;  %v7460_v18 = vld [vmem:[#allocation16 + $0x14] ss:$8 sps:$4 sm:$0xff]   ;;  %v7463_v11 = vld [vmem:[#allocation16 + $0x24] ss:$8 sps:$4 sm:$0xff]  }
0x16b5   : > { %v3323_v51 = vsel %vm2273_vm2, %v3319_v13, %v7308_v16  ;;  %v3324_v33 = vsel %vm2273_vm2, %v3320_v59, %v7309_v31  ;;  %v3328_v32 = vpack.c.bf16 %v3326_v58, %v3325_v62  ;;  %3602 = vmatpush1.bf16.msra.mxu1 %v7455_v47  ;;  %v7461_v24 = vld [vmem:[#allocation16 + $0x20] ss:$8 sps:$4 sm:$0xff]   ;;  %v7464_v31 = vld [vmem:[#allocation16 + $0x30] ss:$8 sps:$4 sm:$0xff]   ;;  %v7469_v16 = vld [vmem:[#allocation16 + $0x44] ss:$8 sps:$4 sm:$0xff]  }
0x16b6   : > { %v3327_v41 = vpack.c.bf16 %v3324_v33, %v3323_v51  ;;  %3603 = vmatprep.subr.bf16.mxu1 %v7460_v18  ;;  %v7467_v62 = vld [vmem:[#allocation16 + $0x40] ss:$8 sps:$4 sm:$0xff]   ;;  %v7472_v58 = vld [vmem:[#allocation16 + $0x54] ss:$8 sps:$4 sm:$0xff]   ;;  %v7470_v13 = vld [vmem:[#allocation16 + $0x50] ss:$8 sps:$4 sm:$0xff]  }
0x16b7   : > { %v7475_v59 = vld [vmem:[#allocation16 + $0x64] ss:$8 sps:$4 sm:$0xff]   ;;  %v7473_v51 = vld [vmem:[#allocation16 + $0x60] ss:$8 sps:$4 sm:$0xff]   ;;  %v7478_v33 = vld [vmem:[#allocation16 + $0x74] ss:$8 sps:$4 sm:$0xff]  }
0x16b8   : > { %6867 = vmatprep.mubr.bf16.mxu0 %v3327_v41  ;;  %v7811_v41 = vld [vmem:[#allocation8 + $0x4] ss:$12 sps:$4 sm:$0xff]  }
0x16b9   : > { %6868 = vmatmul.mubr.bf16.vlgmr.msra.gmra.mrb[40].mxu0 %v3328_v32  ;;  %3604 = vmatpush1.bf16.msra.mxu1 %v7458_v48  ;;  %v7476_v32 = vld [vmem:[#allocation16 + $0x70] ss:$8 sps:$4 sm:$0xff]  }
0x16ba   : > { %3605 = vmatprep.subr.bf16.mxu1 %v7463_v11 }
0x16bd   : > { %3606 = vmatpush1.bf16.msra.mxu1 %v7461_v24 }
0x178c   : > { %v6869_v54 = vpop.f32.mrb[40].mxu0 }
0x178d   : > { %v3417_v20 = vpop.f32.mrb[41].mxu0  ;;  %v3426_v23 = vadd.f32 %v6869_v54, %v6311_v10  ;;  %v7480_v54 = vld [vmem:[#allocation17] sm:$0xff]  }
0x178e   : > { %v3418_v37 = vadd.f32 %v6311_v10, %v3417_v20  ;;  %v6870_v42 = vpop.f32.mrb[42].mxu0  ;;  %v7481_v20 = vld [vmem:[#allocation17 + $0x48] sm:$0xff]  }
0x178f   : > { %v3420_v9 = vpop.f32.mrb[43].mxu0  ;;  %v3429_v63 = vadd.f32 %v6870_v42, %v6311_v10  ;;  %v9423_v38 = vadd.f32 %v3426_v23, %v9172_v53  ;;  %v7466_v53 = vld [vmem:[#allocation16 + $0x34] ss:$8 sps:$4 sm:$0xff]   ;;  %v7488_v23 = vld [vmem:[#allocation17 + $0x20] sm:$0xff]  }
0x1790   : > { %v9405_v39 = vadd.f32 %v3418_v37, %v9166_v43  ;;  %v3421_v56 = vadd.f32 %v6311_v10, %v3420_v9  ;;  %3607 = vmatprep.subr.bf16.mxu1 %v7466_v53  ;;  %v7479_v10 = vld [vmem:[#allocation17 + $0x40] sm:$0xff]   ;;  %v7482_v37 = vld [vmem:[#allocation17 + $0x8] sm:$0xff]   ;;  %v7483_v42 = vld [vmem:[#allocation17 + $0x50] sm:$0xff]  }
0x1791   : > { %v9415_v3 = vadd.f32 %v3429_v63, %v9174_v49  ;;  %v3450_v49 = vmul.f32 %v9423_v38, %v9423_v38  ;;  %3608 = vmatpush1.bf16.msra.mxu1 %v7464_v31  ;;  %6503 = vmatprep.subr.bf16.mxu0 %v7479_v10  ;;  %v7484_v9 = vld [vmem:[#allocation17 + $0x10] sm:$0xff]   ;;  %v7486_v63 = vld [vmem:[#allocation17 + $0x18] sm:$0xff]  }
0x1792   : > { %v9408_v2 = vadd.f32 %v3421_v56, %v9168_v46  ;;  %3436 = vadd.xlane.f32.xlu0 %v9405_v39  ;;  %v3448_v34 = vmul.f32 %v9405_v39, %v9405_v39  ;;  %3609 = vmatprep.subr.bf16.mxu1 %v7469_v16  ;;  %v7485_v56 = vld [vmem:[#allocation17 + $0x58] sm:$0xff]  }
0x1793   : > { %v3451_v46 = vmul.f32 %v9415_v3, %v9415_v3  ;;  %6504 = vmatpush3.bf16.msra.mxu0 %v7480_v54 }
0x1794   : > { %3438 = vadd.xlane.f32.xlu1 %v9408_v2  ;;  %v3449_v43 = vmul.f32 %v9408_v2, %v9408_v2  ;;  %6505 = vmatprep.subr.bf16.mxu0 %v7481_v20 }
0x1795   : > { %3610 = vmatpush1.bf16.msra.mxu1 %v7467_v62 }
0x1796   : > { %3452 = vadd.xlane.f32.xlu0 %v3448_v34  ;;  %3611 = vmatprep.subr.bf16.mxu1 %v7472_v58  ;;  %v7487_v34 = vld [vmem:[#allocation17 + $0x60] sm:$0xff]  }
0x1797   : > { %6506 = vmatpush3.bf16.msra.mxu0 %v7482_v37 }
0x1798   : > { %3442 = vadd.xlane.f32.xlu1 %v9415_v3  ;;  %6507 = vmatprep.subr.bf16.mxu0 %v7483_v42 }
0x1799   : > { %3612 = vmatpush1.bf16.msra.mxu1 %v7470_v13 }
0x179a   : > { %3454 = vadd.xlane.f32.xlu0 %v3449_v43  ;;  %3613 = vmatprep.subr.bf16.mxu1 %v7475_v59  ;;  %v7489_v43 = vld [vmem:[#allocation17 + $0x68] sm:$0xff]  }
0x179b   : > { %6508 = vmatpush3.bf16.msra.mxu0 %v7484_v9 }
0x179c   : > { %3458 = vadd.xlane.f32.xlu1 %v3451_v46  ;;  %6509 = vmatprep.subr.bf16.mxu0 %v7485_v56 }
0x179d   : > { %3614 = vmatpush1.bf16.msra.mxu1 %v7473_v51 }
0x179e   : > { %3440 = vadd.xlane.f32.xlu0 %v9423_v38  ;;  %3615 = vmatprep.subr.bf16.mxu1 %v7478_v33 }
0x179f   : > { %6510 = vmatpush3.bf16.msra.mxu0 %v7486_v63 }
0x17a0   : > { %6511 = vmatprep.subr.bf16.mxu0 %v7487_v34 }
0x17a1   : > { %3616 = vmatpush1.bf16.msra.mxu1 %v7476_v32 }
0x17a2   : > { %3456 = vadd.xlane.f32.xlu0 %v3450_v49  ;;  %3895 = vmatprep.subr.bf16.mxu1 %v7811_v41 }
0x17a3   : > { %6512 = vmatpush3.bf16.msra.mxu0 %v7488_v23 }
0x17a4   : > { %6513 = vmatprep.subr.bf16.mxu0 %v7489_v43 }
0x181f   : > { %v3437_v46 = vpop.xlane.xlu0 %3436 }
0x1820   : > { %v3444_v49 = vmul.f32 0.0078125, %v3437_v46 }
0x1821   : > { %v3439_v17 = vpop.xlane.xlu1 %3438 }
0x1822   : > { %v3464_v18 = vmul.f32 %v3444_v49, %v3444_v49  ;;  %v3445_v48 = vmul.f32 0.0078125, %v3439_v17  ;;  %v3472_v34 = vsub.f32 %v9405_v39, %v3444_v49  ;;  %v6320_v17 = vld [vmem:[%s10109_s8] ss:$0 sm:$0xff] }
0x1823   : > { %v3453_v47 = vpop.xlane.xlu0 %3452 }
0x1824   : > { %v3460_v11 = vmul.f32 0.0078125, %v3453_v47  ;;  %v3465_v62 = vmul.f32 %v3445_v48, %v3445_v48  ;;  %v3473_v47 = vsub.f32 %v9408_v2, %v3445_v48 }
0x1825   : > { %v3443_v24 = vpop.xlane.xlu1 %3442 }
0x1826   : > { %v3468_v53 = vsub.f32 %v3460_v11, %v3464_v18  ;;  %v3447_v31 = vmul.f32 0.0078125, %v3443_v24 }
0x1827   : > { %v3455_v16 = vpop.xlane.xlu0 %3454 }
0x1828   : > { %v3476_v58 = vadd.f32 1e-05, %v3468_v53  ;;  %v3461_v13 = vmul.f32 0.0078125, %v3455_v16  ;;  %v3467_v51 = vmul.f32 %v3447_v31, %v3447_v31  ;;  %v6321_v16 = vld [vmem:[%s10110_s1] ss:$0 sm:$0xff]  ;;  %v3475_v39 = vsub.f32 %v9415_v3, %v3447_v31 }
0x1829   : > { %v3459_v59 = vpop.xlane.xlu1 %3458  ;;  %v7813_v31 = vld [vmem:[#allocation8 + $0x1c] ss:$12 sps:$4 sm:$0xff]  }
0x182a   : > { %7631 = vrsqrt.f32 %v3476_v58  ;;  %v3469_v33 = vsub.f32 %v3461_v13, %v3465_v62  ;;  %v3463_v32 = vmul.f32 0.0078125, %v3459_v59 }
0x182b   : > { %v3441_v41 = vpop.xlane.xlu0 %3440 }
0x182c   : > { %v3477_v10 = vadd.f32 1e-05, %v3469_v33  ;;  %v3471_v54 = vsub.f32 %v3463_v32, %v3467_v51  ;;  %v3446_v20 = vmul.f32 0.0078125, %v3441_v41  ;;  %v7812_v32 = vld [vmem:[#allocation8] ss:$12 sps:$4 sm:$0xff]  }
0x182e   : > { %7633 = vrsqrt.f32 %v3477_v10  ;;  %v3479_v37 = vadd.f32 1e-05, %v3471_v54  ;;  %v3466_v9 = vmul.f32 %v3446_v20, %v3446_v20  ;;  %v3474_v59 = vsub.f32 %v9423_v38, %v3446_v20  ;;  %v7814_v54 = vld [vmem:[#allocation8 + $0x18] ss:$12 sps:$4 sm:$0xff]   ;;  %v7815_v20 = vld [vmem:[#allocation8 + $0x34] ss:$12 sps:$4 sm:$0xff]  }
0x182f   : > { %v3457_v42 = vpop.xlane.xlu0 %3456 }
0x1830   : > { %7635 = vrsqrt.f32 %v3479_v37  ;;  %v3462_v56 = vmul.f32 0.0078125, %v3457_v42  ;;  %v7816_v37 = vld [vmem:[#allocation8 + $0x30] ss:$12 sps:$4 sm:$0xff]   ;;  %v7817_v42 = vld [vmem:[#allocation8 + $0x4c] ss:$12 sps:$4 sm:$0xff]  }
0x1832   : > { %v3470_v63 = vsub.f32 %v3462_v56, %v3466_v9  ;;  %v7818_v9 = vld [vmem:[#allocation8 + $0x48] ss:$12 sps:$4 sm:$0xff]   ;;  %v7819_v56 = vld [vmem:[#allocation8 + $0x64] ss:$12 sps:$4 sm:$0xff]  }
0x1834   : > { %v7632_v23 = vpop.eup %7631  ;;  %v3478_v43 = vadd.f32 1e-05, %v3470_v63  ;;  %v7820_v63 = vld [vmem:[#allocation8 + $0x60] ss:$12 sps:$4 sm:$0xff]  }
0x1835   : > { %v3484_v46 = vmul.f32 %v7632_v23, %v3472_v34  ;;  %v7821_v34 = vld [vmem:[#allocation8 + $0x7c] ss:$12 sps:$4 sm:$0xff]   ;;  %v7822_v23 = vld [vmem:[#allocation8 + $0x78] ss:$12 sps:$4 sm:$0xff]  }
0x1836   : > { %7637 = vrsqrt.f32 %v3478_v43  ;;  %v7823_v43 = vld [vmem:[#allocation8 + $0x94] ss:$12 sps:$4 sm:$0xff]  }
0x1837   : > { %v3494_v24 = vmul.f32 %v6320_v17, %v3484_v46  ;;  %v7824_v46 = vld [vmem:[#allocation8 + $0x90] ss:$12 sps:$4 sm:$0xff]  }
0x1838   : > { %v7634_v18 = vpop.eup %7633 }
0x1839   : > { %v3485_v11 = vmul.f32 %v7634_v18, %v3473_v47  ;;  %v9437_v62 = vadd.f32 %v6321_v16, %v3494_v24  ;;  %v7826_v47 = vld [vmem:[#allocation8 + $0xa8] ss:$12 sps:$4 sm:$0xff]  }
0x183a   : > { %v7636_v53 = vpop.eup %7635  ;;  %v7490_v18 = vld [vmem:[#allocation17 + $0x28] sm:$0xff]   ;;  %v7492_v24 = vld [vmem:[#allocation17 + $0x30] sm:$0xff]  }
0x183b   : > { %v3495_v49 = vmul.f32 %v6320_v17, %v3485_v11  ;;  %v3487_v13 = vmul.f32 %v7636_v53, %v3475_v39  ;;  %6514 = vmatpush3.bf16.msra.mxu0 %v7490_v18  ;;  %v7491_v11 = vld [vmem:[#allocation17 + $0x70] sm:$0xff]   ;;  %v7493_v53 = vld [vmem:[#allocation17 + $0x78] sm:$0xff]  }
0x183c   : > { %6515 = vmatprep.subr.bf16.mxu0 %v7491_v11  ;;  %v7827_v39 = vld [vmem:[#allocation8 + $0x8] ss:$12 sps:$4 sm:$0xff]   ;;  %v7828_v11 = vld [vmem:[#allocation8 + $0x20] ss:$12 sps:$4 sm:$0xff]  }
0x183d   : > { %v9439_v58 = vadd.f32 %v6321_v16, %v3495_v49  ;;  %v3497_v33 = vmul.f32 %v6320_v17, %v3487_v13  ;;  %v1065_v49 = vld [vmem:[%s10111_s0] sm:$0x3]  ;;  %s10116_s0 = sld [smem:[#allocation52_spill]] }
0x183e   : > { %v9456_v13 = vrot.slane %v1065_v49, %v8860_v25 }
0x183f   : > { %v3508_v2 = vpack.c.bf16 %v9439_v58, %v9437_v62  ;;  %v9447_v10 = vadd.f32 %v6321_v16, %v3497_v33  ;;  %6516 = vmatpush3.bf16.msra.mxu0 %v7492_v24 }
0x1840   : > { %v7638_v48 = vpop.eup %7637  ;;  %6517 = vmatprep.subr.bf16.mxu0 %v7493_v53  ;;  %10112 = vst [vmem:[#allocation31_spill] sm:$0xff] %v9456_v13 }
0x1841   : > { %3634 = vmatmul.mubr.bf16.vlgmr.msra.gmra.mrb[52].mxu1 %v3508_v2  ;;  %v3486_v51 = vmul.f32 %v7638_v48, %v3474_v59  ;;  %v9459_v59 = vrot.slane %v1065_v49, %v8868_v27 }
0x1842   : > { %3643 = vmatprep.mubr.bf16.mxu1 %v10037_v0  ;;  %3896 = vmatpush1.bf16.msra.mxu1 %v7812_v32 }
0x1843   : > { %v3496_v3 = vmul.f32 %v6320_v17, %v3486_v51  ;;  %3897 = vmatprep.subr.bf16.mxu1 %v7813_v31  ;;  %v7825_v17 = vld [vmem:[#allocation8 + $0xac] ss:$12 sps:$4 sm:$0xff]   ;;  %10113 = vst [vmem:[#allocation32_spill] sm:$0xff] %v9459_v59 }
0x1845   : > { %v9445_v41 = vadd.f32 %v6321_v16, %v3496_v3  ;;  %v7494_v16 = vld [vmem:[#allocation17 + $0x38] sm:$0xff]  }
0x1846   : > { %3898 = vmatpush1.bf16.msra.mxu1 %v7814_v54  ;;  %6518 = vmatpush3.bf16.msra.mxu0 %v7494_v16 }
0x1847   : > { %v3509_v38 = vpack.c.bf16 %v9447_v10, %v9445_v41  ;;  %3899 = vmatprep.subr.bf16.mxu1 %v7815_v20  ;;  %6871 = vmatprep.subr.bf16.mxu0 %v7827_v39 }
0x1849   : > { %3644 = vmatmul.mubr.bf16.gmra.mrb[56].mxu1 %v3509_v38 }
0x184a   : > { %3900 = vmatpush1.bf16.msra.mxu1 %v7816_v37  ;;  %3927 = vmatprep.mubr.bf16.mxu1 %v10037_v0 }
0x184b   : > { %3901 = vmatprep.subr.bf16.mxu1 %v7817_v42 }
0x184e   : > { %3902 = vmatpush1.bf16.msra.mxu1 %v7818_v9 }
0x184f   : > { %3903 = vmatprep.subr.bf16.mxu1 %v7819_v56 }
0x1852   : > { %3904 = vmatpush1.bf16.msra.mxu1 %v7820_v63 }
0x1853   : > { %3905 = vmatprep.subr.bf16.mxu1 %v7821_v34 }
0x1856   : > { %3906 = vmatpush1.bf16.msra.mxu1 %v7822_v23 }
0x1857   : > { %3907 = vmatprep.subr.bf16.mxu1 %v7823_v43 }
0x185a   : > { %3908 = vmatpush1.bf16.msra.mxu1 %v7824_v46 }
0x185b   : > { %3909 = vmatprep.subr.bf16.mxu1 %v7825_v17 }
0x185e   : > { %3910 = vmatpush1.bf16.msra.mxu1 %v7826_v47 }
0x1914   : > { %v3635_v2 = vpop.f32.mrb[52].mxu1 }
0x1915   : > { %v3636_v48 = vadd.f32 %v3635_v2, %v9456_v13  ;;  %v3637_v51 = vpop.f32.mrb[53].mxu1  ;;  %v7829_v2 = vld [vmem:[#allocation8 + $0x38] ss:$12 sps:$4 sm:$0xff]  }
0x1916   : > { %v3638_v33 = vadd.f32 %v3637_v51, %v9459_v59  ;;  %v3639_v32 = vpop.f32.mrb[54].mxu1  ;;  %v7831_v51 = vld [vmem:[#allocation8 + $0x68] ss:$12 sps:$4 sm:$0xff]  }
0x1917   : > { %v3640_v3 = vadd.f32 %v3639_v32, %v9456_v13  ;;  %v3641_v31 = vpop.f32.mrb[55].mxu1  ;;  %v3654_v38 = vmax.f32 %v3636_v48, 0.0  ;;  %v7830_v48 = vld [vmem:[#allocation8 + $0x50] ss:$12 sps:$4 sm:$0xff]  }
0x1918   : > { %v3642_v54 = vadd.f32 %v3641_v31, %v9459_v59  ;;  %v3655_v37 = vmax.f32 %v3638_v33, 0.0  ;;  %v7833_v33 = vld [vmem:[#allocation8 + $0x98] ss:$12 sps:$4 sm:$0xff]   ;;  %v7834_v32 = vld [vmem:[#allocation8 + $0xb0] ss:$12 sps:$4 sm:$0xff]  }
0x1919   : > { %v3656_v20 = vmax.f32 %v3640_v3, 0.0  ;;  %v6338_v31 = vld [vmem:[%s10114_s15] ss:$0 sm:$0xff] }
0x191a   : > { %v3657_v25 = vmax.f32 %v3642_v54, 0.0 }
0x191b   : > { %v3662_v42 = vpack.c.bf16 %v3656_v20, %v3654_v38 }
0x191c   : > { %v3663_v9 = vpack.c.bf16 %v3657_v25, %v3655_v37  ;;  %v3645_v27 = vpop.f32.mrb[56].mxu1 }
0x191d   : > { %v3646_v56 = vadd.f32 %v3645_v27, %v9456_v13  ;;  %v3647_v63 = vpop.f32.mrb[57].mxu1 }
0x191e   : > { %v3648_v34 = vadd.f32 %v3647_v63, %v9459_v59  ;;  %v3649_v23 = vpop.f32.mrb[58].mxu1  ;;  %3800 = vmatprep.mubr.bf16.mxu0 %v3663_v9 }
0x191f   : > { %v3650_v43 = vadd.f32 %v3649_v23, %v9456_v13  ;;  %v3651_v46 = vpop.f32.mrb[59].mxu1  ;;  %3801 = vmatmul.mubr.bf16.vlgmr.msra.gmra.mrb[44].mxu0 %v3662_v42  ;;  %v3658_v47 = vmax.f32 %v3646_v56, 0.0 }
0x1920   : > { %v3652_v17 = vadd.f32 %v3651_v46, %v9459_v59  ;;  %6872 = vmatpush3.bf16.msra.mxu0 %v7827_v39  ;;  %v3659_v24 = vmax.f32 %v3648_v34, 0.0  ;;  %v7832_v39 = vld [vmem:[#allocation8 + $0x80] ss:$12 sps:$4 sm:$0xff]  }
0x1921   : > { %v3660_v18 = vmax.f32 %v3650_v43, 0.0  ;;  %6873 = vmatprep.subr.bf16.mxu0 %v7828_v11 }
0x1922   : > { %v3661_v53 = vmax.f32 %v3652_v17, 0.0 }
0x1923   : > { %v3664_v16 = vpack.c.bf16 %v3660_v18, %v3658_v47 }
0x1924   : > { %v3665_v49 = vpack.c.bf16 %v3661_v53, %v3659_v24  ;;  %6874 = vmatpush3.bf16.msra.mxu0 %v7828_v11 }
0x1925   : > { %6875 = vmatprep.subr.bf16.mxu0 %v7829_v2 }
0x1926   : > { %3808 = vmatprep.mubr.bf16.mxu0 %v3665_v49 }
0x1927   : > { %3809 = vmatmul.mubr.bf16.gmra.mrb[48].mxu0 %v3664_v16 }
0x1928   : > { %6876 = vmatpush3.bf16.msra.mxu0 %v7829_v2 }
0x1929   : > { %6877 = vmatprep.subr.bf16.mxu0 %v7830_v48 }
0x192c   : > { %6878 = vmatpush3.bf16.msra.mxu0 %v7830_v48 }
0x192d   : > { %6879 = vmatprep.subr.bf16.mxu0 %v7831_v51 }
0x1930   : > { %6880 = vmatpush3.bf16.msra.mxu0 %v7831_v51 }
0x1931   : > { %6881 = vmatprep.subr.bf16.mxu0 %v7832_v39 }
0x1934   : > { %6882 = vmatpush3.bf16.msra.mxu0 %v7832_v39 }
0x1935   : > { %6883 = vmatprep.subr.bf16.mxu0 %v7833_v33 }
0x1938   : > { %6884 = vmatpush3.bf16.msra.mxu0 %v7833_v33 }
0x1939   : > { %6885 = vmatprep.subr.bf16.mxu0 %v7834_v32 }
0x193c   : > { %6886 = vmatpush3.bf16.msra.mxu0 %v7834_v32 }
0x19f2   : > { %v6519_v3 = vpop.f32.mrb[44].mxu0 }
0x19f3   : > { %v6520_v54 = vpop.f32.mrb[45].mxu0 }
0x19f4   : > { %v6521_v38 = vadd.f32 %v6520_v54, %v6519_v3  ;;  %v6522_v20 = vpop.f32.mrb[46].mxu0 }
0x19f5   : > { %v6523_v37 = vpop.f32.mrb[47].mxu0 }
0x19f6   : > { %v3803_v25 = vadd.f32 %v6521_v38, %v6338_v31  ;;  %v6524_v42 = vadd.f32 %v6523_v37, %v6522_v20 }
0x19f8   : > { %v3806_v9 = vadd.f32 %v6524_v42, %v6338_v31  ;;  %v3817_v27 = vadd.f32 %v3803_v25, %v9437_v62 }
0x19fa   : > { %3821 = vadd.xlane.f32.xlu0 %v3817_v27  ;;  %v6525_v56 = vpop.f32.mrb[48].mxu0  ;;  %v3818_v63 = vadd.f32 %v3806_v9, %v9439_v58  ;;  %v3833_v46 = vmul.f32 %v3817_v27, %v3817_v27 }
0x19fb   : > { %v6526_v34 = vpop.f32.mrb[49].mxu0 }
0x19fc   : > { %v6527_v23 = vadd.f32 %v6526_v34, %v6525_v56  ;;  %3823 = vadd.xlane.f32.xlu1 %v3818_v63  ;;  %v6528_v43 = vpop.f32.mrb[50].mxu0  ;;  %v3834_v11 = vmul.f32 %v3818_v63, %v3818_v63 }
0x19fd   : > { %v6529_v17 = vpop.f32.mrb[51].mxu0 }
0x19fe   : > { %v3811_v47 = vadd.f32 %v6527_v23, %v6338_v31  ;;  %v6530_v18 = vadd.f32 %v6529_v17, %v6528_v43  ;;  %3837 = vadd.xlane.f32.xlu0 %v3833_v46 }
0x1a00   : > { %v3814_v24 = vadd.f32 %v6530_v18, %v6338_v31  ;;  %3839 = vadd.xlane.f32.xlu1 %v3834_v11  ;;  %v3819_v53 = vadd.f32 %v3811_v47, %v9445_v41 }
0x1a02   : > { %3825 = vadd.xlane.f32.xlu0 %v3819_v53  ;;  %v3820_v62 = vadd.f32 %v3814_v24, %v9447_v10  ;;  %v3835_v16 = vmul.f32 %v3819_v53, %v3819_v53 }
0x1a04   : > { %3827 = vadd.xlane.f32.xlu1 %v3820_v62  ;;  %v3836_v58 = vmul.f32 %v3820_v62, %v3820_v62 }
0x1a06   : > { %3841 = vadd.xlane.f32.xlu0 %v3835_v16 }
0x1a08   : > { %3843 = vadd.xlane.f32.xlu1 %v3836_v58 }
0x1a87   : > { %v3822_v49 = vpop.xlane.xlu0 %3821 }
0x1a88   : > { %v3829_v2 = vmul.f32 0.0078125, %v3822_v49  ;;  %v6355_v49 = vld [vmem:[%s10115_s13] ss:$0 sm:$0xff] }
0x1a89   : > { %v3824_v48 = vpop.xlane.xlu1 %3823 }
0x1a8a   : > { %v3830_v51 = vmul.f32 0.0078125, %v3824_v48  ;;  %v3849_v33 = vmul.f32 %v3829_v2, %v3829_v2  ;;  %v3857_v16 = vsub.f32 %v3817_v27, %v3829_v2 }
0x1a8b   : > { %v3838_v39 = vpop.xlane.xlu0 %3837 }
0x1a8c   : > { %v3845_v32 = vmul.f32 0.0078125, %v3838_v39  ;;  %v3850_v31 = vmul.f32 %v3830_v51, %v3830_v51  ;;  %v3858_v48 = vsub.f32 %v3818_v63, %v3830_v51 }
0x1a8d   : > { %v3840_v3 = vpop.xlane.xlu1 %3839 }
0x1a8e   : > { %v3853_v54 = vsub.f32 %v3845_v32, %v3849_v33  ;;  %v3846_v38 = vmul.f32 0.0078125, %v3840_v3 }
0x1a8f   : > { %v3826_v41 = vpop.xlane.xlu0 %3825 }
0x1a90   : > { %v3861_v20 = vadd.f32 1e-05, %v3853_v54  ;;  %v3854_v37 = vsub.f32 %v3846_v38, %v3850_v31  ;;  %v3831_v10 = vmul.f32 0.0078125, %v3826_v41  ;;  %v6356_v31 = vld [vmem:[%s10116_s0] ss:$0 sm:$0xff] }
0x1a91   : > { %v3828_v25 = vpop.xlane.xlu1 %3827 }
0x1a92   : > { %7639 = vrsqrt.f32 %v3861_v20  ;;  %v3862_v42 = vadd.f32 1e-05, %v3854_v37  ;;  %v3832_v9 = vmul.f32 0.0078125, %v3828_v25  ;;  %v3851_v34 = vmul.f32 %v3831_v10, %v3831_v10 }
0x1a93   : > { %v3842_v56 = vpop.xlane.xlu0 %3841  ;;  %v3859_v38 = vsub.f32 %v3819_v53, %v3831_v10 }
0x1a94   : > { %7641 = vrsqrt.f32 %v3862_v42  ;;  %v3847_v23 = vmul.f32 0.0078125, %v3842_v56  ;;  %v3852_v46 = vmul.f32 %v3832_v9, %v3832_v9  ;;  %v3860_v20 = vsub.f32 %v3820_v62, %v3832_v9 }
0x1a95   : > { %v3844_v43 = vpop.xlane.xlu1 %3843 }
0x1a96   : > { %v3855_v17 = vsub.f32 %v3847_v23, %v3851_v34  ;;  %v3848_v47 = vmul.f32 0.0078125, %v3844_v43 }
0x1a98   : > { %v3863_v18 = vadd.f32 1e-05, %v3855_v17  ;;  %v3856_v11 = vsub.f32 %v3848_v47, %v3852_v46 }
0x1a9a   : > { %7643 = vrsqrt.f32 %v3863_v18  ;;  %v3864_v24 = vadd.f32 1e-05, %v3856_v11 }
0x1a9c   : > { %v7640_v58 = vpop.eup %7639  ;;  %7645 = vrsqrt.f32 %v3864_v24 }
0x1a9d   : > { %v3869_v39 = vmul.f32 %v7640_v58, %v3857_v16 }
0x1a9e   : > { %v7642_v33 = vpop.eup %7641 }
0x1a9f   : > { %v3870_v32 = vmul.f32 %v7642_v33, %v3858_v48  ;;  %v3879_v3 = vmul.f32 %v6355_v49, %v3869_v39 }
0x1aa1   : > { %v3880_v54 = vmul.f32 %v6355_v49, %v3870_v32  ;;  %v9482_v41 = vadd.f32 %v6356_v31, %v3879_v3 }
0x1aa3   : > { %v9484_v27 = vadd.f32 %v6356_v31, %v3880_v54 }
0x1aa4   : > { %v7644_v2 = vpop.eup %7643 }
0x1aa5   : > { %v3893_v37 = vpack.c.bf16 %v9484_v27, %v9482_v41  ;;  %v3871_v63 = vmul.f32 %v7644_v2, %v3859_v38 }
0x1aa6   : > { %v7646_v51 = vpop.eup %7645 }
0x1aa7   : > { %3928 = vmatmul.mubr.bf16.vlgmr.msra.gmra.mrb[60].mxu1 %v3893_v37  ;;  %6887 = vmatprep.mubr.bf16.mxu0 %v3893_v37  ;;  %v3872_v25 = vmul.f32 %v7646_v51, %v3860_v20  ;;  %v3881_v42 = vmul.f32 %v6355_v49, %v3871_v63 }
0x1aa8   : > { %3937 = vmatprep.mubr.bf16.mxu1 %v10037_v0 }
0x1aa9   : > { %v3882_v56 = vmul.f32 %v6355_v49, %v3872_v25  ;;  %v9489_v34 = vadd.f32 %v6356_v31, %v3881_v42 }
0x1aab   : > { %v9491_v53 = vadd.f32 %v6356_v31, %v3882_v56 }
0x1aad   : > { %v3894_v10 = vpack.c.bf16 %v9491_v53, %v9489_v34 }
0x1aaf   : > { %3938 = vmatmul.mubr.bf16.gmra.mrb[64].mxu1 %v3894_v10  ;;  %6888 = vmatmul.mubr.bf16.vlgmr.msra.gmra.mrb[52].mxu0 %v3894_v10 }
0x1b7a   : > { %v3929_v62 = vpop.f32.mrb[60].mxu1 }
0x1b7b   : > { %v3930_v9 = vadd.f32 %v3929_v62, %v8872_v28  ;;  %v3931_v23 = vpop.f32.mrb[61].mxu1 }
0x1b7c   : > { %v3933_v43 = vpop.f32.mrb[62].mxu1  ;;  %v3932_v47 = vadd.f32 %v3931_v23, %v8876_v30 }
0x1b7d   : > { %v3934_v46 = vadd.f32 %v3933_v43, %v8872_v28  ;;  %v3935_v17 = vpop.f32.mrb[63].mxu1  ;;  %v3997_v11 = vmul.f32 0.17677669, %v3930_v9 }
0x1b7e   : > { %v3936_v18 = vadd.f32 %v3935_v17, %v8876_v30  ;;  %v9535_v17 = vld [vmem:[#allocation7] sm:$0xff] }
0x1b7f   : > { %v3998_v24 = vmul.f32 0.17677669, %v3934_v46 }
0x1b80   : > { %v9499_v16 = vpack.c.bf16 %v3936_v18, %v3932_v47 }
0x1b81   : > { %v9501_v58 = vpack.c.bf16 %v3998_v24, %v3997_v11  ;;  %v9538_v24 = vld [vmem:[#allocation7 + $0x10] sm:$0xff] }
0x1b82   : > { %v3939_v49 = vpop.f32.mrb[64].mxu1  ;;  %v6889_v48 = vpop.f32.mrb[52].mxu0  ;;  %7095 = vmatprep.subr.msk.bf16.mxu1 %vm1519_vm0, %v9499_v16  ;;  %v4014_v39 = vsel %vm1519_vm0, %v9499_v16, 0 }
0x1b83   : > { %v3940_v33 = vadd.f32 %v3939_v49, %v8872_v28  ;;  %v3941_v32 = vpop.f32.mrb[65].mxu1  ;;  %v3982_v3 = vpop.f32.mrb[53].mxu0  ;;  %6892 = vmatpush3.bf16.xpose.msra.mxu1 %v4014_v39  ;;  %6895 = vmatprep.mubr.msk.bf16.mxu1 %vm1519_vm0, %v9501_v58  ;;  %v3991_v38 = vadd.f32 %v6889_v48, %v8944_v29  ;;  %v9541_v48 = vld [vmem:[#allocation7 + $0x8] sm:$0xff] }
0x1b84   : > { %v3943_v31 = vpop.f32.mrb[66].mxu1  ;;  %v6890_v54 = vpop.f32.mrb[54].mxu0  ;;  %v3942_v51 = vadd.f32 %v3941_v32, %v8876_v30  ;;  %v3983_v25 = vadd.f32 %v3982_v3, %v8944_v29  ;;  %v9545_v32 = vld [vmem:[#allocation7 + $0x18] sm:$0xff] }
0x1b85   : > { %v3944_v2 = vadd.f32 %v3943_v31, %v8872_v28  ;;  %v3994_v20 = vadd.f32 %v6890_v54, %v8944_v29  ;;  %v3945_v37 = vpop.f32.mrb[67].mxu1  ;;  %v3985_v63 = vpop.f32.mrb[55].mxu0  ;;  %v3999_v10 = vmul.f32 0.17677669, %v3940_v33 }
0x1b86   : > { %v3946_v42 = vadd.f32 %v3945_v37, %v8876_v30  ;;  %v3986_v56 = vadd.f32 %v3985_v63, %v8944_v29 }
0x1b87   : > { %v4000_v62 = vmul.f32 0.17677669, %v3944_v2  ;;  %v9517_v9 = vpack.c.bf16 %v3994_v20, %v3991_v38 }
0x1b88   : > { %v9519_v23 = vpack.c.bf16 %v3946_v42, %v3942_v51  ;;  %v9521_v43 = vpack.c.bf16 %v3986_v56, %v3983_v25 }
0x1b89   : > { %v9523_v28 = vpack.c.bf16 %v4000_v62, %v3999_v10 }
0x1b8a   : > { %7096 = vmatprep.subr.msk.bf16.mxu1 %vm1519_vm0, %v9519_v23  ;;  %v4017_v46 = vsel %vm1519_vm0, %v9519_v23, 0 }
0x1b8b   : > { %6894 = vmatpush3.bf16.xpose.msra.mxu1 %v4017_v46 }
0x1b8c   : > { %6899 = vmatprep.subr.bf16.mxu1 %v9521_v43 }
0x1b92   : > { %6896 = vmatmul.mubr.msk.bf16.vlgmr.msra.gmra.mrb[68].mxu1 %vm1519_vm0, %v9523_v28 }
0x1b93   : > { %6900 = vmatpush3.bf16.msra.mxu1 %v9521_v43 }
0x1b94   : > { %6901 = vmatprep.subr.bf16.mxu1 %v9517_v9 }
0x1b97   : > { %6902 = vmatpush3.bf16.msra.mxu1 %v9517_v9 }
0x1c65   : > { %v6897_v30 = vpop.f32.mrb[68].mxu1 }
0x1c66   : > { %v4053_v29 = vpop.f32.mrb[69].mxu1  ;;  %v4062_v49 = vadd.f32 %v9538_v24, %v6897_v30 }
0x1c67   : > { %v4054_v47 = vadd.f32 %v9535_v17, %v4053_v29  ;;  %v6898_v18 = vpop.f32.mrb[70].mxu1 }
0x1c68   : > { %v4056_v11 = vpop.f32.mrb[71].mxu1  ;;  %v4065_v3 = vadd.f32 %v9545_v32, %v6898_v18  ;;  %v4074_v54 = vsel %vm1519_vm0, %v4062_v49, -inf }
0x1c69   : > { %v4057_v39 = vadd.f32 %v9541_v48, %v4056_v11  ;;  %v4068_v33 = vsel %vm1519_vm0, %v4054_v47, -inf }
0x1c6a   : > { %4069 = vmax.xlane.f32.xlu0 %v4068_v33  ;;  %v4077_v38 = vsel %vm1519_vm0, %v4065_v3, -inf }
0x1c6b   : > { %v4071_v31 = vsel %vm1519_vm0, %v4057_v39, -inf }
0x1c6c   : > { %4072 = vmax.xlane.f32.xlu1 %v4071_v31 }
0x1c6e   : > { %4075 = vmax.xlane.f32.xlu0 %v4074_v54 }
0x1c70   : > { %4078 = vmax.xlane.f32.xlu1 %v4077_v38 }
0x1cf7   : > { %v4070_v2 = vpop.xlane.xlu0 %4069 }
0x1cf8   : > { %v4080_v20 = vsub.f32 %v4054_v47, %v4070_v2 }
0x1cf9   : > { %v4073_v37 = vpop.xlane.xlu1 %4072 }
0x1cfa   : > { %v4081_v63 = vsub.f32 %v4057_v39, %v4073_v37  ;;  %v4084_v56 = vmul.f32 1.442695, %v4080_v20 }
0x1cfb   : > { %v4076_v51 = vpop.xlane.xlu0 %4075 }
0x1cfc   : > { %v4086_v25 = vmul.f32 1.442695, %v4081_v63  ;;  %v4082_v42 = vsub.f32 %v4062_v49, %v4076_v51 }
0x1cfd   : > { %v4079_v10 = vpop.xlane.xlu1 %4078 }
0x1cfe   : > { %7647 = vpow2.f32 %v4086_v25  ;;  %v4088_v62 = vmul.f32 1.442695, %v4082_v42  ;;  %v4083_v46 = vsub.f32 %v4065_v3, %v4079_v10 }
0x1d00   : > { %7649 = vpow2.f32 %v4088_v62  ;;  %v4090_v30 = vmul.f32 1.442695, %v4083_v46 }
0x1d01   : > { %7651 = vpow2.f32 %v4084_v56 }
0x1d02   : > { %7653 = vpow2.f32 %v4090_v30 }
0x1d08   : > { %v7648_v29 = vpop.eup %7647 }
0x1d09   : > { %v4095_v18 = vsel %vm1519_vm0, %v7648_v29, 0.0 }
0x1d0a   : > { %v7650_v11 = vpop.eup %7649  ;;  %4096 = vadd.xlane.f32.xlu1 %v4095_v18 }
0x1d0b   : > { %v7652_v47 = vpop.eup %7651  ;;  %v4098_v39 = vsel %vm1519_vm0, %v7650_v11, 0.0 }
0x1d0c   : > { %v7654_v33 = vpop.eup %7653  ;;  %4099 = vadd.xlane.f32.xlu0 %v4098_v39  ;;  %v4092_v31 = vsel %vm1519_vm0, %v7652_v47, 0.0 }
0x1d0d   : > { %v4101_v49 = vsel %vm1519_vm0, %v7654_v33, 0.0 }
0x1d0e   : > { %4102 = vadd.xlane.f32.xlu1 %v4101_v49 }
0x1d10   : > { %4093 = vadd.xlane.f32.xlu0 %v4092_v31 }
0x1d1f   : > { %4179 = vrot.lane.b32.xlu1 %v9519_v23, %s8298_s16 }
0x1d23   : > { %4171 = vrot.lane.b32.xlu1 %v9501_v58, %s8298_s16 }
0x1d26   : > { %4177 = vrot.lane.b32.xlu0 %v9499_v16, %s8298_s16 }
0x1d27   : > { %4173 = vrot.lane.b32.xlu1 %v9523_v28, %s8298_s16 }
0x1d97   : > { %v4097_v3 = vpop.xlane.xlu1 %4096 }
0x1d98   : > { %7655 = vrcp.f32 %v4097_v3 }
0x1d99   : > { %v4100_v54 = vpop.xlane.xlu0 %4099 }
0x1d9b   : > { %v4103_v38 = vpop.xlane.xlu1 %4102 }
0x1d9c   : > { %7657 = vrcp.f32 %v4103_v38 }
0x1d9d   : > { %7659 = vrcp.f32 %v4100_v54  ;;  %v4094_v2 = vpop.xlane.xlu0 %4093 }
0x1d9e   : > { %7661 = vrcp.f32 %v4094_v2 }
0x1d9f   : > { %v4180_v56 = vpop.permute.xlu1 %4179 }
0x1da1   : > { %v4178_v20 = vpop.permute.xlu0 %4177 }
0x1da2   : > { %7097 = vmatprep.subr.msk.bf16.mxu1 %vm1519_vm0, %v4178_v20  ;;  %v7656_v37 = vpop.eup %7655  ;;  %v4188_v49 = vsel %vm1519_vm0, %v4178_v20, 0 }
0x1da3   : > { %v4109_v62 = vmul.f32 %v7656_v37, %v7648_v29  ;;  %v4172_v39 = vpop.permute.xlu1 %4171 }
0x1da6   : > { %v7658_v63 = vpop.eup %7657 }
0x1da7   : > { %v7660_v51 = vpop.eup %7659  ;;  %v4111_v42 = vmul.f32 %v7658_v63, %v7654_v33  ;;  %v4191_v33 = vsel %vm1519_vm0, %v4180_v56, 0 }
0x1da8   : > { %v7662_v25 = vpop.eup %7661  ;;  %v4110_v46 = vmul.f32 %v7660_v51, %v7650_v11 }
0x1da9   : > { %v4108_v10 = vmul.f32 %v7662_v25, %v7652_v47  ;;  %v4174_v47 = vpop.permute.xlu1 %4173 }
0x1daa   : > { %v4113_v18 = vpack.c.bf16 %v4111_v42, %v4110_v46 }
0x1dab   : > { %v4112_v30 = vpack.c.bf16 %v4109_v62, %v4108_v10 }
0x1dad   : > { %6903 = vmatprep.mubr.msk.bf16.mxu1 %vm1519_vm0, %v4112_v30 }
0x1dae   : > { %6904 = vmatmul.mubr.msk.bf16.vlgmr.msra.gmra.mrb[72].mxu1 %vm1519_vm0, %v4113_v18 }
0x1daf   : > { %6908 = vmatpush3.bf16.xpose.msra.mxu1 %v4188_v49  ;;  %6911 = vmatprep.mubr.msk.bf16.mxu1 %vm1519_vm0, %v4172_v39 }
0x1db0   : > { %7098 = vmatprep.subr.msk.bf16.mxu1 %vm1519_vm0, %v4180_v56 }
0x1db7   : > { %6910 = vmatpush3.bf16.xpose.msra.mxu1 %v4191_v33 }
0x1dbe   : > { %6912 = vmatmul.mubr.msk.bf16.vlgmr.msra.gmra.mrb[76].mxu1 %vm1519_vm0, %v4174_v47 }
0x1e81   : > { %v9571_v29 = vpop.f32.mrb[72].mxu1 }
0x1e82   : > { %v9573_v11 = vpop.f32.mrb[73].mxu1 }
0x1e83   : > { %v9575_v31 = vpop.f32.mrb[74].mxu1 }
0x1e84   : > { %v9577_v3 = vpop.f32.mrb[75].mxu1 }
0x1e91   : > { %v6913_v54 = vpop.f32.mrb[76].mxu1 }
0x1e92   : > { %v4227_v38 = vpop.f32.mrb[77].mxu1  ;;  %v4236_v63 = vadd.f32 %v9538_v24, %v6913_v54 }
0x1e93   : > { %v4228_v2 = vadd.f32 %v9535_v17, %v4227_v38  ;;  %v6914_v20 = vpop.f32.mrb[78].mxu1 }
0x1e94   : > { %v4230_v37 = vpop.f32.mrb[79].mxu1  ;;  %v4239_v56 = vadd.f32 %v9545_v32, %v6914_v20  ;;  %v4248_v10 = vsel %vm1519_vm0, %v4236_v63, -inf }
0x1e95   : > { %v4231_v51 = vadd.f32 %v9541_v48, %v4230_v37  ;;  %v4242_v25 = vsel %vm1519_vm0, %v4228_v2, -inf }
0x1e96   : > { %4243 = vmax.xlane.f32.xlu0 %v4242_v25  ;;  %v4251_v62 = vsel %vm1519_vm0, %v4239_v56, -inf }
0x1e97   : > { %v4245_v42 = vsel %vm1519_vm0, %v4231_v51, -inf }
0x1e98   : > { %4246 = vmax.xlane.f32.xlu1 %v4245_v42 }
0x1e9a   : > { %4249 = vmax.xlane.f32.xlu0 %v4248_v10 }
0x1e9e   : > { %4252 = vmax.xlane.f32.xlu0 %v4251_v62 }
0x1ea9   : > { %4292 = vrot.lane.b32.xlu1 %v9517_v9, %s8298_s16 }
0x1f23   : > { %v4244_v46 = vpop.xlane.xlu0 %4243 }
0x1f24   : > { %v4254_v30 = vsub.f32 %v4228_v2, %v4244_v46 }
0x1f25   : > { %v4247_v18 = vpop.xlane.xlu1 %4246 }
0x1f26   : > { %v4258_v33 = vmul.f32 1.442695, %v4254_v30  ;;  %v4255_v47 = vsub.f32 %v4231_v51, %v4247_v18 }
0x1f27   : > { %v4250_v39 = vpop.xlane.xlu0 %4249 }
0x1f28   : > { %v4256_v49 = vsub.f32 %v4236_v63, %v4250_v39  ;;  %v4260_v37 = vmul.f32 1.442695, %v4255_v47 }
0x1f29   : > { %v4293_v30 = vpop.permute.xlu1 %4292 }
0x1f2a   : > { %v4262_v54 = vmul.f32 1.442695, %v4256_v49 }
0x1f2b   : > { %v4253_v38 = vpop.xlane.xlu0 %4252 }
0x1f2c   : > { %7663 = vpow2.f32 %v4262_v54  ;;  %v4257_v20 = vsub.f32 %v4239_v56, %v4253_v38 }
0x1f2d   : > { %7665 = vpow2.f32 %v4258_v33 }
0x1f2e   : > { %v4264_v25 = vmul.f32 1.442695, %v4257_v20 }
0x1f30   : > { %7667 = vpow2.f32 %v4264_v25 }
0x1f31   : > { %7669 = vpow2.f32 %v4260_v37 }
0x1f36   : > { %v7664_v42 = vpop.eup %7663 }
0x1f37   : > { %v4272_v10 = vsel %vm1519_vm0, %v7664_v42, 0.0  ;;  %v7666_v62 = vpop.eup %7665 }
0x1f38   : > { %4273 = vadd.xlane.f32.xlu0 %v4272_v10  ;;  %v4266_v46 = vsel %vm1519_vm0, %v7666_v62, 0.0 }
0x1f3a   : > { %v7668_v2 = vpop.eup %7667 }
0x1f3b   : > { %v4275_v63 = vsel %vm1519_vm0, %v7668_v2, 0.0  ;;  %v7670_v51 = vpop.eup %7669 }
0x1f3c   : > { %4267 = vadd.xlane.f32.xlu0 %v4266_v46  ;;  %4276 = vadd.xlane.f32.xlu1 %v4275_v63  ;;  %v4269_v56 = vsel %vm1519_vm0, %v7670_v51, 0.0 }
0x1f40   : > { %4270 = vadd.xlane.f32.xlu1 %v4269_v56 }
0x1f51   : > { %4355 = vrot.lane.b32.xlu1 %v9499_v16, %s8299_s6 }
0x1f52   : > { %4290 = vrot.lane.b32.xlu0 %v9521_v43, %s8298_s16 }
0x1f55   : > { %4357 = vrot.lane.b32.xlu1 %v9519_v23, %s8299_s6 }
0x1f56   : > { %4351 = vrot.lane.b32.xlu0 %v9501_v58, %s8299_s6 }
0x1f59   : > { %4353 = vrot.lane.b32.xlu1 %v9523_v28, %s8299_s6 }
0x1fc5   : > { %v4274_v18 = vpop.xlane.xlu0 %4273 }
0x1fc9   : > { %v4277_v39 = vpop.xlane.xlu1 %4276  ;;  %v4268_v49 = vpop.xlane.xlu0 %4267 }
0x1fca   : > { %7671 = vrcp.f32 %v4277_v39 }
0x1fcb   : > { %7673 = vrcp.f32 %v4268_v49 }
0x1fcc   : > { %7675 = vrcp.f32 %v4274_v18 }
0x1fcd   : > { %v4271_v33 = vpop.xlane.xlu1 %4270  ;;  %v4291_v47 = vpop.permute.xlu0 %4290 }
0x1fce   : > { %7677 = vrcp.f32 %v4271_v33  ;;  %6915 = vmatprep.subr.bf16.mxu0 %v4291_v47 }
0x1fcf   : > { %6916 = vmatpush3.bf16.msra.mxu0 %v4291_v47 }
0x1fd0   : > { %6917 = vmatprep.subr.bf16.mxu0 %v4293_v30 }
0x1fd1   : > { %v4356_v54 = vpop.permute.xlu1 %4355  ;;  %v4352_v49 = vpop.permute.xlu0 %4351 }
0x1fd2   : > { %v4366_v33 = vsel %vm1519_vm0, %v4356_v54, 0 }
0x1fd3   : > { %6918 = vmatpush3.bf16.msra.mxu0 %v4293_v30 }
0x1fd4   : > { %7099 = vmatprep.subr.msk.bf16.mxu0 %vm1519_vm0, %v4356_v54  ;;  %v7672_v38 = vpop.eup %7671 }
0x1fd5   : > { %v7674_v20 = vpop.eup %7673  ;;  %v4285_v10 = vmul.f32 %v7672_v38, %v7668_v2  ;;  %v4358_v30 = vpop.permute.xlu1 %4357 }
0x1fd6   : > { %v7676_v37 = vpop.eup %7675  ;;  %v4282_v46 = vmul.f32 %v7674_v20, %v7666_v62  ;;  %v4369_v2 = vsel %vm1519_vm0, %v4358_v30, 0 }
0x1fd7   : > { %v4284_v56 = vmul.f32 %v7676_v37, %v7664_v42 }
0x1fd8   : > { %v7678_v25 = vpop.eup %7677 }
0x1fd9   : > { %v4283_v63 = vmul.f32 %v7678_v25, %v7670_v51  ;;  %v4287_v18 = vpack.c.bf16 %v4285_v10, %v4284_v56  ;;  %v4354_v62 = vpop.permute.xlu1 %4353 }
0x1fdb   : > { %v4286_v39 = vpack.c.bf16 %v4283_v63, %v4282_v46 }
0x1fdd   : > { %6919 = vmatprep.mubr.msk.bf16.mxu0 %vm1519_vm0, %v4286_v39 }
0x1fde   : > { %6920 = vmatmul.mubr.msk.bf16.vlgmr.msra.gmra.mrb[56].mxu0 %vm1519_vm0, %v4287_v18 }
0x1fdf   : > { %6924 = vmatpush3.bf16.xpose.msra.mxu0 %v4366_v33  ;;  %6927 = vmatprep.mubr.msk.bf16.mxu0 %vm1519_vm0, %v4352_v49 }
0x1fe0   : > { %7100 = vmatprep.subr.msk.bf16.mxu0 %vm1519_vm0, %v4358_v30 }
0x1fe7   : > { %6926 = vmatpush3.bf16.xpose.msra.mxu0 %v4369_v2 }
0x1fee   : > { %6928 = vmatmul.mubr.msk.bf16.vlgmr.msra.gmra.mrb[60].mxu0 %vm1519_vm0, %v4354_v62 }
0x20b1   : > { %v9611_v42 = vpop.f32.mrb[56].mxu0 }
0x20b2   : > { %v9613_v51 = vpop.f32.mrb[57].mxu0 }
0x20b3   : > { %v9615_v47 = vpop.f32.mrb[58].mxu0 }
0x20b4   : > { %v9619_v38 = vpop.f32.mrb[59].mxu0 }
0x20c1   : > { %v6929_v37 = vpop.f32.mrb[60].mxu0 }
0x20c2   : > { %v4405_v25 = vpop.f32.mrb[61].mxu0  ;;  %v4414_v56 = vadd.f32 %v9538_v24, %v6929_v37 }
0x20c3   : > { %v4406_v10 = vadd.f32 %v9535_v17, %v4405_v25  ;;  %v6930_v46 = vpop.f32.mrb[62].mxu0 }
0x20c4   : > { %v4408_v63 = vpop.f32.mrb[63].mxu0  ;;  %v4417_v33 = vadd.f32 %v9545_v32, %v6930_v46  ;;  %v4426_v30 = vsel %vm1519_vm0, %v4414_v56, -inf }
0x20c5   : > { %v4409_v39 = vadd.f32 %v9541_v48, %v4408_v63  ;;  %v4420_v18 = vsel %vm1519_vm0, %v4406_v10, -inf }
0x20c6   : > { %4421 = vmax.xlane.f32.xlu0 %v4420_v18  ;;  %v4429_v2 = vsel %vm1519_vm0, %v4417_v33, -inf }
0x20c7   : > { %v4423_v49 = vsel %vm1519_vm0, %v4409_v39, -inf }
0x20c8   : > { %4424 = vmax.xlane.f32.xlu1 %v4423_v49 }
0x20ca   : > { %4427 = vmax.xlane.f32.xlu0 %v4426_v30 }
0x20ce   : > { %4430 = vmax.xlane.f32.xlu0 %v4429_v2 }
0x20d9   : > { %4468 = vrot.lane.b32.xlu1 %v9517_v9, %s8299_s6 }
0x2153   : > { %v4422_v62 = vpop.xlane.xlu0 %4421 }
0x2154   : > { %v4432_v37 = vsub.f32 %v4406_v10, %v4422_v62 }
0x2155   : > { %v4425_v25 = vpop.xlane.xlu1 %4424 }
0x2156   : > { %v4436_v18 = vmul.f32 1.442695, %v4432_v37  ;;  %v4433_v54 = vsub.f32 %v4409_v39, %v4425_v25 }
0x2157   : > { %v4428_v63 = vpop.xlane.xlu0 %4427 }
0x2158   : > { %v4434_v0 = vsub.f32 %v4414_v56, %v4428_v63  ;;  %v4438_v59 = vmul.f32 1.442695, %v4433_v54 }
0x215a   : > { %v4440_v20 = vmul.f32 1.442695, %v4434_v0 }
0x215b   : > { %v4431_v49 = vpop.xlane.xlu0 %4430 }
0x215c   : > { %7679 = vpow2.f32 %v4440_v20  ;;  %v4435_v46 = vsub.f32 %v4417_v33, %v4431_v49 }
0x215d   : > { %7681 = vpow2.f32 %v4436_v18 }
0x215e   : > { %v4442_v30 = vmul.f32 1.442695, %v4435_v46 }
0x2160   : > { %7683 = vpow2.f32 %v4442_v30 }
0x2161   : > { %7685 = vpow2.f32 %v4438_v59 }
0x2166   : > { %v7680_v2 = vpop.eup %7679 }
0x2167   : > { %v4450_v13 = vsel %vm1519_vm0, %v7680_v2, 0.0  ;;  %v7682_v21 = vpop.eup %7681 }
0x2168   : > { %4451 = vadd.xlane.f32.xlu0 %v4450_v13  ;;  %v4444_v62 = vsel %vm1519_vm0, %v7682_v21, 0.0  ;;  %v4469_v13 = vpop.permute.xlu1 %4468 }
0x216a   : > { %v7684_v10 = vpop.eup %7683 }
0x216b   : > { %v4453_v56 = vsel %vm1519_vm0, %v7684_v10, 0.0  ;;  %v7686_v39 = vpop.eup %7685 }
0x216c   : > { %4445 = vadd.xlane.f32.xlu0 %v4444_v62  ;;  %4454 = vadd.xlane.f32.xlu1 %v4453_v56  ;;  %v4447_v0 = vsel %vm1519_vm0, %v7686_v39, 0.0 }
0x2170   : > { %4448 = vadd.xlane.f32.xlu1 %v4447_v0 }
0x2181   : > { %4531 = vrot.lane.b32.xlu1 %v9499_v16, %s8300_s9 }
0x2182   : > { %4466 = vrot.lane.b32.xlu0 %v9521_v43, %s8299_s6 }
0x2185   : > { %4533 = vrot.lane.b32.xlu1 %v9519_v23, %s8300_s9 }
0x2186   : > { %4527 = vrot.lane.b32.xlu0 %v9501_v58, %s8300_s9 }
0x2189   : > { %4529 = vrot.lane.b32.xlu1 %v9523_v28, %s8300_s9 }
0x21f5   : > { %v4452_v59 = vpop.xlane.xlu0 %4451 }
0x21f9   : > { %v4455_v54 = vpop.xlane.xlu1 %4454  ;;  %v4446_v20 = vpop.xlane.xlu0 %4445 }
0x21fa   : > { %7687 = vrcp.f32 %v4455_v54  ;;  %v7842_v54 = vld [vmem:[#allocation11 + $0x18] sm:$0xff]  }
0x21fb   : > { %7689 = vrcp.f32 %v4446_v20  ;;  %v7843_v20 = vld [vmem:[#allocation11 + $0x20] sm:$0xff]  }
0x21fc   : > { %7691 = vrcp.f32 %v4452_v59  ;;  %v7841_v59 = vld [vmem:[#allocation11 + $0x10] sm:$0xff]  }
0x21fd   : > { %v4449_v16 = vpop.xlane.xlu1 %4448  ;;  %v4467_v33 = vpop.permute.xlu0 %4466 }
0x21fe   : > { %7693 = vrcp.f32 %v4449_v16  ;;  %6931 = vmatprep.subr.bf16.mxu1 %v4467_v33  ;;  %v7844_v16 = vld [vmem:[#allocation11 + $0x28] sm:$0xff]  }
0x21ff   : > { %6932 = vmatpush3.bf16.msra.mxu1 %v4467_v33  ;;  %v7845_v33 = vld [vmem:[#allocation11 + $0x30] sm:$0xff]  }
0x2200   : > { %6933 = vmatprep.subr.bf16.mxu1 %v4469_v13 }
0x2201   : > { %v4532_v23 = vpop.permute.xlu1 %4531  ;;  %v4528_v0 = vpop.permute.xlu0 %4527 }
0x2202   : > { %v4542_v56 = vsel %vm1519_vm0, %v4532_v23, 0 }
0x2203   : > { %6934 = vmatpush3.bf16.msra.mxu1 %v4469_v13 }
0x2204   : > { %7101 = vmatprep.subr.msk.bf16.mxu1 %vm1519_vm0, %v4532_v23  ;;  %v7688_v58 = vpop.eup %7687  ;;  %v7846_v23 = vld [vmem:[#allocation11 + $0x38] sm:$0xff]  }
0x2205   : > { %v7690_v37 = vpop.eup %7689  ;;  %v4463_v63 = vmul.f32 %v7688_v58, %v7684_v10  ;;  %v4534_v13 = vpop.permute.xlu1 %4533 }
0x2206   : > { %v7692_v28 = vpop.eup %7691  ;;  %v4460_v18 = vmul.f32 %v7690_v37, %v7682_v21  ;;  %v4545_v10 = vsel %vm1519_vm0, %v4534_v13, 0  ;;  %v7839_v21 = vld [vmem:[#allocation11] sm:$0xff]  }
0x2207   : > { %v4462_v46 = vmul.f32 %v7692_v28, %v7680_v2 }
0x2208   : > { %v7694_v25 = vpop.eup %7693 }
0x2209   : > { %v4461_v49 = vmul.f32 %v7694_v25, %v7686_v39  ;;  %v4465_v62 = vpack.c.bf16 %v4463_v63, %v4462_v46  ;;  %v4530_v2 = vpop.permute.xlu1 %4529  ;;  %v7840_v39 = vld [vmem:[#allocation11 + $0x8] sm:$0xff]  }
0x220b   : > { %v4464_v30 = vpack.c.bf16 %v4461_v49, %v4460_v18 }
0x220d   : > { %6935 = vmatprep.mubr.msk.bf16.mxu1 %vm1519_vm0, %v4464_v30 }
0x220e   : > { %6936 = vmatmul.mubr.msk.bf16.vlgmr.msra.gmra.mrb[80].mxu1 %vm1519_vm0, %v4465_v62 }
0x220f   : > { %6940 = vmatpush3.bf16.xpose.msra.mxu1 %v4542_v56  ;;  %6943 = vmatprep.mubr.msk.bf16.mxu1 %vm1519_vm0, %v4528_v0 }
0x2210   : > { %7102 = vmatprep.subr.msk.bf16.mxu1 %vm1519_vm0, %v4534_v13 }
0x2217   : > { %6942 = vmatpush3.bf16.xpose.msra.mxu1 %v4545_v10 }
0x2218   : > { %6975 = vmatprep.subr.bf16.mxu1 %v7839_v21 }
0x221e   : > { %6944 = vmatmul.mubr.msk.bf16.vlgmr.msra.gmra.mrb[84].mxu1 %vm1519_vm0, %v4530_v2 }
0x221f   : > { %6976 = vmatpush3.bf16.msra.mxu1 %v7839_v21 }
0x2220   : > { %6977 = vmatprep.subr.bf16.mxu1 %v7840_v39 }
0x2223   : > { %6978 = vmatpush3.bf16.msra.mxu1 %v7840_v39 }
0x2224   : > { %6979 = vmatprep.subr.bf16.mxu1 %v7841_v59 }
0x2227   : > { %6980 = vmatpush3.bf16.msra.mxu1 %v7841_v59 }
0x2228   : > { %6981 = vmatprep.subr.bf16.mxu1 %v7842_v54 }
0x222b   : > { %6982 = vmatpush3.bf16.msra.mxu1 %v7842_v54 }
0x222c   : > { %6983 = vmatprep.subr.bf16.mxu1 %v7843_v20 }
0x222f   : > { %6984 = vmatpush3.bf16.msra.mxu1 %v7843_v20 }
0x2230   : > { %6985 = vmatprep.subr.bf16.mxu1 %v7844_v16 }
0x2233   : > { %6986 = vmatpush3.bf16.msra.mxu1 %v7844_v16 }
0x2234   : > { %6987 = vmatprep.subr.bf16.mxu1 %v7845_v33 }
0x2237   : > { %6988 = vmatpush3.bf16.msra.mxu1 %v7845_v33 }
0x2238   : > { %6989 = vmatprep.subr.bf16.mxu1 %v7846_v23 }
0x223b   : > { %6990 = vmatpush3.bf16.msra.mxu1 %v7846_v23 }
0x223c   : > { %7003 = vmatprep.subr.bf16.mxu1 %v8936_v61 }
0x22e1   : > { %v6937_v58 = vpop.f32.mrb[80].mxu1 }
0x22e2   : > { %v4512_v37 = vpop.f32.mrb[81].mxu1 }
0x22e3   : > { %v6938_v28 = vpop.f32.mrb[82].mxu1 }
0x22e4   : > { %v7330_v25 = vpack.i.bf16 %v6938_v28, %v6937_v58  ;;  %v4515_v63 = vpop.f32.mrb[83].mxu1 }
0x22e5   : > { %v7325_v18 = vpack.i.bf16 %v4515_v63, %v4512_v37 }
0x22f1   : > { %v6945_v49 = vpop.f32.mrb[84].mxu1 }
0x22f2   : > { %v4581_v46 = vpop.f32.mrb[85].mxu1  ;;  %v4590_v0 = vadd.f32 %v9538_v24, %v6945_v49 }
0x22f3   : > { %v4582_v30 = vadd.f32 %v9535_v17, %v4581_v46  ;;  %v6946_v62 = vpop.f32.mrb[86].mxu1 }
0x22f4   : > { %v4584_v56 = vpop.f32.mrb[87].mxu1  ;;  %v4593_v2 = vadd.f32 %v9545_v32, %v6946_v62  ;;  %v4602_v39 = vsel %vm1519_vm0, %v4590_v0, -inf }
0x22f5   : > { %v4585_v13 = vadd.f32 %v9541_v48, %v4584_v56  ;;  %v4596_v10 = vsel %vm1519_vm0, %v4582_v30, -inf }
0x22f6   : > { %4597 = vmax.xlane.f32.xlu0 %v4596_v10  ;;  %v4605_v59 = vsel %vm1519_vm0, %v4593_v2, -inf  ;;  %v10117_v10 = vpack.i.bf16 %v9619_v38, %v9613_v51  ;;  %v7847_v38 = vld [vmem:[#allocation10] sm:$0xff]  }
0x22f7   : > { %v4599_v21 = vsel %vm1519_vm0, %v4585_v13, -inf }
0x22f8   : > { %4600 = vmax.xlane.f32.xlu1 %v4599_v21  ;;  %v10118_v21 = vpack.i.bf16 %v9615_v47, %v9611_v42 }
0x22fa   : > { %4603 = vmax.xlane.f32.xlu0 %v4602_v39 }
0x22fe   : > { %4606 = vmax.xlane.f32.xlu0 %v4605_v59 }
0x2383   : > { %v4598_v17 = vpop.xlane.xlu0 %4597 }
0x2384   : > { %v4608_v54 = vsub.f32 %v4582_v30, %v4598_v17 }
0x2385   : > { %v4601_v20 = vpop.xlane.xlu1 %4600 }
0x2386   : > { %v4612_v48 = vmul.f32 1.442695, %v4608_v54  ;;  %v4609_v33 = vsub.f32 %v4585_v13, %v4601_v20 }
0x2387   : > { %v4604_v24 = vpop.xlane.xlu0 %4603 }
0x2388   : > { %v4610_v16 = vsub.f32 %v4590_v0, %v4604_v24  ;;  %v4614_v28 = vmul.f32 1.442695, %v4609_v33  ;;  %v7848_v33 = vld [vmem:[#allocation10 + $0x8] sm:$0xff]  }
0x238a   : > { %v4616_v23 = vmul.f32 1.442695, %v4610_v16 }
0x238b   : > { %v4607_v58 = vpop.xlane.xlu0 %4606 }
0x238c   : > { %7695 = vpow2.f32 %v4616_v23  ;;  %v4611_v37 = vsub.f32 %v4593_v2, %v4607_v58  ;;  %v7849_v23 = vld [vmem:[#allocation10 + $0x10] sm:$0xff]   ;;  %v7850_v58 = vld [vmem:[#allocation10 + $0x18] sm:$0xff]  }
0x238d   : > { %7697 = vpow2.f32 %v4612_v48 }
0x238e   : > { %v4618_v32 = vmul.f32 1.442695, %v4611_v37  ;;  %v7851_v37 = vld [vmem:[#allocation10 + $0x20] sm:$0xff]  }
0x2390   : > { %7699 = vpow2.f32 %v4618_v32  ;;  %v7853_v32 = vld [vmem:[#allocation10 + $0x30] sm:$0xff]  }
0x2391   : > { %7701 = vpow2.f32 %v4614_v28  ;;  %v7852_v28 = vld [vmem:[#allocation10 + $0x28] sm:$0xff]  }
0x2396   : > { %v7696_v63 = vpop.eup %7695 }
0x2397   : > { %v4626_v49 = vsel %vm1519_vm0, %v7696_v63, 0.0  ;;  %v7698_v46 = vpop.eup %7697 }
0x2398   : > { %4627 = vadd.xlane.f32.xlu0 %v4626_v49  ;;  %v4620_v62 = vsel %vm1519_vm0, %v7698_v46, 0.0 }
0x239a   : > { %v7700_v30 = vpop.eup %7699 }
0x239b   : > { %v4629_v56 = vsel %vm1519_vm0, %v7700_v30, 0.0  ;;  %v7702_v0 = vpop.eup %7701 }
0x239c   : > { %4621 = vadd.xlane.f32.xlu0 %v4620_v62  ;;  %4630 = vadd.xlane.f32.xlu1 %v4629_v56  ;;  %v4623_v13 = vsel %vm1519_vm0, %v7702_v0, 0.0 }
0x23a0   : > { %4624 = vadd.xlane.f32.xlu1 %v4623_v13 }
0x23b1   : > { %4644 = vrot.lane.b32.xlu1 %v9517_v9, %s8300_s9 }
0x23b2   : > { %4642 = vrot.lane.b32.xlu0 %v9521_v43, %s8300_s9 }
0x23b5   : > { %7316 = vrot.lane.b32.xlu1 %v10117_v10, %s8300_s9 }
0x23b6   : > { %7326 = vrot.lane.b32.xlu0 %v7325_v18, %s8299_s6 }
0x23b9   : > { %7321 = vrot.lane.b32.xlu1 %v10118_v21, %s8300_s9 }
0x23bd   : > { %7331 = vrot.lane.b32.xlu1 %v7330_v25, %s8299_s6 }
0x2425   : > { %v4628_v2 = vpop.xlane.xlu0 %4627 }
0x2429   : > { %v4631_v39 = vpop.xlane.xlu1 %4630  ;;  %v4622_v9 = vpop.xlane.xlu0 %4621 }
0x242a   : > { %7703 = vrcp.f32 %v4631_v39 }
0x242b   : > { %7705 = vrcp.f32 %v4622_v9 }
0x242c   : > { %7707 = vrcp.f32 %v4628_v2 }
0x242d   : > { %v4625_v43 = vpop.xlane.xlu1 %4624  ;;  %v4643_v59 = vpop.permute.xlu0 %4642 }
0x242e   : > { %7709 = vrcp.f32 %v4625_v43  ;;  %6947 = vmatprep.subr.bf16.mxu0 %v4643_v59 }
0x242f   : > { %6948 = vmatpush3.bf16.msra.mxu0 %v4643_v59 }
0x2431   : > { %v4645_v51 = vpop.permute.xlu1 %4644  ;;  %v7327_v9 = vpop.permute.xlu0 %7326 }
0x2432   : > { %6949 = vmatprep.subr.bf16.mxu0 %v4645_v51 }
0x2433   : > { %6950 = vmatpush3.bf16.msra.mxu0 %v4645_v51 }
0x2434   : > { %6955 = vmatprep.subr.bf16.mxu0 %v7847_v38  ;;  %v7704_v42 = vpop.eup %7703 }
0x2435   : > { %v7706_v47 = vpop.eup %7705  ;;  %v4639_v17 = vmul.f32 %v7704_v42, %v7700_v30  ;;  %v7317_v13 = vpop.permute.xlu1 %7316  ;;  %v7328_v42 = vunpack.i.l.bf16 %v7327_v9 }
0x2436   : > { %v7708_v18 = vpop.eup %7707  ;;  %v4636_v54 = vmul.f32 %v7706_v47, %v7698_v46  ;;  %v7319_v2 = vunpack.i.h.bf16 %v7317_v13  ;;  %v7318_v39 = vunpack.i.l.bf16 %v7317_v13 }
0x2437   : > { %v4638_v24 = vmul.f32 %v7708_v18, %v7696_v63  ;;  %v7854_v63 = vld [vmem:[#allocation10 + $0x38] sm:$0xff]  }
0x2438   : > { %v7710_v25 = vpop.eup %7709  ;;  %v4752_v47 = vsel %vm1519_vm0, %v9577_v3, %v7319_v2  ;;  %v4751_v18 = vsel %vm1519_vm0, %v9573_v11, %v7318_v39 }
0x2439   : > { %v4637_v20 = vmul.f32 %v7710_v25, %v7702_v0  ;;  %v4641_v48 = vpack.c.bf16 %v4639_v17, %v4638_v24  ;;  %v7322_v10 = vpop.permute.xlu1 %7321 }
0x243a   : > { %v7324_v43 = vunpack.i.h.bf16 %v7322_v10  ;;  %v7323_v59 = vunpack.i.l.bf16 %v7322_v10 }
0x243b   : > { %v4640_v16 = vpack.c.bf16 %v4637_v20, %v4636_v54 }
0x243c   : > { %v4754_v17 = vsel %vm1519_vm0, %v9575_v31, %v7324_v43  ;;  %v4753_v54 = vsel %vm1519_vm0, %v9571_v29, %v7323_v59 }
0x243d   : > { %6951 = vmatprep.mubr.msk.bf16.mxu0 %vm1519_vm0, %v4640_v16  ;;  %v7332_v21 = vpop.permute.xlu1 %7331 }
0x243e   : > { %6952 = vmatmul.mubr.msk.bf16.vlgmr.msra.gmra.mrb[64].mxu0 %vm1519_vm0, %v4641_v48  ;;  %v7334_v51 = vunpack.i.h.bf16 %v7332_v21 }
0x243f   : > { %6956 = vmatpush3.bf16.msra.mxu0 %v7847_v38  ;;  %v7329_v38 = vunpack.i.h.bf16 %v7327_v9 }
0x2440   : > { %6957 = vmatprep.subr.bf16.mxu0 %v7848_v33 }
0x2441   : > { %v4756_v31 = vsel %vm2268_vm1, %v4752_v47, %v7329_v38 }
0x2443   : > { %6958 = vmatpush3.bf16.msra.mxu0 %v7848_v33  ;;  %v4758_v33 = vsel %vm2268_vm1, %v4754_v17, %v7334_v51 }
0x2444   : > { %6959 = vmatprep.subr.bf16.mxu0 %v7849_v23 }
0x2447   : > { %6960 = vmatpush3.bf16.msra.mxu0 %v7849_v23 }
0x2448   : > { %6961 = vmatprep.subr.bf16.mxu0 %v7850_v58 }
0x244b   : > { %6962 = vmatpush3.bf16.msra.mxu0 %v7850_v58 }
0x244c   : > { %6963 = vmatprep.subr.bf16.mxu0 %v7851_v37 }
0x244f   : > { %6964 = vmatpush3.bf16.msra.mxu0 %v7851_v37  ;;  %v4755_v37 = vsel %vm2268_vm1, %v4751_v18, %v7328_v42 }
0x2450   : > { %6965 = vmatprep.subr.bf16.mxu0 %v7852_v28 }
0x2453   : > { %6966 = vmatpush3.bf16.msra.mxu0 %v7852_v28 }
0x2454   : > { %6967 = vmatprep.subr.bf16.mxu0 %v7853_v32 }
0x2457   : > { %6968 = vmatpush3.bf16.msra.mxu0 %v7853_v32 }
0x2458   : > { %6969 = vmatprep.subr.bf16.mxu0 %v7854_v63 }
0x245b   : > { %6970 = vmatpush3.bf16.msra.mxu0 %v7854_v63 }
0x245c   : > { %7103 = vmatprep.subr.msk.bf16.mxu0 %vm1519_vm0, %v8934_v60  ;;  %v7333_v60 = vunpack.i.l.bf16 %v7332_v21 }
0x245e   : > { %v4757_v48 = vsel %vm2268_vm1, %v4753_v54, %v7333_v60 }
0x2511   : > { %v6953_v49 = vpop.f32.mrb[64].mxu0 }
0x2512   : > { %v4688_v46 = vpop.f32.mrb[65].mxu0 }
0x2513   : > { %v6954_v30 = vpop.f32.mrb[66].mxu0 }
0x2514   : > { %v7340_v62 = vpack.i.bf16 %v6954_v30, %v6953_v49  ;;  %v4691_v56 = vpop.f32.mrb[67].mxu0 }
0x2515   : > { %v7335_v0 = vpack.i.bf16 %v4691_v56, %v4688_v46  ;;  %v7855_v46 = vld [vmem:[%s10105_s20] ss:$0 sm:$0xff] }
0x2516   : > { %7341 = vrot.lane.b32.xlu1 %v7340_v62, %s8298_s16 }
0x2517   : > { %7336 = vrot.lane.b32.xlu0 %v7335_v0, %s8298_s16 }
0x2588   : > { %v7342_v25 = vpop.permute.xlu1 %7341 }
0x2589   : > { %v7344_v20 = vunpack.i.h.bf16 %v7342_v25  ;;  %v7343_v24 = vunpack.i.l.bf16 %v7342_v25  ;;  %v7337_v16 = vpop.permute.xlu0 %7336 }
0x258a   : > { %v7339_v23 = vunpack.i.h.bf16 %v7337_v16  ;;  %v7338_v58 = vunpack.i.l.bf16 %v7337_v16 }
0x258b   : > { %v4762_v3 = vsel %vm2273_vm2, %v4758_v33, %v7344_v20  ;;  %v4761_v11 = vsel %vm2273_vm2, %v4757_v48, %v7343_v24 }
0x258c   : > { %v4764_v28 = vpack.c.bf16 %v4762_v3, %v4761_v11  ;;  %v4759_v29 = vsel %vm2273_vm2, %v4755_v37, %v7338_v58  ;;  %v4760_v32 = vsel %vm2273_vm2, %v4756_v31, %v7339_v23 }
0x258d   : > { %v4763_v63 = vpack.c.bf16 %v4760_v32, %v4759_v29 }
0x258f   : > { %6971 = vmatprep.mubr.bf16.mxu0 %v4763_v63 }
0x2590   : > { %6972 = vmatmul.mubr.bf16.vlgmr.msra.gmra.mrb[68].mxu0 %v4764_v28 }
0x2591   : > { %6996 = vmatpush3.bf16.xpose.msra.mxu0 %v9137_v57 }
0x2592   : > { %7104 = vmatprep.subr.msk.bf16.mxu0 %vm1519_vm0, %v8938_v7 }
0x2599   : > { %6998 = vmatpush3.bf16.xpose.msra.mxu0 %v9144_v6 }
0x259a   : > { %7019 = vmatprep.subr.bf16.mxu0 %v9260_v52 }
0x2663   : > { %v6973_v49 = vpop.f32.mrb[68].mxu0 }
0x2664   : > { %v4808_v30 = vadd.f32 %v7855_v46, %v6973_v49  ;;  %v4799_v62 = vpop.f32.mrb[69].mxu0 }
0x2665   : > { %v6974_v56 = vpop.f32.mrb[70].mxu0  ;;  %v4800_v13 = vadd.f32 %v7855_v46, %v4799_v62 }
0x2666   : > { %v9713_v0 = vadd.f32 %v4808_v30, %v9489_v34  ;;  %v4802_v57 = vpop.f32.mrb[71].mxu0  ;;  %v4811_v7 = vadd.f32 %v7855_v46, %v6974_v56 }
0x2667   : > { %v4803_v10 = vadd.f32 %v7855_v46, %v4802_v57  ;;  %v4814_v21 = vadd.f32 %v4800_v13, %v9482_v41 }
0x2668   : > { %4822 = vadd.xlane.f32.xlu0 %v9713_v0  ;;  %v4817_v2 = vadd.f32 %v4811_v7, %v9491_v53  ;;  %v4832_v43 = vmul.f32 %v9713_v0, %v9713_v0  ;;  %v7856_v7 = vld [vmem:[%s10106_s18] ss:$0 sm:$0xff] }
0x2669   : > { %v4815_v6 = vadd.f32 %v4803_v10, %v9484_v27  ;;  %v4830_v34 = vmul.f32 %v4814_v21, %v4814_v21 }
0x266a   : > { %v4833_v9 = vmul.f32 %v4817_v2, %v4817_v2 }
0x266b   : > { %4820 = vadd.xlane.f32.xlu1 %v4815_v6  ;;  %v4831_v39 = vmul.f32 %v4815_v6, %v4815_v6 }
0x266c   : > { %4818 = vadd.xlane.f32.xlu0 %v4814_v21 }
0x266f   : > { %4836 = vadd.xlane.f32.xlu1 %v4831_v39 }
0x2670   : > { %4824 = vadd.xlane.f32.xlu0 %v4817_v2 }
0x2673   : > { %4840 = vadd.xlane.f32.xlu1 %v4833_v9 }
0x2674   : > { %4834 = vadd.xlane.f32.xlu0 %v4830_v34 }
0x2678   : > { %4838 = vadd.xlane.f32.xlu0 %v4832_v43 }
0x26f5   : > { %v4823_v59 = vpop.xlane.xlu0 %4822 }
0x26f6   : > { %v4828_v48 = vmul.f32 0.0078125, %v4823_v59 }
0x26f8   : > { %v4821_v51 = vpop.xlane.xlu1 %4820  ;;  %v4848_v31 = vmul.f32 %v4828_v48, %v4828_v48  ;;  %v4856_v34 = vsub.f32 %v9713_v0, %v4828_v48 }
0x26f9   : > { %v4827_v27 = vmul.f32 0.0078125, %v4821_v51  ;;  %v4819_v60 = vpop.xlane.xlu0 %4818 }
0x26fa   : > { %v4826_v53 = vmul.f32 0.0078125, %v4819_v60 }
0x26fb   : > { %v4847_v38 = vmul.f32 %v4827_v27, %v4827_v27  ;;  %v4855_v46 = vsub.f32 %v4815_v6, %v4827_v27  ;;  %v7857_v6 = vld [vmem:[%s10107_s23] ss:$0 sm:$0xff] }
0x26fc   : > { %v4837_v41 = vpop.xlane.xlu1 %4836  ;;  %v4846_v33 = vmul.f32 %v4826_v53, %v4826_v53  ;;  %v4854_v56 = vsub.f32 %v4814_v21, %v4826_v53  ;;  %v7858_v53 = vld [vmem:[%s9992_s10] ss:$0 sm:$0xff] }
0x26fd   : > { %v4843_v42 = vmul.f32 0.0078125, %v4837_v41  ;;  %v4825_v47 = vpop.xlane.xlu0 %4824 }
0x26fe   : > { %v4829_v18 = vmul.f32 0.0078125, %v4825_v47 }
0x26ff   : > { %v4851_v25 = vsub.f32 %v4843_v42, %v4847_v38 }
0x2700   : > { %v4849_v17 = vmul.f32 %v4829_v18, %v4829_v18  ;;  %v4841_v54 = vpop.xlane.xlu1 %4840  ;;  %v4857_v13 = vsub.f32 %v4817_v2, %v4829_v18 }
0x2701   : > { %v4859_v20 = vadd.f32 1e-05, %v4851_v25  ;;  %v4845_v24 = vmul.f32 0.0078125, %v4841_v54  ;;  %v4835_v16 = vpop.xlane.xlu0 %4834 }
0x2702   : > { %v4842_v23 = vmul.f32 0.0078125, %v4835_v16 }
0x2703   : > { %7711 = vrsqrt.f32 %v4859_v20  ;;  %v4853_v58 = vsub.f32 %v4845_v24, %v4849_v17 }
0x2704   : > { %v4850_v3 = vsub.f32 %v4842_v23, %v4846_v33 }
0x2705   : > { %v4861_v11 = vadd.f32 1e-05, %v4853_v58  ;;  %v4839_v37 = vpop.xlane.xlu0 %4838 }
0x2706   : > { %v4858_v28 = vadd.f32 1e-05, %v4850_v3  ;;  %v4844_v29 = vmul.f32 0.0078125, %v4839_v37 }
0x2707   : > { %7713 = vrsqrt.f32 %v4861_v11 }
0x2708   : > { %7715 = vrsqrt.f32 %v4858_v28  ;;  %v4852_v32 = vsub.f32 %v4844_v29, %v4848_v31 }
0x270a   : > { %v4860_v63 = vadd.f32 1e-05, %v4852_v32 }
0x270c   : > { %7717 = vrsqrt.f32 %v4860_v63 }
0x270d   : > { %v7712_v49 = vpop.eup %7711 }
0x270e   : > { %v4867_v30 = vmul.f32 %v7712_v49, %v4855_v46 }
0x2710   : > { %v4871_v39 = vmul.f32 %v7856_v7, %v4867_v30 }
0x2711   : > { %v7714_v62 = vpop.eup %7713 }
0x2712   : > { %v7716_v57 = vpop.eup %7715  ;;  %v4869_v9 = vmul.f32 %v7714_v62, %v4857_v13  ;;  %v9730_v21 = vadd.f32 %v7857_v6, %v4871_v39 }
0x2713   : > { %v4866_v10 = vmul.f32 %v7716_v57, %v4854_v56 }
0x2714   : > { %v4873_v27 = vmul.f32 %v7856_v7, %v4869_v9 }
0x2715   : > { %v4870_v43 = vmul.f32 %v7856_v7, %v4866_v10 }
0x2716   : > { %v7718_v59 = vpop.eup %7717  ;;  %v9736_v0 = vadd.f32 %v7857_v6, %v4873_v27 }
0x2717   : > { %v9728_v51 = vadd.f32 %v7857_v6, %v4870_v43  ;;  %v4868_v2 = vmul.f32 %v7718_v59, %v4856_v34 }
0x2719   : > { %v4878_v60 = vpack.c.bf16 %v9730_v21, %v9728_v51  ;;  %v4872_v41 = vmul.f32 %v7856_v7, %v4868_v2 }
0x271b   : > { %6991 = vmatprep.mubr.bf16.mxu1 %v4878_v60  ;;  %v9734_v38 = vadd.f32 %v7857_v6, %v4872_v41 }
0x271d   : > { %v4879_v42 = vpack.c.bf16 %v9736_v0, %v9734_v38 }
0x271f   : > { %6992 = vmatmul.mubr.bf16.vlgmr.msra.gmra.mrb[88].mxu1 %v4879_v42 }
0x2720   : > { %7004 = vmatpush3.bf16.msra.mxu1 %v8936_v61 }
0x2721   : > { %7005 = vmatprep.subr.bf16.mxu1 %v8940_v8 }
0x2724   : > { %7006 = vmatpush3.bf16.msra.mxu1 %v8940_v8 }
0x2725   : > { %7105 = vmatprep.subr.msk.bf16.mxu1 %vm1519_vm0, %v9208_v35 }
0x27f2   : > { %v6993_v47 = vpop.f32.mrb[88].mxu1 }
0x27f3   : > { %v4923_v18 = vadd.f32 %v7858_v53, %v6993_v47  ;;  %v4914_v25 = vpop.f32.mrb[89].mxu1 }
0x27f4   : > { %v4915_v17 = vadd.f32 %v7858_v53, %v4914_v25  ;;  %v6994_v54 = vpop.f32.mrb[90].mxu1 }
0x27f5   : > { %v4926_v20 = vadd.f32 %v7858_v53, %v6994_v54  ;;  %v4917_v24 = vpop.f32.mrb[91].mxu1  ;;  %v4931_v61 = vmul.f32 0.17677669, %v4923_v18 }
0x27f6   : > { %v4918_v16 = vadd.f32 %v7858_v53, %v4917_v24  ;;  %v4929_v33 = vmul.f32 0.17677669, %v4915_v17 }
0x27f7   : > { %v4932_v48 = vmul.f32 0.17677669, %v4926_v20 }
0x27f8   : > { %v4930_v23 = vmul.f32 0.17677669, %v4918_v16 }
0x27f9   : > { %v9748_v8 = vpack.c.bf16 %v4932_v48, %v4931_v61 }
0x27fa   : > { %v9750_v58 = vpack.c.bf16 %v4930_v23, %v4929_v33 }
0x27fc   : > { %6999 = vmatprep.mubr.msk.bf16.mxu0 %vm1519_vm0, %v9750_v58 }
0x27fd   : > { %7000 = vmatmul.mubr.msk.bf16.vlgmr.msra.gmra.mrb[72].mxu0 %vm1519_vm0, %v9748_v8 }
0x27fe   : > { %7020 = vmatpush3.bf16.msra.mxu0 %v9260_v52 }
0x27ff   : > { %7021 = vmatprep.subr.bf16.mxu0 %v9258_v50 }
0x2802   : > { %7022 = vmatpush3.bf16.msra.mxu0 %v9258_v50 }
0x2803   : > { %7107 = vmatprep.subr.msk.bf16.mxu0 %vm1519_vm0, %v9265_v12 }
0x28d0   : > { %v7001_v35 = vpop.f32.mrb[72].mxu0 }
0x28d1   : > { %v4975_v3 = vpop.f32.mrb[73].mxu0  ;;  %v4996_v29 = vsel %vm1519_vm0, %v7001_v35, -inf }
0x28d2   : > { %v7002_v11 = vpop.f32.mrb[74].mxu0  ;;  %v4990_v37 = vsel %vm1519_vm0, %v4975_v3, -inf }
0x28d3   : > { %4991 = vmax.xlane.f32.xlu0 %v4990_v37  ;;  %v4978_v31 = vpop.f32.mrb[75].mxu0  ;;  %v4999_v52 = vsel %vm1519_vm0, %v7002_v11, -inf }
0x28d4   : > { %v4993_v28 = vsel %vm1519_vm0, %v4978_v31, -inf }
0x28d5   : > { %4994 = vmax.xlane.f32.xlu1 %v4993_v28 }
0x28d7   : > { %4997 = vmax.xlane.f32.xlu0 %v4996_v29 }
0x28d9   : > { %5000 = vmax.xlane.f32.xlu1 %v4999_v52 }
0x2960   : > { %v4992_v50 = vpop.xlane.xlu0 %4991 }
0x2961   : > { %v5002_v32 = vsub.f32 %v4975_v3, %v4992_v50 }
0x2962   : > { %v4995_v63 = vpop.xlane.xlu1 %4994 }
0x2963   : > { %v5006_v12 = vmul.f32 1.442695, %v5002_v32  ;;  %v5003_v49 = vsub.f32 %v4978_v31, %v4995_v63 }
0x2964   : > { %v4998_v46 = vpop.xlane.xlu0 %4997 }
0x2965   : > { %7719 = vpow2.f32 %v5006_v12  ;;  %v5008_v30 = vmul.f32 1.442695, %v5003_v49  ;;  %v5004_v62 = vsub.f32 %v7001_v35, %v4998_v46 }
0x2966   : > { %v5001_v56 = vpop.xlane.xlu1 %5000 }
0x2967   : > { %7721 = vpow2.f32 %v5008_v30  ;;  %v5010_v13 = vmul.f32 1.442695, %v5004_v62  ;;  %v5005_v57 = vsub.f32 %v7002_v11, %v5001_v56 }
0x2969   : > { %7723 = vpow2.f32 %v5010_v13  ;;  %v5012_v10 = vmul.f32 1.442695, %v5005_v57 }
0x296b   : > { %7725 = vpow2.f32 %v5012_v10 }
0x296f   : > { %v7720_v7 = vpop.eup %7719 }
0x2970   : > { %v5014_v39 = vsel %vm1519_vm0, %v7720_v7, 0.0 }
0x2971   : > { %v7722_v9 = vpop.eup %7721  ;;  %5015 = vadd.xlane.f32.xlu0 %v5014_v39 }
0x2972   : > { %v5017_v34 = vsel %vm1519_vm0, %v7722_v9, 0.0 }
0x2973   : > { %v7724_v43 = vpop.eup %7723  ;;  %5018 = vadd.xlane.f32.xlu1 %v5017_v34 }
0x2974   : > { %v5020_v59 = vsel %vm1519_vm0, %v7724_v43, 0.0 }
0x2975   : > { %v7726_v6 = vpop.eup %7725  ;;  %5021 = vadd.xlane.f32.xlu0 %v5020_v59 }
0x2976   : > { %v5023_v2 = vsel %vm1519_vm0, %v7726_v6, 0.0 }
0x2977   : > { %5024 = vadd.xlane.f32.xlu1 %v5023_v2 }
0x2988   : > { %5095 = vrot.lane.b32.xlu1 %v9748_v8, %s8298_s16 }
0x298b   : > { %5093 = vrot.lane.b32.xlu0 %v9750_v58, %s8298_s16 }
0x29fe   : > { %v5016_v27 = vpop.xlane.xlu0 %5015 }
0x29ff   : > { %7727 = vrcp.f32 %v5016_v27 }
0x2a00   : > { %v5019_v60 = vpop.xlane.xlu1 %5018 }
0x2a01   : > { %7729 = vrcp.f32 %v5019_v60 }
0x2a02   : > { %v5022_v41 = vpop.xlane.xlu0 %5021 }
0x2a03   : > { %7731 = vrcp.f32 %v5022_v41 }
0x2a04   : > { %v5025_v42 = vpop.xlane.xlu1 %5024 }
0x2a05   : > { %7733 = vrcp.f32 %v5025_v42 }
0x2a06   : > { %v5094_v48 = vpop.permute.xlu0 %5093 }
0x2a08   : > { %v5096_v33 = vpop.permute.xlu1 %5095 }
0x2a09   : > { %v7728_v47 = vpop.eup %7727 }
0x2a0a   : > { %v5030_v18 = vmul.f32 %v7728_v47, %v7720_v7 }
0x2a0b   : > { %v7730_v53 = vpop.eup %7729 }
0x2a0c   : > { %v5031_v25 = vmul.f32 %v7730_v53, %v7722_v9 }
0x2a0d   : > { %v7732_v17 = vpop.eup %7731 }
0x2a0e   : > { %v5034_v54 = vpack.c.bf16 %v5031_v25, %v5030_v18  ;;  %v5032_v24 = vmul.f32 %v7732_v17, %v7724_v43 }
0x2a0f   : > { %v7734_v20 = vpop.eup %7733 }
0x2a10   : > { %v5033_v16 = vmul.f32 %v7734_v20, %v7726_v6  ;;  %7007 = vmatprep.mubr.msk.bf16.mxu1 %vm1519_vm0, %v5034_v54 }
0x2a12   : > { %v5035_v61 = vpack.c.bf16 %v5033_v16, %v5032_v24 }
0x2a14   : > { %7008 = vmatmul.mubr.msk.bf16.vlgmr.msra.gmra.mrb[92].mxu1 %vm1519_vm0, %v5035_v61  ;;  %v9819_v61 = vld [vmem:[#allocation14] sm:$0xff]  }
0x2a15   : > { %7012 = vmatpush3.bf16.xpose.msra.mxu1 %v9218_v55  ;;  %7015 = vmatprep.mubr.msk.bf16.mxu1 %vm1519_vm0, %v5094_v48 }
0x2a16   : > { %7106 = vmatprep.subr.msk.bf16.mxu1 %vm1519_vm0, %v9212_v14 }
0x2a1d   : > { %7014 = vmatpush3.bf16.xpose.msra.mxu1 %v9226_v45 }
0x2a1e   : > { %7035 = vmatprep.subr.bf16.mxu1 %v9322_v44 }
0x2a24   : > { %7016 = vmatmul.mubr.msk.bf16.vlgmr.msra.gmra.mrb[96].mxu1 %vm1519_vm0, %v5096_v33 }
0x2a25   : > { %7036 = vmatpush3.bf16.msra.mxu1 %v9322_v44 }
0x2a26   : > { %7037 = vmatprep.subr.bf16.mxu1 %v9320_v22 }
0x2a29   : > { %7038 = vmatpush3.bf16.msra.mxu1 %v9320_v22 }
0x2a2a   : > { %7109 = vmatprep.subr.msk.bf16.mxu1 %vm1519_vm0, %v9327_v26 }
0x2ae7   : > { %v9787_v55 = vpop.f32.mrb[92].mxu1 }
0x2ae8   : > { %v9789_v23 = vpop.f32.mrb[93].mxu1 }
0x2ae9   : > { %v9791_v14 = vpop.f32.mrb[94].mxu1 }
0x2aea   : > { %v9793_v45 = vpop.f32.mrb[95].mxu1 }
0x2af7   : > { %v7017_v35 = vpop.f32.mrb[96].mxu1 }
0x2af8   : > { %v5137_v3 = vpop.f32.mrb[97].mxu1  ;;  %v5158_v31 = vsel %vm1519_vm0, %v7017_v35, -inf }
0x2af9   : > { %v7018_v11 = vpop.f32.mrb[98].mxu1  ;;  %v5152_v44 = vsel %vm1519_vm0, %v5137_v3, -inf }
0x2afa   : > { %5153 = vmax.xlane.f32.xlu1 %v5152_v44  ;;  %v5140_v37 = vpop.f32.mrb[99].mxu1  ;;  %v5161_v26 = vsel %vm1519_vm0, %v7018_v11, -inf }
0x2afb   : > { %v5155_v22 = vsel %vm1519_vm0, %v5140_v37, -inf }
0x2afc   : > { %5156 = vmax.xlane.f32.xlu0 %v5155_v22 }
0x2afe   : > { %5162 = vmax.xlane.f32.xlu1 %v5161_v26 }
0x2b00   : > { %5159 = vmax.xlane.f32.xlu0 %v5158_v31 }
0x2b87   : > { %v5154_v28 = vpop.xlane.xlu1 %5153 }
0x2b88   : > { %v5164_v29 = vsub.f32 %v5137_v3, %v5154_v28 }
0x2b89   : > { %v5157_v52 = vpop.xlane.xlu0 %5156 }
0x2b8a   : > { %v5168_v50 = vmul.f32 1.442695, %v5164_v29  ;;  %v5165_v32 = vsub.f32 %v5140_v37, %v5157_v52 }
0x2b8b   : > { %v5163_v63 = vpop.xlane.xlu1 %5162 }
0x2b8c   : > { %7735 = vpow2.f32 %v5168_v50  ;;  %v5170_v12 = vmul.f32 1.442695, %v5165_v32  ;;  %v5167_v49 = vsub.f32 %v7018_v11, %v5163_v63 }
0x2b8d   : > { %v5160_v46 = vpop.xlane.xlu0 %5159 }
0x2b8e   : > { %7737 = vpow2.f32 %v5170_v12  ;;  %v5174_v30 = vmul.f32 1.442695, %v5167_v49  ;;  %v5166_v62 = vsub.f32 %v7017_v35, %v5160_v46 }
0x2b90   : > { %7739 = vpow2.f32 %v5174_v30  ;;  %v5172_v56 = vmul.f32 1.442695, %v5166_v62 }
0x2b92   : > { %7741 = vpow2.f32 %v5172_v56 }
0x2b96   : > { %v7736_v13 = vpop.eup %7735 }
0x2b97   : > { %v5176_v57 = vsel %vm1519_vm0, %v7736_v13, 0.0 }
0x2b98   : > { %v7738_v10 = vpop.eup %7737  ;;  %5177 = vadd.xlane.f32.xlu0 %v5176_v57 }
0x2b99   : > { %v5179_v7 = vsel %vm1519_vm0, %v7738_v10, 0.0 }
0x2b9a   : > { %v7740_v39 = vpop.eup %7739  ;;  %5180 = vadd.xlane.f32.xlu1 %v5179_v7 }
0x2b9b   : > { %v5185_v34 = vsel %vm1519_vm0, %v7740_v39, 0.0 }
0x2b9c   : > { %v7742_v9 = vpop.eup %7741 }
0x2b9d   : > { %v5182_v43 = vsel %vm1519_vm0, %v7742_v9, 0.0 }
0x2b9e   : > { %5186 = vadd.xlane.f32.xlu1 %v5185_v34  ;;  %5183 = vadd.xlane.f32.xlu0 %v5182_v43 }
0x2baf   : > { %5255 = vrot.lane.b32.xlu1 %v9748_v8, %s8299_s6 }
0x2bb4   : > { %5253 = vrot.lane.b32.xlu0 %v9750_v58, %s8299_s6 }
0x2c25   : > { %v5178_v59 = vpop.xlane.xlu0 %5177 }
0x2c26   : > { %7743 = vrcp.f32 %v5178_v59 }
0x2c27   : > { %v5181_v6 = vpop.xlane.xlu1 %5180 }
0x2c28   : > { %7745 = vrcp.f32 %v5181_v6 }
0x2c2b   : > { %v5187_v2 = vpop.xlane.xlu1 %5186  ;;  %v5184_v27 = vpop.xlane.xlu0 %5183 }
0x2c2c   : > { %7747 = vrcp.f32 %v5187_v2 }
0x2c2d   : > { %7749 = vrcp.f32 %v5184_v27 }
0x2c2f   : > { %v5254_v24 = vpop.permute.xlu0 %5253  ;;  %v5256_v16 = vpop.permute.xlu1 %5255 }
0x2c30   : > { %v7744_v60 = vpop.eup %7743 }
0x2c31   : > { %v5192_v42 = vmul.f32 %v7744_v60, %v7736_v13 }
0x2c32   : > { %v7746_v41 = vpop.eup %7745 }
0x2c33   : > { %v5193_v47 = vmul.f32 %v7746_v41, %v7738_v10 }
0x2c35   : > { %v5196_v53 = vpack.c.bf16 %v5193_v47, %v5192_v42 }
0x2c36   : > { %v7748_v18 = vpop.eup %7747 }
0x2c37   : > { %v7750_v25 = vpop.eup %7749  ;;  %v5195_v17 = vmul.f32 %v7748_v18, %v7740_v39  ;;  %7023 = vmatprep.mubr.msk.bf16.mxu0 %vm1519_vm0, %v5196_v53 }
0x2c38   : > { %v5194_v54 = vmul.f32 %v7750_v25, %v7742_v9 }
0x2c3a   : > { %v5197_v20 = vpack.c.bf16 %v5195_v17, %v5194_v54  ;;  %v10119_v54 = vld [vmem:[#allocation30_spill] sm:$0xff] }
0x2c3c   : > { %7024 = vmatmul.mubr.msk.bf16.vlgmr.msra.gmra.mrb[76].mxu0 %vm1519_vm0, %v5197_v20  ;;  %v7860_v20 = vld [vmem:[#allocation16 + $0x4] ss:$8 sps:$4 sm:$0xff]  }
0x2c3d   : > { %7028 = vmatpush3.bf16.xpose.msra.mxu0 %v9274_v4  ;;  %7031 = vmatprep.mubr.msk.bf16.mxu0 %vm1519_vm0, %v5254_v24 }
0x2c3e   : > { %7108 = vmatprep.subr.msk.bf16.mxu0 %vm1519_vm0, %v9276_v5 }
0x2c45   : > { %7030 = vmatpush3.bf16.xpose.msra.mxu0 %v9284_v36 }
0x2c46   : > { %7051 = vmatprep.subr.bf16.mxu0 %v9373_v15 }
0x2c4c   : > { %7032 = vmatmul.mubr.msk.bf16.vlgmr.msra.gmra.mrb[80].mxu0 %vm1519_vm0, %v5256_v16  ;;  %v7861_v16 = vld [vmem:[#allocation16] ss:$8 sps:$4 sm:$0xff]  }
0x2c4d   : > { %7052 = vmatpush3.bf16.msra.mxu0 %v9373_v15 }
0x2c4e   : > { %7053 = vmatprep.subr.bf16.mxu0 %v9377_v40 }
0x2c51   : > { %7054 = vmatpush3.bf16.msra.mxu0 %v9377_v40 }
0x2c52   : > { %7059 = vmatprep.subr.bf16.mxu0 %v9819_v61 }
0x2d0f   : > { %v9822_v4 = vpop.f32.mrb[76].mxu0 }
0x2d10   : > { %v9824_v5 = vpop.f32.mrb[77].mxu0 }
0x2d11   : > { %v9826_v36 = vpop.f32.mrb[78].mxu0 }
0x2d12   : > { %v7350_v48 = vpack.i.bf16 %v9826_v36, %v9822_v4  ;;  %v9830_v33 = vpop.f32.mrb[79].mxu0 }
0x2d13   : > { %v7345_v15 = vpack.i.bf16 %v9830_v33, %v9824_v5 }
0x2d1f   : > { %v7033_v35 = vpop.f32.mrb[80].mxu0 }
0x2d20   : > { %v5297_v40 = vpop.f32.mrb[81].mxu0  ;;  %v5318_v26 = vsel %vm1519_vm0, %v7033_v35, -inf }
0x2d21   : > { %v7034_v3 = vpop.f32.mrb[82].mxu0  ;;  %v5312_v11 = vsel %vm1519_vm0, %v5297_v40, -inf }
0x2d22   : > { %5313 = vmax.xlane.f32.xlu1 %v5312_v11  ;;  %v5300_v44 = vpop.f32.mrb[83].mxu0  ;;  %v5321_v22 = vsel %vm1519_vm0, %v7034_v3, -inf  ;;  %v7865_v11 = vld [vmem:[#allocation16 + $0x20] ss:$8 sps:$4 sm:$0xff]  }
0x2d23   : > { %v5315_v37 = vsel %vm1519_vm0, %v5300_v44, -inf }
0x2d24   : > { %5316 = vmax.xlane.f32.xlu0 %v5315_v37  ;;  %v7868_v37 = vld [vmem:[#allocation16 + $0x44] ss:$8 sps:$4 sm:$0xff]  }
0x2d26   : > { %5322 = vmax.xlane.f32.xlu1 %v5321_v22  ;;  %v7869_v22 = vld [vmem:[#allocation16 + $0x40] ss:$8 sps:$4 sm:$0xff]  }
0x2d28   : > { %5319 = vmax.xlane.f32.xlu0 %v5318_v26  ;;  %v7870_v26 = vld [vmem:[#allocation16 + $0x54] ss:$8 sps:$4 sm:$0xff]  }
0x2daf   : > { %v5314_v31 = vpop.xlane.xlu1 %5313 }
0x2db0   : > { %v5324_v28 = vsub.f32 %v5297_v40, %v5314_v31  ;;  %v7862_v40 = vld [vmem:[#allocation16 + $0x14] ss:$8 sps:$4 sm:$0xff]   ;;  %v7871_v31 = vld [vmem:[#allocation16 + $0x50] ss:$8 sps:$4 sm:$0xff]  }
0x2db1   : > { %v5317_v29 = vpop.xlane.xlu0 %5316 }
0x2db2   : > { %v5328_v52 = vmul.f32 1.442695, %v5324_v28  ;;  %v5325_v50 = vsub.f32 %v5300_v44, %v5317_v29  ;;  %v7867_v44 = vld [vmem:[#allocation16 + $0x30] ss:$8 sps:$4 sm:$0xff]   ;;  %v7872_v28 = vld [vmem:[#allocation16 + $0x64] ss:$8 sps:$4 sm:$0xff]  }
0x2db3   : > { %v5323_v32 = vpop.xlane.xlu1 %5322  ;;  %v7873_v29 = vld [vmem:[#allocation16 + $0x60] ss:$8 sps:$4 sm:$0xff]  }
0x2db4   : > { %7751 = vpow2.f32 %v5328_v52  ;;  %v5330_v63 = vmul.f32 1.442695, %v5325_v50  ;;  %v5327_v12 = vsub.f32 %v7034_v3, %v5323_v32  ;;  %v7863_v3 = vld [vmem:[#allocation16 + $0x10] ss:$8 sps:$4 sm:$0xff]   ;;  %v7874_v52 = vld [vmem:[#allocation16 + $0x74] ss:$8 sps:$4 sm:$0xff]  }
0x2db5   : > { %v5320_v49 = vpop.xlane.xlu0 %5319  ;;  %v7875_v50 = vld [vmem:[#allocation16 + $0x70] ss:$8 sps:$4 sm:$0xff]  }
0x2db6   : > { %7753 = vpow2.f32 %v5330_v63  ;;  %v5334_v46 = vmul.f32 1.442695, %v5327_v12  ;;  %v5326_v30 = vsub.f32 %v7033_v35, %v5320_v49  ;;  %v10120_v35 = vmov 0  }
0x2db8   : > { %7755 = vpow2.f32 %v5334_v46  ;;  %v5332_v62 = vmul.f32 1.442695, %v5326_v30 }
0x2dba   : > { %7757 = vpow2.f32 %v5332_v62 }
0x2dbe   : > { %v7752_v56 = vpop.eup %7751 }
0x2dbf   : > { %v5336_v13 = vsel %vm1519_vm0, %v7752_v56, 0.0 }
0x2dc0   : > { %v7754_v57 = vpop.eup %7753  ;;  %5337 = vadd.xlane.f32.xlu0 %v5336_v13 }
0x2dc1   : > { %v5339_v10 = vsel %vm1519_vm0, %v7754_v57, 0.0 }
0x2dc2   : > { %v7756_v7 = vpop.eup %7755  ;;  %5340 = vadd.xlane.f32.xlu1 %v5339_v10 }
0x2dc3   : > { %v5345_v9 = vsel %vm1519_vm0, %v7756_v7, 0.0 }
0x2dc4   : > { %v7758_v39 = vpop.eup %7757 }
0x2dc5   : > { %v5342_v34 = vsel %vm1519_vm0, %v7758_v39, 0.0 }
0x2dc6   : > { %5346 = vadd.xlane.f32.xlu1 %v5345_v9  ;;  %5343 = vadd.xlane.f32.xlu0 %v5342_v34 }
0x2dd7   : > { %5415 = vrot.lane.b32.xlu1 %v9748_v8, %s8300_s9 }
0x2ddc   : > { %5413 = vrot.lane.b32.xlu0 %v9750_v58, %s8300_s9 }
0x2e4d   : > { %v5338_v43 = vpop.xlane.xlu0 %5337 }
0x2e4e   : > { %7759 = vrcp.f32 %v5338_v43 }
0x2e4f   : > { %v5341_v59 = vpop.xlane.xlu1 %5340 }
0x2e50   : > { %7761 = vrcp.f32 %v5341_v59 }
0x2e53   : > { %v5347_v6 = vpop.xlane.xlu1 %5346  ;;  %v5344_v2 = vpop.xlane.xlu0 %5343 }
0x2e54   : > { %7763 = vrcp.f32 %v5347_v6 }
0x2e55   : > { %7765 = vrcp.f32 %v5344_v2 }
0x2e57   : > { %v5414_v17 = vpop.permute.xlu0 %5413  ;;  %v5416_v24 = vpop.permute.xlu1 %5415 }
0x2e58   : > { %v7760_v27 = vpop.eup %7759 }
0x2e59   : > { %v5352_v41 = vmul.f32 %v7760_v27, %v7752_v56 }
0x2e5a   : > { %v7762_v60 = vpop.eup %7761 }
0x2e5b   : > { %v5353_v42 = vmul.f32 %v7762_v60, %v7754_v57 }
0x2e5d   : > { %v5356_v47 = vpack.c.bf16 %v5353_v42, %v5352_v41 }
0x2e5e   : > { %v7764_v53 = vpop.eup %7763 }
0x2e5f   : > { %v7766_v18 = vpop.eup %7765  ;;  %v5355_v25 = vmul.f32 %v7764_v53, %v7756_v7  ;;  %7039 = vmatprep.mubr.msk.bf16.mxu1 %vm1519_vm0, %v5356_v47 }
0x2e60   : > { %v5354_v8 = vmul.f32 %v7766_v18, %v7758_v39 }
0x2e62   : > { %v5357_v58 = vpack.c.bf16 %v5355_v25, %v5354_v8 }
0x2e64   : > { %7040 = vmatmul.mubr.msk.bf16.vlgmr.msra.gmra.mrb[100].mxu1 %vm1519_vm0, %v5357_v58 }
0x2e65   : > { %7044 = vmatpush3.bf16.xpose.msra.mxu1 %v9336_v19  ;;  %7047 = vmatprep.mubr.msk.bf16.mxu1 %vm1519_vm0, %v5414_v17  ;;  %v7864_v19 = vld [vmem:[#allocation16 + $0x24] ss:$8 sps:$4 sm:$0xff]  }
0x2e66   : > { %7110 = vmatprep.subr.msk.bf16.mxu1 %vm1519_vm0, %v9338_v1  ;;  %v7866_v1 = vld [vmem:[#allocation16 + $0x34] ss:$8 sps:$4 sm:$0xff]  }
0x2e6d   : > { %7046 = vmatpush3.bf16.xpose.msra.mxu1 %v10119_v54 }
0x2e6e   : > { %5750 = vmatprep.subr.bf16.mxu1 %v7860_v20 }
0x2e74   : > { %7048 = vmatmul.mubr.msk.bf16.vlgmr.msra.gmra.mrb[104].mxu1 %vm1519_vm0, %v5416_v24 }
0x2e75   : > { %5751 = vmatpush1.bf16.msra.mxu1 %v7861_v16  ;;  %5782 = vmatprep.mubr.bf16.mxu1 %v10120_v35 }
0x2e76   : > { %5752 = vmatprep.subr.bf16.mxu1 %v7862_v40 }
0x2e79   : > { %5753 = vmatpush1.bf16.msra.mxu1 %v7863_v3 }
0x2e7a   : > { %5754 = vmatprep.subr.bf16.mxu1 %v7864_v19 }
0x2e7d   : > { %5755 = vmatpush1.bf16.msra.mxu1 %v7865_v11 }
0x2e7e   : > { %5756 = vmatprep.subr.bf16.mxu1 %v7866_v1 }
0x2e81   : > { %5757 = vmatpush1.bf16.msra.mxu1 %v7867_v44 }
0x2e82   : > { %5758 = vmatprep.subr.bf16.mxu1 %v7868_v37 }
0x2e85   : > { %5759 = vmatpush1.bf16.msra.mxu1 %v7869_v22 }
0x2e86   : > { %5760 = vmatprep.subr.bf16.mxu1 %v7870_v26 }
0x2e89   : > { %5761 = vmatpush1.bf16.msra.mxu1 %v7871_v31  ;;  %v7877_v31 = vld [vmem:[#allocation14 + $0x10] sm:$0xff]  }
0x2e8a   : > { %5762 = vmatprep.subr.bf16.mxu1 %v7872_v28  ;;  %v7878_v28 = vld [vmem:[#allocation14 + $0x18] sm:$0xff]  }
0x2e8d   : > { %5763 = vmatpush1.bf16.msra.mxu1 %v7873_v29  ;;  %v7879_v29 = vld [vmem:[#allocation14 + $0x20] sm:$0xff]  }
0x2e8e   : > { %5764 = vmatprep.subr.bf16.mxu1 %v7874_v52  ;;  %v7880_v52 = vld [vmem:[#allocation14 + $0x28] sm:$0xff]  }
0x2e91   : > { %5765 = vmatpush1.bf16.msra.mxu1 %v7875_v50  ;;  %v7881_v50 = vld [vmem:[#allocation14 + $0x30] sm:$0xff]  }
0x2f37   : > { %v7041_v32 = vpop.f32.mrb[100].mxu1 }
0x2f38   : > { %v5398_v63 = vpop.f32.mrb[101].mxu1 }
0x2f39   : > { %v7042_v12 = vpop.f32.mrb[102].mxu1 }
0x2f3a   : > { %v7360_v49 = vpack.i.bf16 %v7042_v12, %v7041_v32  ;;  %v5401_v46 = vpop.f32.mrb[103].mxu1  ;;  %v7882_v32 = vld [vmem:[#allocation14 + $0x38] sm:$0xff]  }
0x2f3b   : > { %v7355_v30 = vpack.i.bf16 %v5401_v46, %v5398_v63 }
0x2f47   : > { %v7049_v62 = vpop.f32.mrb[104].mxu1 }
0x2f48   : > { %v5457_v56 = vpop.f32.mrb[105].mxu1  ;;  %v5478_v9 = vsel %vm1519_vm0, %v7049_v62, -inf }
0x2f49   : > { %v7050_v13 = vpop.f32.mrb[106].mxu1  ;;  %v5472_v57 = vsel %vm1519_vm0, %v5457_v56, -inf }
0x2f4a   : > { %5473 = vmax.xlane.f32.xlu1 %v5472_v57  ;;  %v5460_v10 = vpop.f32.mrb[107].mxu1  ;;  %v5481_v39 = vsel %vm1519_vm0, %v7050_v13, -inf }
0x2f4b   : > { %v5475_v7 = vsel %vm1519_vm0, %v5460_v10, -inf }
0x2f4c   : > { %5476 = vmax.xlane.f32.xlu0 %v5475_v7 }
0x2f4e   : > { %5482 = vmax.xlane.f32.xlu1 %v5481_v39 }
0x2f50   : > { %5479 = vmax.xlane.f32.xlu0 %v5478_v9 }
0x2fd7   : > { %v5474_v34 = vpop.xlane.xlu1 %5473 }
0x2fd8   : > { %v5484_v43 = vsub.f32 %v5457_v56, %v5474_v34 }
0x2fd9   : > { %v5477_v59 = vpop.xlane.xlu0 %5476 }
0x2fda   : > { %v5488_v6 = vmul.f32 1.442695, %v5484_v43  ;;  %v5485_v2 = vsub.f32 %v5460_v10, %v5477_v59 }
0x2fdb   : > { %v5483_v27 = vpop.xlane.xlu1 %5482 }
0x2fdc   : > { %7767 = vpow2.f32 %v5488_v6  ;;  %v5490_v60 = vmul.f32 1.442695, %v5485_v2  ;;  %v5487_v41 = vsub.f32 %v7050_v13, %v5483_v27 }
0x2fdd   : > { %v5480_v42 = vpop.xlane.xlu0 %5479 }
0x2fde   : > { %7769 = vpow2.f32 %v5490_v60  ;;  %v5494_v47 = vmul.f32 1.442695, %v5487_v41  ;;  %v5486_v53 = vsub.f32 %v7049_v62, %v5480_v42 }
0x2fe0   : > { %7771 = vpow2.f32 %v5494_v47  ;;  %v5492_v18 = vmul.f32 1.442695, %v5486_v53 }
0x2fe2   : > { %7773 = vpow2.f32 %v5492_v18 }
0x2fe6   : > { %v7768_v25 = vpop.eup %7767 }
0x2fe7   : > { %v5496_v8 = vsel %vm1519_vm0, %v7768_v25, 0.0 }
0x2fe8   : > { %v7770_v58 = vpop.eup %7769  ;;  %5497 = vadd.xlane.f32.xlu0 %v5496_v8 }
0x2fe9   : > { %v5499_v17 = vsel %vm1519_vm0, %v7770_v58, 0.0 }
0x2fea   : > { %v7772_v54 = vpop.eup %7771  ;;  %5500 = vadd.xlane.f32.xlu1 %v5499_v17 }
0x2feb   : > { %v5505_v24 = vsel %vm1519_vm0, %v7772_v54, 0.0 }
0x2fec   : > { %v7774_v20 = vpop.eup %7773 }
0x2fed   : > { %v5502_v16 = vsel %vm1519_vm0, %v7774_v20, 0.0 }
0x2fee   : > { %5506 = vadd.xlane.f32.xlu1 %v5505_v24  ;;  %5503 = vadd.xlane.f32.xlu0 %v5502_v16 }
0x2fff   : > { %7351 = vrot.lane.b32.xlu1 %v7350_v48, %s8300_s9 }
0x3003   : > { %7356 = vrot.lane.b32.xlu1 %v7355_v30, %s8299_s6 }
0x3004   : > { %7346 = vrot.lane.b32.xlu0 %v7345_v15, %s8300_s9  ;;  %v7876_v15 = vld [vmem:[#allocation14 + $0x8] sm:$0xff]  }
0x3007   : > { %7361 = vrot.lane.b32.xlu1 %v7360_v49, %s8299_s6  ;;  %s6398_s6 = sshll.u32 %s8455_s26, 9  ;;  %s8301_s26 = smov [#allocation19]  }
0x3075   : > { %v5498_v40 = vpop.xlane.xlu0 %5497 }
0x3076   : > { %7775 = vrcp.f32 %v5498_v40 }
0x3077   : > { %v5501_v3 = vpop.xlane.xlu1 %5500 }
0x3078   : > { %7777 = vrcp.f32 %v5501_v3  ;;  %v7884_v3 = vld [vmem:[#allocation17] sm:$0xff]  }
0x307b   : > { %v5507_v19 = vpop.xlane.xlu1 %5506  ;;  %v5504_v11 = vpop.xlane.xlu0 %5503 }
0x307c   : > { %7779 = vrcp.f32 %v5507_v19  ;;  %v7885_v19 = vld [vmem:[#allocation17 + $0x48] sm:$0xff]  }
0x307d   : > { %7781 = vrcp.f32 %v5504_v11  ;;  %v7886_v11 = vld [vmem:[#allocation17 + $0x8] sm:$0xff]  }
0x307f   : > { %v7352_v56 = vpop.permute.xlu1 %7351  ;;  %v7347_v57 = vpop.permute.xlu0 %7346 }
0x3080   : > { %v7776_v1 = vpop.eup %7775  ;;  %v7354_v7 = vunpack.i.h.bf16 %v7352_v56  ;;  %v7353_v39 = vunpack.i.l.bf16 %v7352_v56  ;;  %v7349_v9 = vunpack.i.h.bf16 %v7347_v57  ;;  %v7348_v34 = vunpack.i.l.bf16 %v7347_v57 }
0x3081   : > { %v5512_v36 = vmul.f32 %v7776_v1, %v7768_v25  ;;  %v7887_v1 = vld [vmem:[#allocation17 + $0x50] sm:$0xff]  }
0x3082   : > { %v7778_v4 = vpop.eup %7777  ;;  %v5624_v27 = vsel %vm1519_vm0, %v9791_v14, %v7354_v7  ;;  %v5623_v60 = vsel %vm1519_vm0, %v9787_v55, %v7353_v39  ;;  %v5622_v42 = vsel %vm1519_vm0, %v9793_v45, %v7349_v9  ;;  %v5621_v47 = vsel %vm1519_vm0, %v9789_v23, %v7348_v34 }
0x3083   : > { %v5513_v48 = vmul.f32 %v7778_v4, %v7770_v58  ;;  %v7357_v13 = vpop.permute.xlu1 %7356  ;;  %v7888_v4 = vld [vmem:[#allocation17 + $0x10] sm:$0xff]  }
0x3084   : > { %v7359_v6 = vunpack.i.h.bf16 %v7357_v13  ;;  %v7358_v2 = vunpack.i.l.bf16 %v7357_v13 }
0x3085   : > { %v5516_v44 = vpack.c.bf16 %v5513_v48, %v5512_v36  ;;  %v7889_v36 = vld [vmem:[#allocation17 + $0x58] sm:$0xff]  }
0x3086   : > { %v7780_v37 = vpop.eup %7779  ;;  %v5625_v14 = vsel %vm2268_vm1, %v5621_v47, %v7358_v2  ;;  %v5626_v55 = vsel %vm2268_vm1, %v5622_v42, %v7359_v6  ;;  %v7890_v48 = vld [vmem:[#allocation17 + $0x18] sm:$0xff]  }
0x3087   : > { %v7782_v22 = vpop.eup %7781  ;;  %v5515_v26 = vmul.f32 %v7780_v37, %v7772_v54  ;;  %7055 = vmatprep.mubr.msk.bf16.mxu0 %vm1519_vm0, %v5516_v44  ;;  %v7362_v10 = vpop.permute.xlu1 %7361  ;;  %v7891_v44 = vld [vmem:[#allocation17 + $0x60] sm:$0xff]  }
0x3088   : > { %v5514_v5 = vmul.f32 %v7782_v22, %v7774_v20  ;;  %v7364_v43 = vunpack.i.h.bf16 %v7362_v10  ;;  %v7363_v59 = vunpack.i.l.bf16 %v7362_v10  ;;  %v7892_v37 = vld [vmem:[#allocation17 + $0x20] sm:$0xff]   ;;  %v7893_v22 = vld [vmem:[#allocation17 + $0x68] sm:$0xff]  }
0x308a   : > { %v5517_v33 = vpack.c.bf16 %v5515_v26, %v5514_v5  ;;  %v5627_v8 = vsel %vm2268_vm1, %v5623_v60, %v7363_v59  ;;  %v5628_v58 = vsel %vm2268_vm1, %v5624_v27, %v7364_v43  ;;  %v7894_v26 = vld [vmem:[#allocation17 + $0x28] sm:$0xff]   ;;  %v7895_v5 = vld [vmem:[#allocation17 + $0x70] sm:$0xff]  }
0x308c   : > { %7056 = vmatmul.mubr.msk.bf16.vlgmr.msra.gmra.mrb[84].mxu0 %vm1519_vm0, %v5517_v33  ;;  %v7896_v33 = vld [vmem:[#allocation17 + $0x30] sm:$0xff]  }
0x308d   : > { %7060 = vmatpush3.bf16.msra.mxu0 %v9819_v61  ;;  %v7883_v61 = vld [vmem:[#allocation17 + $0x40] sm:$0xff]  }
0x308e   : > { %7061 = vmatprep.subr.bf16.mxu0 %v7876_v15 }
0x3091   : > { %7062 = vmatpush3.bf16.msra.mxu0 %v7876_v15  ;;  %v7897_v15 = vld [vmem:[#allocation17 + $0x78] sm:$0xff]  }
0x3092   : > { %7063 = vmatprep.subr.bf16.mxu0 %v7877_v31 }
0x3095   : > { %7064 = vmatpush3.bf16.msra.mxu0 %v7877_v31  ;;  %v7898_v31 = vld [vmem:[#allocation17 + $0x38] sm:$0xff]  }
0x3096   : > { %7065 = vmatprep.subr.bf16.mxu0 %v7878_v28 }
0x3099   : > { %7066 = vmatpush3.bf16.msra.mxu0 %v7878_v28 }
0x309a   : > { %7067 = vmatprep.subr.bf16.mxu0 %v7879_v29 }
0x309d   : > { %7068 = vmatpush3.bf16.msra.mxu0 %v7879_v29 }
0x309e   : > { %7069 = vmatprep.subr.bf16.mxu0 %v7880_v52 }
0x30a1   : > { %7070 = vmatpush3.bf16.msra.mxu0 %v7880_v52  ;;  %v7899_v52 = vld [vmem:[%s9996_s14] ss:$0 sm:$0xff] }
0x30a2   : > { %7071 = vmatprep.subr.bf16.mxu0 %v7881_v50 }
0x30a5   : > { %7072 = vmatpush3.bf16.msra.mxu0 %v7881_v50 }
0x30a6   : > { %7073 = vmatprep.subr.bf16.mxu0 %v7882_v32 }
0x30a9   : > { %7074 = vmatpush3.bf16.msra.mxu0 %v7882_v32 }
0x30aa   : > { %6635 = vmatprep.subr.bf16.mxu0 %v7883_v61 }
0x315f   : > { %v7057_v63 = vpop.f32.mrb[84].mxu0 }
0x3160   : > { %v5558_v12 = vpop.f32.mrb[85].mxu0 }
0x3161   : > { %v7058_v49 = vpop.f32.mrb[86].mxu0 }
0x3162   : > { %v7370_v46 = vpack.i.bf16 %v7058_v49, %v7057_v63  ;;  %v5561_v30 = vpop.f32.mrb[87].mxu0 }
0x3163   : > { %v7365_v62 = vpack.i.bf16 %v5561_v30, %v5558_v12 }
0x3164   : > { %7371 = vrot.lane.b32.xlu1 %v7370_v46, %s8298_s16 }
0x3165   : > { %7366 = vrot.lane.b32.xlu0 %v7365_v62, %s8298_s16  ;;  %s938_s16 = scalar_lea.vmem [#allocation19], %s8806_s17 }
0x3166   : > { %s6018_s9 = sshll.u32 %s938_s16, 4  ;;  %s9938_s9 = int_to_ptr.vmem [resolvable:$true] %s6018_s9 }
0x3167   : > { %s8189_s5 = scalar_lea.vmem %s9938_s9, 512 }
0x3168   : > { %p8190_p0 = scmp.ne.s32.totalorder %s9938_s9, %s8189_s5 }
0x316a   : > { %p8191_p5 = pnand %p8190_p0, %p10126_p2 }
0x316c   : > { %p8192_p8 = pneg %p8191_p5 }
0x31d6   : > { %v7372_v41 = vpop.permute.xlu1 %7371 }
0x31d7   : > { %v7374_v53 = vunpack.i.h.bf16 %v7372_v41  ;;  %v7373_v18 = vunpack.i.l.bf16 %v7372_v41  ;;  %v7367_v25 = vpop.permute.xlu0 %7366 }
0x31d8   : > { %v7369_v17 = vunpack.i.h.bf16 %v7367_v25  ;;  %v7368_v54 = vunpack.i.l.bf16 %v7367_v25 }
0x31d9   : > { %v5632_v20 = vsel %vm2273_vm2, %v5628_v58, %v7374_v53  ;;  %v5631_v45 = vsel %vm2273_vm2, %v5627_v8, %v7373_v18 }
0x31da   : > { %v5634_v24 = vpack.c.bf16 %v5632_v20, %v5631_v45  ;;  %v5629_v23 = vsel %vm2273_vm2, %v5625_v14, %v7368_v54  ;;  %v5630_v16 = vsel %vm2273_vm2, %v5626_v55, %v7369_v17 }
0x31db   : > { %v5633_v40 = vpack.c.bf16 %v5630_v16, %v5629_v23 }
0x31dd   : > { %7075 = vmatprep.mubr.bf16.mxu0 %v5633_v40 }
0x31de   : > { %7076 = vmatmul.mubr.bf16.vlgmr.msra.gmra.mrb[88].mxu0 %v5634_v24 }
0x31df   : > { %6636 = vmatpush3.bf16.msra.mxu0 %v7884_v3 }
0x31e0   : > { %6637 = vmatprep.subr.bf16.mxu0 %v7885_v19 }
0x31e3   : > { %6638 = vmatpush3.bf16.msra.mxu0 %v7886_v11 }
0x31e4   : > { %6639 = vmatprep.subr.bf16.mxu0 %v7887_v1  ;;  %v7900_v1 = vld [vmem:[%s10109_s8] ss:$0 sm:$0xff] }
0x31e7   : > { %6640 = vmatpush3.bf16.msra.mxu0 %v7888_v4 }
0x31e8   : > { %6641 = vmatprep.subr.bf16.mxu0 %v7889_v36 }
0x31eb   : > { %6642 = vmatpush3.bf16.msra.mxu0 %v7890_v48 }
0x31ec   : > { %6643 = vmatprep.subr.bf16.mxu0 %v7891_v44 }
0x31ef   : > { %6644 = vmatpush3.bf16.msra.mxu0 %v7892_v37  ;;  %v7901_v37 = vld [vmem:[%s10110_s1] ss:$0 sm:$0xff] }
0x31f0   : > { %6645 = vmatprep.subr.bf16.mxu0 %v7893_v22 }
0x31f3   : > { %6646 = vmatpush3.bf16.msra.mxu0 %v7894_v26 }
0x31f4   : > { %6647 = vmatprep.subr.bf16.mxu0 %v7895_v5 }
0x31f7   : > { %6648 = vmatpush3.bf16.msra.mxu0 %v7896_v33 }
0x31f8   : > { %6649 = vmatprep.subr.bf16.mxu0 %v7897_v15 }
0x31fb   : > { %6650 = vmatpush3.bf16.msra.mxu0 %v7898_v31 }
0x32b1   : > { %v7077_v28 = vpop.f32.mrb[88].mxu0 }
0x32b2   : > { %v5669_v29 = vpop.f32.mrb[89].mxu0  ;;  %v5678_v56 = vadd.f32 %v7899_v52, %v7077_v28 }
0x32b3   : > { %v5670_v50 = vadd.f32 %v7899_v52, %v5669_v29  ;;  %v7078_v32 = vpop.f32.mrb[90].mxu0 }
0x32b4   : > { %v5672_v61 = vpop.f32.mrb[91].mxu0  ;;  %v5681_v49 = vadd.f32 %v7899_v52, %v7078_v32  ;;  %v5686_v10 = vadd.f32 %v5678_v56, %v9734_v38 }
0x32b5   : > { %v5684_v63 = vadd.f32 %v5670_v50, %v9728_v51  ;;  %v5673_v12 = vadd.f32 %v7899_v52, %v5672_v61 }
0x32b6   : > { %v5687_v62 = vadd.f32 %v5681_v49, %v9736_v0  ;;  %v5702_v51 = vmul.f32 %v5686_v10, %v5686_v10 }
0x32b7   : > { %v5685_v46 = vadd.f32 %v5673_v12, %v9730_v21  ;;  %5688 = vadd.xlane.f32.xlu0 %v5684_v63  ;;  %v5700_v30 = vmul.f32 %v5684_v63, %v5684_v63  ;;  %v10121_v12 = vld [vmem:[#allocation31_spill] sm:$0xff] }
0x32b8   : > { %v5703_v57 = vmul.f32 %v5687_v62, %v5687_v62 }
0x32b9   : > { %5690 = vadd.xlane.f32.xlu1 %v5685_v46  ;;  %v5701_v13 = vmul.f32 %v5685_v46, %v5685_v46 }
0x32bb   : > { %5704 = vadd.xlane.f32.xlu0 %v5700_v30  ;;  %v10122_v30 = vld [vmem:[#allocation32_spill] sm:$0xff] }
0x32bd   : > { %5694 = vadd.xlane.f32.xlu1 %v5687_v62 }
0x32bf   : > { %5706 = vadd.xlane.f32.xlu0 %v5701_v13 }
0x32c1   : > { %5710 = vadd.xlane.f32.xlu1 %v5703_v57 }
0x32c3   : > { %5692 = vadd.xlane.f32.xlu0 %v5686_v10 }
0x32c7   : > { %5708 = vadd.xlane.f32.xlu0 %v5702_v51 }
0x3344   : > { %v5689_v7 = vpop.xlane.xlu0 %5688 }
0x3345   : > { %v5696_v39 = vmul.f32 0.0078125, %v5689_v7 }
0x3346   : > { %v5691_v21 = vpop.xlane.xlu1 %5690 }
0x3347   : > { %v5716_v34 = vmul.f32 %v5696_v39, %v5696_v39  ;;  %v5697_v43 = vmul.f32 0.0078125, %v5691_v21  ;;  %v5724_v24 = vsub.f32 %v5684_v63, %v5696_v39 }
0x3348   : > { %v5705_v9 = vpop.xlane.xlu0 %5704 }
0x3349   : > { %v5712_v59 = vmul.f32 0.0078125, %v5705_v9  ;;  %v5717_v60 = vmul.f32 %v5697_v43, %v5697_v43  ;;  %v5725_v3 = vsub.f32 %v5685_v46, %v5697_v43 }
0x334a   : > { %v5695_v0 = vpop.xlane.xlu1 %5694 }
0x334b   : > { %v5720_v6 = vsub.f32 %v5712_v59, %v5716_v34  ;;  %v5699_v2 = vmul.f32 0.0078125, %v5695_v0 }
0x334c   : > { %v5707_v27 = vpop.xlane.xlu0 %5706 }
0x334d   : > { %v5728_v41 = vadd.f32 1e-05, %v5720_v6  ;;  %v5713_v42 = vmul.f32 0.0078125, %v5707_v27  ;;  %v5719_v38 = vmul.f32 %v5699_v2, %v5699_v2  ;;  %v5727_v48 = vsub.f32 %v5687_v62, %v5699_v2 }
0x334e   : > { %v5711_v47 = vpop.xlane.xlu1 %5710 }
0x334f   : > { %7783 = vrsqrt.f32 %v5728_v41  ;;  %v5721_v53 = vsub.f32 %v5713_v42, %v5717_v60  ;;  %v5715_v18 = vmul.f32 0.0078125, %v5711_v47 }
0x3350   : > { %v5693_v25 = vpop.xlane.xlu0 %5692 }
0x3351   : > { %v5729_v8 = vadd.f32 1e-05, %v5721_v53  ;;  %v5723_v58 = vsub.f32 %v5715_v18, %v5719_v38  ;;  %v5698_v17 = vmul.f32 0.0078125, %v5693_v25 }
0x3353   : > { %7785 = vrsqrt.f32 %v5729_v8  ;;  %v5731_v54 = vadd.f32 1e-05, %v5723_v58  ;;  %v5718_v55 = vmul.f32 %v5698_v17, %v5698_v17  ;;  %v5726_v33 = vsub.f32 %v5686_v10, %v5698_v17 }
0x3354   : > { %v5709_v14 = vpop.xlane.xlu0 %5708 }
0x3355   : > { %7787 = vrsqrt.f32 %v5731_v54  ;;  %v5714_v20 = vmul.f32 0.0078125, %v5709_v14  ;;  %v7902_v14 = vld [vmem:[%s10114_s15] ss:$0 sm:$0xff] }
0x3357   : > { %v5722_v45 = vsub.f32 %v5714_v20, %v5718_v55 }
0x3359   : > { %v7784_v23 = vpop.eup %7783  ;;  %v5730_v16 = vadd.f32 1e-05, %v5722_v45 }
0x335a   : > { %v5736_v40 = vmul.f32 %v7784_v23, %v5724_v24 }
0x335b   : > { %7789 = vrsqrt.f32 %v5730_v16 }
0x335c   : > { %v5740_v4 = vmul.f32 %v7900_v1, %v5736_v40 }
0x335d   : > { %v7786_v19 = vpop.eup %7785 }
0x335e   : > { %v5737_v11 = vmul.f32 %v7786_v19, %v5725_v3  ;;  %v5744_v22 = vadd.f32 %v7901_v37, %v5740_v4 }
0x335f   : > { %v7788_v36 = vpop.eup %7787 }
0x3360   : > { %v5741_v44 = vmul.f32 %v7900_v1, %v5737_v11  ;;  %v5739_v5 = vmul.f32 %v7788_v36, %v5727_v48 }
0x3362   : > { %v5745_v26 = vadd.f32 %v7901_v37, %v5741_v44  ;;  %v5743_v29 = vmul.f32 %v7900_v1, %v5739_v5 }
0x3364   : > { %v5748_v15 = vpack.c.bf16 %v5745_v26, %v5744_v22  ;;  %v5747_v32 = vadd.f32 %v7901_v37, %v5743_v29 }
0x3365   : > { %v7790_v31 = vpop.eup %7789 }
0x3366   : > { %5783 = vmatmul.mubr.bf16.vlgmr.msra.gmra.mrb[108].mxu1 %v5748_v15  ;;  %v5738_v28 = vmul.f32 %v7790_v31, %v5726_v33 }
0x3367   : > { %5792 = vmatprep.mubr.bf16.mxu1 %v10120_v35 }
0x3368   : > { %v5742_v52 = vmul.f32 %v7900_v1, %v5738_v28 }
0x336a   : > { %v5746_v50 = vadd.f32 %v7901_v37, %v5742_v52 }
0x336c   : > { %v5749_v61 = vpack.c.bf16 %v5747_v32, %v5746_v50 }
0x336e   : > { %5793 = vmatmul.mubr.bf16.gmra.mrb[112].mxu1 %v5749_v61 }
0x3439   : > { %v5784_v63 = vpop.f32.mrb[108].mxu1 }
0x343a   : > { %v5785_v49 = vadd.f32 %v5784_v63, %v10121_v12  ;;  %v5786_v46 = vpop.f32.mrb[109].mxu1 }
0x343b   : > { %v5787_v62 = vadd.f32 %v5786_v46, %v10122_v30  ;;  %v5788_v56 = vpop.f32.mrb[110].mxu1 }
0x343c   : > { %v5789_v13 = vadd.f32 %v5788_v56, %v10121_v12  ;;  %v5790_v57 = vpop.f32.mrb[111].mxu1  ;;  %v5803_v51 = vmax.f32 %v5785_v49, 0.0 }
0x343d   : > { %v5791_v10 = vadd.f32 %v5790_v57, %v10122_v30  ;;  %v5804_v35 = vmax.f32 %v5787_v62, 0.0 }
0x343e   : > { %v5805_v7 = vmax.f32 %v5789_v13, 0.0 }
0x343f   : > { %v5806_v39 = vmax.f32 %v5791_v10, 0.0 }
0x3440   : > { %v5811_v21 = vpack.c.bf16 %v5805_v7, %v5803_v51 }
0x3441   : > { %v5812_v9 = vpack.c.bf16 %v5806_v39, %v5804_v35  ;;  %v5794_v34 = vpop.f32.mrb[112].mxu1 }
0x3442   : > { %v5795_v43 = vadd.f32 %v5794_v34, %v10121_v12  ;;  %v5796_v59 = vpop.f32.mrb[113].mxu1 }
0x3443   : > { %v5797_v0 = vadd.f32 %v5796_v59, %v10122_v30  ;;  %v5798_v6 = vpop.f32.mrb[114].mxu1  ;;  %5847 = vmatprep.mubr.bf16.mxu0 %v5812_v9 }
0x3444   : > { %v5799_v2 = vadd.f32 %v5798_v6, %v10121_v12  ;;  %v5800_v27 = vpop.f32.mrb[115].mxu1  ;;  %5848 = vmatmul.mubr.bf16.vlgmr.msra.gmra.mrb[92].mxu0 %v5811_v21  ;;  %v5807_v41 = vmax.f32 %v5795_v43, 0.0 }
0x3445   : > { %v5801_v60 = vadd.f32 %v5800_v27, %v10122_v30  ;;  %v5808_v47 = vmax.f32 %v5797_v0, 0.0 }
0x3446   : > { %v5809_v42 = vmax.f32 %v5799_v2, 0.0 }
0x3447   : > { %v5810_v38 = vmax.f32 %v5801_v60, 0.0 }
0x3448   : > { %v5813_v53 = vpack.c.bf16 %v5809_v42, %v5807_v41  ;;  %v7903_v41 = vld [vmem:[%s10115_s13] ss:$0 sm:$0xff] }
0x3449   : > { %v5814_v18 = vpack.c.bf16 %v5810_v38, %v5808_v47  ;;  %v7904_v38 = vld [vmem:[%s10116_s0] ss:$0 sm:$0xff] }
0x344b   : > { %5855 = vmatprep.mubr.bf16.mxu0 %v5814_v18 }
0x344c   : > { %5856 = vmatmul.mubr.bf16.gmra.mrb[96].mxu0 %v5813_v53 }
0x3517   : > { %v6651_v25 = vpop.f32.mrb[92].mxu0 }
0x3518   : > { %v6652_v8 = vpop.f32.mrb[93].mxu0 }
0x3519   : > { %v6653_v58 = vadd.f32 %v6652_v8, %v6651_v25  ;;  %v6654_v17 = vpop.f32.mrb[94].mxu0 }
0x351a   : > { %v6655_v54 = vpop.f32.mrb[95].mxu0 }
0x351b   : > { %v5850_v55 = vadd.f32 %v7902_v14, %v6653_v58  ;;  %v6656_v20 = vadd.f32 %v6655_v54, %v6654_v17 }
0x351d   : > { %v5853_v45 = vadd.f32 %v7902_v14, %v6656_v20  ;;  %v5864_v24 = vadd.f32 %v5850_v55, %v5744_v22 }
0x351f   : > { %5868 = vadd.xlane.f32.xlu0 %v5864_v24  ;;  %v6657_v23 = vpop.f32.mrb[96].mxu0  ;;  %v5865_v16 = vadd.f32 %v5853_v45, %v5745_v26  ;;  %v5880_v11 = vmul.f32 %v5864_v24, %v5864_v24 }
0x3520   : > { %v6658_v40 = vpop.f32.mrb[97].mxu0 }
0x3521   : > { %v6659_v3 = vadd.f32 %v6658_v40, %v6657_v23  ;;  %5870 = vadd.xlane.f32.xlu1 %v5865_v16  ;;  %v6660_v19 = vpop.f32.mrb[98].mxu0  ;;  %v5881_v48 = vmul.f32 %v5865_v16, %v5865_v16 }
0x3522   : > { %v6661_v1 = vpop.f32.mrb[99].mxu0 }
0x3523   : > { %v5858_v4 = vadd.f32 %v7902_v14, %v6659_v3  ;;  %v6662_v36 = vadd.f32 %v6661_v1, %v6660_v19  ;;  %5884 = vadd.xlane.f32.xlu0 %v5880_v11 }
0x3525   : > { %v5861_v44 = vadd.f32 %v7902_v14, %v6662_v36  ;;  %5886 = vadd.xlane.f32.xlu1 %v5881_v48  ;;  %v5866_v37 = vadd.f32 %v5858_v4, %v5746_v50 }
0x3527   : > { %5872 = vadd.xlane.f32.xlu0 %v5866_v37  ;;  %v5867_v5 = vadd.f32 %v5861_v44, %v5747_v32  ;;  %v5882_v22 = vmul.f32 %v5866_v37, %v5866_v37 }
0x3529   : > { %5874 = vadd.xlane.f32.xlu1 %v5867_v5  ;;  %v5883_v33 = vmul.f32 %v5867_v5, %v5867_v5 }
0x352b   : > { %5888 = vadd.xlane.f32.xlu0 %v5882_v22 }
0x352d   : > { %5890 = vadd.xlane.f32.xlu1 %v5883_v33 }
0x35ac   : > { %v5869_v26 = vpop.xlane.xlu0 %5868 }
0x35ad   : > { %v5876_v15 = vmul.f32 0.0078125, %v5869_v26 }
0x35ae   : > { %v5871_v31 = vpop.xlane.xlu1 %5870 }
0x35af   : > { %v5877_v28 = vmul.f32 0.0078125, %v5871_v31  ;;  %v5896_v52 = vmul.f32 %v5876_v15, %v5876_v15  ;;  %v5904_v0 = vsub.f32 %v5864_v24, %v5876_v15 }
0x35b0   : > { %v5885_v29 = vpop.xlane.xlu0 %5884 }
0x35b1   : > { %v5892_v61 = vmul.f32 0.0078125, %v5885_v29  ;;  %v5897_v12 = vmul.f32 %v5877_v28, %v5877_v28  ;;  %v5905_v2 = vsub.f32 %v5865_v16, %v5877_v28 }
0x35b2   : > { %v5887_v63 = vpop.xlane.xlu1 %5886 }
0x35b3   : > { %v5900_v49 = vsub.f32 %v5892_v61, %v5896_v52  ;;  %v5893_v46 = vmul.f32 0.0078125, %v5887_v63 }
0x35b4   : > { %v5873_v30 = vpop.xlane.xlu0 %5872 }
0x35b5   : > { %v5908_v50 = vadd.f32 1e-05, %v5900_v49  ;;  %v5901_v62 = vsub.f32 %v5893_v46, %v5897_v12  ;;  %v5878_v32 = vmul.f32 0.0078125, %v5873_v30 }
0x35b6   : > { %v5875_v56 = vpop.xlane.xlu1 %5874 }
0x35b7   : > { %7791 = vrsqrt.f32 %v5908_v50  ;;  %v5909_v13 = vadd.f32 1e-05, %v5901_v62  ;;  %v5879_v57 = vmul.f32 0.0078125, %v5875_v56  ;;  %v5898_v51 = vmul.f32 %v5878_v32, %v5878_v32 }
0x35b8   : > { %v5889_v10 = vpop.xlane.xlu0 %5888  ;;  %v5906_v25 = vsub.f32 %v5866_v37, %v5878_v32 }
0x35b9   : > { %7793 = vrsqrt.f32 %v5909_v13  ;;  %v5894_v7 = vmul.f32 0.0078125, %v5889_v10  ;;  %v5899_v39 = vmul.f32 %v5879_v57, %v5879_v57  ;;  %v5907_v17 = vsub.f32 %v5867_v5, %v5879_v57 }
0x35ba   : > { %v5891_v35 = vpop.xlane.xlu1 %5890 }
0x35bb   : > { %v5902_v21 = vsub.f32 %v5894_v7, %v5898_v51  ;;  %v5895_v9 = vmul.f32 0.0078125, %v5891_v35  ;;  %v6389_v7 = vld [vmem:[%s10123_s28] ss:$0 sm:$0xff]  ;;  %s10125_s28 = sld [smem:[#allocation55_spill]] }
0x35bd   : > { %v5910_v34 = vadd.f32 1e-05, %v5902_v21  ;;  %v5903_v43 = vsub.f32 %v5895_v9, %v5899_v39  ;;  %v6390_v9 = vld [vmem:[%s10124_s21] ss:$0 sm:$0xff]  ;;  %s8193_s21 = sshll.u32 %s8301_s26, 4  ;;  %s8194_s21 = int_to_ptr.vmem [resolvable:$false] %s8193_s21 }
0x35be   : > { %s8195_s11 = scalar_lea.vmem %s8194_s21, 1024  ;;  %p8196_p4 = scmp.lt.s32.totalorder %s9938_s9, %s8194_s21 }
0x35bf   : > { %7795 = vrsqrt.f32 %v5910_v34  ;;  %v5911_v59 = vadd.f32 1e-05, %v5903_v43  ;;  %p8197_p3 = scmp.lt.s32.totalorder %s8195_s11, %s8189_s5 }
0x35c1   : > { %v7792_v6 = vpop.eup %7791  ;;  %7797 = vrsqrt.f32 %v5911_v59  ;;  %s9936_s17 = scalar_lea.hbm %s10125_s28, %s6398_s6  ;;  %p8198_p10 = por %p8197_p3, %p8196_p4 }
0x35c2   : > { %v5916_v27 = vmul.f32 %v7792_v6, %v5904_v0 }
0x35c3   : > { %v7794_v60 = vpop.eup %7793  ;;  %p8199_p1 = pnand %p8198_p10, %p8192_p8 }
0x35c4   : > { %v5920_v42 = vmul.f32 %v7903_v41, %v5916_v27  ;;  %v5917_v47 = vmul.f32 %v7794_v60, %v5905_v2 }
0x35c6   : > { %v5924_v53 = vadd.f32 %v7904_v38, %v5920_v42  ;;  %v5921_v18 = vmul.f32 %v7903_v41, %v5917_v47 }
0x35c8   : > { %5928 = vadd.xlane.f32.xlu0 %v5924_v53  ;;  %v5925_v8 = vadd.f32 %v7904_v38, %v5921_v18  ;;  %v5940_v54 = vmul.f32 %v5924_v53, %v5924_v53 }
0x35c9   : > { %v7796_v58 = vpop.eup %7795 }
0x35ca   : > { %5930 = vadd.xlane.f32.xlu1 %v5925_v8  ;;  %v5918_v14 = vmul.f32 %v7796_v58, %v5906_v25  ;;  %v5941_v20 = vmul.f32 %v5925_v8, %v5925_v8 }
0x35cb   : > { %v7798_v55 = vpop.eup %7797 }
0x35cc   : > { %5944 = vadd.xlane.f32.xlu0 %v5940_v54  ;;  %v5922_v45 = vmul.f32 %v7903_v41, %v5918_v14  ;;  %v5919_v24 = vmul.f32 %v7798_v55, %v5907_v17 }
0x35ce   : > { %5946 = vadd.xlane.f32.xlu1 %v5941_v20  ;;  %v5926_v23 = vadd.f32 %v7904_v38, %v5922_v45  ;;  %v5923_v16 = vmul.f32 %v7903_v41, %v5919_v24 }
0x35d0   : > { %5932 = vadd.xlane.f32.xlu0 %v5926_v23  ;;  %v5927_v40 = vadd.f32 %v7904_v38, %v5923_v16  ;;  %v5942_v3 = vmul.f32 %v5926_v23, %v5926_v23 }
0x35d2   : > { %5934 = vadd.xlane.f32.xlu1 %v5927_v40  ;;  %v5943_v19 = vmul.f32 %v5927_v40, %v5927_v40 }
0x35d4   : > { %5948 = vadd.xlane.f32.xlu0 %v5942_v3 }
0x35d6   : > { %5950 = vadd.xlane.f32.xlu1 %v5943_v19 }
0x3655   : > { %v5929_v11 = vpop.xlane.xlu0 %5928 }
0x3656   : > { %v5936_v1 = vmul.f32 0.0078125, %v5929_v11 }
0x3657   : > { %v5931_v4 = vpop.xlane.xlu1 %5930 }
0x3658   : > { %v5937_v36 = vmul.f32 0.0078125, %v5931_v4  ;;  %v5956_v44 = vmul.f32 %v5936_v1, %v5936_v1  ;;  %v5964_v10 = vsub.f32 %v5924_v53, %v5936_v1 }
0x3659   : > { %v5945_v48 = vpop.xlane.xlu0 %5944 }
0x365a   : > { %v5952_v37 = vmul.f32 0.0078125, %v5945_v48  ;;  %v5957_v22 = vmul.f32 %v5937_v36, %v5937_v36  ;;  %v5965_v35 = vsub.f32 %v5925_v8, %v5937_v36 }
0x365b   : > { %v5947_v5 = vpop.xlane.xlu1 %5946 }
0x365c   : > { %v5960_v33 = vsub.f32 %v5952_v37, %v5956_v44  ;;  %v5953_v26 = vmul.f32 0.0078125, %v5947_v5 }
0x365d   : > { %v5933_v15 = vpop.xlane.xlu0 %5932 }
0x365e   : > { %v5968_v31 = vadd.f32 1e-05, %v5960_v33  ;;  %v5961_v28 = vsub.f32 %v5953_v26, %v5957_v22  ;;  %v5938_v29 = vmul.f32 0.0078125, %v5933_v15 }
0x365f   : > { %v5935_v52 = vpop.xlane.xlu1 %5934 }
0x3660   : > { %7799 = vrsqrt.f32 %v5968_v31  ;;  %v5969_v61 = vadd.f32 1e-05, %v5961_v28  ;;  %v5939_v63 = vmul.f32 0.0078125, %v5935_v52  ;;  %v5958_v49 = vmul.f32 %v5938_v29, %v5938_v29 }
0x3661   : > { %v5949_v12 = vpop.xlane.xlu0 %5948  ;;  %v5966_v2 = vsub.f32 %v5926_v23, %v5938_v29 }
0x3662   : > { %7801 = vrsqrt.f32 %v5969_v61  ;;  %v5954_v46 = vmul.f32 0.0078125, %v5949_v12  ;;  %v5959_v50 = vmul.f32 %v5939_v63, %v5939_v63  ;;  %v5967_v60 = vsub.f32 %v5927_v40, %v5939_v63 }
0x3663   : > { %v5951_v30 = vpop.xlane.xlu1 %5950 }
0x3664   : > { %v5962_v62 = vsub.f32 %v5954_v46, %v5958_v49  ;;  %v5955_v32 = vmul.f32 0.0078125, %v5951_v30 }
0x3666   : > { %v5970_v56 = vadd.f32 1e-05, %v5962_v62  ;;  %v5963_v13 = vsub.f32 %v5955_v32, %v5959_v50 }
0x3668   : > { %7803 = vrsqrt.f32 %v5970_v56  ;;  %v5971_v57 = vadd.f32 1e-05, %v5963_v13 }
0x366a   : > { %v7800_v51 = vpop.eup %7799  ;;  %7805 = vrsqrt.f32 %v5971_v57 }
0x366b   : > { %v5976_v39 = vmul.f32 %v7800_v51, %v5964_v10 }
0x366c   : > { %v7802_v21 = vpop.eup %7801 }
0x366d   : > { %v5986_v34 = vmul.f32 %v6389_v7, %v5976_v39  ;;  %v5977_v43 = vmul.f32 %v7802_v21, %v5965_v35 }
0x366f   : > { %v5996_v59 = vadd.f32 %v6390_v9, %v5986_v34  ;;  %v5987_v0 = vmul.f32 %v6389_v7, %v5977_v43 }
0x3671   : > { %6000 = vst [vmem:[%s938_s16] sm:$0xff] %v5996_v59  ;;  %v5997_v6 = vadd.f32 %v6390_v9, %v5987_v0 }
0x3672   : > { %v7804_v27 = vpop.eup %7803 }
0x3673   : > { %6001 = vst [vmem:[%s938_s16 + $0x8] sm:$0xff] %v5997_v6  ;;  %v5978_v41 = vmul.f32 %v7804_v27, %v5966_v2 }
0x3674   : > { %v7806_v42 = vpop.eup %7805 }
0x3675   : > { %v5988_v47 = vmul.f32 %v6389_v7, %v5978_v41  ;;  %v5979_v38 = vmul.f32 %v7806_v42, %v5967_v60 }
0x3677   : > { %v5998_v53 = vadd.f32 %v6390_v9, %v5988_v47  ;;  %v5989_v18 = vmul.f32 %v6389_v7, %v5979_v38 }
0x3679   : > { %6002 = vst [vmem:[%s938_s16 + $0x10] sm:$0xff] %v5998_v53  ;;  %v5999_v25 = vadd.f32 %v6390_v9, %v5989_v18 }
0x367b   : > { %6003 = vst [vmem:[%s938_s16 + $0x18] sm:$0xff] %v5999_v25 }
0x367c   : > { %8202 = shalt.err (!%p8199_p1)
}
0x367d   : > { %s8203_s16 = scalar_lea.hbm %s9936_s17, 512  ;;  %s8207_s26 = scalar_lea.hbm %s10125_s28, 1024 }
0x367e   : > { %p8204_p11 = scmp.ne.s32.totalorder %s9936_s17, %s8203_s16  ;;  %p8208_p13 = scmp.lt.u32.totalorder %s9936_s17, %s10125_s28 }
0x367f   : > { %p8209_p7 = scmp.lt.u32.totalorder %s8207_s26, %s8203_s16  ;;  %p8211_p0 = scmp.lt.u32.totalorder %s8203_s16, %s9936_s17 }
0x3680   : > { %p8205_p12 = pnand %p8204_p11, %p10126_p2 }
0x3681   : > { %p8210_p9 = por %p8209_p7, %p8208_p13 }
0x3682   : > { %p8206_p6 = pneg %p8205_p12 }
0x3683   : > { %p8212_p5 = por %p8211_p0, %p8210_p9 }
0x3685   : > { %p8213_p8 = pnand %p8212_p5, %p8206_p6 }
0x3687   : > { %8216 = shalt.err (!%p8213_p8)
}
0x3688   : > { %s8302_s5 = smov 128   ;;  %s8303_s11 = smov 8  }
0x3689   : > { %s10127_s0 = scalar_lea.sflag [#allocation4], %s8803_s24 }
0x368a   : > { %7147 = dma.vmem_to_hbm [thread:$0]  (%p10126_p2), %s9938_s9, 512, %s9936_s17, %s10127_s0, %s8302_s5, %s8302_s5, %s8303_s11  }
0x368b PF: > { %s6033_s22 = sand.u32 1, %s8267_s29   ;;  %p10128_p4 = scmp.ne.s32.totalorder %s10089_s3, 0 }
0x368c   : > { %p10129_p3 = scmp.ge.s32.totalorder %s8279_s30, 2  ;;  %s6034_s16 = scalar_lea.sflag [#allocation4], %s6033_s22 }
0x368e   : > { %p7182_p10 = pnand %p10129_p3, %p10128_p4 }
0x3690   : > { %8262 = dma.done.wait (!%p7182_p10), %s6034_s16, 512  }
0x3691   : > { %8264 = vsyncadd (!%p7182_p10), %s6034_s16, 4294966784  ;;  %s10130_s6 = sld [smem:[#allocation28_spill]]  ;;  %s10131_s25 = sld [smem:[#allocation29_spill]] }
0x3692   : > { %p45_p1 = scmp.ge.s32.totalorder %s8681_s4, 4   ;;  %s10132_s29 = smov %s8271_s2 }
0x3693   : > { %s10135_s30 = smov %s8681_s4 }
0x3694   :  { %47 = sbr.rel (!%p45_p1) target bundleno = 35 (0x23), region = 210 }
0x3697   : > { %s10133_s2 = smov %s10130_s6  ;;  %s10134_s6 = smov %s10131_s25 }
0x369b   :  { %6039 = vsyncpa [#allocation3], 1 }
0x369c   :  { %6041 = vsyncpa [#allocation3 + $0x1], 1 }
0x369d   :  { %6042 = vsyncpa [#allocation6], 1 }
0x369e   :  { %6044 = vsyncpa [#allocation6 + $0x1], 1 }
0x369f   :  { %6045 = vsyncpa [#allocation9], 1 }
0x36a0   :  { %6046 = vsyncpa [#allocation12], 1 }
0x36a1   :  { %6047 = vsyncpa [#allocation15], 1 }
0x36a2   :  { %6048 = vsyncpa [#allocation18], 1 }
0x36a3   :  { %6049 = vsyncpa [#allocation4], 1 }
0x36a4   :  { %6051 = vsyncpa [#allocation4 + $0x1], 1 }

</bundles_post_ra>
